<compile_context>
chip_gen: v5e
topology: v5e:2x2
jax: 0.10.0
libtpu: 0.0.40
codegen_flags: <defaults>
</compile_context>

<pallas_src>
import functools
import numpy as np
import jax
import jax.numpy as jnp
from jax import lax
from jax.experimental import pallas as pl
from jax.experimental.pallas import tpu as pltpu


# ----------------------------------------------------------------------------
# Pallas kernel: one grid step == one decode timestep t.
# h/c recurrent state lives in VMEM scratch and persists across grid steps.
# ----------------------------------------------------------------------------
def _decoder_step_kernel(
    enc_ref,       # (B, Pp, E)  bf16  encoder_out (pixel-padded)           [constant]
    encatt_ref,    # (B, Pp, A)  bf16  enc@W_enc_att + b_enc_att + b_dec_att [constant]
    gpre_ref,      # (1, B, 4D)  f32   emb_t @ W_ih_emb + b_ih + b_hh        [streamed]
    h0_ref,        # (B, D) f32                                             [constant]
    c0_ref,        # (B, D) f32                                             [constant]
    Wfused_ref,    # (D, A+E+4D) bf16  [W_dec_att | W_f_beta | W_hh]        [constant]
    bfb_ref,       # (1, E) f32  f_beta bias                                [constant]
    wf_ref,        # (1, A) f32  full_att weight row (bias dropped)         [constant]
    Wic_ref,       # (E, 4D) bf16  LSTM ih, context part                    [constant]
    h_out_ref,     # out (1, B, D)  f32   hidden state at t
    alpha_ref,     # out (1, B, Pp) f32
    h_scr,         # scratch (B, D) f32
    c_scr,         # scratch (B, D) f32
    *, A, E, D, P_real,
):
    t = pl.program_id(0)

    @pl.when(t == 0)
    def _():
        h_scr[...] = h0_ref[...]
        c_scr[...] = c0_ref[...]

    h = h_scr[...]
    c = c_scr[...]
    h_bf = h.astype(jnp.bfloat16)

    # ---- one fused MXU matmul for the three h-driven projections ------------
    fused = jnp.dot(h_bf, Wfused_ref[...], preferred_element_type=jnp.float32)  # (B, A+E+4D)
    att2 = fused[:, :A]                                                    # decoder_att
    gate = jax.nn.sigmoid(fused[:, A:A + E] + bfb_ref[...])                # f_beta gate
    hh_gates = fused[:, A + E:]                                            # LSTM hh part

    # ---- Attention (elementwise path in f32) --------------------------------
    att = jnp.maximum(encatt_ref[...].astype(jnp.float32) + att2[:, None, :], 0.0)  # (B,Pp,A)
    e = jnp.sum(att * wf_ref[...][None, :, :], axis=-1)                    # (B, Pp)
    if P_real < e.shape[1]:
        pix = lax.broadcasted_iota(jnp.int32, e.shape, 1)
        e = jnp.where(pix < P_real, e, -1e30)                              # mask padded pixels
    e = e - jnp.max(e, axis=-1, keepdims=True)
    pe = jnp.exp(e)
    alpha = pe / jnp.sum(pe, axis=-1, keepdims=True)                       # softmax over P

    # attention-weighted encoding: batched MXU dot (B,1,Pp) @ (B,Pp,E) -> (B,E)
    awe = jnp.einsum('bqp,bpe->bqe', alpha[:, None, :].astype(jnp.bfloat16),
                     enc_ref[...], preferred_element_type=jnp.float32)[:, 0, :]
    awe = gate * awe

    # ---- LSTM cell (emb@W_ih hoisted to wrapper; hh fused above) ------------
    gates = (gpre_ref[0]
             + jnp.dot(awe.astype(jnp.bfloat16), Wic_ref[...],
                       preferred_element_type=jnp.float32)
             + hh_gates)
    i_g = jax.nn.sigmoid(gates[:, 0:D])
    f_g = jax.nn.sigmoid(gates[:, D:2 * D])
    g_g = jnp.tanh(gates[:, 2 * D:3 * D])
    o_g = jax.nn.sigmoid(gates[:, 3 * D:4 * D])
    c_new = f_g * c + i_g * g_g
    h_new = o_g * jnp.tanh(c_new)
    h_scr[...] = h_new
    c_scr[...] = c_new

    h_out_ref[0] = h_new
    alpha_ref[0] = alpha


# ----------------------------------------------------------------------------
# Wrapper
# ----------------------------------------------------------------------------
def decoder_with_attention_forward(encoder_out, captions, caption_lengths, params):
    """encoder_out: (B, P, E) f32; captions: (B, L) int32; caption_lengths: (B,) int32
    sorted in descending order (standard show-attend-tell training setup)."""
    B0, P0, E = encoder_out.shape
    emb_table = params["embedding"]                    # (V, M)
    M = emb_table.shape[1]
    D = params["W_init_h"].shape[1]
    A = params["W_enc_att"].shape[1]
    V = params["W_fc"].shape[1]
    L = captions.shape[1]

    decode_lengths = np.asarray(caption_lengths).astype(np.int32) - 1
    T = int(decode_lengths.max())

    # Pad batch to a multiple of 8 sublanes.
    pad_b = (-B0) % 8
    if pad_b:
        encoder_out = jnp.concatenate(
            [encoder_out, jnp.zeros((pad_b, P0, E), encoder_out.dtype)], axis=0)
        captions = jnp.concatenate(
            [captions, jnp.zeros((pad_b, L), captions.dtype)], axis=0)
        decode_lengths = np.concatenate([decode_lengths, np.zeros((pad_b,), np.int32)])
    B = B0 + pad_b

    # init h/c from mean over the REAL pixels (before pixel padding).
    mean_enc = jnp.mean(encoder_out, axis=1)
    h0 = (mean_enc @ params["W_init_h"] + params["b_init_h"]).astype(jnp.float32)
    c0 = (mean_enc @ params["W_init_c"] + params["b_init_c"]).astype(jnp.float32)

    # Pad pixel axis to a multiple of 128 (lane-dense softmax / alpha stores).
    pad_p = (-P0) % 128
    P = P0 + pad_p
    if pad_p:
        encoder_out = jnp.concatenate(
            [encoder_out, jnp.zeros((B, pad_p, E), encoder_out.dtype)], axis=1)

    # ---- timestep-invariant work hoisted out of the recurrence (plain XLA) ----
    # encoder_att projection with b_dec_att folded in (saves a per-step broadcast add).
    enc_att = (encoder_out.reshape(B * P, E) @ params["W_enc_att"]
               + params["b_enc_att"] + params["b_dec_att"]).reshape(B, P, A)
    # embedding lookup and emb @ W_ih_emb hoisted into one big GEMM (biases folded).
    embeddings = emb_table[captions]                                  # (B, L, M)
    emb_t = jnp.transpose(embeddings[:, :T, :], (1, 0, 2))            # (T, B, M)
    gpre = (emb_t.reshape(T * B, M) @ params["W_ih"][:M]
            + params["b_ih"] + params["b_hh"]).reshape(T, B, 4 * D).astype(jnp.float32)

    # bf16 MXU operands (f32 accumulation kept inside the kernel).
    W_fused = jnp.concatenate(
        [params["W_dec_att"], params["W_f_beta"], params["W_hh"]], axis=1
    ).astype(jnp.bfloat16)                                            # (D, A+E+4D)
    Wic = params["W_ih"][M:].astype(jnp.bfloat16)                     # (E, 4D)
    wf_row = params["w_full_att"].reshape(1, A).astype(jnp.float32)   # (1, A) - VPU path
    bfb = params["b_f_beta"].astype(jnp.float32)                      # (1, E)
    enc_bf = encoder_out.astype(jnp.bfloat16)
    enc_att_bf = enc_att.astype(jnp.bfloat16)
    # b_full_att dropped: a constant added to all logits does not change softmax.

    kernel = functools.partial(_decoder_step_kernel, A=A, E=E, D=D, P_real=P0)

    # per-generation VMEM limit (v5e/v6e ~110 MiB, v7x ~56 MiB).
    try:
        cap = int(getattr(pltpu.get_tpu_info(), "vmem_capacity_bytes", 64 * 1024 * 1024))
    except Exception:
        cap = 64 * 1024 * 1024
    vmem_limit = int(max(32 << 20, min(cap - (8 << 20), 110 << 20)))

    full3 = lambda t: (0, 0, 0)
    full2 = lambda t: (0, 0)
    step3 = lambda t: (t, 0, 0)

    def _call(single_buffer):
        if single_buffer:
            # constant-index blocks: single-buffered (no pointless 2x VMEM residency).
            cspec = lambda shp, im: pl.BlockSpec(shp, im, pipeline_mode=pl.Buffered(1))
        else:
            cspec = lambda shp, im: pl.BlockSpec(shp, im)

        in_specs = [
            cspec((B, P, E), full3),                  # encoder_out (bf16)
            cspec((B, P, A), full3),                  # enc_att (bf16)
            pl.BlockSpec((1, B, 4 * D), step3),       # gpre[t] (streamed, double-buffered)
            cspec((B, D), full2),                     # h0
            cspec((B, D), full2),                     # c0
            cspec((D, A + E + 4 * D), full2),         # fused h-weights (bf16)
            cspec((1, E), full2),                     # f_beta bias
            cspec((1, A), full2),                     # full_att weight row
            cspec((E, 4 * D), full2),                 # LSTM ih context part (bf16)
        ]
        out_specs = [
            pl.BlockSpec((1, B, D), step3),           # hidden states (time-major)
            pl.BlockSpec((1, B, P), step3),           # alphas (time-major, lane-dense)
        ]
        grid_spec = pltpu.PrefetchScalarGridSpec(
            num_scalar_prefetch=0,
            grid=(T,),
            in_specs=in_specs,
            out_specs=out_specs,
            scratch_shapes=[
                pltpu.VMEM((B, D), jnp.float32),      # h state
                pltpu.VMEM((B, D), jnp.float32),      # c state
            ],
        )
        return pl.pallas_call(
            kernel,
            grid_spec=grid_spec,
            out_shape=(
                jax.ShapeDtypeStruct((T, B, D), jnp.float32),
                jax.ShapeDtypeStruct((T, B, P), jnp.float32),
            ),
            compiler_params=pltpu.CompilerParams(
                dimension_semantics=("arbitrary",),    # recurrent state -> sequential grid
                vmem_limit_bytes=vmem_limit,
            ),
        )(enc_bf, enc_att_bf, gpre, h0, c0, W_fused, bfb, wf_row, Wic)

    try:
        h_tm, alphas_tm = _call(True)
    except Exception:
        # fallback if pipeline_mode=pl.Buffered(1) is unavailable in this jax version
        h_tm, alphas_tm = _call(False)

    # fc projection hoisted out of the recurrence: one big GEMM over all timesteps,
    # producing the (B, T, V) result directly in the PyTorch layout.
    mask_bt = jnp.asarray(
        (np.arange(T)[None, :] < decode_lengths[:, None]).astype(np.float32))  # (B, T)
    h_bt = jnp.transpose(h_tm, (1, 0, 2))                              # (B, T, D)
    preds = (h_bt.reshape(B * T, D) @ params["W_fc"] + params["b_fc"]).reshape(B, T, V)
    predictions = preds * mask_bt[:, :, None]
    alphas = jnp.transpose(alphas_tm, (1, 0, 2))[:, :, :P0] * mask_bt[:, :, None]
    return predictions[:B0], alphas[:B0]


# ----------------------------------------------------------------------------
# Pure-JAX f32 reference (mirrors the PyTorch loop with sorted caption_lengths)
# ----------------------------------------------------------------------------
def reference_forward(encoder_out, captions, caption_lengths, params):
    B, P, E = encoder_out.shape
    emb_table = params["embedding"]
    D = params["W_init_h"].shape[1]
    V = params["W_fc"].shape[1]
    decode_lengths = np.asarray(caption_lengths) - 1
    T = int(decode_lengths.max())

    embeddings = emb_table[captions]
    mean_enc = jnp.mean(encoder_out, axis=1)
    h = mean_enc @ params["W_init_h"] + params["b_init_h"]
    c = mean_enc @ params["W_init_c"] + params["b_init_c"]

    predictions = np.zeros((B, T, V), np.float32)
    alphas = np.zeros((B, T, P), np.float32)
    for t in range(T):
        att1 = encoder_out.reshape(B * P, E) @ params["W_enc_att"] + params["b_enc_att"]
        att1 = att1.reshape(B, P, -1)
        att2 = h @ params["W_dec_att"] + params["b_dec_att"]
        att = jnp.maximum(att1 + att2[:, None, :], 0.0)
        e = (att.reshape(B * P, -1) @ params["w_full_att"]).reshape(B, P) + params["b_full_att"][0, 0]
        alpha = jax.nn.softmax(e, axis=1)
        awe = jnp.sum(encoder_out * alpha[:, :, None], axis=1)
        gate = jax.nn.sigmoid(h @ params["W_f_beta"] + params["b_f_beta"])
        awe = gate * awe
        x = jnp.concatenate([embeddings[:, t, :], awe], axis=1)
        gates = x @ params["W_ih"] + params["b_ih"] + h @ params["W_hh"] + params["b_hh"]
        i_g = jax.nn.sigmoid(gates[:, 0:D])
        f_g = jax.nn.sigmoid(gates[:, D:2 * D])
        g_g = jnp.tanh(gates[:, 2 * D:3 * D])
        o_g = jax.nn.sigmoid(gates[:, 3 * D:4 * D])
        c = f_g * c + i_g * g_g
        h = o_g * jnp.tanh(c)
        preds = h @ params["W_fc"] + params["b_fc"]
        m = (decode_lengths > t).astype(np.float32)[:, None]
        predictions[:, t, :] = np.asarray(preds) * m
        alphas[:, t, :] = np.asarray(alpha) * m
    return predictions, alphas


# ----------------------------------------------------------------------------
# Deterministic parameter construction + demo
# ----------------------------------------------------------------------------
def make_params(key, *, E, D, A, M, V):
    ks = jax.random.split(key, 20)

    def w(k, shape, fan_in):
        return (jax.random.normal(k, shape, jnp.float32) / np.sqrt(fan_in)).astype(jnp.float32)

    return {
        "embedding": w(ks[0], (V, M), M),
        "W_enc_att": w(ks[1], (E, A), E), "b_enc_att": w(ks[2], (1, A), A),
        "W_dec_att": w(ks[3], (D, A), D), "b_dec_att": w(ks[4], (1, A), A),
        "w_full_att": w(ks[5], (A, 1), A), "b_full_att": w(ks[6], (1, 1), A),
        "W_f_beta": w(ks[7], (D, E), D), "b_f_beta": w(ks[8], (1, E), E),
        "W_ih": w(ks[9], (M + E, 4 * D), M + E), "b_ih": w(ks[10], (1, 4 * D), 4 * D),
        "W_hh": w(ks[11], (D, 4 * D), D), "b_hh": w(ks[12], (1, 4 * D), 4 * D),
        "W_fc": w(ks[13], (D, V), D), "b_fc": jnp.zeros((1, V), jnp.float32),
        "W_init_h": w(ks[14], (E, D), E), "b_init_h": w(ks[15], (1, D), D),
        "W_init_c": w(ks[16], (E, D), E), "b_init_c": w(ks[17], (1, D), D),
    }


if __name__ == "__main__":
    # Small but tile-friendly shapes: B multiple of 8; A, D, V multiples of 128.
    B, P, E = 8, 16, 128            # batch, num_pixels (4x4 encoder grid), encoder_dim
    A, M, D, V = 128, 64, 128, 256  # attention_dim, embed_dim, decoder_dim, vocab_size
    L = 9                           # max caption length

    key = jax.random.PRNGKey(0)
    k_enc, k_cap, k_par = jax.random.split(key, 3)

    encoder_out = jax.random.normal(k_enc, (B, P, E), jnp.float32)
    captions = jax.random.randint(k_cap, (B, L), 0, V, jnp.int32)
    caption_lengths = np.array([9, 8, 8, 7, 6, 6, 5, 4], dtype=np.int32)   # sorted descending
    params = make_params(k_par, E=E, D=D, A=A, M=M, V=V)

    preds, alphas = decoder_with_attention_forward(encoder_out, captions, caption_lengths, params)
    preds = jax.block_until_ready(preds)
    alphas = jax.block_until_ready(alphas)

    ref_preds, ref_alphas = reference_forward(encoder_out, captions, caption_lengths, params)
    # Tolerances loosened vs f32 reference because MXU operands are bf16 (f32 accumulation);
    # the T-step recurrence amplifies bf16 rounding slightly.
    assert np.allclose(np.asarray(preds), ref_preds, atol=5e-2, rtol=5e-2), \
        float(np.max(np.abs(np.asarray(preds) - ref_preds)))
    assert np.allclose(np.asarray(alphas), ref_alphas, atol=2e-2, rtol=2e-2), \
        float(np.max(np.abs(np.asarray(alphas) - ref_alphas)))

    print("KERNEL_OK")
</pallas_src>

<mosaic_0001>
module attributes {stable_mosaic.version = 11 : i64} {
  func.func @_decoder_step_kernel(%arg0: i32, %arg1: memref<8x128x128xbf16, #tpu.memory_space<vmem>>, %arg2: memref<8x128x128xbf16, #tpu.memory_space<vmem>>, %arg3: memref<1x8x512xf32, #tpu.memory_space<vmem>>, %arg4: memref<8x128xf32, #tpu.memory_space<vmem>>, %arg5: memref<8x128xf32, #tpu.memory_space<vmem>>, %arg6: memref<128x768xbf16, #tpu.memory_space<vmem>>, %arg7: memref<1x128xf32, #tpu.memory_space<vmem>>, %arg8: memref<1x128xf32, #tpu.memory_space<vmem>>, %arg9: memref<128x512xbf16, #tpu.memory_space<vmem>>, %arg10: memref<1x8x128xf32, #tpu.memory_space<vmem>>, %arg11: memref<1x8x128xf32, #tpu.memory_space<vmem>>, %arg12: memref<8x128xf32, #tpu.memory_space<vmem>>, %arg13: memref<8x128xf32, #tpu.memory_space<vmem>>) attributes {dimension_semantics = [#tpu.dimension_semantics<arbitrary>], iteration_bounds = array<i64: 8>, scalar_prefetch = 0 : i64, scratch_operands = 2 : i64, tpu.core_type = #tpu.core_type<tc>, window_params = [{pipeline_mode = #tpu.pipeline_mode<synchronous>, transform_indices = @transform_0, window_bounds = array<i64: 8, 128, 128>}, {pipeline_mode = #tpu.pipeline_mode<synchronous>, transform_indices = @transform_1, window_bounds = array<i64: 8, 128, 128>}, {transform_indices = @transform_2, window_bounds = array<i64: 1, 8, 512>}, {pipeline_mode = #tpu.pipeline_mode<synchronous>, transform_indices = @transform_3, window_bounds = array<i64: 8, 128>}, {pipeline_mode = #tpu.pipeline_mode<synchronous>, transform_indices = @transform_4, window_bounds = array<i64: 8, 128>}, {pipeline_mode = #tpu.pipeline_mode<synchronous>, transform_indices = @transform_5, window_bounds = array<i64: 128, 768>}, {pipeline_mode = #tpu.pipeline_mode<synchronous>, transform_indices = @transform_6, window_bounds = array<i64: 1, 128>}, {pipeline_mode = #tpu.pipeline_mode<synchronous>, transform_indices = @transform_7, window_bounds = array<i64: 1, 128>}, {pipeline_mode = #tpu.pipeline_mode<synchronous>, transform_indices = @transform_8, window_bounds = array<i64: 128, 512>}, {transform_indices = @transform_9, window_bounds = array<i64: 1, 8, 128>}, {transform_indices = @transform_10, window_bounds = array<i64: 1, 8, 128>}]} {
    %c0_i32 = arith.constant 0 : i32
    %0 = arith.cmpi eq, %arg0, %c0_i32 : i32
    %1 = arith.extui %0 : i1 to i32
    %c0_i32_0 = arith.constant 0 : i32
    %2 = arith.cmpi ne, %1, %c0_i32_0 : i32
    scf.if %2 {
      %c0_42 = arith.constant 0 : index
      %c0_43 = arith.constant 0 : index
      %91 = vector.load %arg4[%c0_42, %c0_43] : memref<8x128xf32, #tpu.memory_space<vmem>>, vector<8x128xf32>
      %c0_44 = arith.constant 0 : index
      %c0_45 = arith.constant 0 : index
      %92 = vector.load %arg12[%c0_44, %c0_45] : memref<8x128xf32, #tpu.memory_space<vmem>>, vector<8x128xf32>
      tpu.vector_store %arg12[%c0_44, %c0_45], %91 {strides = array<i32>} : memref<8x128xf32, #tpu.memory_space<vmem>>, vector<8x128xf32>,
      %c0_46 = arith.constant 0 : index
      %c0_47 = arith.constant 0 : index
      %93 = vector.load %arg5[%c0_46, %c0_47] : memref<8x128xf32, #tpu.memory_space<vmem>>, vector<8x128xf32>
      %c0_48 = arith.constant 0 : index
      %c0_49 = arith.constant 0 : index
      %94 = vector.load %arg13[%c0_48, %c0_49] : memref<8x128xf32, #tpu.memory_space<vmem>>, vector<8x128xf32>
      tpu.vector_store %arg13[%c0_48, %c0_49], %93 {strides = array<i32>} : memref<8x128xf32, #tpu.memory_space<vmem>>, vector<8x128xf32>,
    } else {
    }
    %c0 = arith.constant 0 : index
    %c0_1 = arith.constant 0 : index
    %3 = vector.load %arg12[%c0, %c0_1] : memref<8x128xf32, #tpu.memory_space<vmem>>, vector<8x128xf32>
    %c0_2 = arith.constant 0 : index
    %c0_3 = arith.constant 0 : index
    %4 = vector.load %arg13[%c0_2, %c0_3] : memref<8x128xf32, #tpu.memory_space<vmem>>, vector<8x128xf32>
    %5 = arith.truncf %3 : vector<8x128xf32> to vector<8x128xbf16>
    %c0_4 = arith.constant 0 : index
    %c0_5 = arith.constant 0 : index
    %6 = vector.load %arg6[%c0_4, %c0_5] : memref<128x768xbf16, #tpu.memory_space<vmem>>, vector<128x768xbf16>
    %cst = arith.constant dense<0.000000e+00> : vector<8x768xf32>
    %7 = tpu.matmul %5, %6, %cst {dimension_numbers = #tpu.dot_dimension_numbers<[1], [0], [0], [1], [0, 0, 1, 1], [], []>} : vector<8x128xbf16>, vector<128x768xbf16>, vector<8x768xf32> -> vector<8x768xf32>
    %8 = vector.extract_strided_slice %7 {offsets = [0, 0], sizes = [8, 128], strides = [1, 1]} : vector<8x768xf32> to vector<8x128xf32>
    %9 = vector.extract_strided_slice %7 {offsets = [0, 128], sizes = [8, 128], strides = [1, 1]} : vector<8x768xf32> to vector<8x128xf32>
    %c0_6 = arith.constant 0 : index
    %c0_7 = arith.constant 0 : index
    %10 = vector.load %arg7[%c0_6, %c0_7] : memref<1x128xf32, #tpu.memory_space<vmem>>, vector<1x128xf32>
    %11 = vector.broadcast %10 : vector<1x128xf32> to vector<8x128xf32>
    %12 = arith.addf %9, %11 : vector<8x128xf32>
    %13 = arith.negf %12 : vector<8x128xf32>
    %14 = math.exp %13 : vector<8x128xf32>
    %cst_8 = arith.constant 1.000000e+00 : f32
    %15 = vector.broadcast %cst_8 : f32 to vector<8x128xf32>
    %16 = arith.addf %15, %14 : vector<8x128xf32>
    %17 = arith.divf %15, %16 : vector<8x128xf32>
    %18 = vector.extract_strided_slice %7 {offsets = [0, 256], sizes = [8, 512], strides = [1, 1]} : vector<8x768xf32> to vector<8x512xf32>
    %c0_9 = arith.constant 0 : index
    %c0_10 = arith.constant 0 : index
    %c0_11 = arith.constant 0 : index
    %19 = vector.load %arg2[%c0_9, %c0_10, %c0_11] : memref<8x128x128xbf16, #tpu.memory_space<vmem>>, vector<8x128x128xbf16>
    %20 = arith.extf %19 : vector<8x128x128xbf16> to vector<8x128x128xf32>
    %21 = vector.shape_cast %8 : vector<8x128xf32> to vector<8x1x128xf32>
    %22 = vector.broadcast %21 : vector<8x1x128xf32> to vector<8x128x128xf32>
    %23 = arith.addf %20, %22 : vector<8x128x128xf32>
    %cst_12 = arith.constant 0.000000e+00 : f32
    %24 = vector.broadcast %cst_12 : f32 to vector<8x128x128xf32>
    %25 = arith.maximumf %23, %24 : vector<8x128x128xf32>
    %c0_13 = arith.constant 0 : index
    %c0_14 = arith.constant 0 : index
    %26 = vector.load %arg8[%c0_13, %c0_14] : memref<1x128xf32, #tpu.memory_space<vmem>>, vector<1x128xf32>
    %27 = vector.shape_cast %26 : vector<1x128xf32> to vector<1x1x128xf32>
    %28 = vector.broadcast %27 : vector<1x1x128xf32> to vector<8x128x128xf32>
    %29 = arith.mulf %25, %28 : vector<8x128x128xf32>
    %cst_15 = arith.constant dense<0.000000e+00> : vector<8x128xf32>
    %30 = vector.multi_reduction <add>, %29, %cst_15 [2] : vector<8x128x128xf32> to vector<8x128xf32>
    %31 = tpu.iota {dimensions = array<i32: 1>} : vector<8x128xi32>
    %c16_i32 = arith.constant 16 : i32
    %32 = vector.broadcast %c16_i32 : i32 to vector<8x128xi32>
    %33 = arith.cmpi slt, %31, %32 : vector<8x128xi32>
    %cst_16 = arith.constant -1.000000e+30 : f32
    %34 = vector.broadcast %cst_16 : f32 to vector<8x128xf32>
    %35 = arith.select %33, %30, %34 : vector<8x128xi1>, vector<8x128xf32>
    %cst_17 = arith.constant dense<0xFF800000> : vector<8xf32>
    %36 = vector.multi_reduction <maximumf>, %35, %cst_17 [1] : vector<8x128xf32> to vector<8xf32>
    %37 = vector.shape_cast %36 : vector<8xf32> to vector<8x1xf32>
    %38 = vector.broadcast %37 : vector<8x1xf32> to vector<8x128xf32>
    %39 = arith.subf %35, %38 : vector<8x128xf32>
    %40 = math.exp %39 : vector<8x128xf32>
    %cst_18 = arith.constant dense<0.000000e+00> : vector<8xf32>
    %41 = vector.multi_reduction <add>, %40, %cst_18 [1] : vector<8x128xf32> to vector<8xf32>
    %42 = vector.shape_cast %41 : vector<8xf32> to vector<8x1xf32>
    %43 = vector.broadcast %42 : vector<8x1xf32> to vector<8x128xf32>
    %44 = arith.divf %40, %43 : vector<8x128xf32>
    %45 = vector.shape_cast %44 : vector<8x128xf32> to vector<8x1x128xf32>
    %46 = arith.truncf %45 : vector<8x1x128xf32> to vector<8x1x128xbf16>
    %c0_19 = arith.constant 0 : index
    %c0_20 = arith.constant 0 : index
    %c0_21 = arith.constant 0 : index
    %47 = vector.load %arg1[%c0_19, %c0_20, %c0_21] : memref<8x128x128xbf16, #tpu.memory_space<vmem>>, vector<8x128x128xbf16>
    "tpu.trace_start"() <{level = 10 : i32, message = "bqp,bpe->bqe"}> : () -> ()
    %cst_22 = arith.constant dense<0.000000e+00> : vector<8x1x128xf32>
    %48 = tpu.matmul %46, %47, %cst_22 {dimension_numbers = #tpu.dot_dimension_numbers<[2], [1], [1], [2], [0, 0, 0, 1, 1, 2], [0], [0]>} : vector<8x1x128xbf16>, vector<8x128x128xbf16>, vector<8x1x128xf32> -> vector<8x1x128xf32>
    "tpu.trace_stop"() : () -> ()
    %49 = vector.shape_cast %48 : vector<8x1x128xf32> to vector<8x128xf32>
    %50 = arith.mulf %17, %49 : vector<8x128xf32>
    %c0_23 = arith.constant 0 : index
    %c0_24 = arith.constant 0 : index
    %c0_25 = arith.constant 0 : index
    %51 = vector.load %arg3[%c0_23, %c0_24, %c0_25] : memref<1x8x512xf32, #tpu.memory_space<vmem>>, vector<1x8x512xf32>
    %52 = vector.shape_cast %51 : vector<1x8x512xf32> to vector<8x512xf32>
    %53 = arith.truncf %50 : vector<8x128xf32> to vector<8x128xbf16>
    %c0_26 = arith.constant 0 : index
    %c0_27 = arith.constant 0 : index
    %54 = vector.load %arg9[%c0_26, %c0_27] : memref<128x512xbf16, #tpu.memory_space<vmem>>, vector<128x512xbf16>
    %cst_28 = arith.constant dense<0.000000e+00> : vector<8x512xf32>
    %55 = tpu.matmul %53, %54, %cst_28 {dimension_numbers = #tpu.dot_dimension_numbers<[1], [0], [0], [1], [0, 0, 1, 1], [], []>} : vector<8x128xbf16>, vector<128x512xbf16>, vector<8x512xf32> -> vector<8x512xf32>
    %56 = arith.addf %52, %55 : vector<8x512xf32>
    %57 = arith.addf %56, %18 : vector<8x512xf32>
    %58 = vector.extract_strided_slice %57 {offsets = [0, 0], sizes = [8, 128], strides = [1, 1]} : vector<8x512xf32> to vector<8x128xf32>
    %59 = arith.negf %58 : vector<8x128xf32>
    %60 = math.exp %59 : vector<8x128xf32>
    %cst_29 = arith.constant 1.000000e+00 : f32
    %61 = vector.broadcast %cst_29 : f32 to vector<8x128xf32>
    %62 = arith.addf %61, %60 : vector<8x128xf32>
    %63 = arith.divf %61, %62 : vector<8x128xf32>
    %64 = vector.extract_strided_slice %57 {offsets = [0, 128], sizes = [8, 128], strides = [1, 1]} : vector<8x512xf32> to vector<8x128xf32>
    %65 = arith.negf %64 : vector<8x128xf32>
    %66 = math.exp %65 : vector<8x128xf32>
    %cst_30 = arith.constant 1.000000e+00 : f32
    %67 = vector.broadcast %cst_30 : f32 to vector<8x128xf32>
    %68 = arith.addf %67, %66 : vector<8x128xf32>
    %69 = arith.divf %67, %68 : vector<8x128xf32>
    %70 = vector.extract_strided_slice %57 {offsets = [0, 256], sizes = [8, 128], strides = [1, 1]} : vector<8x512xf32> to vector<8x128xf32>
    %71 = math.tanh %70 : vector<8x128xf32>
    %72 = vector.extract_strided_slice %57 {offsets = [0, 384], sizes = [8, 128], strides = [1, 1]} : vector<8x512xf32> to vector<8x128xf32>
    %73 = arith.negf %72 : vector<8x128xf32>
    %74 = math.exp %73 : vector<8x128xf32>
    %cst_31 = arith.constant 1.000000e+00 : f32
    %75 = vector.broadcast %cst_31 : f32 to vector<8x128xf32>
    %76 = arith.addf %75, %74 : vector<8x128xf32>
    %77 = arith.divf %75, %76 : vector<8x128xf32>
    %78 = arith.mulf %69, %4 : vector<8x128xf32>
    %79 = arith.mulf %63, %71 : vector<8x128xf32>
    %80 = arith.addf %78, %79 : vector<8x128xf32>
    %81 = math.tanh %80 : vector<8x128xf32>
    %82 = arith.mulf %77, %81 : vector<8x128xf32>
    %c0_32 = arith.constant 0 : index
    %c0_33 = arith.constant 0 : index
    %83 = vector.load %arg12[%c0_32, %c0_33] : memref<8x128xf32, #tpu.memory_space<vmem>>, vector<8x128xf32>
    tpu.vector_store %arg12[%c0_32, %c0_33], %82 {strides = array<i32>} : memref<8x128xf32, #tpu.memory_space<vmem>>, vector<8x128xf32>,
    %c0_34 = arith.constant 0 : index
    %c0_35 = arith.constant 0 : index
    %84 = vector.load %arg13[%c0_34, %c0_35] : memref<8x128xf32, #tpu.memory_space<vmem>>, vector<8x128xf32>
    tpu.vector_store %arg13[%c0_34, %c0_35], %80 {strides = array<i32>} : memref<8x128xf32, #tpu.memory_space<vmem>>, vector<8x128xf32>,
    %c0_36 = arith.constant 0 : index
    %c0_37 = arith.constant 0 : index
    %c0_38 = arith.constant 0 : index
    %85 = vector.load %arg10[%c0_36, %c0_37, %c0_38] : memref<1x8x128xf32, #tpu.memory_space<vmem>>, vector<1x8x128xf32>
    %86 = vector.shape_cast %85 : vector<1x8x128xf32> to vector<8x128xf32>
    %87 = vector.shape_cast %82 : vector<8x128xf32> to vector<1x8x128xf32>
    tpu.vector_store %arg10[%c0_36, %c0_37, %c0_38], %87 {strides = array<i32>} : memref<1x8x128xf32, #tpu.memory_space<vmem>>, vector<1x8x128xf32>,
    %c0_39 = arith.constant 0 : index
    %c0_40 = arith.constant 0 : index
    %c0_41 = arith.constant 0 : index
    %88 = vector.load %arg11[%c0_39, %c0_40, %c0_41] : memref<1x8x128xf32, #tpu.memory_space<vmem>>, vector<1x8x128xf32>
    %89 = vector.shape_cast %88 : vector<1x8x128xf32> to vector<8x128xf32>
    %90 = vector.shape_cast %44 : vector<8x128xf32> to vector<1x8x128xf32>
    tpu.vector_store %arg11[%c0_39, %c0_40, %c0_41], %90 {strides = array<i32>} : memref<1x8x128xf32, #tpu.memory_space<vmem>>, vector<1x8x128xf32>,
    return
  }
  func.func @transform_0(%arg0: i32) -> (i32, i32, i32) {
    %c0_i32 = arith.constant 0 : i32
    %c0_i32_0 = arith.constant 0 : i32
    %c0_i32_1 = arith.constant 0 : i32
    %c0_i32_2 = arith.constant 0 : i32
    return %c0_i32, %c0_i32_0, %c0_i32_1 : i32, i32, i32
  }
  func.func @transform_1(%arg0: i32) -> (i32, i32, i32) {
    %c0_i32 = arith.constant 0 : i32
    %c0_i32_0 = arith.constant 0 : i32
    %c0_i32_1 = arith.constant 0 : i32
    %c0_i32_2 = arith.constant 0 : i32
    return %c0_i32, %c0_i32_0, %c0_i32_1 : i32, i32, i32
  }
  func.func @transform_2(%arg0: i32) -> (i32, i32, i32) {
    %c0_i32 = arith.constant 0 : i32
    %c0_i32_0 = arith.constant 0 : i32
    %c0_i32_1 = arith.constant 0 : i32
    return %arg0, %c0_i32, %c0_i32_0 : i32, i32, i32
  }
  func.func @transform_3(%arg0: i32) -> (i32, i32) {
    %c0_i32 = arith.constant 0 : i32
    %c0_i32_0 = arith.constant 0 : i32
    %c0_i32_1 = arith.constant 0 : i32
    return %c0_i32, %c0_i32_0 : i32, i32
  }
  func.func @transform_4(%arg0: i32) -> (i32, i32) {
    %c0_i32 = arith.constant 0 : i32
    %c0_i32_0 = arith.constant 0 : i32
    %c0_i32_1 = arith.constant 0 : i32
    return %c0_i32, %c0_i32_0 : i32, i32
  }
  func.func @transform_5(%arg0: i32) -> (i32, i32) {
    %c0_i32 = arith.constant 0 : i32
    %c0_i32_0 = arith.constant 0 : i32
    %c0_i32_1 = arith.constant 0 : i32
    return %c0_i32, %c0_i32_0 : i32, i32
  }
  func.func @transform_6(%arg0: i32) -> (i32, i32) {
    %c0_i32 = arith.constant 0 : i32
    %c0_i32_0 = arith.constant 0 : i32
    %c0_i32_1 = arith.constant 0 : i32
    return %c0_i32, %c0_i32_0 : i32, i32
  }
  func.func @transform_7(%arg0: i32) -> (i32, i32) {
    %c0_i32 = arith.constant 0 : i32
    %c0_i32_0 = arith.constant 0 : i32
    %c0_i32_1 = arith.constant 0 : i32
    return %c0_i32, %c0_i32_0 : i32, i32
  }
  func.func @transform_8(%arg0: i32) -> (i32, i32) {
    %c0_i32 = arith.constant 0 : i32
    %c0_i32_0 = arith.constant 0 : i32
    %c0_i32_1 = arith.constant 0 : i32
    return %c0_i32, %c0_i32_0 : i32, i32
  }
  func.func @transform_9(%arg0: i32) -> (i32, i32, i32) {
    %c0_i32 = arith.constant 0 : i32
    %c0_i32_0 = arith.constant 0 : i32
    %c0_i32_1 = arith.constant 0 : i32
    return %arg0, %c0_i32, %c0_i32_0 : i32, i32, i32
  }
  func.func @transform_10(%arg0: i32) -> (i32, i32, i32) {
    %c0_i32 = arith.constant 0 : i32
    %c0_i32_0 = arith.constant 0 : i32
    %c0_i32_1 = arith.constant 0 : i32
    return %arg0, %c0_i32, %c0_i32_0 : i32, i32, i32
  }
}

module attributes {stable_mosaic.version = 11 : i64} {
  func.func @_decoder_step_kernel(%arg0: i32, %arg1: memref<8x128x128xbf16, #tpu.memory_space<vmem>>, %arg2: memref<8x128x128xbf16, #tpu.memory_space<vmem>>, %arg3: memref<1x8x512xf32, #tpu.memory_space<vmem>>, %arg4: memref<8x128xf32, #tpu.memory_space<vmem>>, %arg5: memref<8x128xf32, #tpu.memory_space<vmem>>, %arg6: memref<128x768xbf16, #tpu.memory_space<vmem>>, %arg7: memref<1x128xf32, #tpu.memory_space<vmem>>, %arg8: memref<1x128xf32, #tpu.memory_space<vmem>>, %arg9: memref<128x512xbf16, #tpu.memory_space<vmem>>, %arg10: memref<1x8x128xf32, #tpu.memory_space<vmem>>, %arg11: memref<1x8x128xf32, #tpu.memory_space<vmem>>, %arg12: memref<8x128xf32, #tpu.memory_space<vmem>>, %arg13: memref<8x128xf32, #tpu.memory_space<vmem>>) attributes {dimension_semantics = [#tpu.dimension_semantics<arbitrary>], iteration_bounds = array<i64: 8>, scalar_prefetch = 0 : i64, scratch_operands = 2 : i64, tpu.core_type = #tpu.core_type<tc>, window_params = [{pipeline_mode = #tpu.pipeline_mode<synchronous>, transform_indices = @transform_0, window_bounds = array<i64: 8, 128, 128>}, {pipeline_mode = #tpu.pipeline_mode<synchronous>, transform_indices = @transform_1, window_bounds = array<i64: 8, 128, 128>}, {transform_indices = @transform_2, window_bounds = array<i64: 1, 8, 512>}, {pipeline_mode = #tpu.pipeline_mode<synchronous>, transform_indices = @transform_3, window_bounds = array<i64: 8, 128>}, {pipeline_mode = #tpu.pipeline_mode<synchronous>, transform_indices = @transform_4, window_bounds = array<i64: 8, 128>}, {pipeline_mode = #tpu.pipeline_mode<synchronous>, transform_indices = @transform_5, window_bounds = array<i64: 128, 768>}, {pipeline_mode = #tpu.pipeline_mode<synchronous>, transform_indices = @transform_6, window_bounds = array<i64: 1, 128>}, {pipeline_mode = #tpu.pipeline_mode<synchronous>, transform_indices = @transform_7, window_bounds = array<i64: 1, 128>}, {pipeline_mode = #tpu.pipeline_mode<synchronous>, transform_indices = @transform_8, window_bounds = array<i64: 128, 512>}, {transform_indices = @transform_9, window_bounds = array<i64: 1, 8, 128>}, {transform_indices = @transform_10, window_bounds = array<i64: 1, 8, 128>}]} {
    %c0_i32 = arith.constant 0 : i32
    %0 = arith.cmpi eq, %arg0, %c0_i32 : i32
    %1 = arith.extui %0 : i1 to i32
    %c0_i32_0 = arith.constant 0 : i32
    %2 = arith.cmpi ne, %1, %c0_i32_0 : i32
    scf.if %2 {
      %c0_42 = arith.constant 0 : index
      %c0_43 = arith.constant 0 : index
      %91 = vector.load %arg4[%c0_42, %c0_43] : memref<8x128xf32, #tpu.memory_space<vmem>>, vector<8x128xf32>
      %c0_44 = arith.constant 0 : index
      %c0_45 = arith.constant 0 : index
      %92 = vector.load %arg12[%c0_44, %c0_45] : memref<8x128xf32, #tpu.memory_space<vmem>>, vector<8x128xf32>
      tpu.vector_store %arg12[%c0_44, %c0_45], %91 {strides = array<i32>} : memref<8x128xf32, #tpu.memory_space<vmem>>, vector<8x128xf32>,
      %c0_46 = arith.constant 0 : index
      %c0_47 = arith.constant 0 : index
      %93 = vector.load %arg5[%c0_46, %c0_47] : memref<8x128xf32, #tpu.memory_space<vmem>>, vector<8x128xf32>
      %c0_48 = arith.constant 0 : index
      %c0_49 = arith.constant 0 : index
      %94 = vector.load %arg13[%c0_48, %c0_49] : memref<8x128xf32, #tpu.memory_space<vmem>>, vector<8x128xf32>
      tpu.vector_store %arg13[%c0_48, %c0_49], %93 {strides = array<i32>} : memref<8x128xf32, #tpu.memory_space<vmem>>, vector<8x128xf32>,
    } else {
    }
    %c0 = arith.constant 0 : index
    %c0_1 = arith.constant 0 : index
    %3 = vector.load %arg12[%c0, %c0_1] : memref<8x128xf32, #tpu.memory_space<vmem>>, vector<8x128xf32>
    %c0_2 = arith.constant 0 : index
    %c0_3 = arith.constant 0 : index
    %4 = vector.load %arg13[%c0_2, %c0_3] : memref<8x128xf32, #tpu.memory_space<vmem>>, vector<8x128xf32>
    %5 = arith.truncf %3 : vector<8x128xf32> to vector<8x128xbf16>
    %c0_4 = arith.constant 0 : index
    %c0_5 = arith.constant 0 : index
    %6 = vector.load %arg6[%c0_4, %c0_5] : memref<128x768xbf16, #tpu.memory_space<vmem>>, vector<128x768xbf16>
    %cst = arith.constant dense<0.000000e+00> : vector<8x768xf32>
    %7 = tpu.matmul %5, %6, %cst {dimension_numbers = #tpu.dot_dimension_numbers<[1], [0], [0], [1], [0, 0, 1, 1], [], []>} : vector<8x128xbf16>, vector<128x768xbf16>, vector<8x768xf32> -> vector<8x768xf32>
    %8 = vector.extract_strided_slice %7 {offsets = [0, 0], sizes = [8, 128], strides = [1, 1]} : vector<8x768xf32> to vector<8x128xf32>
    %9 = vector.extract_strided_slice %7 {offsets = [0, 128], sizes = [8, 128], strides = [1, 1]} : vector<8x768xf32> to vector<8x128xf32>
    %c0_6 = arith.constant 0 : index
    %c0_7 = arith.constant 0 : index
    %10 = vector.load %arg7[%c0_6, %c0_7] : memref<1x128xf32, #tpu.memory_space<vmem>>, vector<1x128xf32>
    %11 = vector.broadcast %10 : vector<1x128xf32> to vector<8x128xf32>
    %12 = arith.addf %9, %11 : vector<8x128xf32>
    %13 = arith.negf %12 : vector<8x128xf32>
    %14 = math.exp %13 : vector<8x128xf32>
    %cst_8 = arith.constant 1.000000e+00 : f32
    %15 = vector.broadcast %cst_8 : f32 to vector<8x128xf32>
    %16 = arith.addf %15, %14 : vector<8x128xf32>
    %17 = arith.divf %15, %16 : vector<8x128xf32>
    %18 = vector.extract_strided_slice %7 {offsets = [0, 256], sizes = [8, 512], strides = [1, 1]} : vector<8x768xf32> to vector<8x512xf32>
    %c0_9 = arith.constant 0 : index
    %c0_10 = arith.constant 0 : index
    %c0_11 = arith.constant 0 : index
    %19 = vector.load %arg2[%c0_9, %c0_10, %c0_11] : memref<8x128x128xbf16, #tpu.memory_space<vmem>>, vector<8x128x128xbf16>
    %20 = arith.extf %19 : vector<8x128x128xbf16> to vector<8x128x128xf32>
    %21 = vector.shape_cast %8 : vector<8x128xf32> to vector<8x1x128xf32>
    %22 = vector.broadcast %21 : vector<8x1x128xf32> to vector<8x128x128xf32>
    %23 = arith.addf %20, %22 : vector<8x128x128xf32>
    %cst_12 = arith.constant 0.000000e+00 : f32
    %24 = vector.broadcast %cst_12 : f32 to vector<8x128x128xf32>
    %25 = arith.maximumf %23, %24 : vector<8x128x128xf32>
    %c0_13 = arith.constant 0 : index
    %c0_14 = arith.constant 0 : index
    %26 = vector.load %arg8[%c0_13, %c0_14] : memref<1x128xf32, #tpu.memory_space<vmem>>, vector<1x128xf32>
    %27 = vector.shape_cast %26 : vector<1x128xf32> to vector<1x1x128xf32>
    %28 = vector.broadcast %27 : vector<1x1x128xf32> to vector<8x128x128xf32>
    %29 = arith.mulf %25, %28 : vector<8x128x128xf32>
    %cst_15 = arith.constant dense<0.000000e+00> : vector<8x128xf32>
    %30 = vector.multi_reduction <add>, %29, %cst_15 [2] : vector<8x128x128xf32> to vector<8x128xf32>
    %31 = tpu.iota {dimensions = array<i32: 1>} : vector<8x128xi32>
    %c16_i32 = arith.constant 16 : i32
    %32 = vector.broadcast %c16_i32 : i32 to vector<8x128xi32>
    %33 = arith.cmpi slt, %31, %32 : vector<8x128xi32>
    %cst_16 = arith.constant -1.000000e+30 : f32
    %34 = vector.broadcast %cst_16 : f32 to vector<8x128xf32>
    %35 = arith.select %33, %30, %34 : vector<8x128xi1>, vector<8x128xf32>
    %cst_17 = arith.constant dense<0xFF800000> : vector<8xf32>
    %36 = vector.multi_reduction <maximumf>, %35, %cst_17 [1] : vector<8x128xf32> to vector<8xf32>
    %37 = vector.shape_cast %36 : vector<8xf32> to vector<8x1xf32>
    %38 = vector.broadcast %37 : vector<8x1xf32> to vector<8x128xf32>
    %39 = arith.subf %35, %38 : vector<8x128xf32>
    %40 = math.exp %39 : vector<8x128xf32>
    %cst_18 = arith.constant dense<0.000000e+00> : vector<8xf32>
    %41 = vector.multi_reduction <add>, %40, %cst_18 [1] : vector<8x128xf32> to vector<8xf32>
    %42 = vector.shape_cast %41 : vector<8xf32> to vector<8x1xf32>
    %43 = vector.broadcast %42 : vector<8x1xf32> to vector<8x128xf32>
    %44 = arith.divf %40, %43 : vector<8x128xf32>
    %45 = vector.shape_cast %44 : vector<8x128xf32> to vector<8x1x128xf32>
    %46 = arith.truncf %45 : vector<8x1x128xf32> to vector<8x1x128xbf16>
    %c0_19 = arith.constant 0 : index
    %c0_20 = arith.constant 0 : index
    %c0_21 = arith.constant 0 : index
    %47 = vector.load %arg1[%c0_19, %c0_20, %c0_21] : memref<8x128x128xbf16, #tpu.memory_space<vmem>>, vector<8x128x128xbf16>
    "tpu.trace_start"() <{level = 10 : i32, message = "bqp,bpe->bqe"}> : () -> ()
    %cst_22 = arith.constant dense<0.000000e+00> : vector<8x1x128xf32>
    %48 = tpu.matmul %46, %47, %cst_22 {dimension_numbers = #tpu.dot_dimension_numbers<[2], [1], [1], [2], [0, 0, 0, 1, 1, 2], [0], [0]>} : vector<8x1x128xbf16>, vector<8x128x128xbf16>, vector<8x1x128xf32> -> vector<8x1x128xf32>
    "tpu.trace_stop"() : () -> ()
    %49 = vector.shape_cast %48 : vector<8x1x128xf32> to vector<8x128xf32>
    %50 = arith.mulf %17, %49 : vector<8x128xf32>
    %c0_23 = arith.constant 0 : index
    %c0_24 = arith.constant 0 : index
    %c0_25 = arith.constant 0 : index
    %51 = vector.load %arg3[%c0_23, %c0_24, %c0_25] : memref<1x8x512xf32, #tpu.memory_space<vmem>>, vector<1x8x512xf32>
    %52 = vector.shape_cast %51 : vector<1x8x512xf32> to vector<8x512xf32>
    %53 = arith.truncf %50 : vector<8x128xf32> to vector<8x128xbf16>
    %c0_26 = arith.constant 0 : index
    %c0_27 = arith.constant 0 : index
    %54 = vector.load %arg9[%c0_26, %c0_27] : memref<128x512xbf16, #tpu.memory_space<vmem>>, vector<128x512xbf16>
    %cst_28 = arith.constant dense<0.000000e+00> : vector<8x512xf32>
    %55 = tpu.matmul %53, %54, %cst_28 {dimension_numbers = #tpu.dot_dimension_numbers<[1], [0], [0], [1], [0, 0, 1, 1], [], []>} : vector<8x128xbf16>, vector<128x512xbf16>, vector<8x512xf32> -> vector<8x512xf32>
    %56 = arith.addf %52, %55 : vector<8x512xf32>
    %57 = arith.addf %56, %18 : vector<8x512xf32>
    %58 = vector.extract_strided_slice %57 {offsets = [0, 0], sizes = [8, 128], strides = [1, 1]} : vector<8x512xf32> to vector<8x128xf32>
    %59 = arith.negf %58 : vector<8x128xf32>
    %60 = math.exp %59 : vector<8x128xf32>
    %cst_29 = arith.constant 1.000000e+00 : f32
    %61 = vector.broadcast %cst_29 : f32 to vector<8x128xf32>
    %62 = arith.addf %61, %60 : vector<8x128xf32>
    %63 = arith.divf %61, %62 : vector<8x128xf32>
    %64 = vector.extract_strided_slice %57 {offsets = [0, 128], sizes = [8, 128], strides = [1, 1]} : vector<8x512xf32> to vector<8x128xf32>
    %65 = arith.negf %64 : vector<8x128xf32>
    %66 = math.exp %65 : vector<8x128xf32>
    %cst_30 = arith.constant 1.000000e+00 : f32
    %67 = vector.broadcast %cst_30 : f32 to vector<8x128xf32>
    %68 = arith.addf %67, %66 : vector<8x128xf32>
    %69 = arith.divf %67, %68 : vector<8x128xf32>
    %70 = vector.extract_strided_slice %57 {offsets = [0, 256], sizes = [8, 128], strides = [1, 1]} : vector<8x512xf32> to vector<8x128xf32>
    %71 = math.tanh %70 : vector<8x128xf32>
    %72 = vector.extract_strided_slice %57 {offsets = [0, 384], sizes = [8, 128], strides = [1, 1]} : vector<8x512xf32> to vector<8x128xf32>
    %73 = arith.negf %72 : vector<8x128xf32>
    %74 = math.exp %73 : vector<8x128xf32>
    %cst_31 = arith.constant 1.000000e+00 : f32
    %75 = vector.broadcast %cst_31 : f32 to vector<8x128xf32>
    %76 = arith.addf %75, %74 : vector<8x128xf32>
    %77 = arith.divf %75, %76 : vector<8x128xf32>
    %78 = arith.mulf %69, %4 : vector<8x128xf32>
    %79 = arith.mulf %63, %71 : vector<8x128xf32>
    %80 = arith.addf %78, %79 : vector<8x128xf32>
    %81 = math.tanh %80 : vector<8x128xf32>
    %82 = arith.mulf %77, %81 : vector<8x128xf32>
    %c0_32 = arith.constant 0 : index
    %c0_33 = arith.constant 0 : index
    %83 = vector.load %arg12[%c0_32, %c0_33] : memref<8x128xf32, #tpu.memory_space<vmem>>, vector<8x128xf32>
    tpu.vector_store %arg12[%c0_32, %c0_33], %82 {strides = array<i32>} : memref<8x128xf32, #tpu.memory_space<vmem>>, vector<8x128xf32>,
    %c0_34 = arith.constant 0 : index
    %c0_35 = arith.constant 0 : index
    %84 = vector.load %arg13[%c0_34, %c0_35] : memref<8x128xf32, #tpu.memory_space<vmem>>, vector<8x128xf32>
    tpu.vector_store %arg13[%c0_34, %c0_35], %80 {strides = array<i32>} : memref<8x128xf32, #tpu.memory_space<vmem>>, vector<8x128xf32>,
    %c0_36 = arith.constant 0 : index
    %c0_37 = arith.constant 0 : index
    %c0_38 = arith.constant 0 : index
    %85 = vector.load %arg10[%c0_36, %c0_37, %c0_38] : memref<1x8x128xf32, #tpu.memory_space<vmem>>, vector<1x8x128xf32>
    %86 = vector.shape_cast %85 : vector<1x8x128xf32> to vector<8x128xf32>
    %87 = vector.shape_cast %82 : vector<8x128xf32> to vector<1x8x128xf32>
    tpu.vector_store %arg10[%c0_36, %c0_37, %c0_38], %87 {strides = array<i32>} : memref<1x8x128xf32, #tpu.memory_space<vmem>>, vector<1x8x128xf32>,
    %c0_39 = arith.constant 0 : index
    %c0_40 = arith.constant 0 : index
    %c0_41 = arith.constant 0 : index
    %88 = vector.load %arg11[%c0_39, %c0_40, %c0_41] : memref<1x8x128xf32, #tpu.memory_space<vmem>>, vector<1x8x128xf32>
    %89 = vector.shape_cast %88 : vector<1x8x128xf32> to vector<8x128xf32>
    %90 = vector.shape_cast %44 : vector<8x128xf32> to vector<1x8x128xf32>
    tpu.vector_store %arg11[%c0_39, %c0_40, %c0_41], %90 {strides = array<i32>} : memref<1x8x128xf32, #tpu.memory_space<vmem>>, vector<1x8x128xf32>,
    return
  }
  func.func @transform_0(%arg0: i32) -> (i32, i32, i32) {
    %c0_i32 = arith.constant 0 : i32
    %c0_i32_0 = arith.constant 0 : i32
    %c0_i32_1 = arith.constant 0 : i32
    %c0_i32_2 = arith.constant 0 : i32
    return %c0_i32, %c0_i32_0, %c0_i32_1 : i32, i32, i32
  }
  func.func @transform_1(%arg0: i32) -> (i32, i32, i32) {
    %c0_i32 = arith.constant 0 : i32
    %c0_i32_0 = arith.constant 0 : i32
    %c0_i32_1 = arith.constant 0 : i32
    %c0_i32_2 = arith.constant 0 : i32
    return %c0_i32, %c0_i32_0, %c0_i32_1 : i32, i32, i32
  }
  func.func @transform_2(%arg0: i32) -> (i32, i32, i32) {
    %c0_i32 = arith.constant 0 : i32
    %c0_i32_0 = arith.constant 0 : i32
    %c0_i32_1 = arith.constant 0 : i32
    return %arg0, %c0_i32, %c0_i32_0 : i32, i32, i32
  }
  func.func @transform_3(%arg0: i32) -> (i32, i32) {
    %c0_i32 = arith.constant 0 : i32
    %c0_i32_0 = arith.constant 0 : i32
    %c0_i32_1 = arith.constant 0 : i32
    return %c0_i32, %c0_i32_0 : i32, i32
  }
  func.func @transform_4(%arg0: i32) -> (i32, i32) {
    %c0_i32 = arith.constant 0 : i32
    %c0_i32_0 = arith.constant 0 : i32
    %c0_i32_1 = arith.constant 0 : i32
    return %c0_i32, %c0_i32_0 : i32, i32
  }
  func.func @transform_5(%arg0: i32) -> (i32, i32) {
    %c0_i32 = arith.constant 0 : i32
    %c0_i32_0 = arith.constant 0 : i32
    %c0_i32_1 = arith.constant 0 : i32
    return %c0_i32, %c0_i32_0 : i32, i32
  }
  func.func @transform_6(%arg0: i32) -> (i32, i32) {
    %c0_i32 = arith.constant 0 : i32
    %c0_i32_0 = arith.constant 0 : i32
    %c0_i32_1 = arith.constant 0 : i32
    return %c0_i32, %c0_i32_0 : i32, i32
  }
  func.func @transform_7(%arg0: i32) -> (i32, i32) {
    %c0_i32 = arith.constant 0 : i32
    %c0_i32_0 = arith.constant 0 : i32
    %c0_i32_1 = arith.constant 0 : i32
    return %c0_i32, %c0_i32_0 : i32, i32
  }
  func.func @transform_8(%arg0: i32) -> (i32, i32) {
    %c0_i32 = arith.constant 0 : i32
    %c0_i32_0 = arith.constant 0 : i32
    %c0_i32_1 = arith.constant 0 : i32
    return %c0_i32, %c0_i32_0 : i32, i32
  }
  func.func @transform_9(%arg0: i32) -> (i32, i32, i32) {
    %c0_i32 = arith.constant 0 : i32
    %c0_i32_0 = arith.constant 0 : i32
    %c0_i32_1 = arith.constant 0 : i32
    return %arg0, %c0_i32, %c0_i32_0 : i32, i32, i32
  }
  func.func @transform_10(%arg0: i32) -> (i32, i32, i32) {
    %c0_i32 = arith.constant 0 : i32
    %c0_i32_0 = arith.constant 0 : i32
    %c0_i32_1 = arith.constant 0 : i32
    return %arg0, %c0_i32, %c0_i32_0 : i32, i32, i32
  }
}

</mosaic_0001>

<bundles_post_ra>
// kernel: tpu_custom_call.1
= control target key start
LH: loop header
LB: loop body
LE: loop exit
PB: predicated region body
PF: predicated region fallthrough
CT: control target
= control target key end

     0   :  { %s6160_s0 = inlined_call_operand.hbm [shape: bf16[8,128,128], index: 0, kind: input, shape index: {}]   ;;  %s6161_s1 = inlined_call_operand.hbm [shape: bf16[8,128,128], index: 1, kind: input, shape index: {}]   ;;  %s6162_s2 = inlined_call_operand.hbm [shape: f32[8,8,512], index: 2, kind: input, shape index: {}]   ;;  %s6163_s3 = inlined_call_operand.hbm [shape: f32[8,128], index: 3, kind: input, shape index: {}]   ;;  %s6164_s4 = inlined_call_operand.hbm [shape: f32[8,128], index: 4, kind: input, shape index: {}]   ;;  %s6165_s5 = inlined_call_operand.hbm [shape: bf16[128,768], index: 5, kind: input, shape index: {}]   ;;  %s6166_s6 = inlined_call_operand.vmem [shape: f32[1,128], index: 6, kind: input, shape index: {}]   ;;  %s6167_s7 = inlined_call_operand.vmem [shape: f32[1,128], index: 7, kind: input, shape index: {}]   ;;  %s6168_s8 = inlined_call_operand.hbm [shape: bf16[128,512], index: 8, kind: input, shape index: {}]   ;;  %s6169_s9 = inlined_call_operand.hbm [shape: f32[8,8,128], index: 9, kind: output, shape index: {0}]   ;;  %s6170_s10 = inlined_call_operand.hbm [shape: f32[8,8,128], index: 10, kind: output, shape index: {1}]  }
   0x1   :  { %6171 = sst [smem:[#allocation27_spill]] %s6160_s0 }
   0x2   :  { %6172 = sst [smem:[#allocation28_spill]] %s6161_s1 }
   0x3   :  { %6173 = sst [smem:[#allocation29_spill]] %s6162_s2 }
   0x4   :  { %6174 = sst [smem:[#allocation30_spill]] %s6163_s3 }
   0x5   :  { %6175 = sst [smem:[#allocation31_spill]] %s6164_s4 }
   0x6   :  { %6176 = sst [smem:[#allocation32_spill]] %s6165_s5 }
   0x7   :  { %6177 = sst [smem:[#allocation33_spill]] %s6166_s6 }
   0x8   :  { %16 = vsyncpa [#allocation5], 0 }
   0x9   :  { %17 = vsyncpa [#allocation8], 0 }
   0xa   :  { %18 = vsyncpa [#allocation12], 0 }
   0xb   :  { %19 = vsyncpa [#allocation15], 0 }
   0xc   :  { %20 = vsyncpa [#allocation6], 0 }
   0xd   :  { %22 = vsyncpa [#allocation6 + $0x1], 0 }
   0xe   :  { %23 = vsyncpa [#allocation18], 0 }
   0xf   :  { %25 = vsyncpa [#allocation18 + $0x1], 0  ;;  %s5051_s13 = smov 0   ;;  %s5053_s14 = smov 0  }
  0x10   :  { %s5055_s15 = smov 0   ;;  %s5057_s16 = smov 0  }
  0x11 LB: > { %s6178_s0 = sld [smem:[#allocation27_spill]]  ;;  %s5075_s20 = sadd.s32 4294967295, %s4982_s16   ;;  %s4982_s16 = sphi %s5057_s16, %s6196_s16   ;;  %s4978_s15 = sphi %s5055_s15, %s6195_s15   ;;  %s4974_s14 = sphi %s5053_s14, %s6194_s14   ;;  %s4970_s13 = sphi %s5051_s13, %s6193_s13  }
  0x12   : > { %p3437_p0 = scmp.ge.s32.totalorder %s4982_s16, 1  ;;  %p94_p1 = scmp.eq.s32.totalorder %s5075_s20, 0 }
  0x13   : > { %p282_p2 = scmp.lt.s32.totalorder %s4982_s16, 9  ;;  %s4984_s22 = smov [#allocation4]  }
  0x14   : > { %s295_s23 = sshll.u32 %s4984_s22, 4  ;;  %s6180_s1 = sld [smem:[#allocation28_spill]]  ;;  %s296_s23 = int_to_ptr.vmem [resolvable:$true] %s295_s23 }
  0x15   : > { %p5081_p4 = pnand %p3437_p0, %p282_p2  ;;  %s6182_s4 = sld [smem:[#allocation31_spill]] }
  0x16   : > { %s4985_s11 = smov [#allocation7]   ;;  %s4986_s17 = smov 64  }
  0x17   : > { %s293_s19 = sshll.u32 %s6178_s0, 4  ;;  %p4539_p5 = pneg %p5081_p4  ;;  %s294_s19 = int_to_ptr.hbm [resolvable:$true] %s293_s19 }
  0x18   : > { %s309_s12 = sshll.u32 %s4985_s11, 4  ;;  %s4987_s18 = smov 4   ;;  %s310_s12 = int_to_ptr.vmem [resolvable:$true] %s309_s12 }
  0x19   : > { %p5092_p6 = pnand %p4539_p5, %p94_p1  ;;  %s6183_s3 = sld [smem:[#allocation30_spill]] }
  0x1a   : > { %s307_s26 = sshll.u32 %s6180_s1, 4  ;;  %s4988_s0 = smov [#allocation11]   ;;  %s308_s26 = int_to_ptr.hbm [resolvable:$true] %s307_s26 }
  0x1b   : > { %s334_s30 = sshll.u32 %s6182_s4, 4  ;;  %s336_s1 = sshll.u32 %s4988_s0, 4  ;;  %s335_s30 = int_to_ptr.hbm [resolvable:$true] %s334_s30  ;;  %s337_s1 = int_to_ptr.vmem [resolvable:$true] %s336_s1 }
  0x1c   : > { %4542 = dma.hbm_to_vmem [thread:$0]  (!%p5092_p6), %s294_s19, 8192, %s296_s23, [#allocation5], %s4986_s17, %s4986_s17, %s4987_s18  }
  0x1d   : > { %4545 = dma.hbm_to_vmem [thread:$0]  (!%p5092_p6), %s308_s26, 8192, %s310_s12, [#allocation8], %s4986_s17, %s4986_s17, %s4987_s18  }
  0x1e   : > { %4551 = dma.hbm_to_vmem [thread:$0]  (!%p5092_p6), %s335_s30, 128, %s337_s1, [#allocation12]  }
  0x1f   : > { %s322_s25 = sshll.u32 %s6183_s3, 4  ;;  %s4989_s28 = smov [#allocation10]   ;;  %s323_s25 = int_to_ptr.hbm [resolvable:$true] %s322_s25 }
  0x20   : > { %s324_s29 = sshll.u32 %s4989_s28, 4  ;;  %s6184_s5 = sld [smem:[#allocation32_spill]]  ;;  %s325_s29 = int_to_ptr.vmem [resolvable:$true] %s324_s29 }
  0x21   : > { %4548 = dma.hbm_to_vmem [thread:$0]  (!%p5092_p6), %s323_s25, 128, %s325_s29, [#allocation8]  }
  0x22   : > { %s4990_s23 = smov [#allocation13]   ;;  %s365_s30 = sshll.u32 %s6168_s8, 4  ;;  %s366_s30 = int_to_ptr.hbm [resolvable:$true] %s365_s30 }
  0x23   : > { %s347_s0 = sshll.u32 %s4990_s23, 4  ;;  %s4991_s4 = smov 384   ;;  %s348_s0 = int_to_ptr.vmem [resolvable:$true] %s347_s0 }
  0x24   : > { %s4992_s12 = smov 24   ;;  %s4993_s17 = smov [#allocation14]  }
  0x25   : > { %s367_s18 = sshll.u32 %s4993_s17, 4  ;;  %s4994_s22 = smov 256   ;;  %s368_s18 = int_to_ptr.vmem [resolvable:$true] %s367_s18 }
  0x26   : > { %s345_s19 = sshll.u32 %s6184_s5, 4  ;;  %s4995_s24 = smov 16   ;;  %s346_s19 = int_to_ptr.hbm [resolvable:$true] %s345_s19 }
  0x27   : > { %4554 = dma.hbm_to_vmem [thread:$0]  (!%p5092_p6), %s346_s19, 6144, %s348_s0, [#allocation12], %s4991_s4, %s4991_s4, %s4992_s12  }
  0x28   : > { %4557 = dma.hbm_to_vmem [thread:$0]  (!%p5092_p6), %s366_s30, 4096, %s368_s18, [#allocation15], %s4994_s22, %s4994_s22, %s4995_s24  }
  0x29   : > { %s3436_s25 = sadd.s32 4294967294, %s4982_s16   ;;  %s5122_s28 = sadd.s32 1, %s4982_s16  }
  0x2a   : > { %s77_s29 = ssub.s32 %s4982_s16, %s5122_s28  ;;  %s80_s11 = sadd.s32 1, %s4978_s15 }
  0x2b   : > { %p78_p7 = scmp.eq.s32.totalorder %s77_s29, 0  ;;  %p87_p8 = scmp.ne.s32.totalorder %s4978_s15, %s4974_s14 }
  0x2c   : > { %p88_p9 = scmp.eq.s32.totalorder %s4982_s16, 0  ;;  %p93_p10 = scmp.ne.s32.totalorder %s4974_s14, %s4970_s13 }
  0x2d   : > { %s5133_s19 = scalar_select %p78_p7, %s4978_s15, %s80_s11  }
  0x2e   : > { %p5137_p11 = por %p94_p1, %p93_p10  ;;  %p243_p12 = scmp.eq.s32.totalorder %s5075_s20, 7 }
  0x2f   : > { %p249_p13 = scmp.eq.s32.totalorder %s3436_s25, 7  ;;  %p5142_p0 = por %p88_p9, %p87_p8 }
  0x30   : > { %p4575_p2 = scmp.lt.s32.totalorder %s4982_s16, 8  ;;  %p5147_p5 = por %p243_p12, %p87_p8 }
  0x31   : > { %p5151_p6 = por %p249_p13, %p93_p10  ;;  %s381_s1 = sand.u32 1, %s4982_s16  }
  0x32   : > { %s383_s30 = sand.u32 1, %s4978_s15   ;;  %s4045_s12 = sshll.u32 %s4982_s16, 5 }
  0x33   : > { %s3445_s4 = sshll.u32 %s383_s30, 5  ;;  %s6189_s2 = sld [smem:[#allocation29_spill]] }
  0x34   : > { %s385_s25 = scalar_lea.vmem [#allocation9], %s3445_s4  ;;  %p5165_p7 = pnand %p4575_p2, %p5142_p0 }
  0x35   : > { %s394_s29 = sshll.u32 %s385_s25, 4  ;;  %s382_s3 = scalar_lea.sflag [#allocation5], %s381_s1  ;;  %s395_s29 = int_to_ptr.vmem [resolvable:$true] %s394_s29 }
  0x36   : > { %p4838_p9 = pneg %p5165_p7 }
  0x39   : > { %s390_s22 = scalar_lea.hbm %s6189_s2, %s4045_s12  ;;  %s4841_s17 = scalar_lea.hbm %s6189_s2, 256 }
  0x3a   : > { %s392_s24 = sshll.u32 %s390_s22, 4  ;;  %s393_s24 = int_to_ptr.hbm [resolvable:$true] %s392_s24 }
  0x3b   : > { %s4834_s5 = sshra.s32 %s393_s24, 4  ;;  %s4835_s5 = int_to_ptr.hbm [resolvable:$true] %s4834_s5 }
  0x3c   : > { %s4836_s30 = scalar_lea.hbm %s4835_s5, 32  ;;  %p4842_p13 = scmp.lt.s32.totalorder %s4835_s5, %s6189_s2 }
  0x3d   : > { %p4837_p8 = scmp.ne.s32.totalorder %s4835_s5, %s4836_s30  ;;  %p4843_p0 = scmp.lt.s32.totalorder %s4841_s17, %s4836_s30 }
  0x3f   : > { %p4839_p10 = pnand %p4838_p9, %p4837_p8  ;;  %p4844_p2 = por %p4843_p0, %p4842_p13 }
  0x41   : > { %p4840_p12 = pneg %p4839_p10 }
  0x43   : > { %p4845_p3 = pnand %p4844_p2, %p4840_p12 }
  0x45   : > { %4848 = shalt.err (!%p4845_p3)
}
  0x46   : > { %4561 = dma.hbm_to_vmem [thread:$0]  (!%p5165_p7), %s393_s24, 512, %s395_s29, %s382_s3  }
  0x47   : > { %403 = sbr.rel (%p5081_p4) target bundleno = 1331 (0x533), region = 56 }
  0x4c   : > { %4937 = dma.done.wait (%p94_p1), [#allocation5], 8192  }
  0x4d   : > { %4939 = vsyncadd (%p94_p1), [#allocation5], 4294959104 }
  0x4e   : > { %4941 = dma.done.wait (%p94_p1), [#allocation8], 8192  }
  0x4f   : > { %4943 = vsyncadd (%p94_p1), [#allocation8], 4294959104  ;;  %s415_s5 = sand.u32 1, %s5075_s20   ;;  %s5191_s3 = sand.u32 1, %s4974_s14  }
  0x50   : > { %s3451_s21 = sshll.u32 %s5191_s3, 5  ;;  %s416_s1 = scalar_lea.sflag [#allocation5], %s415_s5 }
  0x51   : > { %s5194_s22 = scalar_lea.vmem [#allocation9], %s3451_s21 }
  0x52   : > { %4945 = dma.done.wait (%p5137_p11), %s416_s1, 512  }
  0x53   : > { %4947 = vsyncadd (%p5137_p11), %s416_s1, 4294966784 }
  0x54   : > { %4949 = dma.done.wait (%p94_p1), [#allocation8], 128  }
  0x55   : > { %4951 = vsyncadd (%p94_p1), [#allocation8], 4294967168 }
  0x56   : > { %4953 = dma.done.wait (%p94_p1), [#allocation12], 6272  }
  0x57   : > { %4955 = vsyncadd (%p94_p1), [#allocation12], 4294961024 }
  0x58   : > { %4957 = dma.done.wait (%p94_p1), [#allocation15], 4096  }
  0x59   : > { %4959 = vsyncadd (%p94_p1), [#allocation15], 4294963200  ;;  %s3456_s23 = sshll.u32 %s5191_s3, 3  ;;  %p6191_p3 = scmp.ne.s32.totalorder %s5075_s20, 0 }
  0x5a   : > { %s5213_s24 = scalar_lea.vmem [#allocation16], %s3456_s23  ;;  %s5215_s25 = scalar_lea.vmem [#allocation17], %s3456_s23 }
  0x5b   : > { %485 = sbr.rel (%p6191_p3) target bundleno = 99 (0x63), region = 88 }
  0x60   : > { %v486_v0 = vld [vmem:[#allocation10] sm:$0xff]  ;;  %v488_v1 = vld [vmem:[#allocation11] sm:$0xff] }
  0x61   : > { %487 = vst [vmem:[#allocation2] sm:$0xff] %v486_v0 }
  0x62   : > { %489 = vst [vmem:[#allocation3] sm:$0xff] %v488_v1 }
  0x63 PF: > { %v3629_v2 = vld [vmem:[#allocation13 + $0x150] sm:$0xf]  ;;  %v4091_v3 = vld [vmem:[#allocation13 + $0x164] sm:$0xf0]  ;;  %v3605_v4 = vld [vmem:[#allocation13 + $0x120] sm:$0xf] }
  0x64   : > { %v3630_v5 = vor.u32 %v4091_v3, %v3629_v2  ;;  %v4085_v6 = vld [vmem:[#allocation13 + $0x134] sm:$0xf0]  ;;  %v3581_v8 = vld [vmem:[#allocation13 + $0xf0] sm:$0xf]  ;;  %v4079_v9 = vld [vmem:[#allocation13 + $0x104] sm:$0xf0] }
  0x65   : > { %v3606_v7 = vor.u32 %v4085_v6, %v3605_v4  ;;  %v3582_v10 = vor.u32 %v4079_v9, %v3581_v8  ;;  %v3557_v11 = vld [vmem:[#allocation13 + $0xc0] sm:$0xf]  ;;  %v4073_v12 = vld [vmem:[#allocation13 + $0xd4] sm:$0xf0]  ;;  %v3533_v14 = vld [vmem:[#allocation13 + $0x90] sm:$0xf] }
  0x66   : > { %781 = vmatpush.bf16.msra.mxu0 %v3630_v5  ;;  %v3558_v13 = vor.u32 %v4073_v12, %v3557_v11  ;;  %v4067_v15 = vld [vmem:[#allocation13 + $0xa4] sm:$0xf0]  ;;  %v3509_v17 = vld [vmem:[#allocation13 + $0x60] sm:$0xf]  ;;  %v4061_v18 = vld [vmem:[#allocation13 + $0x74] sm:$0xf0] }
  0x67   : > { %v3534_v16 = vor.u32 %v4067_v15, %v3533_v14  ;;  %v3510_v19 = vor.u32 %v4061_v18, %v3509_v17  ;;  %v3485_v20 = vld [vmem:[#allocation13 + $0x30] sm:$0xf]  ;;  %v4055_v21 = vld [vmem:[#allocation13 + $0x44] sm:$0xf0]  ;;  %v3461_v23 = vld [vmem:[#allocation13] sm:$0xf] }
  0x68   : > { %v3486_v22 = vor.u32 %v4055_v21, %v3485_v20  ;;  %v4049_v24 = vld [vmem:[#allocation13 + $0x14] sm:$0xf0]  ;;  %v490_v26 = vld [vmem:[#allocation2] sm:$0xff]  ;;  %v4191_v30 = vld [vmem:[#allocation7] sm:$0xff]   ;;  %vm1941_vm0 = vcmask 130112   ;;  %vm1945_vm1 = vcmask 195712  }
  0x69   : > { %v3462_v25 = vor.u32 %v4049_v24, %v3461_v23  ;;  %v5219_v27 = vpack.c.bf16 %v490_v26, %v490_v26  ;;  %v4447_v28 = vld [vmem:[#allocation7 + $0x10] sm:$0xff]   ;;  %v4446_v29 = vld [vmem:[#allocation7 + $0x8] sm:$0xff]   ;;  %v4192_v34 = vunpack.c.l.bf16 %v4191_v30  ;;  %v4193_v42 = vunpack.c.h.bf16 %v4191_v30  ;;  %v4448_v53 = vld [vmem:[#allocation7 + $0x18] sm:$0xff]   ;;  %s6192_s6 = sld [smem:[#allocation33_spill]]  ;;  %s4041_s27 = sshll.u32 %s5075_s20, 3 }
  0x6a   : > { %782 = vmatpush.bf16.msra.mxu0 %v3606_v7  ;;  %v4200_v32 = vunpack.c.l.bf16 %v4447_v28  ;;  %v4196_v33 = vunpack.c.l.bf16 %v4446_v29  ;;  %v5231_v37 = vld [vmem:[%s6167_s7] ss:$0 sm:$0xff]  ;;  %v4201_v38 = vunpack.c.h.bf16 %v4447_v28  ;;  %v4197_v41 = vunpack.c.h.bf16 %v4446_v29  ;;  %v4449_v54 = vld [vmem:[#allocation7 + $0x20] sm:$0xff]   ;;  %v5248_v4 = vld [vmem:[#allocation7 + $0x28] sm:$0xff]   ;;  %s3271_s21 = scalar_lea.hbm %s6170_s10, %s4041_s27  ;;  %s3273_s1 = sshll.u32 %s5215_s25, 4  ;;  %s3274_s1 = int_to_ptr.vmem [resolvable:$true] %s3273_s1 }
  0x6b   : > { %v4205_v56 = vunpack.c.h.bf16 %v4448_v53  ;;  %v4204_v59 = vunpack.c.l.bf16 %v4448_v53  ;;  %v4209_v60 = vunpack.c.h.bf16 %v4449_v54  ;;  %v5250_v5 = vld [vmem:[#allocation7 + $0x80] sm:$0xff]   ;;  %v4208_v7 = vunpack.c.l.bf16 %v4449_v54  ;;  %v4454_v21 = vld [vmem:[#allocation7 + $0x48] sm:$0xff]   ;;  %s3275_s23 = sshll.u32 %s3271_s21, 4  ;;  %s3247_s29 = scalar_lea.sflag [#allocation18], %s5191_s3  ;;  %s3276_s23 = int_to_ptr.hbm [resolvable:$true] %s3275_s23 }
  0x6c   : > { %v4212_v8 = vunpack.c.l.bf16 %v5248_v4  ;;  %v4256_v12 = vunpack.c.l.bf16 %v5250_v5  ;;  %v4453_v20 = vld [vmem:[#allocation7 + $0x40] sm:$0xff]   ;;  %v4229_v28 = vunpack.c.h.bf16 %v4454_v21  ;;  %v4228_v29 = vunpack.c.l.bf16 %v4454_v21  ;;  %v4462_v54 = vld [vmem:[#allocation7 + $0x88] sm:$0xff]   ;;  %s4878_s11 = sshra.s32 %s3276_s23, 4  ;;  %s4884_s17 = scalar_lea.hbm %s6170_s10, 64  ;;  %s4879_s11 = int_to_ptr.hbm [resolvable:$true] %s4878_s11 }
  0x6d   : > { %v4224_v24 = vunpack.c.l.bf16 %v4453_v20  ;;  %v4470_v21 = vld [vmem:[#allocation7 + $0xc8] sm:$0xff]   ;;  %vm1949_vm2 = vcmask 261312   ;;  %vm1953_vm3 = vcmask 326912   ;;  %vm1957_vm4 = vcmask 392512   ;;  %s4880_s30 = scalar_lea.hbm %s4879_s11, 8  ;;  %p4885_p7 = scmp.lt.s32.totalorder %s4879_s11, %s6170_s10 }
  0x6e   : > { %783 = vmatpush.bf16.msra.mxu0 %v3582_v10  ;;  %vm1961_vm5 = vcmask 458112   ;;  %vm1965_vm6 = vcmask 523712   ;;  %vm1969_vm7 = vcmask 589312   ;;  %vm1973_vm8 = vcmask 654912   ;;  %p4881_p1 = scmp.ne.s32.totalorder %s4879_s11, %s4880_s30  ;;  %p4886_p8 = scmp.lt.s32.totalorder %s4884_s17, %s4880_s30 }
  0x6f   : > { %vm1977_vm9 = vcmask 720512   ;;  %vm1981_vm10 = vcmask 786112   ;;  %vm1985_vm11 = vcmask 851712   ;;  %vm1989_vm12 = vcmask 917312  }
  0x70   : > { %vm1993_vm13 = vcmask 982912   ;;  %vm1997_vm14 = vcmask 1048512   ;;  %vm2216_vm15 = vcmask 1041409   ;;  %p4882_p4 = pnand %p4881_p1, %p5147_p5  ;;  %p4887_p9 = por %p4886_p8, %p4885_p7 }
  0x72   : > { %784 = vmatpush.bf16.msra.mxu0 %v3558_v13  ;;  %p4883_p11 = pneg %p4882_p4 }
  0x74   : > { %p4888_p10 = pnand %p4887_p9, %p4883_p11 }
  0x76   : > { %785 = vmatpush.bf16.msra.mxu0 %v3534_v16 }
  0x7a   : > { %786 = vmatpush.bf16.msra.mxu0 %v3510_v19 }
  0x7e   : > { %787 = vmatpush.bf16.msra.mxu0 %v3486_v22 }
  0x82   : > { %788 = vmatpush.bf16.msra.mxu0 %v3462_v25 }
  0x85   : > { %789 = vmatmul.bf16.vlgmr.msra.gmra.mxu0 %v5219_v27 }
 0x102   : > { %v5222_v31 = vpop.f32.mrf.mxu0 }
 0x103   : > { %v5225_v35 = vperm.slane %v5222_v31, 0  ;;  %v1141_v61 = vrot.slane %v5222_v31, 2  ;;  %v1140_v13 = vrot.slane %v5222_v31, 1  ;;  %v1142_v30 = vrot.slane %v5222_v31, 3 }
 0x105   : > { %v1167_v36 = vadd.f32 %v4200_v32, %v5225_v35  ;;  %v1165_v39 = vadd.f32 %v4196_v33, %v5225_v35  ;;  %v1163_v40 = vadd.f32 %v4192_v34, %v5225_v35  ;;  %v1168_v48 = vadd.f32 %v4201_v38, %v5225_v35 }
 0x106   : > { %v1166_v51 = vadd.f32 %v4197_v41, %v5225_v35  ;;  %v1164_v52 = vadd.f32 %v4193_v42, %v5225_v35  ;;  %v1170_v63 = vadd.f32 %v4205_v56, %v5225_v35  ;;  %v1169_v2 = vadd.f32 %v4204_v59, %v5225_v35 }
 0x107   : > { %v1295_v43 = vmax.f32 %v1167_v36, 0.0  ;;  %v1293_v44 = vmax.f32 %v1165_v39, 0.0  ;;  %v1291_v45 = vmax.f32 %v1163_v40, 0.0  ;;  %v1296_v55 = vmax.f32 %v1168_v48, 0.0  ;;  %v4469_v40 = vld [vmem:[#allocation7 + $0xc0] sm:$0xff]  }
 0x108   : > { %v1294_v57 = vmax.f32 %v1166_v51, 0.0  ;;  %v1292_v58 = vmax.f32 %v1164_v52, 0.0  ;;  %v1172_v3 = vadd.f32 %v4209_v60, %v5225_v35  ;;  %v1298_v6 = vmax.f32 %v1170_v63, 0.0 }
 0x109   : > { %v1427_v47 = vmul.f32 %v5231_v37, %v1295_v43  ;;  %v1425_v49 = vmul.f32 %v5231_v37, %v1293_v44  ;;  %v1423_v50 = vmul.f32 %v5231_v37, %v1291_v45  ;;  %v1428_v62 = vmul.f32 %v5231_v37, %v1296_v55  ;;  %v4455_v55 = vld [vmem:[#allocation7 + $0x50] sm:$0xff]  }
 0x10a   : > { %v792_v46 = vpop.f32.mrf.mxu0  ;;  %v1426_v0 = vmul.f32 %v5231_v37, %v1294_v57  ;;  %v1424_v1 = vmul.f32 %v5231_v37, %v1292_v58  ;;  %v5253_v9 = vperm.slane %v1141_v61, 0  ;;  %v1297_v10 = vmax.f32 %v1169_v2, 0.0 }
 0x10b   : > { %1559 = vadd.xlane.f32.xlu1 %v1427_v47  ;;  %1555 = vadd.xlane.f32.xlu2 %v1425_v49  ;;  %v1300_v11 = vmax.f32 %v1172_v3, 0.0  ;;  %v1430_v14 = vmul.f32 %v5231_v37, %v1298_v6  ;;  %v1171_v15 = vadd.f32 %v4208_v7, %v5225_v35  ;;  %v1173_v18 = vadd.f32 %v4212_v8, %v5225_v35  ;;  %v4477_v7 = vld [vmem:[#allocation7 + $0x100] sm:$0xff]  }
 0x10c   : > { %1551 = vadd.xlane.f32.xlu0 %v1423_v50  ;;  %v1429_v16 = vmul.f32 %v5231_v37, %v1297_v10  ;;  %v1195_v19 = vadd.f32 %v4256_v12, %v5253_v9  ;;  %v5263_v22 = vperm.slane %v1140_v13, 0  ;;  %v4289_v42 = vunpack.c.h.bf16 %v4469_v40 }
 0x10d   : > { %v1432_v17 = vmul.f32 %v5231_v37, %v1300_v11  ;;  %v1299_v23 = vmax.f32 %v1171_v15, 0.0  ;;  %v1301_v25 = vmax.f32 %v1173_v18, 0.0  ;;  %v4225_v43 = vunpack.c.h.bf16 %v4453_v20 }
 0x10e   : > { %v1323_v26 = vmax.f32 %v1195_v19, 0.0  ;;  %v1179_v33 = vadd.f32 %v4224_v24, %v5263_v22  ;;  %v1182_v38 = vadd.f32 %v4229_v28, %v5263_v22  ;;  %v1181_v39 = vadd.f32 %v4228_v29, %v5263_v22 }
 0x10f   : > { %v1431_v32 = vmul.f32 %v5231_v37, %v1299_v23  ;;  %v1433_v34 = vmul.f32 %v5231_v37, %v1301_v25  ;;  %v5272_v44 = vperm.slane %v1142_v30, 0  ;;  %v4288_v47 = vunpack.c.l.bf16 %v4469_v40  ;;  %v5296_v23 = vld [vmem:[#allocation7 + $0x90] sm:$0xff]  }
 0x110   : > { %v1455_v36 = vmul.f32 %v5231_v37, %v1323_v26  ;;  %v1307_v41 = vmax.f32 %v1179_v33, 0.0  ;;  %v1310_v45 = vmax.f32 %v1182_v38, 0.0  ;;  %v1309_v46 = vmax.f32 %v1181_v39, 0.0 }
 0x111   : > { %v1180_v49 = vadd.f32 %v4225_v43, %v5263_v22  ;;  %v1212_v52 = vadd.f32 %v4289_v42, %v5272_v44  ;;  %v1211_v53 = vadd.f32 %v4288_v47, %v5272_v44  ;;  %v4257_v57 = vunpack.c.h.bf16 %v5250_v5  ;;  %v4478_v42 = vld [vmem:[#allocation7 + $0x108] sm:$0xff]  }
 0x112   : > { %v1439_v48 = vmul.f32 %v5231_v37, %v1307_v41  ;;  %v1442_v50 = vmul.f32 %v5231_v37, %v1310_v45  ;;  %v1441_v51 = vmul.f32 %v5231_v37, %v1309_v46  ;;  %v4261_v60 = vunpack.c.h.bf16 %v4462_v54  ;;  %v4485_v41 = vld [vmem:[#allocation7 + $0x140] sm:$0xff]  }
 0x113   : > { %1561 = vadd.xlane.f32.xlu1 %v1428_v62  ;;  %1557 = vadd.xlane.f32.xlu2 %v1426_v0  ;;  %v1308_v56 = vmax.f32 %v1180_v49, 0.0  ;;  %v1340_v58 = vmax.f32 %v1212_v52, 0.0  ;;  %v1339_v59 = vmax.f32 %v1211_v53, 0.0  ;;  %v4232_v61 = vunpack.c.l.bf16 %v4455_v55 }
 0x114   : > { %1553 = vadd.xlane.f32.xlu0 %v1424_v1  ;;  %v1143_v62 = vrot.slane %v5222_v31, 4  ;;  %v1196_v0 = vadd.f32 %v4257_v57, %v5253_v9  ;;  %v1198_v3 = vadd.f32 %v4261_v60, %v5253_v9  ;;  %v4321_v8 = vunpack.c.h.bf16 %v4477_v7  ;;  %v4456_v57 = vld [vmem:[#allocation7 + $0x58] sm:$0xff]  }
 0x115   : > { %v1440_v63 = vmul.f32 %v5231_v37, %v1308_v56  ;;  %v1472_v1 = vmul.f32 %v5231_v37, %v1340_v58  ;;  %v1471_v2 = vmul.f32 %v5231_v37, %v1339_v59  ;;  %v1183_v6 = vadd.f32 %v4232_v61, %v5263_v22  ;;  %v5314_v58 = vld [vmem:[#allocation7 + $0xd0] sm:$0xff]  }
 0x116   : > { %v1324_v5 = vmax.f32 %v1196_v0, 0.0  ;;  %v4260_v10 = vunpack.c.l.bf16 %v4462_v54  ;;  %v5288_v11 = vperm.slane %v1143_v62, 0  ;;  %v1326_v12 = vmax.f32 %v1198_v3, 0.0 }
 0x117   : > { %v1311_v13 = vmax.f32 %v1183_v6, 0.0  ;;  %v4292_v25 = vunpack.c.l.bf16 %v4470_v21  ;;  %v4264_v29 = vunpack.c.l.bf16 %v5296_v23  ;;  %v4233_v30 = vunpack.c.h.bf16 %v4455_v55 }
 0x118   : > { %v1456_v15 = vmul.f32 %v5231_v37, %v1324_v5  ;;  %v1228_v19 = vadd.f32 %v4321_v8, %v5288_v11  ;;  %v4352_v45 = vunpack.c.l.bf16 %v4485_v41  ;;  %v4293_v46 = vunpack.c.h.bf16 %v4470_v21 }
 0x119   : > { %v1443_v18 = vmul.f32 %v5231_v37, %v1311_v13  ;;  %v1199_v39 = vadd.f32 %v4264_v29, %v5253_v9  ;;  %v1184_v40 = vadd.f32 %v4233_v30, %v5263_v22  ;;  %v4353_v60 = vunpack.c.h.bf16 %v4485_v41 }
 0x11a   : > { %v1356_v26 = vmax.f32 %v1228_v19, 0.0  ;;  %v1214_v52 = vadd.f32 %v4293_v46, %v5272_v44  ;;  %v4296_v0 = vunpack.c.l.bf16 %v5314_v58  ;;  %v4325_v13 = vunpack.c.h.bf16 %v4478_v42 }
 0x11b   : > { %1565 = vadd.xlane.f32.xlu1 %v1430_v14  ;;  %1563 = vadd.xlane.f32.xlu2 %v1429_v16  ;;  %v4320_v14 = vunpack.c.l.bf16 %v4477_v7  ;;  %v1197_v16 = vadd.f32 %v4260_v10, %v5253_v9  ;;  %v1312_v49 = vmax.f32 %v1184_v40, 0.0  ;;  %v4493_v10 = vld [vmem:[#allocation7 + $0x180] sm:$0xff]  }
 0x11c   : > { %1569 = vadd.xlane.f32.xlu0 %v1432_v17  ;;  %v1458_v17 = vmul.f32 %v5231_v37, %v1326_v12  ;;  %v1342_v59 = vmax.f32 %v1214_v52, 0.0  ;;  %v1215_v8 = vadd.f32 %v4296_v0, %v5272_v44 }
 0x11d   : > { %v1227_v20 = vadd.f32 %v4320_v14, %v5288_v11  ;;  %v1325_v24 = vmax.f32 %v1197_v16, 0.0  ;;  %v1444_v54 = vmul.f32 %v5231_v37, %v1312_v49  ;;  %v4265_v14 = vunpack.c.h.bf16 %v5296_v23 }
 0x11f   : > { %v1355_v28 = vmax.f32 %v1227_v20, 0.0  ;;  %v1457_v33 = vmul.f32 %v5231_v37, %v1325_v24  ;;  %v1200_v20 = vadd.f32 %v4265_v14, %v5253_v9  ;;  %v5363_v14 = vld [vmem:[#allocation7 + $0x60] sm:$0xff]  }
 0x121   : > { %v1487_v38 = vmul.f32 %v5231_v37, %v1355_v28  ;;  %v4486_v28 = vld [vmem:[#allocation7 + $0x148] sm:$0xff]   ;;  %v1328_v23 = vmax.f32 %v1200_v20, 0.0 }
 0x122   : > { %v4356_v29 = vunpack.c.l.bf16 %v4486_v28 }
 0x123   : > { %1567 = vadd.xlane.f32.xlu1 %v1431_v32  ;;  %1571 = vadd.xlane.f32.xlu2 %v1433_v34  ;;  %v1144_v32 = vrot.slane %v5222_v31, 5  ;;  %v1213_v34 = vadd.f32 %v4292_v25, %v5272_v44  ;;  %v1230_v25 = vadd.f32 %v4325_v13, %v5288_v11  ;;  %v5361_v13 = vld [vmem:[#allocation7 + $0xd8] sm:$0xff]  }
 0x124   : > { %1615 = vadd.xlane.f32.xlu0 %v1455_v36  ;;  %v1488_v36 = vmul.f32 %v5231_v37, %v1356_v26 }
 0x125   : > { %v1341_v43 = vmax.f32 %v1213_v34, 0.0  ;;  %v5306_v47 = vperm.slane %v1144_v32, 0  ;;  %v1358_v30 = vmax.f32 %v1230_v25, 0.0  ;;  %v4237_v34 = vunpack.c.h.bf16 %v4456_v57 }
 0x127   : > { %v1243_v55 = vadd.f32 %v4352_v45, %v5306_v47  ;;  %v1244_v3 = vadd.f32 %v4353_v60, %v5306_v47  ;;  %v5341_v45 = vld [vmem:[#allocation7 + $0x110] sm:$0xff]   ;;  %v4494_v60 = vld [vmem:[#allocation7 + $0x188] sm:$0xff]  }
 0x128   : > { %v4328_v52 = vunpack.c.l.bf16 %v5341_v45 }
 0x129   : > { %v1371_v61 = vmax.f32 %v1243_v55, 0.0  ;;  %v1372_v12 = vmax.f32 %v1244_v3, 0.0 }
 0x12b   : > { %1583 = vadd.xlane.f32.xlu1 %v1439_v48  ;;  %1587 = vadd.xlane.f32.xlu2 %v1441_v51  ;;  %v1327_v48 = vmax.f32 %v1199_v39, 0.0  ;;  %v1473_v51 = vmul.f32 %v5231_v37, %v1341_v43  ;;  %v1503_v6 = vmul.f32 %v5231_v37, %v1371_v61  ;;  %v1504_v19 = vmul.f32 %v5231_v37, %v1372_v12  ;;  %v5339_v43 = vld [vmem:[#allocation7 + $0x98] sm:$0xff]   ;;  %v4501_v61 = vld [vmem:[#allocation7 + $0x1c0] sm:$0xff]  }
 0x12c   : > { %1589 = vadd.xlane.f32.xlu0 %v1442_v50  ;;  %v4324_v50 = vunpack.c.l.bf16 %v4478_v42  ;;  %v1490_v39 = vmul.f32 %v5231_v37, %v1358_v30  ;;  %v1186_v42 = vadd.f32 %v4237_v34, %v5263_v22  ;;  %v4416_v3 = vunpack.c.l.bf16 %v4501_v61 }
 0x12d   : > { %v1459_v53 = vmul.f32 %v5231_v37, %v1327_v48  ;;  %v4297_v48 = vunpack.c.h.bf16 %v5314_v58  ;;  %v1231_v58 = vadd.f32 %v4328_v52, %v5288_v11  ;;  %v4417_v20 = vunpack.c.h.bf16 %v4501_v61 }
 0x12e   : > { %v1229_v56 = vadd.f32 %v4324_v50, %v5288_v11  ;;  %v1314_v50 = vmax.f32 %v1186_v42, 0.0  ;;  %v4269_v30 = vunpack.c.h.bf16 %v5339_v43  ;;  %v4389_v34 = vunpack.c.h.bf16 %v4494_v60 }
 0x12f   : > { %v1216_v55 = vadd.f32 %v4297_v48, %v5272_v44  ;;  %v5376_v48 = vld [vmem:[#allocation7 + $0x150] sm:$0xff]  }
 0x130   : > { %v1357_v62 = vmax.f32 %v1229_v56, 0.0 }
 0x132   : > { %v1489_v7 = vmul.f32 %v5231_v37, %v1357_v62 }
 0x133   : > { %1585 = vadd.xlane.f32.xlu1 %v1440_v63  ;;  %1647 = vadd.xlane.f32.xlu2 %v1471_v2  ;;  %v4236_v63 = vunpack.c.l.bf16 %v4456_v57  ;;  %v1474_v2 = vmul.f32 %v5231_v37, %v1342_v59  ;;  %v1446_v57 = vmul.f32 %v5231_v37, %v1314_v50 }
 0x134   : > { %1649 = vadd.xlane.f32.xlu0 %v1472_v1  ;;  %v1145_v1 = vrot.slane %v5222_v31, 6 }
 0x135   : > { %v1185_v5 = vadd.f32 %v4236_v63, %v5263_v22  ;;  %v4388_v63 = vunpack.c.l.bf16 %v4494_v60  ;;  %v4241_v60 = vunpack.c.h.bf16 %v5363_v14 }
 0x137   : > { %v1313_v16 = vmax.f32 %v1185_v5, 0.0 }
 0x139   : > { %v1445_v21 = vmul.f32 %v5231_v37, %v1313_v16 }
 0x13b   : > { %1617 = vadd.xlane.f32.xlu1 %v1456_v15  ;;  %1591 = vadd.xlane.f32.xlu2 %v1443_v18  ;;  %v5325_v15 = vperm.slane %v1145_v1, 0  ;;  %v4384_v18 = vunpack.c.l.bf16 %v4493_v10  ;;  %v1359_v1 = vmax.f32 %v1231_v58, 0.0 }
 0x13c   : > { %1621 = vadd.xlane.f32.xlu0 %v1458_v17  ;;  %v1343_v17 = vmax.f32 %v1215_v8, 0.0 }
 0x13d   : > { %v1259_v26 = vadd.f32 %v4384_v18, %v5325_v15  ;;  %v1491_v8 = vmul.f32 %v5231_v37, %v1359_v1 }
 0x13e   : > { %v1475_v24 = vmul.f32 %v5231_v37, %v1343_v17  ;;  %v4300_v17 = vunpack.c.l.bf16 %v5361_v13 }
 0x13f   : > { %v1387_v32 = vmax.f32 %v1259_v26, 0.0 }
 0x140   : > { %v1217_v25 = vadd.f32 %v4300_v17, %v5272_v44 }
 0x141   : > { %v1519_v40 = vmul.f32 %v5231_v37, %v1387_v32  ;;  %v1807_v32 = vlaneseq }
 0x143   : > { %1619 = vadd.xlane.f32.xlu1 %v1457_v33  ;;  %1679 = vadd.xlane.f32.xlu2 %v1487_v38  ;;  %v4385_v33 = vunpack.c.h.bf16 %v4493_v10  ;;  %v1245_v38 = vadd.f32 %v4356_v29, %v5306_v47  ;;  %v5380_v50 = vand.u32 127, %v1807_v32 }
 0x144   : > { %1681 = vadd.xlane.f32.xlu0 %v1488_v36  ;;  %v1460_v36 = vmul.f32 %v5231_v37, %v1328_v23 }
 0x145   : > { %v1260_v41 = vadd.f32 %v4385_v33, %v5325_v15  ;;  %v1373_v46 = vmax.f32 %v1245_v38, 0.0  ;;  %v1345_v33 = vmax.f32 %v1217_v25, 0.0  ;;  %v5401_v1 = vadd.s32 4294967264, %v5380_v50 }
 0x146   : > { %v5421_v25 = vadd.s32 4294967240, %v5380_v50 }
 0x147   : > { %v1388_v49 = vmax.f32 %v1260_v41, 0.0 }
 0x149   : > { %v1520_v56 = vmul.f32 %v5231_v37, %v1388_v49  ;;  %v5378_v49 = vld [vmem:[#allocation7 + $0x1c8] sm:$0xff]  }
 0x14b   : > { %1651 = vadd.xlane.f32.xlu1 %v1473_v51  ;;  %1593 = vadd.xlane.f32.xlu2 %v1444_v54  ;;  %v4268_v51 = vunpack.c.l.bf16 %v5339_v43  ;;  %v1505_v54 = vmul.f32 %v5231_v37, %v1373_v46  ;;  %v1202_v46 = vadd.f32 %v4269_v30, %v5253_v9  ;;  %v1477_v43 = vmul.f32 %v5231_v37, %v1345_v33 }
 0x14c   : > { %1623 = vadd.xlane.f32.xlu0 %v1459_v53  ;;  %v1146_v53 = vrot.slane %v5222_v31, 7  ;;  %v1344_v31 = vmax.f32 %v1216_v55, 0.0  ;;  %v4301_v30 = vunpack.c.h.bf16 %v5361_v13 }
 0x14d   : > { %v1201_v59 = vadd.f32 %v4268_v51, %v5253_v9  ;;  %v1262_v51 = vadd.f32 %v4389_v34, %v5325_v15  ;;  %v1330_v55 = vmax.f32 %v1202_v46, 0.0 }
 0x14e   : > { %v5353_v62 = vperm.slane %v1146_v53, 0  ;;  %v1218_v13 = vadd.f32 %v4301_v30, %v5272_v44 }
 0x14f   : > { %v1329_v0 = vmax.f32 %v1201_v59, 0.0  ;;  %v5393_v59 = vadd.s32 4294967280, %v5380_v50  ;;  %v1390_v58 = vmax.f32 %v1262_v51, 0.0 }
 0x150   : > { %v1275_v12 = vadd.f32 %v4416_v3, %v5353_v62  ;;  %v1276_v23 = vadd.f32 %v4417_v20, %v5353_v62  ;;  %v5416_v20 = vld [vmem:[#allocation7 + $0x118] sm:$0xff]  }
 0x151   : > { %v1461_v5 = vmul.f32 %v5231_v37, %v1329_v0  ;;  %v4332_v34 = vunpack.c.l.bf16 %v5416_v20 }
 0x152   : > { %v1404_v38 = vmax.f32 %v1276_v23, 0.0 }
 0x153   : > { %1653 = vadd.xlane.f32.xlu1 %v1474_v2  ;;  %1683 = vadd.xlane.f32.xlu2 %v1489_v7  ;;  %v4357_v2 = vunpack.c.h.bf16 %v4486_v28  ;;  %v1261_v7 = vadd.f32 %v4388_v63, %v5325_v15 }
 0x154   : > { %1711 = vadd.xlane.f32.xlu0 %v1503_v6  ;;  %v1476_v6 = vmul.f32 %v5231_v37, %v1344_v31  ;;  %v1536_v52 = vmul.f32 %v5231_v37, %v1404_v38  ;;  %v5397_v31 = vadd.s32 4294967272, %v5380_v50 }
 0x155   : > { %v1246_v10 = vadd.f32 %v4357_v2, %v5306_v47  ;;  %v1389_v16 = vmax.f32 %v1261_v7, 0.0 }
 0x157   : > { %v1374_v18 = vmax.f32 %v1246_v10, 0.0 }
 0x159   : > { %v1506_v26 = vmul.f32 %v5231_v37, %v1374_v18 }
 0x15b   : > { %1713 = vadd.xlane.f32.xlu1 %v1504_v19  ;;  %1655 = vadd.xlane.f32.xlu2 %v1475_v24  ;;  %v1403_v19 = vmax.f32 %v1275_v12, 0.0  ;;  %v1521_v24 = vmul.f32 %v5231_v37, %v1389_v16  ;;  %v1188_v16 = vadd.f32 %v4241_v60, %v5263_v22 }
 0x15c   : > { %1595 = vadd.xlane.f32.xlu0 %v1445_v21  ;;  %v4240_v21 = vunpack.c.l.bf16 %v5363_v14  ;;  %v1522_v14 = vmul.f32 %v5231_v37, %v1390_v58  ;;  %v5445_v58 = vadd.s32 4294967232, %v5380_v50 }
 0x15d   : > { %v1535_v28 = vmul.f32 %v5231_v37, %v1403_v19  ;;  %v1316_v33 = vmax.f32 %v1188_v16, 0.0 }
 0x15e   : > { %v1187_v29 = vadd.f32 %v4240_v21, %v5263_v22 }
 0x163   : > { %1625 = vadd.xlane.f32.xlu1 %v1460_v36  ;;  %1743 = vadd.xlane.f32.xlu2 %v1519_v40  ;;  %v4329_v40 = vunpack.c.h.bf16 %v5341_v45 }
 0x164   : > { %1685 = vadd.xlane.f32.xlu0 %v1490_v39  ;;  %v1315_v39 = vmax.f32 %v1187_v29, 0.0  ;;  %v5428_v29 = vadd.s32 4294967248, %v5380_v50 }
 0x165   : > { %v1232_v45 = vadd.f32 %v4329_v40, %v5288_v11 }
 0x166   : > { %v1447_v53 = vmul.f32 %v5231_v37, %v1315_v39 }
 0x167   : > { %v1360_v63 = vmax.f32 %v1232_v45, 0.0 }
 0x169   : > { %v1492_v19 = vmul.f32 %v5231_v37, %v1360_v63  ;;  %v5451_v63 = vadd.s32 4294967224, %v5380_v50 }
 0x16b   : > { %1715 = vadd.xlane.f32.xlu1 %v1505_v54  ;;  %1597 = vadd.xlane.f32.xlu2 %v1446_v57  ;;  %v4360_v54 = vunpack.c.l.bf16 %v5376_v48  ;;  %v5390_v57 = vadd.s32 4294967288, %v5380_v50 }
 0x16c   : > { %1745 = vadd.xlane.f32.xlu0 %v1520_v56  ;;  %v4420_v56 = vunpack.c.l.bf16 %v5378_v49 }
 0x16d   : > { %v1247_v0 = vadd.f32 %v4360_v54, %v5306_v47 }
 0x16e   : > { %v1277_v7 = vadd.f32 %v4420_v56, %v5353_v62 }
 0x16f   : > { %v1375_v39 = vmax.f32 %v1247_v0, 0.0  ;;  %v1346_v0 = vmax.f32 %v1218_v13, 0.0 }
 0x170   : > { %v1405_v40 = vmax.f32 %v1277_v7, 0.0 }
 0x171   : > { %v1507_v54 = vmul.f32 %v5231_v37, %v1375_v39 }
 0x173   : > { %1657 = vadd.xlane.f32.xlu1 %v1476_v6  ;;  %1687 = vadd.xlane.f32.xlu2 %v1491_v8  ;;  %v1462_v6 = vmul.f32 %v5231_v37, %v1330_v55  ;;  %v5407_v8 = vadd.s32 4294967256, %v5380_v50  ;;  %v1537_v55 = vmul.f32 %v5231_v37, %v1405_v40 }
 0x174   : > { %1627 = vadd.xlane.f32.xlu0 %v1461_v5 }
 0x17b   : > { %1747 = vadd.xlane.f32.xlu1 %v1521_v24  ;;  %1775 = vadd.xlane.f32.xlu2 %v1535_v28 }
 0x17c   : > { %1717 = vadd.xlane.f32.xlu0 %v1506_v26  ;;  %v5423_v26 = vld [vmem:[#allocation7 + $0xa0] sm:$0xff]  }
 0x17d   : > { %v4273_v40 = vunpack.c.h.bf16 %v5423_v26 }
 0x17e   : > { %v1560_v36 = vpop.xlane.xlu1 %1559  ;;  %v1556_v41 = vpop.xlane.xlu2 %1555 }
 0x17f   : > { %v1552_v42 = vpop.xlane.xlu0 %1551  ;;  %v1944_v12 = vperm.slane %v1556_v41, %v5393_v59  ;;  %v1952_v21 = vperm.slane %v1560_v36, %v5401_v1  ;;  %v4272_v41 = vunpack.c.l.bf16 %v5423_v26  ;;  %v5488_v26 = vld [vmem:[#allocation7 + $0x158] sm:$0xff]  }
 0x180   : > { %v1938_v5 = vperm.slane %v1552_v42, %v5380_v50 }
 0x181   : > { %v1203_v56 = vadd.f32 %v4272_v41, %v5253_v9 }
 0x183   : > { %1659 = vadd.xlane.f32.xlu1 %v1477_v43  ;;  %1599 = vadd.xlane.f32.xlu2 %v1447_v53  ;;  %v1233_v53 = vadd.f32 %v4332_v34, %v5288_v11 }
 0x184   : > { %1777 = vadd.xlane.f32.xlu0 %v1536_v52  ;;  %v1448_v52 = vmul.f32 %v5231_v37, %v1316_v33 }
 0x186   : > { %v1562_v61 = vpop.xlane.xlu1 %1561  ;;  %v1558_v2 = vpop.xlane.xlu2 %1557 }
 0x187   : > { %v1554_v3 = vpop.xlane.xlu0 %1553  ;;  %v1948_v17 = vperm.slane %v1558_v2, %v5397_v31  ;;  %v1956_v28 = vperm.slane %v1562_v61, %v5407_v8  ;;  %v5448_v61 = vld [vmem:[#allocation7 + $0x190] sm:$0xff]   ;;  %v5454_v2 = vadd.s32 4294967216, %v5380_v50 }
 0x188   : > { %v1940_v10 = vperm.slane %v1554_v3, %v5390_v57  ;;  %v1361_v3 = vmax.f32 %v1233_v53, 0.0 }
 0x18a   : > { %v1942_v18 = vsel %vm1941_vm0, %v1940_v10, %v1938_v5  ;;  %v1331_v5 = vmax.f32 %v1203_v56, 0.0  ;;  %v4392_v10 = vunpack.c.l.bf16 %v5448_v61 }
 0x18b   : > { %v1946_v24 = vsel %vm1945_vm1, %v1944_v12, %v1942_v18  ;;  %1749 = vadd.xlane.f32.xlu1 %v1522_v14  ;;  %1689 = vadd.xlane.f32.xlu2 %v1492_v19  ;;  %v4361_v12 = vunpack.c.h.bf16 %v5376_v48  ;;  %v1478_v19 = vmul.f32 %v5231_v37, %v1346_v0  ;;  %v5468_v48 = vld [vmem:[#allocation7 + $0x68] sm:$0xff]  }
 0x18c   : > { %v1950_v23 = vsel %vm1949_vm2, %v1948_v17, %v1946_v24  ;;  %1629 = vadd.xlane.f32.xlu0 %v1462_v6  ;;  %v4421_v6 = vunpack.c.h.bf16 %v5378_v49  ;;  %v1493_v24 = vmul.f32 %v5231_v37, %v1361_v3  ;;  %v1463_v30 = vmul.f32 %v5231_v37, %v1331_v5 }
 0x18d   : > { %v1954_v32 = vsel %vm1953_vm3, %v1952_v21, %v1950_v23  ;;  %v1248_v33 = vadd.f32 %v4361_v12, %v5306_v47 }
 0x18e   : > { %v1566_v36 = vpop.xlane.xlu1 %1565  ;;  %v1958_v38 = vsel %vm1957_vm4, %v1956_v28, %v1954_v32  ;;  %v1564_v46 = vpop.xlane.xlu2 %1563  ;;  %v1278_v28 = vadd.f32 %v4421_v6, %v5353_v62  ;;  %v1263_v32 = vadd.f32 %v4392_v10, %v5325_v15  ;;  %v4364_v6 = vunpack.c.l.bf16 %v5488_v26 }
 0x18f   : > { %v1964_v42 = vperm.slane %v1566_v36, %v5421_v25  ;;  %v1570_v43 = vpop.xlane.xlu0 %1569  ;;  %v1960_v51 = vperm.slane %v1564_v46, %v5428_v29  ;;  %v5477_v36 = vld [vmem:[#allocation7 + $0xe0] sm:$0xff]   ;;  %v1376_v46 = vmax.f32 %v1248_v33, 0.0  ;;  %v4393_v10 = vunpack.c.h.bf16 %v5448_v61 }
 0x190   : > { %v1972_v18 = vperm.slane %v1570_v43, %v5451_v63  ;;  %v1406_v39 = vmax.f32 %v1278_v28, 0.0  ;;  %v4304_v43 = vunpack.c.l.bf16 %v5477_v36 }
 0x191   : > { %v1962_v45 = vsel %vm1961_vm5, %v1960_v51, %v1958_v38  ;;  %v4244_v38 = vunpack.c.l.bf16 %v5468_v48 }
 0x192   : > { %v1966_v60 = vsel %vm1965_vm6, %v1964_v42, %v1962_v45  ;;  %v1391_v42 = vmax.f32 %v1263_v32, 0.0  ;;  %v1538_v53 = vmul.f32 %v5231_v37, %v1406_v39  ;;  %v1204_v45 = vadd.f32 %v4273_v40, %v5253_v9 }
 0x193   : > { %1601 = vadd.xlane.f32.xlu1 %v1448_v52  ;;  %1779 = vadd.xlane.f32.xlu2 %v1537_v55  ;;  %v1189_v52 = vadd.f32 %v4244_v38, %v5263_v22  ;;  %v1508_v55 = vmul.f32 %v5231_v37, %v1376_v46  ;;  %v1219_v56 = vadd.f32 %v4304_v43, %v5272_v44  ;;  %v4213_v43 = vunpack.c.h.bf16 %v5248_v4 }
 0x194   : > { %1719 = vadd.xlane.f32.xlu0 %v1507_v54  ;;  %v1523_v54 = vmul.f32 %v5231_v37, %v1391_v42  ;;  %v1332_v3 = vmax.f32 %v1204_v45, 0.0  ;;  %v1264_v39 = vadd.f32 %v4393_v10, %v5325_v15 }
 0x195   : > { %v1317_v0 = vmax.f32 %v1189_v52, 0.0  ;;  %v1347_v5 = vmax.f32 %v1219_v56, 0.0 }
 0x196   : > { %v1568_v7 = vpop.xlane.xlu1 %1567  ;;  %v1572_v16 = vpop.xlane.xlu2 %1571 }
 0x197   : > { %v1968_v14 = vperm.slane %v1568_v7, %v5445_v58  ;;  %v5460_v17 = vpop.xlane.xlu0 %1615  ;;  %v1976_v21 = vperm.slane %v1572_v16, %v5454_v2  ;;  %v1479_v38 = vmul.f32 %v5231_v37, %v1347_v5 }
 0x198   : > { %v2030_v45 = vperm.slane %v5460_v17, %v5380_v50 }
 0x199   : > { %v1970_v49 = vsel %vm1969_vm7, %v1968_v14, %v1966_v60  ;;  %v4333_v60 = vunpack.c.h.bf16 %v5416_v20 }
 0x19a   : > { %v1974_v23 = vsel %vm1973_vm8, %v1972_v18, %v1970_v49 }
 0x19b   : > { %v5475_v34 = vsel %vm1977_vm9, %v1976_v21, %v1974_v23  ;;  %1691 = vadd.xlane.f32.xlu1 %v1493_v24  ;;  %1631 = vadd.xlane.f32.xlu2 %v1463_v30  ;;  %v1449_v24 = vmul.f32 %v5231_v37, %v1317_v0  ;;  %v1464_v23 = vmul.f32 %v5231_v37, %v1332_v3 }
 0x19c   : > { %1661 = vadd.xlane.f32.xlu0 %v1478_v19  ;;  %v1234_v19 = vadd.f32 %v4333_v60, %v5288_v11  ;;  %v1249_v30 = vadd.f32 %v4364_v6, %v5306_v47  ;;  %v1174_v6 = vadd.f32 %v4213_v43, %v5225_v35 }
 0x19e   : > { %v1584_v41 = vpop.xlane.xlu1 %1583  ;;  %v1588_v13 = vpop.xlane.xlu2 %1587  ;;  %v1362_v42 = vmax.f32 %v1234_v19, 0.0  ;;  %v1377_v46 = vmax.f32 %v1249_v30, 0.0  ;;  %v4305_v19 = vunpack.c.h.bf16 %v5477_v36 }
 0x19f   : > { %v1590_v51 = vpop.xlane.xlu0 %1589  ;;  %v1999_v12 = vperm.slane %v1584_v41, %v5380_v50  ;;  %v2002_v20 = vperm.slane %v1588_v13, %v5393_v59  ;;  %v5511_v41 = vld [vmem:[#allocation7 + $0x1d0] sm:$0xff]   ;;  %v1392_v13 = vmax.f32 %v1264_v39, 0.0 }
 0x1a0   : > { %v2004_v28 = vperm.slane %v1590_v51, %v5397_v31  ;;  %v4424_v52 = vunpack.c.l.bf16 %v5511_v41  ;;  %v1494_v3 = vmul.f32 %v5231_v37, %v1362_v42  ;;  %v1509_v4 = vmul.f32 %v5231_v37, %v1377_v46 }
 0x1a1   : > { %v1524_v17 = vmul.f32 %v5231_v37, %v1392_v13  ;;  %v1220_v42 = vadd.f32 %v4305_v19, %v5272_v44 }
 0x1a2   : > { %v1279_v5 = vadd.f32 %v4424_v52, %v5353_v62  ;;  %v5548_v52 = vld [vmem:[#allocation7 + $0x198] sm:$0xff]  }
 0x1a3   : > { %1781 = vadd.xlane.f32.xlu1 %v1538_v53  ;;  %1721 = vadd.xlane.f32.xlu2 %v1508_v55  ;;  %v4245_v53 = vunpack.c.h.bf16 %v5468_v48 }
 0x1a4   : > { %1751 = vadd.xlane.f32.xlu0 %v1523_v54 }
 0x1a5   : > { %v1190_v10 = vadd.f32 %v4245_v53, %v5263_v22 }
 0x1a6   : > { %v1586_v7 = vpop.xlane.xlu1 %1585  ;;  %v1648_v16 = vpop.xlane.xlu2 %1647 }
 0x1a7   : > { %v1650_v14 = vpop.xlane.xlu0 %1649  ;;  %v2000_v18 = vperm.slane %v1586_v7, %v5390_v57  ;;  %v2061_v21 = vperm.slane %v1648_v16, %v5380_v50  ;;  %v5524_v7 = vld [vmem:[#allocation7 + $0xa8] sm:$0xff]   ;;  %v1302_v16 = vmax.f32 %v1174_v6, 0.0 }
 0x1a8   : > { %v2062_v49 = vperm.slane %v1650_v14, %v5390_v57  ;;  %v4276_v14 = vunpack.c.l.bf16 %v5524_v7 }
 0x1a9   : > { %v2001_v61 = vsel %vm1941_vm0, %v2000_v18, %v1999_v12  ;;  %v5530_v12 = vld [vmem:[#allocation7 + $0x120] sm:$0xff]  }
 0x1aa   : > { %v5505_v32 = vsel %vm1941_vm0, %v2062_v49, %v2061_v21  ;;  %v2003_v33 = vsel %vm1945_vm1, %v2002_v20, %v2001_v61  ;;  %v4336_v18 = vunpack.c.l.bf16 %v5530_v12  ;;  %v1407_v49 = vmax.f32 %v1279_v5, 0.0 }
 0x1ab   : > { %1633 = vadd.xlane.f32.xlu1 %v1464_v23  ;;  %v2005_v40 = vsel %vm1949_vm2, %v2004_v28, %v2003_v33  ;;  %1663 = vadd.xlane.f32.xlu2 %v1479_v38  ;;  %v1318_v21 = vmax.f32 %v1190_v10, 0.0  ;;  %v1205_v38 = vadd.f32 %v4276_v14, %v5253_v9 }
 0x1ac   : > { %1603 = vadd.xlane.f32.xlu0 %v1449_v24  ;;  %v1235_v36 = vadd.f32 %v4336_v18, %v5288_v11  ;;  %v1539_v43 = vmul.f32 %v5231_v37, %v1407_v49 }
 0x1ad   : > { %v1333_v53 = vmax.f32 %v1205_v38, 0.0 }
 0x1ae   : > { %v1618_v51 = vpop.xlane.xlu1 %1617  ;;  %v1592_v55 = vpop.xlane.xlu2 %1591 }
 0x1af   : > { %v1622_v54 = vpop.xlane.xlu0 %1621  ;;  %v2031_v56 = vperm.slane %v1618_v51, %v5390_v57  ;;  %v2006_v60 = vperm.slane %v1592_v55, %v5401_v1  ;;  %v1450_v51 = vmul.f32 %v5231_v37, %v1318_v21  ;;  %v4396_v55 = vunpack.c.l.bf16 %v5548_v52  ;;  %v5568_v21 = vld [vmem:[#allocation7 + $0x30] sm:$0xff]  }
 0x1b0   : > { %v2035_v23 = vperm.slane %v1622_v54, %v5397_v31  ;;  %v1348_v54 = vmax.f32 %v1220_v42, 0.0  ;;  %v1465_v10 = vmul.f32 %v5231_v37, %v1333_v53  ;;  %v5581_v42 = vld [vmem:[%s6167_s7] ss:$0 sm:$0xff] }
 0x1b1   : > { %v2032_v0 = vsel %vm1941_vm0, %v2031_v56, %v2030_v45  ;;  %v2007_v48 = vsel %vm1953_vm3, %v2006_v60, %v2005_v40  ;;  %v1434_v40 = vmul.f32 %v5231_v37, %v1302_v16  ;;  %v1363_v45 = vmax.f32 %v1235_v36, 0.0 }
 0x1b2   : > { %v4365_v60 = vunpack.c.h.bf16 %v5488_v26  ;;  %v1480_v18 = vmul.f32 %v5231_v37, %v1348_v54  ;;  %v1265_v26 = vadd.f32 %v4396_v55, %v5325_v15 }
 0x1b3   : > { %1723 = vadd.xlane.f32.xlu1 %v1509_v4  ;;  %1753 = vadd.xlane.f32.xlu2 %v1524_v17  ;;  %v1495_v16 = vmul.f32 %v5231_v37, %v1363_v45  ;;  %v4216_v37 = vunpack.c.l.bf16 %v5568_v21 }
 0x1b4   : > { %1693 = vadd.xlane.f32.xlu0 %v1494_v3 }
 0x1b6   : > { %v1620_v20 = vpop.xlane.xlu1 %1619  ;;  %v1680_v28 = vpop.xlane.xlu2 %1679 }
 0x1b7   : > { %v1682_v24 = vpop.xlane.xlu0 %1681  ;;  %v2033_v61 = vperm.slane %v1620_v20, %v5393_v59  ;;  %v2092_v33 = vperm.slane %v1680_v28, %v5380_v50  ;;  %v1250_v20 = vadd.f32 %v4365_v60, %v5306_v47 }
 0x1b8   : > { %v2093_v30 = vperm.slane %v1682_v24, %v5390_v57  ;;  %v5570_v24 = vld [vmem:[#allocation7 + $0x70] sm:$0xff]  }
 0x1b9   : > { %v2034_v39 = vsel %vm1945_vm1, %v2033_v61, %v2032_v0  ;;  %v4425_v0 = vunpack.c.h.bf16 %v5511_v41  ;;  %v4248_v28 = vunpack.c.l.bf16 %v5570_v24 }
 0x1ba   : > { %v2094_v46 = vsel %vm1941_vm0, %v2093_v30, %v2092_v33  ;;  %v2036_v13 = vsel %vm1949_vm2, %v2035_v23, %v2034_v39  ;;  %v1378_v23 = vmax.f32 %v1250_v20, 0.0 }
 0x1bb   : > { %1573 = vadd.xlane.f32.xlu1 %v1434_v40  ;;  %1605 = vadd.xlane.f32.xlu2 %v1450_v51  ;;  %v1280_v49 = vadd.f32 %v4425_v0, %v5353_v62  ;;  %v1175_v51 = vadd.f32 %v4216_v37, %v5225_v35 }
 0x1bc   : > { %1783 = vadd.xlane.f32.xlu0 %v1539_v43  ;;  %v1510_v45 = vmul.f32 %v5581_v42, %v1378_v23 }
 0x1bd   : > { %v1408_v30 = vmax.f32 %v1280_v49, 0.0 }
 0x1be   : > { %v1652_v56 = vpop.xlane.xlu1 %1651  ;;  %v1594_v4 = vpop.xlane.xlu2 %1593 }
 0x1bf   : > { %v1624_v3 = vpop.xlane.xlu0 %1623  ;;  %v2064_v6 = vperm.slane %v1652_v56, %v5393_v59  ;;  %v2008_v5 = vperm.slane %v1594_v4, %v5407_v8  ;;  %v1540_v54 = vmul.f32 %v5581_v42, %v1408_v30  ;;  %v5592_v56 = vld [vmem:[#allocation7 + $0x160] sm:$0xff]   ;;  %v4337_v4 = vunpack.c.h.bf16 %v5530_v12 }
 0x1c0   : > { %v2037_v17 = vperm.slane %v1624_v3, %v5401_v1  ;;  %v4368_v3 = vunpack.c.l.bf16 %v5592_v56 }
 0x1c1   : > { %v2065_v14 = vsel %vm1945_vm1, %v2064_v6, %v5505_v32  ;;  %v2009_v19 = vsel %vm1957_vm4, %v2008_v5, %v2007_v48  ;;  %v1393_v32 = vmax.f32 %v1265_v26, 0.0  ;;  %v4277_v48 = vunpack.c.h.bf16 %v5524_v7  ;;  %v5586_v7 = vld [vmem:[#allocation7 + $0xe8] sm:$0xff]  }
 0x1c2   : > { %v5563_v41 = vsel %vm1953_vm3, %v2037_v17, %v2036_v13  ;;  %v1191_v13 = vadd.f32 %v4248_v28, %v5263_v22  ;;  %v4308_v60 = vunpack.c.l.bf16 %v5586_v7  ;;  %v1251_v12 = vadd.f32 %v4368_v3, %v5306_v47 }
 0x1c3   : > { %1665 = vadd.xlane.f32.xlu1 %v1480_v18  ;;  %1695 = vadd.xlane.f32.xlu2 %v1495_v16  ;;  %v1525_v43 = vmul.f32 %v5581_v42, %v1393_v32  ;;  %v1206_v55 = vadd.f32 %v4277_v48, %v5253_v9  ;;  %v1236_v37 = vadd.f32 %v4337_v4, %v5288_v11  ;;  %v5612_v48 = vld [vmem:[#allocation7 + $0x1d8] sm:$0xff]  }
 0x1c4   : > { %1635 = vadd.xlane.f32.xlu0 %v1465_v10  ;;  %v1319_v0 = vmax.f32 %v1191_v13, 0.0  ;;  %v1221_v20 = vadd.f32 %v4308_v60, %v5272_v44 }
 0x1c5   : > { %v1334_v17 = vmax.f32 %v1206_v55, 0.0 }
 0x1c6   : > { %v1654_v61 = vpop.xlane.xlu1 %1653  ;;  %v1684_v38 = vpop.xlane.xlu2 %1683  ;;  %v1451_v32 = vmul.f32 %v5581_v42, %v1319_v0 }
 0x1c7   : > { %v1712_v33 = vpop.xlane.xlu0 %1711  ;;  %v2066_v39 = vperm.slane %v1654_v61, %v5397_v31  ;;  %v2095_v40 = vperm.slane %v1684_v38, %v5393_v59  ;;  %v1466_v30 = vmul.f32 %v5581_v42, %v1334_v17  ;;  %v1364_v38 = vmax.f32 %v1236_v37, 0.0 }
 0x1c8   : > { %v2123_v5 = vperm.slane %v1712_v33, %v5380_v50  ;;  %v1349_v33 = vmax.f32 %v1221_v20, 0.0 }
 0x1c9   : > { %v2067_v36 = vsel %vm1949_vm2, %v2066_v39, %v2065_v14  ;;  %v2096_v53 = vsel %vm1945_vm1, %v2095_v40, %v2094_v46  ;;  %v1303_v46 = vmax.f32 %v1175_v51, 0.0  ;;  %v4428_v39 = vunpack.c.l.bf16 %v5612_v48 }
 0x1ca   : > { %v1481_v60 = vmul.f32 %v5581_v42, %v1349_v33  ;;  %v1496_v0 = vmul.f32 %v5581_v42, %v1364_v38  ;;  %v5642_v38 = vld [vmem:[#allocation7 + $0x128] sm:$0xff]  }
 0x1cb   : > { %1755 = vadd.xlane.f32.xlu1 %v1525_v43  ;;  %1785 = vadd.xlane.f32.xlu2 %v1540_v54  ;;  %v1435_v23 = vmul.f32 %v5581_v42, %v1303_v46  ;;  %v1379_v43 = vmax.f32 %v1251_v12, 0.0  ;;  %v1281_v3 = vadd.f32 %v4428_v39, %v5353_v62  ;;  %v5628_v46 = vld [vmem:[#allocation7 + $0xb0] sm:$0xff]  }
 0x1cc   : > { %1725 = vadd.xlane.f32.xlu0 %v1510_v45 }
 0x1cd   : > { %v1409_v17 = vmax.f32 %v1281_v3, 0.0 }
 0x1ce   : > { %v1714_v6 = vpop.xlane.xlu1 %1713  ;;  %v1656_v14 = vpop.xlane.xlu2 %1655 }
 0x1cf   : > { %v1596_v10 = vpop.xlane.xlu0 %1595  ;;  %v2124_v16 = vperm.slane %v1714_v6, %v5390_v57  ;;  %v2068_v26 = vperm.slane %v1656_v14, %v5401_v1 }
 0x1d0   : > { %v2010_v18 = vperm.slane %v1596_v10, %v5428_v29  ;;  %v4280_v10 = vunpack.c.l.bf16 %v5628_v46 }
 0x1d1   : > { %v2125_v49 = vsel %vm1941_vm0, %v2124_v16, %v2123_v5  ;;  %v5608_v61 = vsel %vm1953_vm3, %v2068_v26, %v2067_v36  ;;  %v4217_v36 = vunpack.c.h.bf16 %v5568_v21  ;;  %v4309_v5 = vunpack.c.h.bf16 %v5586_v7 }
 0x1d2   : > { %v2011_v28 = vsel %vm1961_vm5, %v2010_v18, %v2009_v19  ;;  %v4397_v19 = vunpack.c.h.bf16 %v5548_v52  ;;  %v1511_v52 = vmul.f32 %v5581_v42, %v1379_v43  ;;  %v1541_v7 = vmul.f32 %v5581_v42, %v1409_v17 }
 0x1d3   : > { %1607 = vadd.xlane.f32.xlu1 %v1451_v32  ;;  %1637 = vadd.xlane.f32.xlu2 %v1466_v30  ;;  %v1176_v6 = vadd.f32 %v4217_v36, %v5225_v35  ;;  %v1222_v30 = vadd.f32 %v4309_v5, %v5272_v44  ;;  %v1207_v33 = vadd.f32 %v4280_v10, %v5253_v9  ;;  %v5650_v36 = vld [vmem:[#allocation7 + $0x1a0] sm:$0xff]  }
 0x1d4   : > { %1575 = vadd.xlane.f32.xlu0 %v1435_v23  ;;  %v1266_v21 = vadd.f32 %v4397_v19, %v5325_v15 }
 0x1d5   : > { %v1304_v16 = vmax.f32 %v1176_v6, 0.0 }
 0x1d6   : > { %v1626_v40 = vpop.xlane.xlu1 %1625  ;;  %v1744_v13 = vpop.xlane.xlu2 %1743 }
 0x1d7   : > { %v1686_v51 = vpop.xlane.xlu0 %1685  ;;  %v2039_v45 = vperm.slane %v1626_v40, %v5407_v8  ;;  %v2154_v32 = vperm.slane %v1744_v13, %v5380_v50  ;;  %v1436_v19 = vmul.f32 %v5581_v42, %v1304_v16  ;;  %v1335_v13 = vmax.f32 %v1207_v33, 0.0 }
 0x1d8   : > { %v2097_v54 = vperm.slane %v1686_v51, %v5397_v31 }
 0x1d9   : > { %v2040_v55 = vsel %vm1957_vm4, %v2039_v45, %v5563_v41  ;;  %v4249_v41 = vunpack.c.h.bf16 %v5570_v24  ;;  %v4369_v45 = vunpack.c.h.bf16 %v5592_v56  ;;  %v1467_v56 = vmul.f32 %v5581_v42, %v1335_v13 }
 0x1da   : > { %v2098_v4 = vsel %vm1949_vm2, %v2097_v54, %v2096_v53  ;;  %v1394_v53 = vmax.f32 %v1266_v21, 0.0 }
 0x1db   : > { %1697 = vadd.xlane.f32.xlu1 %v1496_v0  ;;  %1727 = vadd.xlane.f32.xlu2 %v1511_v52  ;;  %v1192_v24 = vadd.f32 %v4249_v41, %v5263_v22  ;;  %v1252_v10 = vadd.f32 %v4369_v45, %v5306_v47 }
 0x1dc   : > { %1667 = vadd.xlane.f32.xlu0 %v1481_v60  ;;  %v1526_v43 = vmul.f32 %v5581_v42, %v1394_v53  ;;  %v1350_v60 = vmax.f32 %v1222_v30, 0.0 }
 0x1dd   : > { %v1320_v51 = vmax.f32 %v1192_v24, 0.0 }
 0x1de   : > { %v1716_v14 = vpop.xlane.xlu1 %1715  ;;  %v1598_v26 = vpop.xlane.xlu2 %1597  ;;  %v1482_v16 = vmul.f32 %v5581_v42, %v1350_v60 }
 0x1df   : > { %v1746_v18 = vpop.xlane.xlu0 %1745  ;;  %v2126_v20 = vperm.slane %v1716_v14, %v5393_v59  ;;  %v2012_v37 = vperm.slane %v1598_v26, %v5421_v25  ;;  %v1452_v5 = vmul.f32 %v5581_v42, %v1320_v51  ;;  %v5672_v26 = vld [vmem:[#allocation7 + $0x38] sm:$0xff]  }
 0x1e0   : > { %v2155_v12 = vperm.slane %v1746_v18, %v5390_v57 }
 0x1e1   : > { %v2127_v23 = vsel %vm1945_vm1, %v2126_v20, %v2125_v49  ;;  %v5646_v40 = vsel %vm1965_vm6, %v2012_v37, %v2011_v28  ;;  %v4340_v49 = vunpack.c.l.bf16 %v5642_v38  ;;  %v4400_v28 = vunpack.c.l.bf16 %v5650_v36 }
 0x1e2   : > { %v2156_v39 = vsel %vm1941_vm0, %v2155_v12, %v2154_v32  ;;  %v1380_v32 = vmax.f32 %v1252_v10, 0.0  ;;  %v4220_v12 = vunpack.c.l.bf16 %v5672_v26 }
 0x1e3   : > { %1787 = vadd.xlane.f32.xlu1 %v1541_v7  ;;  %1577 = vadd.xlane.f32.xlu2 %v1436_v19  ;;  %v1237_v41 = vadd.f32 %v4340_v49, %v5288_v11  ;;  %v1267_v18 = vadd.f32 %v4400_v28, %v5325_v15  ;;  %v5691_v28 = vld [vmem:[#allocation7 + $0xf0] sm:$0xff]  }
 0x1e4   : > { %1757 = vadd.xlane.f32.xlu0 %v1526_v43  ;;  %v1512_v51 = vmul.f32 %v5581_v42, %v1380_v32  ;;  %v1177_v13 = vadd.f32 %v4220_v12, %v5225_v35 }
 0x1e5   : > { %v1365_v20 = vmax.f32 %v1237_v41, 0.0  ;;  %v1395_v37 = vmax.f32 %v1267_v18, 0.0 }
 0x1e6   : > { %v1658_v54 = vpop.xlane.xlu1 %1657  ;;  %v1688_v3 = vpop.xlane.xlu2 %1687 }
 0x1e7   : > { %v1628_v0 = vpop.xlane.xlu0 %1627  ;;  %v2070_v52 = vperm.slane %v1658_v54, %v5407_v8  ;;  %v2099_v6 = vperm.slane %v1688_v3, %v5401_v1  ;;  %v1497_v49 = vmul.f32 %v5581_v42, %v1365_v20  ;;  %v4341_v3 = vunpack.c.h.bf16 %v5642_v38 }
 0x1e8   : > { %v2041_v21 = vperm.slane %v1628_v0, %v5428_v29  ;;  %v1305_v0 = vmax.f32 %v1177_v13, 0.0 }
 0x1e9   : > { %v2071_v17 = vsel %vm1957_vm4, %v2070_v52, %v5608_v61  ;;  %v5668_v53 = vsel %vm1953_vm3, %v2099_v6, %v2098_v4  ;;  %v5674_v61 = vld [vmem:[#allocation7 + $0x78] sm:$0xff]   ;;  %v4429_v4 = vunpack.c.h.bf16 %v5612_v48  ;;  %v1527_v48 = vmul.f32 %v5581_v42, %v1395_v37 }
 0x1ea   : > { %v5665_v14 = vsel %vm1961_vm5, %v2041_v21, %v2040_v55  ;;  %v4252_v24 = vunpack.c.l.bf16 %v5674_v61  ;;  %v4312_v52 = vunpack.c.l.bf16 %v5691_v28  ;;  %v1437_v38 = vmul.f32 %v5581_v42, %v1305_v0 }
 0x1eb   : > { %1639 = vadd.xlane.f32.xlu1 %v1467_v56  ;;  %1669 = vadd.xlane.f32.xlu2 %v1482_v16  ;;  %v1282_v54 = vadd.f32 %v4429_v4, %v5353_v62  ;;  %v1238_v32 = vadd.f32 %v4341_v3, %v5288_v11 }
 0x1ec   : > { %1609 = vadd.xlane.f32.xlu0 %v1452_v5  ;;  %v1193_v60 = vadd.f32 %v4252_v24, %v5263_v22  ;;  %v1223_v12 = vadd.f32 %v4312_v52, %v5272_v44 }
 0x1ed   : > { %v1410_v21 = vmax.f32 %v1282_v54, 0.0 }
 0x1ee   : > { %v1748_v55 = vpop.xlane.xlu1 %1747  ;;  %v1776_v30 = vpop.xlane.xlu2 %1775  ;;  %v1321_v6 = vmax.f32 %v1193_v60, 0.0 }
 0x1ef   : > { %v1718_v7 = vpop.xlane.xlu0 %1717  ;;  %v2157_v33 = vperm.slane %v1748_v55, %v5393_v59  ;;  %v2185_v10 = vperm.slane %v1776_v30, %v5380_v50  ;;  %v5707_v55 = vld [vmem:[#allocation7 + $0x168] sm:$0xff]   ;;  %v1542_v4 = vmul.f32 %v5581_v42, %v1410_v21 }
 0x1f0   : > { %v2128_v43 = vperm.slane %v1718_v7, %v5397_v31  ;;  %v1453_v24 = vmul.f32 %v5581_v42, %v1321_v6  ;;  %v4372_v7 = vunpack.c.l.bf16 %v5707_v55 }
 0x1f1   : > { %v2158_v19 = vsel %vm1945_vm1, %v2157_v33, %v2156_v39  ;;  %v4281_v39 = vunpack.c.h.bf16 %v5628_v46  ;;  %v1351_v33 = vmax.f32 %v1223_v12, 0.0 }
 0x1f2   : > { %v5686_v45 = vsel %vm1949_vm2, %v2128_v43, %v2127_v23  ;;  %v4401_v43 = vunpack.c.h.bf16 %v5650_v36  ;;  %v1253_v0 = vadd.f32 %v4372_v7, %v5306_v47 }
 0x1f3   : > { %1729 = vadd.xlane.f32.xlu1 %v1512_v51  ;;  %1759 = vadd.xlane.f32.xlu2 %v1527_v48  ;;  %v1208_v46 = vadd.f32 %v4281_v39, %v5253_v9  ;;  %v1366_v51 = vmax.f32 %v1238_v32, 0.0  ;;  %v1483_v36 = vmul.f32 %v5581_v42, %v1351_v33 }
 0x1f4   : > { %1699 = vadd.xlane.f32.xlu0 %v1497_v49 }
 0x1f5   : > { %v1336_v30 = vmax.f32 %v1208_v46, 0.0 }
 0x1f6   : > { %v1660_v23 = vpop.xlane.xlu1 %1659  ;;  %v1600_v5 = vpop.xlane.xlu2 %1599 }
 0x1f7   : > { %v1778_v41 = vpop.xlane.xlu0 %1777  ;;  %v2072_v56 = vperm.slane %v1660_v23, %v5428_v29  ;;  %v2014_v18 = vperm.slane %v1600_v5, %v5445_v58  ;;  %v1468_v52 = vmul.f32 %v5581_v42, %v1336_v30  ;;  %v1268_v23 = vadd.f32 %v4401_v43, %v5325_v15 }
 0x1f8   : > { %v2186_v16 = vperm.slane %v1778_v41, %v5390_v57  ;;  %v1498_v41 = vmul.f32 %v5581_v42, %v1366_v51 }
 0x1f9   : > { %v5702_v20 = vsel %vm1961_vm5, %v2072_v56, %v2071_v17  ;;  %v2015_v57 = vsel %vm1969_vm7, %v2014_v18, %v5646_v40  ;;  %v5714_v17 = vld [vmem:[#allocation7 + $0x1e0] sm:$0xff]   ;;  %v5735_v56 = vld [vmem:[#allocation7 + $0xb8] sm:$0xff]   ;;  %v4253_v18 = vunpack.c.h.bf16 %v5674_v61 }
 0x1fa   : > { %v2187_v37 = vsel %vm1941_vm0, %v2186_v16, %v2185_v10  ;;  %v4432_v13 = vunpack.c.l.bf16 %v5714_v17  ;;  %v1396_v10 = vmax.f32 %v1268_v23, 0.0  ;;  %v4221_v16 = vunpack.c.h.bf16 %v5672_v26 }
 0x1fb   : > { %1579 = vadd.xlane.f32.xlu1 %v1437_v38  ;;  %1611 = vadd.xlane.f32.xlu2 %v1453_v24  ;;  %v4284_v38 = vunpack.c.l.bf16 %v5735_v56  ;;  %v1194_v33 = vadd.f32 %v4253_v18, %v5263_v22  ;;  %vm2218_vm0 = vcmask 1042434  }
 0x1fc   : > { %1789 = vadd.xlane.f32.xlu0 %v1542_v4  ;;  %v1283_v5 = vadd.f32 %v4432_v13, %v5353_v62  ;;  %v1528_v26 = vmul.f32 %v5581_v42, %v1396_v10  ;;  %v1178_v61 = vadd.f32 %v4221_v16, %v5225_v35  ;;  %v5755_v13 = vld [vmem:[#allocation7 + $0x130] sm:$0xff]  }
 0x1fd   : > { %v1322_v35 = vmax.f32 %v1194_v33, 0.0  ;;  %v4344_v22 = vunpack.c.l.bf16 %v5755_v13 }
 0x1fe   : > { %v1750_v49 = vpop.xlane.xlu1 %1749  ;;  %v1690_v48 = vpop.xlane.xlu2 %1689 }
 0x1ff   : > { %v1630_v40 = vpop.xlane.xlu0 %1629  ;;  %v2159_v54 = vperm.slane %v1750_v49, %v5397_v31  ;;  %v2101_v39 = vperm.slane %v1690_v48, %v5407_v8 }
 0x200   : > { %v2043_v60 = vperm.slane %v1630_v40, %v5421_v25  ;;  %v1306_v40 = vmax.f32 %v1178_v61, 0.0 }
 0x201   : > { %v5724_v3 = vsel %vm1949_vm2, %v2159_v54, %v2158_v19  ;;  %v2102_v6 = vsel %vm1957_vm4, %v2101_v39, %v5668_v53  ;;  %v1381_v19 = vmax.f32 %v1253_v0, 0.0 }
 0x202   : > { %v2044_v21 = vsel %vm1965_vm6, %v2043_v60, %v5665_v14  ;;  %v1411_v14 = vmax.f32 %v1283_v5, 0.0  ;;  %v1438_v23 = vmul.f32 %v5581_v42, %v1306_v40  ;;  %v1239_v5 = vadd.f32 %v4344_v22, %v5288_v11 }
 0x203   : > { %1671 = vadd.xlane.f32.xlu1 %v1483_v36  ;;  %1701 = vadd.xlane.f32.xlu2 %v1498_v41  ;;  %v1513_v7 = vmul.f32 %v5581_v42, %v1381_v19  ;;  %v1454_v41 = vmul.f32 %v5581_v42, %v1322_v35  ;;  %v5795_v35 = vld [vmem:[#allocation7 + $0x170] sm:$0xff]  }
 0x204   : > { %1641 = vadd.xlane.f32.xlu0 %v1468_v52  ;;  %v1543_v51 = vmul.f32 %v5581_v42, %v1411_v14  ;;  %v1367_v14 = vmax.f32 %v1239_v5, 0.0 }
 0x206   : > { %v1602_v46 = vpop.xlane.xlu1 %1601  ;;  %v1780_v32 = vpop.xlane.xlu2 %1779 }
 0x207   : > { %v1720_v53 = vpop.xlane.xlu0 %1719  ;;  %v2016_v12 = vperm.slane %v1602_v46, %v5451_v63  ;;  %v2188_v24 = vperm.slane %v1780_v32, %v5393_v59  ;;  %v1209_v59 = vadd.f32 %v4284_v38, %v5253_v9  ;;  %v4433_v38 = vunpack.c.h.bf16 %v5714_v17 }
 0x208   : > { %v2130_v4 = vperm.slane %v1720_v53, %v5401_v1  ;;  %v1499_v17 = vmul.f32 %v5581_v42, %v1367_v14 }
 0x209   : > { %v5745_v30 = vsel %vm1973_vm8, %v2016_v12, %v2015_v57  ;;  %v2189_v49 = vsel %vm1945_vm1, %v2188_v24, %v2187_v37  ;;  %v4313_v57 = vunpack.c.h.bf16 %v5691_v28  ;;  %v1337_v54 = vmax.f32 %v1209_v59, 0.0 }
 0x20a   : > { %v2131_v43 = vsel %vm1953_vm3, %v2130_v4, %v5686_v45  ;;  %v4373_v45 = vunpack.c.h.bf16 %v5707_v55  ;;  %v5770_v55 = vld [vmem:[#allocation7 + $0x1a8] sm:$0xff]   ;;  %v4285_v12 = vunpack.c.h.bf16 %v5735_v56  ;;  %v4476_v56 = vld [vmem:[#allocation7 + $0xf8] sm:$0xff]   ;;  %vm2220_vm1 = vcmask 1043459  }
 0x20b   : > { %1761 = vadd.xlane.f32.xlu1 %v1528_v26  ;;  %1791 = vadd.xlane.f32.xlu2 %v1543_v51  ;;  %v1224_v36 = vadd.f32 %v4313_v57, %v5272_v44  ;;  %v1469_v16 = vmul.f32 %v5581_v42, %v1337_v54  ;;  %v1284_v51 = vadd.f32 %v4433_v38, %v5353_v62  ;;  %v4345_v54 = vunpack.c.h.bf16 %v5755_v13 }
 0x20c   : > { %1731 = vadd.xlane.f32.xlu0 %v1513_v7  ;;  %v1254_v18 = vadd.f32 %v4373_v45, %v5306_v47  ;;  %v1210_v40 = vadd.f32 %v4285_v12, %v5253_v9  ;;  %v4405_v38 = vunpack.c.h.bf16 %v5770_v55  ;;  %v4317_v12 = vunpack.c.h.bf16 %v4476_v56 }
 0x20d   : > { %v1352_v46 = vmax.f32 %v1224_v36, 0.0 }
 0x20e   : > { %v1692_v48 = vpop.xlane.xlu1 %1691  ;;  %v1632_v60 = vpop.xlane.xlu2 %1631  ;;  %v1382_v32 = vmax.f32 %v1254_v18, 0.0 }
 0x20f   : > { %v1662_v37 = vpop.xlane.xlu0 %1661  ;;  %v2103_v39 = vperm.slane %v1692_v48, %v5428_v29  ;;  %v2045_v52 = vperm.slane %v1632_v60, %v5445_v58  ;;  %v1484_v33 = vmul.f32 %v5581_v42, %v1352_v46  ;;  %v1412_v48 = vmax.f32 %v1284_v51, 0.0  ;;  %v5816_v46 = vld [vmem:[#allocation7 + $0x1e8] sm:$0xff]   ;;  %v4484_v51 = vld [vmem:[#allocation7 + $0x138] sm:$0xff]  }
 0x210   : > { %v2074_v0 = vperm.slane %v1662_v37, %v5421_v25  ;;  %v1514_v57 = vmul.f32 %v5581_v42, %v1382_v32  ;;  %v1338_v37 = vmax.f32 %v1210_v40, 0.0 }
 0x211   : > { %v5765_v28 = vsel %vm1961_vm5, %v2103_v39, %v2102_v6  ;;  %v2046_v10 = vsel %vm1969_vm7, %v2045_v52, %v2044_v21  ;;  %v4404_v6 = vunpack.c.l.bf16 %v5770_v55  ;;  %v1544_v13 = vmul.f32 %v5581_v42, %v1412_v48 }
 0x212   : > { %v2075_v19 = vsel %vm1965_vm6, %v2074_v0, %v5702_v20  ;;  %v1470_v18 = vmul.f32 %v5581_v42, %v1338_v37  ;;  %v4348_v48 = vunpack.c.l.bf16 %v4484_v51 }
 0x213   : > { %1613 = vadd.xlane.f32.xlu1 %v1454_v41  ;;  %1643 = vadd.xlane.f32.xlu2 %v1469_v16  ;;  %v1269_v26 = vadd.f32 %v4404_v6, %v5325_v15  ;;  %v1240_v41 = vadd.f32 %v4345_v54, %v5288_v11 }
 0x214   : > { %1581 = vadd.xlane.f32.xlu0 %v1438_v23 }
 0x215   : > { %v1397_v22 = vmax.f32 %v1269_v26, 0.0  ;;  %v1368_v14 = vmax.f32 %v1240_v41, 0.0 }
 0x216   : > { %v1782_v53 = vpop.xlane.xlu1 %1781  ;;  %v1722_v4 = vpop.xlane.xlu2 %1721 }
 0x217   : > { %v1752_v20 = vpop.xlane.xlu0 %1751  ;;  %v2190_v21 = vperm.slane %v1782_v53, %v5397_v31  ;;  %v2132_v7 = vperm.slane %v1722_v4, %v5407_v8  ;;  %v1529_v23 = vmul.f32 %v5581_v42, %v1397_v22  ;;  %v4436_v53 = vunpack.c.l.bf16 %v5816_v46  ;;  %v5837_v22 = vld [vmem:[#allocation7 + $0x1b0] sm:$0xff]  }
 0x218   : > { %v2161_v24 = vperm.slane %v1752_v20, %v5401_v1  ;;  %v1500_v55 = vmul.f32 %v5581_v42, %v1368_v14 }
 0x219   : > { %v5785_v61 = vsel %vm1949_vm2, %v2190_v21, %v2189_v49  ;;  %v2133_v31 = vsel %vm1957_vm4, %v2132_v7, %v2131_v43  ;;  %v4316_v49 = vunpack.c.l.bf16 %v4476_v56  ;;  %vm2222_vm2 = vcmask 1044484  }
 0x21a   : > { %v2162_v59 = vsel %vm1953_vm3, %v2161_v24, %v5724_v3  ;;  %v4376_v3 = vunpack.c.l.bf16 %v5795_v35 }
 0x21b   : > { %1703 = vadd.xlane.f32.xlu1 %v1499_v17  ;;  %1733 = vadd.xlane.f32.xlu2 %v1514_v57  ;;  %v1225_v52 = vadd.f32 %v4316_v49, %v5272_v44  ;;  %v1285_v17 = vadd.f32 %v4436_v53, %v5353_v62  ;;  %v1226_v49 = vadd.f32 %v4317_v12, %v5272_v44  ;;  %v4349_v53 = vunpack.c.h.bf16 %v4484_v51 }
 0x21c   : > { %1673 = vadd.xlane.f32.xlu0 %v1484_v33  ;;  %v1255_v6 = vadd.f32 %v4376_v3, %v5306_v47  ;;  %v1270_v33 = vadd.f32 %v4405_v38, %v5325_v15 }
 0x21d   : > { %v1413_v54 = vmax.f32 %v1285_v17, 0.0  ;;  %v1354_v3 = vmax.f32 %v1226_v49, 0.0  ;;  %v4507_v49 = vld [vmem:[#allocation7 + $0x1f0] sm:$0xff]  }
 0x21e   : > { %v1634_v45 = vpop.xlane.xlu1 %1633  ;;  %v1664_v43 = vpop.xlane.xlu2 %1663  ;;  %v1398_v37 = vmax.f32 %v1270_v33, 0.0 }
 0x21f   : > { %v1604_v60 = vpop.xlane.xlu0 %1603  ;;  %v2047_v39 = vperm.slane %v1634_v45, %v5451_v63  ;;  %v2076_v0 = vperm.slane %v1664_v43, %v5445_v58  ;;  %v4408_v45 = vunpack.c.l.bf16 %v5837_v22 }
 0x220   : > { %v2018_v9 = vperm.slane %v1604_v60, %v5454_v2 }
 0x221   : > { %v5804_v36 = vsel %vm1973_vm8, %v2047_v39, %v2046_v10  ;;  %v5812_v16 = vsel %vm1969_vm7, %v2076_v0, %v2075_v19  ;;  %v1353_v10 = vmax.f32 %v1225_v52, 0.0  ;;  %v1241_v0 = vadd.f32 %v4348_v48, %v5288_v11 }
 0x222   : > { %v2019_v5 = vsel %vm1977_vm9, %v2018_v9, %v5745_v30  ;;  %v1383_v30 = vmax.f32 %v1255_v6, 0.0  ;;  %v1486_v6 = vmul.f32 %v5581_v42, %v1354_v3 }
 0x223   : > { %1793 = vadd.xlane.f32.xlu1 %v1544_v13  ;;  %1645 = vadd.xlane.f32.xlu2 %v1470_v18  ;;  %v1485_v7 = vmul.f32 %v5581_v42, %v1353_v10  ;;  %v4492_v10 = vld [vmem:[#allocation7 + $0x178] sm:$0xff]   ;;  %v1369_v14 = vmax.f32 %v1241_v0, 0.0 }
 0x224   : > { %1763 = vadd.xlane.f32.xlu0 %v1529_v23  ;;  %v1515_v40 = vmul.f32 %v5581_v42, %v1383_v30  ;;  %v1271_v23 = vadd.f32 %v4408_v45, %v5325_v15  ;;  %v4380_v12 = vunpack.c.l.bf16 %v4492_v10  ;;  %v4440_v45 = vunpack.c.l.bf16 %v4507_v49  ;;  %v4500_v0 = vld [vmem:[#allocation7 + $0x1b8] sm:$0xff]  }
 0x226   : > { %v1724_v32 = vpop.xlane.xlu1 %1723  ;;  %v1754_v20 = vpop.xlane.xlu2 %1753  ;;  %v1399_v30 = vmax.f32 %v1271_v23, 0.0 }
 0x227   : > { %v1694_v19 = vpop.xlane.xlu0 %1693  ;;  %v2134_v4 = vperm.slane %v1724_v32, %v5428_v29  ;;  %v2163_v24 = vperm.slane %v1754_v20, %v5407_v8 }
 0x228   : > { %v2105_v21 = vperm.slane %v1694_v19, %v5421_v25  ;;  %v1531_v51 = vmul.f32 %v5581_v42, %v1399_v30 }
 0x229   : > { %v5825_v26 = vsel %vm1961_vm5, %v2134_v4, %v2133_v31  ;;  %v5833_v57 = vsel %vm1957_vm4, %v2163_v24, %v2162_v59  ;;  %v5840_v31 = vadd.s32 4294967208, %v5380_v50 }
 0x22a   : > { %v2106_v56 = vsel %vm1965_vm6, %v2105_v21, %v5765_v28  ;;  %v4377_v28 = vunpack.c.h.bf16 %v5795_v35  ;;  %v1545_v35 = vmul.f32 %v5581_v42, %v1413_v54  ;;  %v4409_v54 = vunpack.c.h.bf16 %v5837_v22 }
 0x22b   : > { %1705 = vadd.xlane.f32.xlu1 %v1500_v55  ;;  %1735 = vadd.xlane.f32.xlu2 %v1515_v40  ;;  %v1242_v55 = vadd.f32 %v4349_v53, %v5288_v11  ;;  %v1257_v40 = vadd.f32 %v4380_v12, %v5306_v47 }
 0x22c   : > { %1675 = vadd.xlane.f32.xlu0 %v1485_v7  ;;  %v1256_v13 = vadd.f32 %v4377_v28, %v5306_v47 }
 0x22d   : > { %v1370_v48 = vmax.f32 %v1242_v55, 0.0  ;;  %v1385_v28 = vmax.f32 %v1257_v40, 0.0  ;;  %v4508_v55 = vld [vmem:[#allocation7 + $0x1f8] sm:$0xff]  }
 0x22e   : > { %v1574_v59 = vpop.xlane.xlu1 %1573  ;;  %v1606_v44 = vpop.xlane.xlu2 %1605  ;;  %v1384_v38 = vmax.f32 %v1256_v13, 0.0  ;;  %v4445_v40 = vunpack.c.h.bf16 %v4508_v55 }
 0x22f   : > { %v1784_v60 = vpop.xlane.xlu0 %1783  ;;  %v1980_v43 = vperm.slane %v1574_v59, %v5840_v31  ;;  %v2020_v9 = vperm.slane %v1606_v44, %v5840_v31  ;;  %v4381_v59 = vunpack.c.h.bf16 %v4492_v10  ;;  %v1502_v22 = vmul.f32 %v5581_v42, %v1370_v48 }
 0x230   : > { %v2192_v39 = vperm.slane %v1784_v60, %v5401_v1  ;;  %v1530_v1 = vmul.f32 %v5581_v42, %v1398_v37  ;;  %v1516_v7 = vmul.f32 %v5581_v42, %v1384_v38  ;;  %v4413_v10 = vunpack.c.h.bf16 %v4500_v0 }
 0x231   : > { %v5850_v52 = vsel %vm1981_vm10, %v1980_v43, %v5475_v34  ;;  %v5858_v18 = vsel %vm1981_vm10, %v2020_v9, %v2019_v5  ;;  %v4437_v34 = vunpack.c.h.bf16 %v5816_v46  ;;  %v1501_v46 = vmul.f32 %v5581_v42, %v1369_v14 }
 0x232   : > { %v2193_v41 = vsel %vm1953_vm3, %v2192_v39, %v5785_v61  ;;  %v1272_v39 = vadd.f32 %v4409_v54, %v5325_v15  ;;  %v1287_v9 = vadd.f32 %v4440_v45, %v5353_v62  ;;  %v1258_v13 = vadd.f32 %v4381_v59, %v5306_v47 }
 0x233   : > { %1795 = vadd.xlane.f32.xlu1 %v1545_v35  ;;  %1677 = vadd.xlane.f32.xlu2 %v1486_v6  ;;  %v1286_v21 = vadd.f32 %v4437_v34, %v5353_v62  ;;  %v4441_v34 = vunpack.c.h.bf16 %v4507_v49  ;;  %vm2224_vm3 = vcmask 1045509  }
 0x234   : > { %1765 = vadd.xlane.f32.xlu0 %v1530_v1  ;;  %v4412_v1 = vunpack.c.l.bf16 %v4500_v0  ;;  %v1415_v6 = vmax.f32 %v1287_v9, 0.0  ;;  %v1386_v38 = vmax.f32 %v1258_v13, 0.0 }
 0x236   : > { %v1666_v32 = vpop.xlane.xlu1 %1665  ;;  %v1696_v19 = vpop.xlane.xlu2 %1695  ;;  %v1273_v12 = vadd.f32 %v4412_v1, %v5325_v15 }
 0x237   : > { %v1636_v61 = vpop.xlane.xlu0 %1635  ;;  %v2078_v5 = vperm.slane %v1666_v32, %v5451_v63  ;;  %v2107_v4 = vperm.slane %v1696_v19, %v5445_v58  ;;  %v1547_v19 = vmul.f32 %v5581_v42, %v1415_v6 }
 0x238   : > { %v2049_v20 = vperm.slane %v1636_v61, %v5454_v2 }
 0x239   : > { %v5869_v24 = vsel %vm1973_vm8, %v2078_v5, %v5812_v16  ;;  %v5877_v17 = vsel %vm1969_vm7, %v2107_v4, %v2106_v56  ;;  %v1414_v16 = vmax.f32 %v1286_v21, 0.0  ;;  %v1274_v5 = vadd.f32 %v4413_v10, %v5325_v15 }
 0x23a   : > { %v2050_v33 = vsel %vm1977_vm9, %v2049_v20, %v5804_v36  ;;  %v1288_v20 = vadd.f32 %v4441_v34, %v5353_v62  ;;  %v1401_v15 = vmax.f32 %v1273_v12, 0.0 }
 0x23b   : > { %1737 = vadd.xlane.f32.xlu1 %v1516_v7  ;;  %1767 = vadd.xlane.f32.xlu2 %v1531_v51  ;;  %v1546_v44 = vmul.f32 %v5581_v42, %v1414_v16  ;;  %v1518_v7 = vmul.f32 %v5581_v42, %v1386_v38  ;;  %v4444_v51 = vunpack.c.l.bf16 %v4508_v55  ;;  %v1402_v16 = vmax.f32 %v1274_v5, 0.0 }
 0x23c   : > { %1707 = vadd.xlane.f32.xlu0 %v1501_v46 }
 0x23d   : > { %v1289_v59 = vadd.f32 %v4444_v51, %v5353_v62 }
 0x23e   : > { %v1756_v11 = vpop.xlane.xlu1 %1755  ;;  %v1786_v37 = vpop.xlane.xlu2 %1785 }
 0x23f   : > { %v1726_v36 = vpop.xlane.xlu0 %1725  ;;  %v2165_v56 = vperm.slane %v1756_v11, %v5428_v29  ;;  %v2194_v60 = vperm.slane %v1786_v37, %v5407_v8  ;;  %v1517_v8 = vmul.f32 %v5581_v42, %v1385_v28 }
 0x240   : > { %v2136_v3 = vperm.slane %v1726_v36, %v5421_v25  ;;  %v1290_v36 = vadd.f32 %v4445_v40, %v5353_v62 }
 0x241   : > { %v5888_v43 = vsel %vm1961_vm5, %v2165_v56, %v5833_v57  ;;  %v5896_v23 = vsel %vm1957_vm4, %v2194_v60, %v2193_v41  ;;  %v5901_v57 = vadd.s32 4294967200, %v5380_v50  ;;  %v1534_v60 = vmul.f32 %v5581_v42, %v1402_v16 }
 0x242   : > { %v2137_v35 = vsel %vm1965_vm6, %v2136_v3, %v5825_v26  ;;  %v1400_v26 = vmax.f32 %v1272_v39, 0.0  ;;  %v1533_v3 = vmul.f32 %v5581_v42, %v1401_v15  ;;  %v1417_v39 = vmax.f32 %v1289_v59, 0.0 }
 0x243   : > { %1709 = vadd.xlane.f32.xlu1 %v1502_v22  ;;  %1739 = vadd.xlane.f32.xlu2 %v1517_v8  ;;  %vm2226_vm4 = vcmask 1046534  }
 0x244   : > { %1797 = vadd.xlane.f32.xlu0 %v1546_v44  ;;  %v1532_v46 = vmul.f32 %v5581_v42, %v1400_v26  ;;  %v1418_v44 = vmax.f32 %v1290_v36, 0.0  ;;  %v1549_v10 = vmul.f32 %v5581_v42, %v1417_v39 }
 0x246   : > { %v1608_v14 = vpop.xlane.xlu1 %1607  ;;  %v1638_v53 = vpop.xlane.xlu2 %1637  ;;  %v1550_v13 = vmul.f32 %v5581_v42, %v1418_v44 }
 0x247   : > { %v1576_v41 = vpop.xlane.xlu0 %1575  ;;  %v2022_v32 = vperm.slane %v1608_v14, %v5901_v57  ;;  %v2051_v30 = vperm.slane %v1638_v53, %v5840_v31 }
 0x248   : > { %v1984_v47 = vperm.slane %v1576_v41, %v5901_v57 }
 0x249   : > { %v2023_v61 = vsel %vm1985_vm11, %v2022_v32, %v5858_v18  ;;  %v2052_v21 = vsel %vm1981_vm10, %v2051_v30, %v2050_v33  ;;  %v1416_v18 = vmax.f32 %v1288_v20, 0.0 }
 0x24a   : > { %v1986_v4 = vsel %vm1985_vm11, %v1984_v47, %v5850_v52 }
 0x24b   : > { %1799 = vadd.xlane.f32.xlu1 %v1547_v19  ;;  %1741 = vadd.xlane.f32.xlu2 %v1518_v7  ;;  %v1548_v28 = vmul.f32 %v5581_v42, %v1416_v18 }
 0x24c   : > { %1769 = vadd.xlane.f32.xlu0 %v1532_v46 }
 0x24e   : > { %v1698_v49 = vpop.xlane.xlu1 %1697  ;;  %v1728_v54 = vpop.xlane.xlu2 %1727 }
 0x24f   : > { %v1668_v48 = vpop.xlane.xlu0 %1667  ;;  %v2109_v52 = vperm.slane %v1698_v49, %v5451_v63  ;;  %v2138_v45 = vperm.slane %v1728_v54, %v5445_v58 }
 0x250   : > { %v2080_v33 = vperm.slane %v1668_v48, %v5454_v2 }
 0x251   : > { %v2110_v11 = vsel %vm1973_vm8, %v2109_v52, %v5877_v17  ;;  %v2139_v56 = vsel %vm1969_vm7, %v2138_v45, %v2137_v35  ;;  %v5931_v17 = vadd.s32 4294967192, %v5380_v50 }
 0x252   : > { %v2081_v37 = vsel %vm1977_vm9, %v2080_v33, %v5869_v24 }
 0x253   : > { %1801 = vadd.xlane.f32.xlu1 %v1548_v28  ;;  %1773 = vadd.xlane.f32.xlu2 %v1534_v60 }
 0x254   : > { %1771 = vadd.xlane.f32.xlu0 %v1533_v3 }
 0x256   : > { %v1788_v22 = vpop.xlane.xlu1 %1787  ;;  %v1578_v62 = vpop.xlane.xlu2 %1577 }
 0x257   : > { %v1758_v9 = vpop.xlane.xlu0 %1757  ;;  %v2196_v24 = vperm.slane %v1788_v22, %v5428_v29  ;;  %v1988_v35 = vperm.slane %v1578_v62, %v5931_v17 }
 0x258   : > { %v2167_v0 = vperm.slane %v1758_v9, %v5421_v25  ;;  %v5981_v9 = vadd.s32 4294967176, %v5380_v50 }
 0x259   : > { %v2197_v8 = vsel %vm1961_vm5, %v2196_v24, %v5896_v23  ;;  %v1990_v6 = vsel %vm1989_vm12, %v1988_v35, %v1986_v4  ;;  %vm2228_vm5 = vcmask 1047559  }
 0x25a   : > { %v2168_v1 = vsel %vm1965_vm6, %v2167_v0, %v5888_v43 }
 0x25b   : > { %1805 = vadd.xlane.f32.xlu1 %v1550_v13 }
 0x25c   : > { %1803 = vadd.xlane.f32.xlu0 %v1549_v10 }
 0x25e   : > { %v1640_v34 = vpop.xlane.xlu1 %1639  ;;  %v1670_v14 = vpop.xlane.xlu2 %1669 }
 0x25f   : > { %v1610_v29 = vpop.xlane.xlu0 %1609  ;;  %v2053_v26 = vperm.slane %v1640_v34, %v5901_v57  ;;  %v2082_v23 = vperm.slane %v1670_v14, %v5840_v31 }
 0x260   : > { %v2024_v38 = vperm.slane %v1610_v29, %v5931_v17 }
 0x261   : > { %v2054_v41 = vsel %vm1985_vm11, %v2053_v26, %v2052_v21  ;;  %v2083_v43 = vsel %vm1981_vm10, %v2082_v23, %v2081_v37  ;;  %v5956_v21 = vadd.s32 4294967184, %v5380_v50 }
 0x262   : > { %v2025_v53 = vsel %vm1989_vm12, %v2024_v38, %v2023_v61 }
 0x266   : > { %v1730_v32 = vpop.xlane.xlu1 %1729  ;;  %v1760_v42 = vpop.xlane.xlu2 %1759 }
 0x267   : > { %v1700_v47 = vpop.xlane.xlu0 %1699  ;;  %v2140_v30 = vperm.slane %v1730_v32, %v5451_v63  ;;  %v2169_v19 = vperm.slane %v1760_v42, %v5445_v58 }
 0x268   : > { %v2111_v12 = vperm.slane %v1700_v47, %v5454_v2 }
 0x269   : > { %v2141_v5 = vsel %vm1973_vm8, %v2140_v30, %v2139_v56  ;;  %v2170_v4 = vsel %vm1969_vm7, %v2169_v19, %v2168_v1 }
 0x26a   : > { %v2112_v20 = vsel %vm1977_vm9, %v2111_v12, %v2110_v11 }
 0x26e   : > { %v1580_v61 = vpop.xlane.xlu1 %1579  ;;  %v1612_v7 = vpop.xlane.xlu2 %1611 }
 0x26f   : > { %v1790_v46 = vpop.xlane.xlu0 %1789  ;;  %v1992_v55 = vperm.slane %v1580_v61, %v5956_v21  ;;  %v2026_v51 = vperm.slane %v1612_v7, %v5956_v21 }
 0x270   : > { %v2198_v18 = vperm.slane %v1790_v46, %v5421_v25 }
 0x271   : > { %v1994_v40 = vsel %vm1993_vm13, %v1992_v55, %v1990_v6  ;;  %v2027_v15 = vsel %vm1993_vm13, %v2026_v51, %v2025_v53 }
 0x272   : > { %v2199_v49 = vsel %vm1965_vm6, %v2198_v18, %v2197_v8  ;;  %vm1809_vm6 = vcmp.lt.s32.totalorder %v5380_v50, 16 }
 0x276   : > { %v1672_v16 = vpop.xlane.xlu1 %1671  ;;  %v1702_v54 = vpop.xlane.xlu2 %1701 }
 0x277   : > { %v1642_v48 = vpop.xlane.xlu0 %1641  ;;  %v2084_v52 = vperm.slane %v1672_v16, %v5901_v57  ;;  %v2113_v45 = vperm.slane %v1702_v54, %v5840_v31 }
 0x278   : > { %v2055_v33 = vperm.slane %v1642_v48, %v5931_v17 }
 0x279   : > { %v2085_v11 = vsel %vm1985_vm11, %v2084_v52, %v2083_v43  ;;  %v2114_v28 = vsel %vm1981_vm10, %v2113_v45, %v2112_v20 }
 0x27a   : > { %v2056_v25 = vsel %vm1989_vm12, %v2055_v33, %v2054_v41 }
 0x27e   : > { %v1762_v59 = vpop.xlane.xlu1 %1761  ;;  %v1792_v37 = vpop.xlane.xlu2 %1791 }
 0x27f   : > { %v1732_v36 = vpop.xlane.xlu0 %1731  ;;  %v2171_v56 = vperm.slane %v1762_v59, %v5451_v63  ;;  %v2200_v60 = vperm.slane %v1792_v37, %v5445_v58 }
 0x280   : > { %v2142_v3 = vperm.slane %v1732_v36, %v5454_v2 }
 0x281   : > { %v5974_v44 = vsel %vm1973_vm8, %v2171_v56, %v2170_v4  ;;  %v5978_v39 = vsel %vm1969_vm7, %v2200_v60, %v2199_v49 }
 0x282   : > { %v2143_v22 = vsel %vm1977_vm9, %v2142_v3, %v2141_v5 }
 0x286   : > { %v1614_v62 = vpop.xlane.xlu1 %1613  ;;  %v1644_v0 = vpop.xlane.xlu2 %1643 }
 0x287   : > { %v1582_v24 = vpop.xlane.xlu0 %1581  ;;  %v2028_v35 = vperm.slane %v1614_v62, %v5981_v9  ;;  %v2057_v29 = vperm.slane %v1644_v0, %v5956_v21 }
 0x288   : > { %v1996_v8 = vperm.slane %v1582_v24, %v5981_v9 }
 0x289   : > { %v2029_v58 = vsel %vm1997_vm14, %v2028_v35, %v2027_v15  ;;  %v2058_v41 = vsel %vm1993_vm13, %v2057_v29, %v2056_v25 }
 0x28a   : > { %v1998_v13 = vsel %vm1997_vm14, %v1996_v8, %v1994_v40 }
 0x28b   : > { %v2217_v1 = vsel %vm2216_vm15, %v2029_v58, %v1998_v13 }
 0x28e   : > { %v1704_v6 = vpop.xlane.xlu1 %1703  ;;  %v1734_v34 = vpop.xlane.xlu2 %1733 }
 0x28f   : > { %v1674_v10 = vpop.xlane.xlu0 %1673  ;;  %v2115_v49 = vperm.slane %v1704_v6, %v5901_v57  ;;  %v2144_v36 = vperm.slane %v1734_v34, %v5840_v31 }
 0x290   : > { %v2086_v30 = vperm.slane %v1674_v10, %v5931_v17 }
 0x291   : > { %v2116_v48 = vsel %vm1985_vm11, %v2115_v49, %v2114_v28  ;;  %v2145_v60 = vsel %vm1981_vm10, %v2144_v36, %v2143_v22  ;;  %v3631_v49 = vld [vmem:[#allocation13 + $0x168] sm:$0xf0] }
 0x292   : > { %v2087_v4 = vsel %vm1989_vm12, %v2086_v30, %v2085_v11 }
 0x296   : > { %v5989_v14 = vpop.xlane.xlu1 %1793  ;;  %v1646_v38 = vpop.xlane.xlu2 %1645 }
 0x297   : > { %v1764_v26 = vpop.xlane.xlu0 %1763  ;;  %v2059_v23 = vperm.slane %v1646_v38, %v5981_v9 }
 0x299   : > { %v2060_v53 = vsel %vm1997_vm14, %v2059_v23, %v2058_v41 }
 0x29a   : > { %v2219_v43 = vsel %vm2218_vm0, %v2060_v53, %v2217_v1  ;;  %v2173_v1 = vperm.slane %v1764_v26, %v5454_v2 }
 0x29c   : > { %v2174_v38 = vsel %vm1977_vm9, %v2173_v1, %v5974_v44  ;;  %v4064_v1 = vld [vmem:[#allocation13 + $0x94] sm:$0xf] }
 0x29e   : > { %v1706_v32 = vpop.xlane.xlu1 %1705  ;;  %v1736_v42 = vpop.xlane.xlu2 %1735 }
 0x29f   : > { %v1676_v47 = vpop.xlane.xlu0 %1675  ;;  %v2117_v15 = vperm.slane %v1706_v32, %v5931_v17  ;;  %v2146_v56 = vperm.slane %v1736_v42, %v5901_v57  ;;  %v2202_v42 = vperm.slane %v5989_v14, %v5451_v63 }
 0x2a0   : > { %v2088_v12 = vperm.slane %v1676_v47, %v5956_v21 }
 0x2a1   : > { %v2118_v52 = vsel %vm1989_vm12, %v2117_v15, %v2116_v48  ;;  %v2147_v24 = vsel %vm1985_vm11, %v2146_v56, %v2145_v60  ;;  %v4082_v15 = vld [vmem:[#allocation13 + $0x124] sm:$0xf]  ;;  %v3559_v56 = vld [vmem:[#allocation13 + $0xd8] sm:$0xf0] }
 0x2a2   : > { %v2089_v46 = vsel %vm1993_vm13, %v2088_v12, %v2087_v4 }
 0x2a6   : > { %v5997_v19 = vpop.xlane.xlu1 %1795  ;;  %v1678_v20 = vpop.xlane.xlu2 %1677 }
 0x2a7   : > { %v1766_v5 = vpop.xlane.xlu0 %1765  ;;  %v2090_v61 = vperm.slane %v1678_v20, %v5981_v9  ;;  %v2204_v44 = vperm.slane %v5997_v19, %v5454_v2 }
 0x2a8   : > { %v2175_v10 = vperm.slane %v1766_v5, %v5840_v31 }
 0x2a9   : > { %v2091_v7 = vsel %vm1997_vm14, %v2090_v61, %v2089_v46  ;;  %v2203_v46 = vsel %vm1973_vm8, %v2202_v42, %v5978_v39  ;;  %v4074_v42 = vld [vmem:[#allocation13 + $0xdc] sm:$0xf0] }
 0x2aa   : > { %v2221_v55 = vsel %vm2220_vm1, %v2091_v7, %v2219_v43  ;;  %v2176_v41 = vsel %vm1981_vm10, %v2175_v10, %v2174_v38  ;;  %v2205_v14 = vsel %vm1977_vm9, %v2204_v44, %v2203_v46  ;;  %v4077_v38 = vld [vmem:[#allocation13 + $0xfc] sm:$0xf]  ;;  %v4071_v44 = vld [vmem:[#allocation13 + $0xcc] sm:$0xf] }
 0x2ab   : > { %v3511_v46 = vld [vmem:[#allocation13 + $0x78] sm:$0xf0] }
 0x2ae   : > { %v1738_v18 = vpop.xlane.xlu1 %1737  ;;  %v1768_v40 = vpop.xlane.xlu2 %1767 }
 0x2af   : > { %v1708_v51 = vpop.xlane.xlu0 %1707  ;;  %v2148_v28 = vperm.slane %v1738_v18, %v5931_v17  ;;  %v2177_v34 = vperm.slane %v1768_v40, %v5901_v57 }
 0x2b0   : > { %v2119_v16 = vperm.slane %v1708_v51, %v5956_v21 }
 0x2b1   : > { %v2149_v8 = vsel %vm1989_vm12, %v2148_v28, %v2147_v24  ;;  %v2178_v26 = vsel %vm1985_vm11, %v2177_v34, %v2176_v41  ;;  %v4086_v24 = vld [vmem:[#allocation13 + $0x13c] sm:$0xf0]  ;;  %v3535_v41 = vld [vmem:[#allocation13 + $0xa8] sm:$0xf0] }
 0x2b2   : > { %v2120_v25 = vsel %vm1993_vm13, %v2119_v16, %v2118_v52  ;;  %v3583_v52 = vld [vmem:[#allocation13 + $0x108] sm:$0xf0] }
 0x2b6   : > { %v1710_v54 = vpop.xlane.xlu1 %1709  ;;  %v1740_v45 = vpop.xlane.xlu2 %1739 }
 0x2b7   : > { %v1798_v33 = vpop.xlane.xlu0 %1797  ;;  %v2121_v11 = vperm.slane %v1710_v54, %v5981_v9  ;;  %v2150_v3 = vperm.slane %v1740_v45, %v5956_v21  ;;  %v4076_v54 = vld [vmem:[#allocation13 + $0xf4] sm:$0xf]  ;;  %v4092_v45 = vld [vmem:[#allocation13 + $0x16c] sm:$0xf0] }
 0x2b8   : > { %v2206_v5 = vperm.slane %v1798_v33, %v5840_v31  ;;  %v3637_v33 = vld [vmem:[#allocation13 + $0x158] sm:$0xf]  ;;  %v3586_v36 = vor.u32 %v4076_v54, %v3583_v52  ;;  %v4059_v52 = vld [vmem:[#allocation13 + $0x6c] sm:$0xf] }
 0x2b9   : > { %v2122_v59 = vsel %vm1997_vm14, %v2121_v11, %v2120_v25  ;;  %v2151_v13 = vsel %vm1993_vm13, %v2150_v3, %v2149_v8  ;;  %v3638_v50 = vor.u32 %v4092_v45, %v3637_v33  ;;  %v4089_v11 = vld [vmem:[#allocation13 + $0x15c] sm:$0xf]  ;;  %v3639_v25 = vld [vmem:[#allocation13 + $0x170] sm:$0xf0]  ;;  %v4093_v3 = vld [vmem:[#allocation13 + $0x174] sm:$0xf0] }
 0x2ba   : > { %v2223_v37 = vsel %vm2222_vm2, %v2122_v59, %v2221_v55  ;;  %v2207_v2 = vsel %vm1981_vm10, %v2206_v5, %v2205_v14  ;;  %v3645_v59 = vld [vmem:[#allocation13 + $0x160] sm:$0xf]  ;;  %v3642_v28 = vor.u32 %v4089_v11, %v3639_v25  ;;  %v3615_v8 = vld [vmem:[#allocation13 + $0x140] sm:$0xf0]  ;;  %v3538_v5 = vor.u32 %v4064_v1, %v3535_v41  ;;  %v3525_v11 = vld [vmem:[#allocation13 + $0x70] sm:$0xf] }
 0x2bb   : > { %807 = vmatpush.bf16.msra.mxu2 %v3638_v50  ;;  %v3646_v60 = vor.u32 %v4093_v3, %v3645_v59  ;;  %v3519_v33 = vld [vmem:[#allocation13 + $0x80] sm:$0xf0]  ;;  %v4063_v25 = vld [vmem:[#allocation13 + $0x84] sm:$0xf0]  ;;  %v3493_v3 = vld [vmem:[#allocation13 + $0x38] sm:$0xf] }
 0x2bc   : > { %820 = vmatpush.bf16.msra.mxu3 %v3642_v28  ;;  %v4046_v59 = vld [vmem:[#allocation13 + $0x4] sm:$0xf]  ;;  %v3522_v28 = vor.u32 %v4059_v52, %v3519_v33  ;;  %v4084_v1 = vld [vmem:[#allocation13 + $0x134] sm:$0xf]  ;;  %v4097_v52 = vld [vmem:[#allocation4 + $0x18] sm:$0xff] }
 0x2bd   : > { %833 = vmatpush.bf16.msrb.mxu0 %v3646_v60  ;;  %v3526_v60 = vor.u32 %v4063_v25, %v3525_v11  ;;  %v3471_v41 = vld [vmem:[#allocation13 + $0x20] sm:$0xf0]  ;;  %v4105_v33 = vld [vmem:[#allocation4 + $0x58] sm:$0xff]  ;;  %v4048_v11 = vld [vmem:[#allocation13 + $0x14] sm:$0xf] }
 0x2be   : > { %v1800_v62 = vpop.xlane.xlu1 %1799  ;;  %v1742_v35 = vpop.xlane.xlu2 %1741  ;;  %v3479_v25 = vld [vmem:[#allocation13 + $0x28] sm:$0xf0] }
 0x2bf   : > { %v1770_v0 = vpop.xlane.xlu0 %1769  ;;  %v2152_v58 = vperm.slane %v1742_v35, %v5981_v9  ;;  %v2208_v4 = vperm.slane %v1800_v62, %v5901_v57  ;;  %v3613_v62 = vld [vmem:[#allocation13 + $0x128] sm:$0xf] }
 0x2c0   : > { %v2179_v29 = vperm.slane %v1770_v0, %v5931_v17  ;;  %v4083_v0 = vld [vmem:[#allocation13 + $0x12c] sm:$0xf]  ;;  %v3614_v35 = vor.u32 %v4086_v24, %v3613_v62  ;;  %v4056_v62 = vld [vmem:[#allocation13 + $0x4c] sm:$0xf0]  ;;  %v4053_v24 = vld [vmem:[#allocation13 + $0x3c] sm:$0xf] }
 0x2c1   : > { %v2153_v6 = vsel %vm1997_vm14, %v2152_v58, %v2151_v13  ;;  %v2209_v31 = vsel %vm1985_vm11, %v2208_v4, %v2207_v2  ;;  %v3621_v58 = vld [vmem:[#allocation13 + $0x130] sm:$0xf]  ;;  %v4087_v13 = vld [vmem:[#allocation13 + $0x144] sm:$0xf0] }
 0x2c2   : > { %v2225_v22 = vsel %vm2224_vm3, %v2153_v6, %v2223_v37  ;;  %v2180_v30 = vsel %vm1989_vm12, %v2179_v29, %v2178_v26  ;;  %v4070_v37 = vld [vmem:[#allocation13 + $0xc4] sm:$0xf]  ;;  %v3618_v6 = vor.u32 %v4083_v0, %v3615_v8  ;;  %v3622_v10 = vor.u32 %v4087_v13, %v3621_v58  ;;  %v4080_v29 = vld [vmem:[#allocation13 + $0x10c] sm:$0xf0]  ;;  %808 = vmatpush.bf16.msra.mxu2 %v3614_v35  ;;  %v4081_v26 = vld [vmem:[#allocation13 + $0x114] sm:$0xf0] }
 0x2c3   : > { %v3562_v34 = vor.u32 %v4070_v37, %v3559_v56  ;;  %v4075_v4 = vld [vmem:[#allocation13 + $0xe4] sm:$0xf0]  ;;  %v4068_v2 = vld [vmem:[#allocation13 + $0xac] sm:$0xf0]  ;;  %v4090_v56 = vld [vmem:[#allocation13 + $0x164] sm:$0xf] }
 0x2c4   : > { %821 = vmatpush.bf16.msra.mxu3 %v3618_v6  ;;  %834 = vmatpush.bf16.msrb.mxu0 %v3622_v10  ;;  %v3495_v0 = vld [vmem:[#allocation13 + $0x50] sm:$0xf0]  ;;  %v3501_v8 = vld [vmem:[#allocation13 + $0x40] sm:$0xf]  ;;  %v4057_v58 = vld [vmem:[#allocation13 + $0x54] sm:$0xf0]  ;;  %v3494_v10 = vor.u32 %v4056_v62, %v3493_v3 }
 0x2c5   : > { %v3623_v6 = vld [vmem:[#allocation13 + $0x148] sm:$0xf0]  ;;  %v4123_v3 = vld [vmem:[#allocation4 + $0xe8] sm:$0xff] }
 0x2c6   : > { %v1802_v23 = vpop.xlane.xlu1 %1801  ;;  %v1774_v43 = vpop.xlane.xlu2 %1773  ;;  %v4121_v62 = vld [vmem:[#allocation4 + $0xd8] sm:$0xff] }
 0x2c7   : > { %v1772_v53 = vpop.xlane.xlu0 %1771  ;;  %v2183_v47 = vperm.slane %v1774_v43, %v5981_v9  ;;  %v2210_v63 = vperm.slane %v1802_v23, %v5931_v17  ;;  %v3591_v23 = vld [vmem:[#allocation13 + $0x110] sm:$0xf0]  ;;  %v3597_v43 = vld [vmem:[#allocation13 + $0x100] sm:$0xf] }
 0x2c8   : > { %v2181_v32 = vperm.slane %v1772_v53, %v5956_v21 }
 0x2c9   : > { %v2211_v57 = vsel %vm1989_vm12, %v2210_v63, %v2209_v31  ;;  %v3543_v31 = vld [vmem:[#allocation13 + $0xb0] sm:$0xf0] }
 0x2ca   : > { %v2182_v12 = vsel %vm1993_vm13, %v2181_v32, %v2180_v30  ;;  %v3594_v32 = vor.u32 %v4077_v38, %v3591_v23  ;;  %v3598_v30 = vor.u32 %v4081_v26, %v3597_v43  ;;  %v4050_v38 = vld [vmem:[#allocation13 + $0x1c] sm:$0xf0]  ;;  %v4047_v23 = vld [vmem:[#allocation13 + $0xc] sm:$0xf]  ;;  %v3477_v43 = vld [vmem:[#allocation13 + $0x10] sm:$0xf] }
 0x2cb   : > { %v2184_v20 = vsel %vm1997_vm14, %v2183_v47, %v2182_v12  ;;  %v3565_v47 = vld [vmem:[#allocation13 + $0xc8] sm:$0xf]  ;;  %v3567_v12 = vld [vmem:[#allocation13 + $0xe0] sm:$0xf0] }
 0x2cc   : > { %v2227_v61 = vsel %vm2226_vm4, %v2184_v20, %v2225_v22  ;;  %v3589_v22 = vld [vmem:[#allocation13 + $0xf8] sm:$0xf]  ;;  %v3573_v20 = vld [vmem:[#allocation13 + $0xd0] sm:$0xf]  ;;  %v3566_v63 = vor.u32 %v4074_v42, %v3565_v47  ;;  %822 = vmatpush.bf16.msra.mxu3 %v3594_v32  ;;  %v3570_v14 = vor.u32 %v4071_v44, %v3567_v12  ;;  %835 = vmatpush.bf16.msrb.mxu0 %v3598_v30  ;;  %v4051_v26 = vld [vmem:[#allocation13 + $0x24] sm:$0xf0] }
 0x2cd   : > { %v3590_v53 = vor.u32 %v4080_v29, %v3589_v22  ;;  %v3498_v22 = vor.u32 %v4053_v24, %v3495_v0  ;;  %v3502_v29 = vor.u32 %v4057_v58, %v3501_v8  ;;  %v3626_v32 = vor.u32 %v4084_v1, %v3623_v6  ;;  %v4078_v47 = vld [vmem:[#allocation13 + $0x104] sm:$0xf]  ;;  %v3599_v42 = vld [vmem:[#allocation13 + $0x118] sm:$0xf0]  ;;  %v4101_v12 = vld [vmem:[#allocation4 + $0x38] sm:$0xff] }
 0x2ce   : > { %v1806_v7 = vpop.xlane.xlu1 %1805  ;;  %v3474_v44 = vor.u32 %v4047_v23, %v3471_v41  ;;  %v4120_v24 = vld [vmem:[#allocation4 + $0xd0] sm:$0xff]  ;;  %v4095_v0 = vld [vmem:[#allocation4 + $0x8] sm:$0xff]  ;;  %v4102_v1 = vld [vmem:[#allocation4 + $0x40] sm:$0xff] }
 0x2cf   : > { %v1804_v19 = vpop.xlane.xlu0 %1803  ;;  %v2214_v55 = vperm.slane %v1806_v7, %v5981_v9  ;;  %v4088_v9 = vld [vmem:[#allocation13 + $0x154] sm:$0xf]  ;;  %809 = vmatpush.bf16.msra.mxu2 %v3590_v53  ;;  %v3541_v7 = vld [vmem:[#allocation13 + $0x98] sm:$0xf]  ;;  %v4140_v23 = vld [vmem:[#allocation4 + $0x170] sm:$0xff] }
 0x2d0   : > { %v2212_v18 = vperm.slane %v1804_v19, %v5956_v21  ;;  %v3634_v16 = vor.u32 %v4088_v9, %v3631_v49  ;;  %v3607_v21 = vld [vmem:[#allocation13 + $0x138] sm:$0xf0]  ;;  %v3574_v19 = vor.u32 %v4075_v4, %v3573_v20  ;;  %v3487_v9 = vld [vmem:[#allocation13 + $0x48] sm:$0xf0]  ;;  %v3542_v49 = vor.u32 %v4068_v2, %v3541_v7  ;;  %823 = vmatpush.bf16.msra.mxu3 %v3570_v14  ;;  %v4100_v14 = vld [vmem:[#allocation4 + $0x30] sm:$0xff] }
 0x2d1   : > { %v3610_v48 = vor.u32 %v4082_v15, %v3607_v21  ;;  %v3517_v21 = vld [vmem:[#allocation13 + $0x68] sm:$0xf]  ;;  %v4108_v7 = vld [vmem:[#allocation4 + $0x70] sm:$0xff]  ;;  %v4111_v8 = vld [vmem:[#allocation4 + $0x88] sm:$0xff] }
 0x2d2   : > { %v2213_v51 = vsel %vm1993_vm13, %v2212_v18, %v2211_v57  ;;  %794 = vmatpush.bf16.msra.mxu1 %v3634_v16  ;;  %v3549_v57 = vld [vmem:[#allocation13 + $0xa0] sm:$0xf]  ;;  %836 = vmatpush.bf16.msrb.mxu0 %v3574_v19  ;;  %v4109_v20 = vld [vmem:[#allocation4 + $0x78] sm:$0xff]  ;;  %v4119_v58 = vld [vmem:[#allocation4 + $0xc8] sm:$0xff] }
 0x2d3   : > { %v2215_v17 = vsel %vm1997_vm14, %v2214_v55, %v2213_v51  ;;  %v4065_v55 = vld [vmem:[#allocation13 + $0x9c] sm:$0xf]  ;;  %v4069_v51 = vld [vmem:[#allocation13 + $0xb4] sm:$0xf0]  ;;  %810 = vmatpush.bf16.msra.mxu2 %v3566_v63  ;;  %v4117_v4 = vld [vmem:[#allocation4 + $0xb8] sm:$0xff] }
 0x2d4   : > { %v2229_v39 = vsel %vm2228_vm5, %v2215_v17, %v2227_v61  ;;  %v4058_v61 = vld [vmem:[#allocation13 + $0x64] sm:$0xf]  ;;  %v3546_v16 = vor.u32 %v4065_v55, %v3543_v31  ;;  %v3550_v54 = vor.u32 %v4069_v51, %v3549_v57  ;;  %v3575_v63 = vld [vmem:[#allocation13 + $0xe8] sm:$0xf0]  ;;  %v3551_v31 = vld [vmem:[#allocation13 + $0xb8] sm:$0xf0] }
 0x2d5   : > { %v6057_v40 = vsel %vm1809_vm6, %v2229_v39, -1e+30  ;;  %v3514_v18 = vor.u32 %v4058_v61, %v3511_v46  ;;  %v4052_v39 = vld [vmem:[#allocation13 + $0x34] sm:$0xf]  ;;  %v3602_v61 = vor.u32 %v4078_v47, %v3599_v42  ;;  %v4116_v2 = vld [vmem:[#allocation4 + $0xb0] sm:$0xff]  ;;  %v4107_v57 = vld [vmem:[#allocation4 + $0x68] sm:$0xff] }
 0x2d6   : > { %2232 = vmax.xlane.f32.xlu2 %v6057_v40  ;;  %795 = vmatpush.bf16.msra.mxu1 %v3610_v48  ;;  %v4062_v48 = vld [vmem:[#allocation13 + $0x7c] sm:$0xf0]  ;;  %v3490_v50 = vor.u32 %v4052_v39, %v3487_v9  ;;  %v4072_v46 = vld [vmem:[#allocation13 + $0xd4] sm:$0xf]  ;;  %v4066_v55 = vld [vmem:[#allocation13 + $0xa4] sm:$0xf] }
 0x2d7   : > { %811 = vmatpush.bf16.msra.mxu2 %v3542_v49  ;;  %v3518_v37 = vor.u32 %v4062_v48, %v3517_v21  ;;  %824 = vmatpush.bf16.msra.mxu3 %v3546_v16  ;;  %v3578_v19 = vor.u32 %v4072_v46, %v3575_v63  ;;  %v4115_v51 = vld [vmem:[#allocation4 + $0xa8] sm:$0xff]  ;;  %v4060_v39 = vld [vmem:[#allocation13 + $0x74] sm:$0xf]  ;;  %v3527_v9 = vld [vmem:[#allocation13 + $0x88] sm:$0xf0] }
 0x2d8   : > { %837 = vmatpush.bf16.msrb.mxu0 %v3550_v54  ;;  %v4098_v49 = vld [vmem:[#allocation4 + $0x20] sm:$0xff]  ;;  %v3530_v21 = vor.u32 %v4060_v39, %v3527_v9  ;;  %v4054_v48 = vld [vmem:[#allocation13 + $0x44] sm:$0xf]  ;;  %v3503_v54 = vld [vmem:[#allocation13 + $0x58] sm:$0xf0] }
 0x2d9   : > { %v4114_v16 = vld [vmem:[#allocation4 + $0xa0] sm:$0xff]  ;;  %v4148_v41 = vld [vmem:[#allocation4 + $0x1b0] sm:$0xff]  ;;  %v4139_v47 = vld [vmem:[#allocation4 + $0x168] sm:$0xff] }
 0x2da   : > { %796 = vmatpush.bf16.msra.mxu1 %v3586_v36  ;;  %v3463_v36 = vld [vmem:[#allocation13 + $0x18] sm:$0xf0]  ;;  %v4110_v6 = vld [vmem:[#allocation4 + $0x80] sm:$0xff]  ;;  %v4137_v63 = vld [vmem:[#allocation4 + $0x158] sm:$0xff] }
 0x2db   : > { %v3466_v35 = vor.u32 %v4046_v59, %v3463_v36  ;;  %812 = vmatpush.bf16.msra.mxu2 %v3518_v37  ;;  %825 = vmatpush.bf16.msra.mxu3 %v3522_v28  ;;  %v4096_v59 = vld [vmem:[#allocation4 + $0x10] sm:$0xff]  ;;  %v4147_v42 = vld [vmem:[#allocation4 + $0x1a8] sm:$0xff] }
 0x2dc   : > { %838 = vmatpush.bf16.msrb.mxu0 %v3526_v60  ;;  %v4104_v36 = vld [vmem:[#allocation4 + $0x50] sm:$0xff]  ;;  %v4122_v60 = vld [vmem:[#allocation4 + $0xe0] sm:$0xff] }
 0x2dd   : > { %v4112_v37 = vld [vmem:[#allocation4 + $0x90] sm:$0xff] }
 0x2de   : > { %797 = vmatpush.bf16.msra.mxu1 %v3562_v34  ;;  %v3469_v34 = vld [vmem:[#allocation13 + $0x8] sm:$0xf]  ;;  %v4124_v28 = vld [vmem:[#allocation4 + $0xf0] sm:$0xff] }
 0x2df   : > { %813 = vmatpush.bf16.msra.mxu2 %v3494_v10  ;;  %826 = vmatpush.bf16.msra.mxu3 %v3498_v22  ;;  %v3470_v30 = vor.u32 %v4050_v38, %v3469_v34  ;;  %v4118_v10 = vld [vmem:[#allocation4 + $0xc0] sm:$0xff]  ;;  %v4141_v22 = vld [vmem:[#allocation4 + $0x178] sm:$0xff]  ;;  %v4132_v38 = vld [vmem:[#allocation4 + $0x130] sm:$0xff] }
 0x2e0   : > { %839 = vmatpush.bf16.msrb.mxu0 %v3502_v29  ;;  %v4149_v34 = vld [vmem:[#allocation4 + $0x1b8] sm:$0xff]  ;;  %v4152_v39 = vld [vmem:[#allocation4 + $0x1d0] sm:$0xff] }
 0x2e1   : > { %v4157_v29 = vld [vmem:[#allocation4 + $0x1f8] sm:$0xff] }
 0x2e2   : > { %798 = vmatpush.bf16.msra.mxu1 %v3538_v5  ;;  %v3478_v5 = vor.u32 %v4051_v26, %v3477_v43  ;;  %v4156_v43 = vld [vmem:[#allocation4 + $0x1f0] sm:$0xff]  ;;  %v4131_v26 = vld [vmem:[#allocation4 + $0x128] sm:$0xff] }
 0x2e3   : > { %814 = vmatpush.bf16.msra.mxu2 %v3470_v30  ;;  %827 = vmatpush.bf16.msra.mxu3 %v3474_v44  ;;  %v4155_v30 = vld [vmem:[#allocation4 + $0x1e8] sm:$0xff]  ;;  %v4130_v44 = vld [vmem:[#allocation4 + $0x120] sm:$0xff] }
 0x2e4   : > { %840 = vmatpush.bf16.msrb.mxu0 %v3478_v5  ;;  %v4146_v5 = vld [vmem:[#allocation4 + $0x1a0] sm:$0xff] }
 0x2e6   : > { %799 = vmatpush.bf16.msra.mxu1 %v3514_v18  ;;  %815 = vmatmul.bf16.vlgmr.msra.gmra.mxu2 %v5219_v27  ;;  %v4099_v18 = vld [vmem:[#allocation4 + $0x28] sm:$0xff] }
 0x2e7   : > { %2453 = vmatpush.bf16.msrb.mxu2 %v4101_v12  ;;  %2514 = vmatpush.bf16.msrb.mxu3 %v4109_v20  ;;  %v4138_v12 = vld [vmem:[#allocation4 + $0x160] sm:$0xff] }
 0x2e8   : > { %2575 = vmatpush.bf16.msra.mxu0 %v4117_v4  ;;  %828 = vmatmul.bf16.vlgmr.msra.gmra.mxu3 %v5219_v27  ;;  %v4154_v20 = vld [vmem:[#allocation4 + $0x1e0] sm:$0xff] }
 0x2e9   : > { %841 = vmatmul.bf16.vlgmr.msrb.gmra.mxu0 %v5219_v27 }
 0x2ea   : > { %800 = vmatpush.bf16.msra.mxu1 %v3490_v50  ;;  %v3506_v50 = vor.u32 %v4054_v48, %v3503_v54  ;;  %v4143_v54 = vld [vmem:[#allocation4 + $0x188] sm:$0xff] }
 0x2eb   : > { %2454 = vmatpush.bf16.msrb.mxu2 %v4100_v14  ;;  %2515 = vmatpush.bf16.msrb.mxu3 %v4108_v7  ;;  %v4145_v14 = vld [vmem:[#allocation4 + $0x198] sm:$0xff] }
 0x2ec   : > { %2576 = vmatpush.bf16.msra.mxu0 %v4116_v2  ;;  %v4153_v7 = vld [vmem:[#allocation4 + $0x1d8] sm:$0xff] }
 0x2ee   : > { %801 = vmatpush.bf16.msra.mxu1 %v3466_v35  ;;  %v4103_v35 = vld [vmem:[#allocation4 + $0x48] sm:$0xff] }
 0x2ef   : > { %2455 = vmatpush.bf16.msrb.mxu2 %v4099_v18  ;;  %2516 = vmatpush.bf16.msrb.mxu3 %v4107_v57  ;;  %v4136_v57 = vld [vmem:[#allocation4 + $0x150] sm:$0xff] }
 0x2f0   : > { %2577 = vmatpush.bf16.msra.mxu0 %v4115_v51 }
 0x2f1   : > { %802 = vmatmul.bf16.vlgmr.msra.gmra.mxu1 %v5219_v27 }
 0x2f3   : > { %2456 = vmatpush.bf16.msrb.mxu2 %v4098_v49 }
 0x2f4   : > { %2578 = vmatpush.bf16.msra.mxu0 %v4114_v16 }
 0x2f7   : > { %2457 = vmatpush.bf16.msrb.mxu2 %v4097_v52  ;;  %v4151_v52 = vld [vmem:[#allocation4 + $0x1c8] sm:$0xff] }
 0x2fb   : > { %2458 = vmatpush.bf16.msrb.mxu2 %v4096_v59 }
 0x2ff   : > { %2459 = vmatpush.bf16.msrb.mxu2 %v4095_v0 }
 0x349   : > { %v2233_v17 = vpop.xlane.xlu2 %2232 }
 0x34a   : > { %v2234_v15 = vsub.f32 %v6057_v40, %v2233_v17  ;;  %v3647_v40 = vld [vmem:[#allocation13 + $0x178] sm:$0xf0]  ;;  %v3554_v17 = vor.u32 %v4066_v55, %v3551_v31  ;;  %v4128_v55 = vld [vmem:[#allocation4 + $0x110] sm:$0xff] }
 0x34b   : > { %v3650_v13 = vor.u32 %v4090_v56, %v3647_v40  ;;  %v3482_v56 = vor.u32 %v4048_v11, %v3479_v25  ;;  %v4125_v40 = vld [vmem:[#allocation4 + $0xf8] sm:$0xff] }
 0x34c   : > { %v2235_v45 = vmul.f32 1.442695, %v2234_v15  ;;  %v4106_v15 = vld [vmem:[#allocation4 + $0x60] sm:$0xff] }
 0x34d   : > { %846 = vmatpush.bf16.msrb.mxu1 %v3650_v13  ;;  %2517 = vmatpush.bf16.msrb.mxu3 %v4106_v15  ;;  %v4094_v13 = vld [vmem:[#allocation4] sm:$0xff]  ;;  %v4127_v15 = vld [vmem:[#allocation4 + $0x108] sm:$0xff] }
 0x34e   : > { %4629 = vpow2.f32 %v2235_v45  ;;  %v4113_v45 = vld [vmem:[#allocation4 + $0x98] sm:$0xff]  ;;  %2460 = vmatpush.bf16.msrb.mxu2 %v4094_v13 }
 0x34f   : > { %2579 = vmatpush.bf16.msra.mxu0 %v4113_v45  ;;  %v4126_v45 = vld [vmem:[#allocation4 + $0x100] sm:$0xff] }
 0x351   : > { %847 = vmatpush.bf16.msrb.mxu1 %v3626_v32  ;;  %2518 = vmatpush.bf16.msrb.mxu3 %v4105_v33 }
 0x353   : > { %2580 = vmatpush.bf16.msra.mxu0 %v4112_v37 }
 0x354   : > { %v6061_v53 = vpop.eup %4629 }
 0x355   : > { %2237 = vadd.xlane.f32.xlu0 %v6061_v53  ;;  %848 = vmatpush.bf16.msrb.mxu1 %v3602_v61  ;;  %v4129_v61 = vld [vmem:[#allocation4 + $0x118] sm:$0xff] }
 0x356   : > { %2519 = vmatpush.bf16.msrb.mxu3 %v4104_v36 }
 0x357   : > { %2581 = vmatpush.bf16.msra.mxu0 %v4111_v8 }
 0x359   : > { %849 = vmatpush.bf16.msrb.mxu1 %v3578_v19 }
 0x35a   : > { %2520 = vmatpush.bf16.msrb.mxu3 %v4103_v35 }
 0x35b   : > { %2582 = vmatpush.bf16.msra.mxu0 %v4110_v6 }
 0x35d   : > { %850 = vmatpush.bf16.msrb.mxu1 %v3554_v17  ;;  %v4144_v17 = vld [vmem:[#allocation4 + $0x190] sm:$0xff] }
 0x35e   : > { %2521 = vmatpush.bf16.msrb.mxu3 %v4102_v1 }
 0x35f   : > { %2819 = vmatpush.bf16.msrb.mxu0 %v4149_v34 }
 0x361   : > { %851 = vmatpush.bf16.msrb.mxu1 %v3530_v21  ;;  %v4135_v21 = vld [vmem:[#allocation4 + $0x148] sm:$0xff] }
 0x362   : > { %2758 = vmatpush.bf16.msra.mxu3 %v4141_v22 }
 0x363   : > { %2820 = vmatpush.bf16.msrb.mxu0 %v4148_v41  ;;  %v4022_v41 = vld [vmem:[#allocation14 + $0xe0] sm:$0xf] }
 0x365   : > { %852 = vmatpush.bf16.msrb.mxu1 %v3506_v50 }
 0x366   : > { %2759 = vmatpush.bf16.msra.mxu3 %v4140_v23  ;;  %v6072_v50 = vpop.f32.mrf.mxu0  ;;  %v4628_v23 = vld [vmem:[%s6192_s6] ss:$0 sm:$0xff] }
 0x367   : > { %2821 = vmatpush.bf16.msrb.mxu0 %v4147_v42  ;;  %v4030_v42 = vld [vmem:[#allocation14 + $0xe8] sm:$0xf] }
 0x369   : > { %853 = vmatpush.bf16.msrb.mxu1 %v3482_v56  ;;  %v4134_v56 = vld [vmem:[#allocation4 + $0x140] sm:$0xff] }
 0x36a   : > { %2760 = vmatpush.bf16.msra.mxu3 %v4139_v47  ;;  %v4024_v47 = vld [vmem:[#allocation14 + $0xf0] sm:$0xf0] }
 0x36b   : > { %2822 = vmatpush.bf16.msrb.mxu0 %v4146_v5  ;;  %v4187_v5 = vld [vmem:[#allocation14 + $0xec] sm:$0xf] }
 0x36c   : > { %854 = vmatmul.bf16.vlgmr.msrb.gmra.mxu1 %v5219_v27  ;;  %v4133_v27 = vld [vmem:[#allocation4 + $0x138] sm:$0xff] }
 0x36d   : > { %2636 = vmatpush.bf16.msra.mxu1 %v4125_v40  ;;  %2697 = vmatpush.bf16.msra.mxu2 %v4133_v27 }
 0x36e   : > { %2761 = vmatpush.bf16.msra.mxu3 %v4138_v12  ;;  %v6069_v51 = vpop.f32.mrf.mxu1  ;;  %v844_v0 = vpop.f32.mrf.mxu0 }
 0x36f   : > { %2823 = vmatpush.bf16.msrb.mxu0 %v4145_v14  ;;  %v4182_v14 = vld [vmem:[#allocation14 + $0xc4] sm:$0xf] }
 0x371   : > { %2637 = vmatpush.bf16.msra.mxu1 %v4124_v28  ;;  %2698 = vmatpush.bf16.msra.mxu2 %v4132_v38 }
 0x372   : > { %2762 = vmatpush.bf16.msra.mxu3 %v4137_v63  ;;  %v4184_v63 = vld [vmem:[#allocation14 + $0xcc] sm:$0xf0] }
 0x373   : > { %2824 = vmatpush.bf16.msrb.mxu0 %v4144_v17  ;;  %v4016_v17 = vld [vmem:[#allocation14 + $0xd8] sm:$0xf0] }
 0x375   : > { %2638 = vmatpush.bf16.msra.mxu1 %v4123_v3  ;;  %2699 = vmatpush.bf16.msra.mxu2 %v4131_v26  ;;  %v4186_v26 = vld [vmem:[#allocation14 + $0xe4] sm:$0xf] }
 0x376   : > { %2763 = vmatpush.bf16.msra.mxu3 %v4136_v57  ;;  %v805_v37 = vpop.f32.mrf.mxu1 }
 0x377   : > { %2825 = vmatpush.bf16.msrb.mxu0 %v4143_v54  ;;  %v4181_v54 = vld [vmem:[#allocation14 + $0xb4] sm:$0xf0]  ;;  %v4174_v37 = vld [vmem:[#allocation14 + $0x84] sm:$0xf] }
 0x379   : > { %2639 = vmatpush.bf16.msra.mxu1 %v4122_v60  ;;  %2700 = vmatpush.bf16.msra.mxu2 %v4130_v44  ;;  %v4142_v60 = vld [vmem:[#allocation4 + $0x180] sm:$0xff]  ;;  %v4027_v44 = vor.u32 %v4186_v26, %v4024_v47 }
 0x37a   : > { %2764 = vmatpush.bf16.msra.mxu3 %v4135_v21  ;;  %v3992_v21 = vld [vmem:[#allocation14 + $0xb0] sm:$0xf0]  ;;  %v4168_v47 = vld [vmem:[#allocation14 + $0x4c] sm:$0xf0] }
 0x37b   : > { %2826 = vmatpush.bf16.msrb.mxu0 %v4142_v60  ;;  %v4177_v60 = vld [vmem:[#allocation14 + $0x94] sm:$0xf0] }
 0x37d   : > { %2640 = vmatpush.bf16.msra.mxu1 %v4121_v62  ;;  %2701 = vmatpush.bf16.msra.mxu2 %v4129_v61  ;;  %v6075_v62 = vpop.f32.mrf.mxu2  ;;  %v863_v61 = vadd.f32 %v4628_v23, %v6069_v51  ;;  %v3990_v51 = vld [vmem:[#allocation14 + $0xa0] sm:$0xf]  ;;  %v4171_v23 = vld [vmem:[#allocation14 + $0x6c] sm:$0xf] }
 0x37e   : > { %2765 = vmatpush.bf16.msra.mxu3 %v4134_v56  ;;  %v3976_v56 = vld [vmem:[#allocation14 + $0x90] sm:$0xf0] }
 0x381   : > { %2641 = vmatpush.bf16.msra.mxu1 %v4120_v24  ;;  %2702 = vmatpush.bf16.msra.mxu2 %v4128_v55  ;;  %v6077_v24 = vpop.f32.mrf.mxu3  ;;  %v4014_v55 = vld [vmem:[#allocation14 + $0xc8] sm:$0xf] }
 0x385   : > { %2642 = vmatpush.bf16.msra.mxu1 %v4119_v58  ;;  %2703 = vmatpush.bf16.msra.mxu2 %v4127_v15  ;;  %v818_v8 = vpop.f32.mrf.mxu2  ;;  %v4178_v15 = vld [vmem:[#allocation14 + $0xa4] sm:$0xf] }
 0x389   : > { %2643 = vmatpush.bf16.msra.mxu1 %v4118_v10  ;;  %2704 = vmatpush.bf16.msra.mxu2 %v4126_v45  ;;  %v831_v58 = vpop.f32.mrf.mxu3  ;;  %v4179_v45 = vld [vmem:[#allocation14 + $0xac] sm:$0xf] }
 0x38a   : > { %v3958_v58 = vld [vmem:[#allocation14 + $0x60] sm:$0xf] }
 0x38d   : > { %2880 = vmatpush.bf16.msrb.mxu1 %v4157_v29 }
 0x391   : > { %2881 = vmatpush.bf16.msrb.mxu1 %v4156_v43  ;;  %v4188_v43 = vld [vmem:[#allocation14 + $0xec] sm:$0xf0] }
 0x395   : > { %2882 = vmatpush.bf16.msrb.mxu1 %v4155_v30  ;;  %v4189_v30 = vld [vmem:[#allocation14 + $0xf4] sm:$0xf0] }
 0x396   : > { %v4031_v12 = vor.u32 %v4189_v30, %v4030_v42  ;;  %v4166_v42 = vld [vmem:[#allocation14 + $0x44] sm:$0xf] }
 0x399   : > { %2883 = vmatpush.bf16.msrb.mxu1 %v4154_v20  ;;  %v4032_v20 = vld [vmem:[#allocation14 + $0xf8] sm:$0xf0] }
 0x39d   : > { %2884 = vmatpush.bf16.msrb.mxu1 %v4153_v7  ;;  %v4008_v7 = vld [vmem:[#allocation14 + $0xd0] sm:$0xf0] }
 0x3a1   : > { %2885 = vmatpush.bf16.msrb.mxu1 %v4152_v39 }
 0x3a5   : > { %2886 = vmatpush.bf16.msrb.mxu1 %v4151_v52  ;;  %v3995_v52 = vor.u32 %v4178_v15, %v3992_v21  ;;  %v4158_v21 = vld [vmem:[#allocation14 + $0x4] sm:$0xf] }
 0x3c8   : > { %v2238_v32 = vpop.xlane.xlu0 %2237 }
 0x3c9   : > { %4631 = vrcp.f32 %v2238_v32  ;;  %v2250_v19 = vand.u32 2147483648, %v2238_v32  ;;  %v2248_v18 = vand.u32 2147483647, %v2238_v32  ;;  %vm2244_vm8 = vweird.f32 %v2238_v32 }
 0x3cb   : > { %v2251_v49 = vor.u32 1.1754944e-38, %v2250_v19  ;;  %vm2249_vm10 = vcmp.eq.f32.partialorder %v2248_v18, 8.507059e+37  ;;  %v4011_v19 = vor.u32 %v4182_v14, %v4008_v7  ;;  %v4183_v18 = vld [vmem:[#allocation14 + $0xcc] sm:$0xf]  ;;  %v3926_v7 = vld [vmem:[#allocation14 + $0x20] sm:$0xf] }
 0x3cc   : > { %v4019_v39 = vor.u32 %v4183_v18, %v4016_v17  ;;  %v3934_v18 = vld [vmem:[#allocation14 + $0x28] sm:$0xf] }
 0x3cf   : > { %v4632_v4 = vpop.eup %4631 }
 0x3d0   : > { %v2240_v46 = vmul.f32 %v4632_v4, %v2238_v32  ;;  %vm2245_vm7 = vweird.f32 %v4632_v4  ;;  %v4023_v32 = vor.u32 %v4188_v43, %v4022_v41  ;;  %v3968_v41 = vld [vmem:[#allocation14 + $0x78] sm:$0xf0] }
 0x3d1   : > { %vm2246_vm9 = vmor %vm2244_vm8, %vm2245_vm7  ;;  %v3971_v43 = vor.u32 %v4171_v23, %v3968_v41 }
 0x3d2   : > { %v2241_v2 = vsub.f32 1.0, %v2240_v46  ;;  %v4035_v46 = vor.u32 %v4187_v5, %v4032_v20  ;;  %v4169_v5 = vld [vmem:[#allocation14 + $0x54] sm:$0xf0] }
 0x3d4   : > { %v2242_v31 = vmul.f32 %v4632_v4, %v2241_v2 }
 0x3d6   : > { %v2243_v9 = vadd.f32 %v4632_v4, %v2242_v31  ;;  %v4185_v31 = vld [vmem:[#allocation14 + $0xd4] sm:$0xf0] }
 0x3d7   : > { %v4015_v57 = vor.u32 %v4185_v31, %v4014_v55  ;;  %v3928_v31 = vld [vmem:[#allocation14 + $0x30] sm:$0xf0] }
 0x3d8   : > { %v2247_v16 = vsel %vm2246_vm9, %v4632_v4, %v2243_v9  ;;  %v4006_v4 = vld [vmem:[#allocation14 + $0xc0] sm:$0xf]  ;;  %v3651_v9 = vmul.f32 -1.442695, %v863_v61 }
 0x3d9   : > { %v2252_v48 = vsel %vm2249_vm10, %v2251_v49, %v2247_v16  ;;  %v4007_v2 = vor.u32 %v4184_v63, %v4006_v4  ;;  %v4180_v49 = vld [vmem:[#allocation14 + $0xac] sm:$0xf0]  ;;  %v3952_v63 = vld [vmem:[#allocation14 + $0x58] sm:$0xf0] }
 0x3da   : > { %v2253_v33 = vmul.f32 %v6061_v53, %v2252_v48  ;;  %v4150_v53 = vld [vmem:[#allocation4 + $0x1c0] sm:$0xff]  ;;  %v3991_v16 = vor.u32 %v4180_v49, %v3990_v51  ;;  %v3998_v48 = vld [vmem:[#allocation14 + $0xa8] sm:$0xf]  ;;  %4633 = vpow2.f32 %v3651_v9  ;;  %v4163_v9 = vld [vmem:[#allocation14 + $0x2c] sm:$0xf] }
 0x3db   : > { %2887 = vmatpush.bf16.msrb.mxu1 %v4150_v53  ;;  %v4175_v53 = vld [vmem:[#allocation14 + $0x8c] sm:$0xf]  ;;  %v3936_v51 = vld [vmem:[#allocation14 + $0x38] sm:$0xf0]  ;;  %v3910_v49 = vld [vmem:[#allocation14] sm:$0xf] }
 0x3dc   : > { %3240 = vst [vmem:[%s5215_s25] sm:$0xff] %v2253_v33  ;;  %v2269_v11 = vpack.c.bf16 %v2253_v33, %v2253_v33  ;;  %v2255_v25 = vrot.slane %v2253_v33, 1  ;;  %v2256_v59 = vrot.slane %v2253_v33, 2  ;;  %v2257_v36 = vrot.slane %v2253_v33, 3 }
 0x3dd   : > { %v2258_v35 = vrot.slane %v2253_v33, 4  ;;  %v2259_v13 = vrot.slane %v2253_v33, 5  ;;  %v2260_v1 = vrot.slane %v2253_v33, 6  ;;  %v2261_v27 = vrot.slane %v2253_v33, 7 }
 0x3de   : > { %2461 = vmatmul.bf16.vlgmr.msrb.gmra.mxu2 %v2269_v11  ;;  %v2270_v40 = vpack.c.bf16 %v2255_v25, %v2255_v25  ;;  %v2271_v28 = vpack.c.bf16 %v2256_v59, %v2256_v59  ;;  %v2272_v3 = vpack.c.bf16 %v2257_v36, %v2257_v36  ;;  %v3999_v33 = vor.u32 %v4181_v54, %v3998_v48  ;;  %v4000_v11 = vld [vmem:[#allocation14 + $0xb8] sm:$0xf0]  ;;  %v3974_v25 = vld [vmem:[#allocation14 + $0x80] sm:$0xf]  ;;  %v4176_v36 = vld [vmem:[#allocation14 + $0x8c] sm:$0xf0] }
 0x3df   : > { %v2273_v6 = vpack.c.bf16 %v2258_v35, %v2258_v35  ;;  %v2274_v10 = vpack.c.bf16 %v2259_v13, %v2259_v13  ;;  %v2275_v22 = vpack.c.bf16 %v2260_v1, %v2260_v1  ;;  %v2276_v34 = vpack.c.bf16 %v2261_v27, %v2261_v27  ;;  %3114 = vmatpush.bf16.msrb.mxu2 %v4023_v32  ;;  %v3984_v35 = vld [vmem:[#allocation14 + $0x98] sm:$0xf0]  ;;  %v4172_v13 = vld [vmem:[#allocation14 + $0x6c] sm:$0xf0]  ;;  %v4170_v1 = vld [vmem:[#allocation14 + $0x64] sm:$0xf] }
 0x3e0   : > { %2522 = vmatmul.bf16.vlgmr.msrb.gmra.mxu3 %v2270_v40  ;;  %2583 = vmatmul.bf16.vlgmr.msra.gmra.mxu0 %v2271_v28  ;;  %v4003_v59 = vor.u32 %v4179_v45, %v4000_v11  ;;  %v3975_v40 = vor.u32 %v4176_v36, %v3974_v25  ;;  %v3979_v28 = vor.u32 %v4174_v37, %v3976_v56  ;;  %v4634_v26 = vpop.eup %4633  ;;  %v3942_v32 = vld [vmem:[#allocation14 + $0x40] sm:$0xf]  ;;  %v3912_v48 = vld [vmem:[#allocation14 + $0x10] sm:$0xf0]  ;;  %v4159_v45 = vld [vmem:[#allocation14 + $0xc] sm:$0xf] }
 0x3e1   : > { %2644 = vmatmul.bf16.vlgmr.msra.gmra.mxu1 %v2272_v3  ;;  %3127 = vmatpush.bf16.msrb.mxu3 %v4027_v44  ;;  %v3982_v3 = vld [vmem:[#allocation14 + $0x88] sm:$0xf]  ;;  %v3987_v8 = vor.u32 %v4175_v53, %v3984_v35  ;;  %v3959_v27 = vor.u32 %v4172_v13, %v3958_v58  ;;  %v3943_v30 = vor.u32 %v4168_v47, %v3942_v32  ;;  %v3944_v44 = vld [vmem:[#allocation14 + $0x50] sm:$0xf0]  ;;  %v6085_v20 = vadd.f32 1.0, %v4634_v26 }
 0x3e2   : > { %3140 = vmatpush.bf16.msra.mxu0 %v4031_v12  ;;  %3153 = vmatpush.bf16.msra.mxu1 %v4035_v46  ;;  %v3983_v0 = vor.u32 %v4177_v60, %v3982_v3  ;;  %v3950_v12 = vld [vmem:[#allocation14 + $0x48] sm:$0xf]  ;;  %v3947_v4 = vor.u32 %v4166_v42, %v3944_v44  ;;  %v4167_v46 = vld [vmem:[#allocation14 + $0x4c] sm:$0xf]  ;;  %v3939_v15 = vor.u32 %v4163_v9, %v3936_v51 }
 0x3e3   : > { %3115 = vmatpush.bf16.msrb.mxu2 %v4007_v2  ;;  %v3951_v61 = vor.u32 %v4169_v5, %v3950_v12  ;;  %v3955_v14 = vor.u32 %v4167_v46, %v3952_v63  ;;  %v4164_v2 = vld [vmem:[#allocation14 + $0x2c] sm:$0xf0]  ;;  %4635 = vrcp.f32 %v6085_v20  ;;  %v3915_v11 = vor.u32 %v4158_v21, %v3912_v48 }
 0x3e4   : > { %v3927_v55 = vor.u32 %v4164_v2, %v3926_v7  ;;  %vm873_vm11 = vweird.f32 %v6085_v20  ;;  %v877_v26 = vand.u32 2147483647, %v6085_v20 }
 0x3e5   : > { %3128 = vmatpush.bf16.msrb.mxu3 %v4011_v19  ;;  %v4162_v19 = vld [vmem:[#allocation14 + $0x24] sm:$0xf] }
 0x3e6   : > { %3141 = vmatpush.bf16.msra.mxu0 %v4015_v57  ;;  %3154 = vmatpush.bf16.msra.mxu1 %v4019_v39  ;;  %v4165_v57 = vld [vmem:[#allocation14 + $0x34] sm:$0xf0]  ;;  %v3931_v17 = vor.u32 %v4162_v19, %v3928_v31  ;;  %vm878_vm14 = vcmp.eq.f32.partialorder %v877_v26, 8.507059e+37 }
 0x3e7   : > { %3116 = vmatpush.bf16.msrb.mxu2 %v3991_v16  ;;  %v3935_v39 = vor.u32 %v4165_v57, %v3934_v18  ;;  %v4160_v16 = vld [vmem:[#allocation14 + $0xc] sm:$0xf0] }
 0x3e8   : > { %v3911_v54 = vor.u32 %v4160_v16, %v3910_v49 }
 0x3e9   : > { %v6079_v29 = vpop.f32.mrf.mxu1  ;;  %3129 = vmatpush.bf16.msrb.mxu3 %v3995_v52  ;;  %v3918_v52 = vld [vmem:[#allocation14 + $0x8] sm:$0xf] }
 0x3ea   : > { %3142 = vmatpush.bf16.msra.mxu0 %v3999_v33  ;;  %3155 = vmatpush.bf16.msra.mxu1 %v4003_v59  ;;  %v4161_v33 = vld [vmem:[#allocation14 + $0x14] sm:$0xf0]  ;;  %v3920_v59 = vld [vmem:[#allocation14 + $0x18] sm:$0xf0] }
 0x3eb   : > { %3117 = vmatpush.bf16.msrb.mxu2 %v3975_v40  ;;  %v3919_v25 = vor.u32 %v4161_v33, %v3918_v52  ;;  %v3923_v37 = vor.u32 %v4159_v45, %v3920_v59 }
 0x3ed   : > { %3130 = vmatpush.bf16.msrb.mxu3 %v3979_v28  ;;  %v4636_v28 = vpop.eup %4635 }
 0x3ee   : > { %2705 = vmatmul.bf16.vlgmr.msra.gmra.mxu2 %v2273_v6  ;;  %3143 = vmatpush.bf16.msra.mxu0 %v3983_v0  ;;  %v3960_v6 = vld [vmem:[#allocation14 + $0x70] sm:$0xf0]  ;;  %v869_v60 = vmul.f32 %v4636_v28, %v6085_v20  ;;  %vm874_vm12 = vweird.f32 %v4636_v28 }
 0x3ef   : > { %3156 = vmatpush.bf16.msra.mxu1 %v3987_v8  ;;  %3118 = vmatpush.bf16.msrb.mxu2 %v3959_v27  ;;  %vm875_vm13 = vmor %vm873_vm11, %vm874_vm12 }
 0x3f0   : > { %2766 = vmatmul.bf16.vlgmr.msra.gmra.mxu3 %v2274_v10  ;;  %2827 = vmatmul.bf16.vlgmr.msrb.gmra.mxu0 %v2275_v22  ;;  %v3966_v10 = vld [vmem:[#allocation14 + $0x68] sm:$0xf]  ;;  %v4173_v22 = vld [vmem:[#allocation14 + $0x74] sm:$0xf0]  ;;  %v870_v35 = vsub.f32 1.0, %v869_v60 }
 0x3f1   : > { %2888 = vmatmul.bf16.vlgmr.msrb.gmra.mxu1 %v2276_v34  ;;  %v857_v38 = vpop.f32.mrf.mxu1  ;;  %v3963_v34 = vor.u32 %v4170_v1, %v3960_v6 }
 0x3f2   : > { %v3967_v38 = vor.u32 %v4173_v22, %v3966_v10  ;;  %v871_v6 = vmul.f32 %v4636_v28, %v870_v35 }
 0x3f3   : > { %3131 = vmatpush.bf16.msrb.mxu3 %v3963_v34  ;;  %3157 = vmatpush.bf16.msra.mxu1 %v3971_v43 }
 0x3f4   : > { %3144 = vmatpush.bf16.msra.mxu0 %v3967_v38  ;;  %3119 = vmatpush.bf16.msrb.mxu2 %v3943_v30  ;;  %v879_v38 = vand.u32 2147483648, %v6085_v20  ;;  %v872_v43 = vadd.f32 %v4636_v28, %v871_v6 }
 0x3f6   : > { %v880_v12 = vor.u32 1.1754944e-38, %v879_v38 }
 0x3f7   : > { %3132 = vmatpush.bf16.msrb.mxu3 %v3947_v4  ;;  %3158 = vmatpush.bf16.msra.mxu1 %v3955_v14 }
 0x3f8   : > { %3145 = vmatpush.bf16.msra.mxu0 %v3951_v61  ;;  %3120 = vmatpush.bf16.msrb.mxu2 %v3927_v55  ;;  %v876_v61 = vsel %vm875_vm13, %v4636_v28, %v872_v43 }
 0x3f9   : > { %v881_v7 = vsel %vm878_vm14, %v880_v12, %v876_v61 }
 0x3fb   : > { %3133 = vmatpush.bf16.msrb.mxu3 %v3931_v17  ;;  %3159 = vmatpush.bf16.msra.mxu1 %v3939_v15 }
 0x3fc   : > { %3146 = vmatpush.bf16.msra.mxu0 %v3935_v39  ;;  %3121 = vmatpush.bf16.msrb.mxu2 %v3911_v54 }
 0x3ff   : > { %3134 = vmatpush.bf16.msrb.mxu3 %v3915_v11  ;;  %3160 = vmatpush.bf16.msra.mxu1 %v3923_v37 }
 0x400   : > { %3147 = vmatpush.bf16.msra.mxu0 %v3919_v25 }
 0x45d   : > { %v2584_v36 = vpop.f32.mrf.mxu0 }
 0x45e   : > { %v2645_v56 = vpop.f32.mrf.mxu1  ;;  %v2903_v10 = vrot.slane %v2584_v36, 6 }
 0x45f   : > { %v2905_v23 = vrot.slane %v2645_v56, 5 }
 0x461   : > { %v2462_v40 = vpop.f32.mrf.mxu2 }
 0x463   : > { %v2523_v3 = vpop.f32.mrf.mxu3 }
 0x464   : > { %v2901_v8 = vrot.slane %v2523_v3, 7 }
 0x465   : > { %v2586_v53 = vpop.f32.mrf.mxu0 }
 0x466   : > { %v2647_v0 = vpop.f32.mrf.mxu1  ;;  %v2902_v1 = vsel %vm2216_vm15, %v2901_v8, %v2462_v40 }
 0x467   : > { %v2904_v34 = vsel %vm2218_vm0, %v2903_v10, %v2902_v1 }
 0x468   : > { %v2906_v47 = vsel %vm2220_vm1, %v2905_v23, %v2904_v34 }
 0x469   : > { %v2464_v58 = vpop.f32.mrf.mxu2 }
 0x46b   : > { %v2525_v13 = vpop.f32.mrf.mxu3 }
 0x46d   : > { %v2828_v27 = vpop.f32.mrf.mxu0 }
 0x46e   : > { %v2889_v22 = vpop.f32.mrf.mxu1  ;;  %v2911_v5 = vrot.slane %v2828_v27, 2 }
 0x46f   : > { %v2913_v46 = vrot.slane %v2889_v22, 1 }
 0x471   : > { %v2706_v41 = vpop.f32.mrf.mxu2 }
 0x472   : > { %v2907_v32 = vrot.slane %v2706_v41, 4 }
 0x473   : > { %v2767_v42 = vpop.f32.mrf.mxu3 }
 0x474   : > { %v2908_v30 = vsel %vm2222_vm2, %v2907_v32, %v2906_v47  ;;  %v2909_v44 = vrot.slane %v2767_v42, 3 }
 0x475   : > { %v2830_v4 = vpop.f32.mrf.mxu0 }
 0x476   : > { %v2910_v63 = vsel %vm2224_vm3, %v2909_v44, %v2908_v30  ;;  %v2891_v20 = vpop.f32.mrf.mxu1 }
 0x477   : > { %v2912_v14 = vsel %vm2226_vm4, %v2911_v5, %v2910_v63 }
 0x478   : > { %v2914_v2 = vsel %vm2228_vm5, %v2913_v46, %v2912_v14 }
 0x479   : > { %v2708_v19 = vpop.f32.mrf.mxu2  ;;  %v2916_v55 = vmul.f32 %v2914_v2, %v881_v7 }
 0x47b   : > { %v2769_v31 = vpop.f32.mrf.mxu3  ;;  %v2921_v18 = vpack.c.bf16 %v2916_v55, %v2916_v55 }
 0x47d   : > { %3122 = vmatmul.bf16.vlgmr.msrb.gmra.mxu2 %v2921_v18  ;;  %3135 = vmatmul.bf16.vlgmr.msrb.gmra.mxu3 %v2921_v18 }
 0x47e   : > { %3148 = vmatmul.bf16.vlgmr.msra.gmra.mxu0 %v2921_v18  ;;  %3161 = vmatmul.bf16.vlgmr.msra.gmra.mxu1 %v2921_v18 }
 0x47f   : > { %4891 = shalt.err (!%p4888_p10)
}
 0x480   : > { %4536 = dma.vmem_to_hbm [thread:$0]  (%p5147_p5), %s3274_s1, 128, %s3276_s23, %s3247_s29   ;;  %v2920_v57 = vld [vmem:[%s5194_s22 + $0x18] sm:$0xff]  ;;  %v2917_v49 = vld [vmem:[%s5194_s22] sm:$0xff]  ;;  %v2918_v15 = vld [vmem:[%s5194_s22 + $0x8] sm:$0xff] }
 0x481   : > { %v2919_v53 = vld [vmem:[%s5194_s22 + $0x10] sm:$0xff]  ;;  %v491_v30 = vld [vmem:[#allocation3] sm:$0xff]  ;;  %s3257_s22 = scalar_lea.hbm %s6169_s9, %s4041_s27  ;;  %s3259_s25 = sshll.u32 %s5213_s24, 4  ;;  %s3260_s25 = int_to_ptr.vmem [resolvable:$true] %s3259_s25 }
 0x482   : > { %s3261_s18 = sshll.u32 %s3257_s22, 4  ;;  %s3242_s5 = scalar_lea.sflag [#allocation6], %s5191_s3  ;;  %s3262_s18 = int_to_ptr.hbm [resolvable:$true] %s3261_s18 }
 0x483   : > { %s4906_s21 = sshra.s32 %s3262_s18, 4  ;;  %s4912_s23 = scalar_lea.hbm %s6169_s9, 64  ;;  %s4907_s21 = int_to_ptr.hbm [resolvable:$true] %s4906_s21 }
 0x484   : > { %s4908_s20 = scalar_lea.hbm %s4907_s21, 8  ;;  %p4913_p2 = scmp.lt.s32.totalorder %s4907_s21, %s6169_s9 }
 0x485   : > { %p4909_p12 = scmp.ne.s32.totalorder %s4907_s21, %s4908_s20  ;;  %p4914_p3 = scmp.lt.s32.totalorder %s4912_s23, %s4908_s20 }
 0x487   : > { %p4910_p13 = pnand %p4909_p12, %p5147_p5  ;;  %p4915_p1 = por %p4914_p3, %p4913_p2 }
 0x489   : > { %p4911_p0 = pneg %p4910_p13 }
 0x48b   : > { %p4916_p4 = pnand %p4915_p1, %p4911_p0 }
 0x4fb   : > { %v3149_v17 = vpop.f32.mrf.mxu0  ;;  %v3162_v39 = vpop.f32.mrf.mxu1 }
 0x4fc   : > { %v3169_v9 = vadd.f32 %v3162_v39, %v2920_v57 }
 0x4fe   : > { %v3173_v51 = vadd.f32 %v3169_v9, %v6079_v29 }
 0x500   : > { %v4038_v16 = vmul.f32 -1.442695, %v3173_v51  ;;  %v3123_v21 = vpop.f32.mrf.mxu2  ;;  %v3136_v48 = vpop.f32.mrf.mxu3 }
 0x501   : > { %v3166_v54 = vadd.f32 %v3123_v21, %v2917_v49  ;;  %v3167_v52 = vadd.f32 %v3136_v48, %v2918_v15 }
 0x502   : > { %4637 = vpow2.f32 %v4038_v16 }
 0x503   : > { %v3170_v33 = vadd.f32 %v3166_v54, %v6075_v62  ;;  %v3171_v45 = vadd.f32 %v3167_v52, %v6077_v24  ;;  %v3151_v11 = vpop.f32.mrf.mxu0  ;;  %v3164_v25 = vpop.f32.mrf.mxu1  ;;  %v3168_v62 = vadd.f32 %v3149_v17, %v2919_v53 }
 0x505   : > { %v4036_v59 = vmul.f32 -1.442695, %v3170_v33  ;;  %v4037_v36 = vmul.f32 -1.442695, %v3171_v45  ;;  %v3172_v8 = vadd.f32 %v3168_v62, %v6072_v50 }
 0x507   : > { %4639 = vpow2.f32 %v4036_v59 }
 0x508   : > { %v4638_v37 = vpop.eup %4637  ;;  %4641 = vpow2.f32 %v4037_v36  ;;  %v3125_v29 = vpop.f32.mrf.mxu2 }
 0x509   : > { %v3138_v56 = vpop.f32.mrf.mxu3  ;;  %v3216_v40 = vadd.f32 1.0, %v4638_v37 }
 0x50b   : > { %4643 = vrcp.f32 %v3216_v40  ;;  %v3228_v2 = vand.u32 2147483648, %v3216_v40  ;;  %vm3222_vm8 = vweird.f32 %v3216_v40  ;;  %v3226_v19 = vand.u32 2147483647, %v3216_v40 }
 0x50d   : > { %v4640_v28 = vpop.eup %4639  ;;  %v3229_v31 = vor.u32 1.1754944e-38, %v3228_v2  ;;  %vm3227_vm10 = vcmp.eq.f32.partialorder %v3226_v19, 8.507059e+37 }
 0x50e   : > { %v4642_v3 = vpop.eup %4641  ;;  %v3177_v60 = vadd.f32 1.0, %v4640_v28 }
 0x50f   : > { %v3196_v0 = vadd.f32 1.0, %v4642_v3 }
 0x510   : > { %4645 = vrcp.f32 %v3177_v60  ;;  %v3189_v10 = vand.u32 2147483648, %v3177_v60  ;;  %v3187_v38 = vand.u32 2147483647, %v3177_v60  ;;  %vm3183_vm1 = vweird.f32 %v3177_v60 }
 0x511   : > { %4647 = vrcp.f32 %v3196_v0  ;;  %v4644_v24 = vpop.eup %4643  ;;  %v3208_v23 = vand.u32 2147483648, %v3196_v0  ;;  %v3206_v43 = vand.u32 2147483647, %v3196_v0  ;;  %vm3202_vm3 = vweird.f32 %v3196_v0 }
 0x512   : > { %v3218_v6 = vmul.f32 %v4644_v24, %v3216_v40  ;;  %4649 = vtanh.f32 %v3172_v8  ;;  %v3190_v50 = vor.u32 1.1754944e-38, %v3189_v10  ;;  %vm3188_vm4 = vcmp.eq.f32.partialorder %v3187_v38, 8.507059e+37 }
 0x513   : > { %v3209_v42 = vor.u32 1.1754944e-38, %v3208_v23  ;;  %vm3207_vm6 = vcmp.eq.f32.partialorder %v3206_v43, 8.507059e+37  ;;  %vm3223_vm7 = vweird.f32 %v4644_v24 }
 0x514   : > { %v3219_v32 = vsub.f32 1.0, %v3218_v6  ;;  %vm3224_vm9 = vmor %vm3222_vm8, %vm3223_vm7 }
 0x516   : > { %v4646_v35 = vpop.eup %4645  ;;  %v3220_v46 = vmul.f32 %v4644_v24, %v3219_v32 }
 0x517   : > { %v4648_v58 = vpop.eup %4647  ;;  %v3179_v13 = vmul.f32 %v4646_v35, %v3177_v60  ;;  %vm3184_vm15 = vweird.f32 %v4646_v35 }
 0x518   : > { %v3198_v1 = vmul.f32 %v4648_v58, %v3196_v0  ;;  %vm3203_vm0 = vweird.f32 %v4648_v58  ;;  %vm3185_vm2 = vmor %vm3183_vm1, %vm3184_vm15  ;;  %v4650_v12 = vpop.eup %4649  ;;  %v3221_v7 = vadd.f32 %v4644_v24, %v3220_v46 }
 0x519   : > { %v3180_v27 = vsub.f32 1.0, %v3179_v13  ;;  %vm3204_vm5 = vmor %vm3202_vm3, %vm3203_vm0 }
 0x51a   : > { %v3199_v22 = vsub.f32 1.0, %v3198_v1  ;;  %v3225_v55 = vsel %vm3224_vm9, %v4644_v24, %v3221_v7 }
 0x51b   : > { %v3181_v34 = vmul.f32 %v4646_v35, %v3180_v27  ;;  %v3230_v57 = vsel %vm3227_vm10, %v3229_v31, %v3225_v55 }
 0x51c   : > { %v3200_v41 = vmul.f32 %v4648_v58, %v3199_v22 }
 0x51d   : > { %v3182_v26 = vadd.f32 %v4646_v35, %v3181_v34 }
 0x51e   : > { %v3201_v47 = vadd.f32 %v4648_v58, %v3200_v41 }
 0x51f   : > { %v3186_v44 = vsel %vm3185_vm2, %v4646_v35, %v3182_v26 }
 0x520   : > { %v3191_v5 = vsel %vm3188_vm4, %v3190_v50, %v3186_v44  ;;  %v3205_v4 = vsel %vm3204_vm5, %v4648_v58, %v3201_v47 }
 0x521   : > { %v3210_v61 = vsel %vm3207_vm6, %v3209_v42, %v3205_v4  ;;  %v3233_v63 = vmul.f32 %v4650_v12, %v3191_v5 }
 0x522   : > { %v3232_v20 = vmul.f32 %v3210_v61, %v491_v30 }
 0x524   : > { %v3234_v14 = vadd.f32 %v3233_v63, %v3232_v20 }
 0x526   : > { %4651 = vtanh.f32 %v3234_v14  ;;  %3238 = vst [vmem:[#allocation3] sm:$0xff] %v3234_v14 }
 0x52c   : > { %v4652_v18 = vpop.eup %4651 }
 0x52d   : > { %v3236_v17 = vmul.f32 %v4652_v18, %v3230_v57 }
 0x52f   : > { %3237 = vst [vmem:[#allocation2] sm:$0xff] %v3236_v17 }
 0x530   : > { %3239 = vst [vmem:[%s5213_s24] sm:$0xff] %v3236_v17 }
 0x531   : > { %4919 = shalt.err (!%p4916_p4)
}
 0x532   : > { %4535 = dma.vmem_to_hbm [thread:$0]  (%p5147_p5), %s3260_s25, 128, %s3262_s18, %s3242_s5  }
 0x533 PF: > { %p4582_p11 = scmp.ge.s32.totalorder %s4982_s16, 2  ;;  %s3287_s3 = sand.u32 1, %s4970_s13  }
 0x534   : > { %s3288_s24 = scalar_lea.sflag [#allocation6], %s3287_s3 }
 0x535   : > { %p4563_p7 = pnand %p4582_p11, %p5151_p6 }
 0x537   : > { %p4564_p8 = pneg %p4563_p7 }
 0x539   : > { %4961 = dma.done.wait (%p4564_p8), %s3288_s24, 128  }
 0x53a   : > { %4963 = vsyncadd (%p4564_p8), %s3288_s24, 4294967168  ;;  %s3298_s30 = scalar_lea.sflag [#allocation18], %s3287_s3 }
 0x53b   : > { %4965 = dma.done.wait (%p4564_p8), %s3298_s30, 128  }
 0x53c   : > { %4967 = vsyncadd (%p4564_p8), %s3298_s30, 4294967168  ;;  %p28_p5 = scmp.ge.s32.totalorder %s5122_s28, 10   ;;  %s6193_s13 = smov %s4974_s14 }
 0x53d   : > { %s6194_s14 = smov %s4978_s15  ;;  %s6195_s15 = smov %s5133_s19 }
 0x53e   : > { %s6196_s16 = smov %s5122_s28  ;;  %30 = sbr.rel (!%p28_p5) target bundleno = 17 (0x11), region = 145 }
 0x543   :  { %3304 = vsyncpa [#allocation5], 1 }
 0x544   :  { %3306 = vsyncpa [#allocation5 + $0x1], 1 }
 0x545   :  { %3307 = vsyncpa [#allocation8], 1 }
 0x546   :  { %3308 = vsyncpa [#allocation12], 1 }
 0x547   :  { %3309 = vsyncpa [#allocation15], 1 }
 0x548   :  { %3310 = vsyncpa [#allocation6], 1 }
 0x549   :  { %3312 = vsyncpa [#allocation6 + $0x1], 1 }
 0x54a   :  { %3313 = vsyncpa [#allocation18], 1 }
 0x54b   :  { %3315 = vsyncpa [#allocation18 + $0x1], 1 }

// kernel: tpu_custom_call.1
= control target key start
LH: loop header
LB: loop body
LE: loop exit
PB: predicated region body
PF: predicated region fallthrough
CT: control target
= control target key end

     0   :  { %s6160_s0 = inlined_call_operand.hbm [shape: bf16[8,128,128], index: 0, kind: input, shape index: {}]   ;;  %s6161_s1 = inlined_call_operand.hbm [shape: bf16[8,128,128], index: 1, kind: input, shape index: {}]   ;;  %s6162_s2 = inlined_call_operand.hbm [shape: f32[8,8,512], index: 2, kind: input, shape index: {}]   ;;  %s6163_s3 = inlined_call_operand.hbm [shape: f32[8,128], index: 3, kind: input, shape index: {}]   ;;  %s6164_s4 = inlined_call_operand.hbm [shape: f32[8,128], index: 4, kind: input, shape index: {}]   ;;  %s6165_s5 = inlined_call_operand.hbm [shape: bf16[128,768], index: 5, kind: input, shape index: {}]   ;;  %s6166_s6 = inlined_call_operand.vmem [shape: f32[1,128], index: 6, kind: input, shape index: {}]   ;;  %s6167_s7 = inlined_call_operand.vmem [shape: f32[1,128], index: 7, kind: input, shape index: {}]   ;;  %s6168_s8 = inlined_call_operand.hbm [shape: bf16[128,512], index: 8, kind: input, shape index: {}]   ;;  %s6169_s9 = inlined_call_operand.hbm [shape: f32[8,8,128], index: 9, kind: output, shape index: {0}]   ;;  %s6170_s10 = inlined_call_operand.hbm [shape: f32[8,8,128], index: 10, kind: output, shape index: {1}]  }
   0x1   :  { %6171 = sst [smem:[#allocation27_spill]] %s6160_s0 }
   0x2   :  { %6172 = sst [smem:[#allocation28_spill]] %s6161_s1 }
   0x3   :  { %6173 = sst [smem:[#allocation29_spill]] %s6162_s2 }
   0x4   :  { %6174 = sst [smem:[#allocation30_spill]] %s6163_s3 }
   0x5   :  { %6175 = sst [smem:[#allocation31_spill]] %s6164_s4 }
   0x6   :  { %6176 = sst [smem:[#allocation32_spill]] %s6165_s5 }
   0x7   :  { %6177 = sst [smem:[#allocation33_spill]] %s6166_s6 }
   0x8   :  { %16 = vsyncpa [#allocation5], 0 }
   0x9   :  { %17 = vsyncpa [#allocation8], 0 }
   0xa   :  { %18 = vsyncpa [#allocation12], 0 }
   0xb   :  { %19 = vsyncpa [#allocation15], 0 }
   0xc   :  { %20 = vsyncpa [#allocation6], 0 }
   0xd   :  { %22 = vsyncpa [#allocation6 + $0x1], 0 }
   0xe   :  { %23 = vsyncpa [#allocation18], 0 }
   0xf   :  { %25 = vsyncpa [#allocation18 + $0x1], 0  ;;  %s5051_s13 = smov 0   ;;  %s5053_s14 = smov 0  }
  0x10   :  { %s5055_s15 = smov 0   ;;  %s5057_s16 = smov 0  }
  0x11 LB: > { %s6178_s0 = sld [smem:[#allocation27_spill]]  ;;  %s5075_s20 = sadd.s32 4294967295, %s4982_s16   ;;  %s4982_s16 = sphi %s5057_s16, %s6196_s16   ;;  %s4978_s15 = sphi %s5055_s15, %s6195_s15   ;;  %s4974_s14 = sphi %s5053_s14, %s6194_s14   ;;  %s4970_s13 = sphi %s5051_s13, %s6193_s13  }
  0x12   : > { %p3437_p0 = scmp.ge.s32.totalorder %s4982_s16, 1  ;;  %p94_p1 = scmp.eq.s32.totalorder %s5075_s20, 0 }
  0x13   : > { %p282_p2 = scmp.lt.s32.totalorder %s4982_s16, 9  ;;  %s4984_s22 = smov [#allocation4]  }
  0x14   : > { %s295_s23 = sshll.u32 %s4984_s22, 4  ;;  %s6180_s1 = sld [smem:[#allocation28_spill]]  ;;  %s296_s23 = int_to_ptr.vmem [resolvable:$true] %s295_s23 }
  0x15   : > { %p5081_p4 = pnand %p3437_p0, %p282_p2  ;;  %s6182_s4 = sld [smem:[#allocation31_spill]] }
  0x16   : > { %s4985_s11 = smov [#allocation7]   ;;  %s4986_s17 = smov 64  }
  0x17   : > { %s293_s19 = sshll.u32 %s6178_s0, 4  ;;  %p4539_p5 = pneg %p5081_p4  ;;  %s294_s19 = int_to_ptr.hbm [resolvable:$true] %s293_s19 }
  0x18   : > { %s309_s12 = sshll.u32 %s4985_s11, 4  ;;  %s4987_s18 = smov 4   ;;  %s310_s12 = int_to_ptr.vmem [resolvable:$true] %s309_s12 }
  0x19   : > { %p5092_p6 = pnand %p4539_p5, %p94_p1  ;;  %s6183_s3 = sld [smem:[#allocation30_spill]] }
  0x1a   : > { %s307_s26 = sshll.u32 %s6180_s1, 4  ;;  %s4988_s0 = smov [#allocation11]   ;;  %s308_s26 = int_to_ptr.hbm [resolvable:$true] %s307_s26 }
  0x1b   : > { %s334_s30 = sshll.u32 %s6182_s4, 4  ;;  %s336_s1 = sshll.u32 %s4988_s0, 4  ;;  %s335_s30 = int_to_ptr.hbm [resolvable:$true] %s334_s30  ;;  %s337_s1 = int_to_ptr.vmem [resolvable:$true] %s336_s1 }
  0x1c   : > { %4542 = dma.hbm_to_vmem [thread:$0]  (!%p5092_p6), %s294_s19, 8192, %s296_s23, [#allocation5], %s4986_s17, %s4986_s17, %s4987_s18  }
  0x1d   : > { %4545 = dma.hbm_to_vmem [thread:$0]  (!%p5092_p6), %s308_s26, 8192, %s310_s12, [#allocation8], %s4986_s17, %s4986_s17, %s4987_s18  }
  0x1e   : > { %4551 = dma.hbm_to_vmem [thread:$0]  (!%p5092_p6), %s335_s30, 128, %s337_s1, [#allocation12]  }
  0x1f   : > { %s322_s25 = sshll.u32 %s6183_s3, 4  ;;  %s4989_s28 = smov [#allocation10]   ;;  %s323_s25 = int_to_ptr.hbm [resolvable:$true] %s322_s25 }
  0x20   : > { %s324_s29 = sshll.u32 %s4989_s28, 4  ;;  %s6184_s5 = sld [smem:[#allocation32_spill]]  ;;  %s325_s29 = int_to_ptr.vmem [resolvable:$true] %s324_s29 }
  0x21   : > { %4548 = dma.hbm_to_vmem [thread:$0]  (!%p5092_p6), %s323_s25, 128, %s325_s29, [#allocation8]  }
  0x22   : > { %s4990_s23 = smov [#allocation13]   ;;  %s365_s30 = sshll.u32 %s6168_s8, 4  ;;  %s366_s30 = int_to_ptr.hbm [resolvable:$true] %s365_s30 }
  0x23   : > { %s347_s0 = sshll.u32 %s4990_s23, 4  ;;  %s4991_s4 = smov 384   ;;  %s348_s0 = int_to_ptr.vmem [resolvable:$true] %s347_s0 }
  0x24   : > { %s4992_s12 = smov 24   ;;  %s4993_s17 = smov [#allocation14]  }
  0x25   : > { %s367_s18 = sshll.u32 %s4993_s17, 4  ;;  %s4994_s22 = smov 256   ;;  %s368_s18 = int_to_ptr.vmem [resolvable:$true] %s367_s18 }
  0x26   : > { %s345_s19 = sshll.u32 %s6184_s5, 4  ;;  %s4995_s24 = smov 16   ;;  %s346_s19 = int_to_ptr.hbm [resolvable:$true] %s345_s19 }
  0x27   : > { %4554 = dma.hbm_to_vmem [thread:$0]  (!%p5092_p6), %s346_s19, 6144, %s348_s0, [#allocation12], %s4991_s4, %s4991_s4, %s4992_s12  }
  0x28   : > { %4557 = dma.hbm_to_vmem [thread:$0]  (!%p5092_p6), %s366_s30, 4096, %s368_s18, [#allocation15], %s4994_s22, %s4994_s22, %s4995_s24  }
  0x29   : > { %s3436_s25 = sadd.s32 4294967294, %s4982_s16   ;;  %s5122_s28 = sadd.s32 1, %s4982_s16  }
  0x2a   : > { %s77_s29 = ssub.s32 %s4982_s16, %s5122_s28  ;;  %s80_s11 = sadd.s32 1, %s4978_s15 }
  0x2b   : > { %p78_p7 = scmp.eq.s32.totalorder %s77_s29, 0  ;;  %p87_p8 = scmp.ne.s32.totalorder %s4978_s15, %s4974_s14 }
  0x2c   : > { %p88_p9 = scmp.eq.s32.totalorder %s4982_s16, 0  ;;  %p93_p10 = scmp.ne.s32.totalorder %s4974_s14, %s4970_s13 }
  0x2d   : > { %s5133_s19 = scalar_select %p78_p7, %s4978_s15, %s80_s11  }
  0x2e   : > { %p5137_p11 = por %p94_p1, %p93_p10  ;;  %p243_p12 = scmp.eq.s32.totalorder %s5075_s20, 7 }
  0x2f   : > { %p249_p13 = scmp.eq.s32.totalorder %s3436_s25, 7  ;;  %p5142_p0 = por %p88_p9, %p87_p8 }
  0x30   : > { %p4575_p2 = scmp.lt.s32.totalorder %s4982_s16, 8  ;;  %p5147_p5 = por %p243_p12, %p87_p8 }
  0x31   : > { %p5151_p6 = por %p249_p13, %p93_p10  ;;  %s381_s1 = sand.u32 1, %s4982_s16  }
  0x32   : > { %s383_s30 = sand.u32 1, %s4978_s15   ;;  %s4045_s12 = sshll.u32 %s4982_s16, 5 }
  0x33   : > { %s3445_s4 = sshll.u32 %s383_s30, 5  ;;  %s6189_s2 = sld [smem:[#allocation29_spill]] }
  0x34   : > { %s385_s25 = scalar_lea.vmem [#allocation9], %s3445_s4  ;;  %p5165_p7 = pnand %p4575_p2, %p5142_p0 }
  0x35   : > { %s394_s29 = sshll.u32 %s385_s25, 4  ;;  %s382_s3 = scalar_lea.sflag [#allocation5], %s381_s1  ;;  %s395_s29 = int_to_ptr.vmem [resolvable:$true] %s394_s29 }
  0x36   : > { %p4838_p9 = pneg %p5165_p7 }
  0x39   : > { %s390_s22 = scalar_lea.hbm %s6189_s2, %s4045_s12  ;;  %s4841_s17 = scalar_lea.hbm %s6189_s2, 256 }
  0x3a   : > { %s392_s24 = sshll.u32 %s390_s22, 4  ;;  %s393_s24 = int_to_ptr.hbm [resolvable:$true] %s392_s24 }
  0x3b   : > { %s4834_s5 = sshra.s32 %s393_s24, 4  ;;  %s4835_s5 = int_to_ptr.hbm [resolvable:$true] %s4834_s5 }
  0x3c   : > { %s4836_s30 = scalar_lea.hbm %s4835_s5, 32  ;;  %p4842_p13 = scmp.lt.s32.totalorder %s4835_s5, %s6189_s2 }
  0x3d   : > { %p4837_p8 = scmp.ne.s32.totalorder %s4835_s5, %s4836_s30  ;;  %p4843_p0 = scmp.lt.s32.totalorder %s4841_s17, %s4836_s30 }
  0x3f   : > { %p4839_p10 = pnand %p4838_p9, %p4837_p8  ;;  %p4844_p2 = por %p4843_p0, %p4842_p13 }
  0x41   : > { %p4840_p12 = pneg %p4839_p10 }
  0x43   : > { %p4845_p3 = pnand %p4844_p2, %p4840_p12 }
  0x45   : > { %4848 = shalt.err (!%p4845_p3)
}
  0x46   : > { %4561 = dma.hbm_to_vmem [thread:$0]  (!%p5165_p7), %s393_s24, 512, %s395_s29, %s382_s3  }
  0x47   : > { %403 = sbr.rel (%p5081_p4) target bundleno = 1331 (0x533), region = 56 }
  0x4c   : > { %4937 = dma.done.wait (%p94_p1), [#allocation5], 8192  }
  0x4d   : > { %4939 = vsyncadd (%p94_p1), [#allocation5], 4294959104 }
  0x4e   : > { %4941 = dma.done.wait (%p94_p1), [#allocation8], 8192  }
  0x4f   : > { %4943 = vsyncadd (%p94_p1), [#allocation8], 4294959104  ;;  %s415_s5 = sand.u32 1, %s5075_s20   ;;  %s5191_s3 = sand.u32 1, %s4974_s14  }
  0x50   : > { %s3451_s21 = sshll.u32 %s5191_s3, 5  ;;  %s416_s1 = scalar_lea.sflag [#allocation5], %s415_s5 }
  0x51   : > { %s5194_s22 = scalar_lea.vmem [#allocation9], %s3451_s21 }
  0x52   : > { %4945 = dma.done.wait (%p5137_p11), %s416_s1, 512  }
  0x53   : > { %4947 = vsyncadd (%p5137_p11), %s416_s1, 4294966784 }
  0x54   : > { %4949 = dma.done.wait (%p94_p1), [#allocation8], 128  }
  0x55   : > { %4951 = vsyncadd (%p94_p1), [#allocation8], 4294967168 }
  0x56   : > { %4953 = dma.done.wait (%p94_p1), [#allocation12], 6272  }
  0x57   : > { %4955 = vsyncadd (%p94_p1), [#allocation12], 4294961024 }
  0x58   : > { %4957 = dma.done.wait (%p94_p1), [#allocation15], 4096  }
  0x59   : > { %4959 = vsyncadd (%p94_p1), [#allocation15], 4294963200  ;;  %s3456_s23 = sshll.u32 %s5191_s3, 3  ;;  %p6191_p3 = scmp.ne.s32.totalorder %s5075_s20, 0 }
  0x5a   : > { %s5213_s24 = scalar_lea.vmem [#allocation16], %s3456_s23  ;;  %s5215_s25 = scalar_lea.vmem [#allocation17], %s3456_s23 }
  0x5b   : > { %485 = sbr.rel (%p6191_p3) target bundleno = 99 (0x63), region = 88 }
  0x60   : > { %v486_v0 = vld [vmem:[#allocation10] sm:$0xff]  ;;  %v488_v1 = vld [vmem:[#allocation11] sm:$0xff] }
  0x61   : > { %487 = vst [vmem:[#allocation2] sm:$0xff] %v486_v0 }
  0x62   : > { %489 = vst [vmem:[#allocation3] sm:$0xff] %v488_v1 }
  0x63 PF: > { %v3629_v2 = vld [vmem:[#allocation13 + $0x150] sm:$0xf]  ;;  %v4091_v3 = vld [vmem:[#allocation13 + $0x164] sm:$0xf0]  ;;  %v3605_v4 = vld [vmem:[#allocation13 + $0x120] sm:$0xf] }
  0x64   : > { %v3630_v5 = vor.u32 %v4091_v3, %v3629_v2  ;;  %v4085_v6 = vld [vmem:[#allocation13 + $0x134] sm:$0xf0]  ;;  %v3581_v8 = vld [vmem:[#allocation13 + $0xf0] sm:$0xf]  ;;  %v4079_v9 = vld [vmem:[#allocation13 + $0x104] sm:$0xf0] }
  0x65   : > { %v3606_v7 = vor.u32 %v4085_v6, %v3605_v4  ;;  %v3582_v10 = vor.u32 %v4079_v9, %v3581_v8  ;;  %v3557_v11 = vld [vmem:[#allocation13 + $0xc0] sm:$0xf]  ;;  %v4073_v12 = vld [vmem:[#allocation13 + $0xd4] sm:$0xf0]  ;;  %v3533_v14 = vld [vmem:[#allocation13 + $0x90] sm:$0xf] }
  0x66   : > { %781 = vmatpush.bf16.msra.mxu0 %v3630_v5  ;;  %v3558_v13 = vor.u32 %v4073_v12, %v3557_v11  ;;  %v4067_v15 = vld [vmem:[#allocation13 + $0xa4] sm:$0xf0]  ;;  %v3509_v17 = vld [vmem:[#allocation13 + $0x60] sm:$0xf]  ;;  %v4061_v18 = vld [vmem:[#allocation13 + $0x74] sm:$0xf0] }
  0x67   : > { %v3534_v16 = vor.u32 %v4067_v15, %v3533_v14  ;;  %v3510_v19 = vor.u32 %v4061_v18, %v3509_v17  ;;  %v3485_v20 = vld [vmem:[#allocation13 + $0x30] sm:$0xf]  ;;  %v4055_v21 = vld [vmem:[#allocation13 + $0x44] sm:$0xf0]  ;;  %v3461_v23 = vld [vmem:[#allocation13] sm:$0xf] }
  0x68   : > { %v3486_v22 = vor.u32 %v4055_v21, %v3485_v20  ;;  %v4049_v24 = vld [vmem:[#allocation13 + $0x14] sm:$0xf0]  ;;  %v490_v26 = vld [vmem:[#allocation2] sm:$0xff]  ;;  %v4191_v30 = vld [vmem:[#allocation7] sm:$0xff]   ;;  %vm1941_vm0 = vcmask 130112   ;;  %vm1945_vm1 = vcmask 195712  }
  0x69   : > { %v3462_v25 = vor.u32 %v4049_v24, %v3461_v23  ;;  %v5219_v27 = vpack.c.bf16 %v490_v26, %v490_v26  ;;  %v4447_v28 = vld [vmem:[#allocation7 + $0x10] sm:$0xff]   ;;  %v4446_v29 = vld [vmem:[#allocation7 + $0x8] sm:$0xff]   ;;  %v4192_v34 = vunpack.c.l.bf16 %v4191_v30  ;;  %v4193_v42 = vunpack.c.h.bf16 %v4191_v30  ;;  %v4448_v53 = vld [vmem:[#allocation7 + $0x18] sm:$0xff]   ;;  %s6192_s6 = sld [smem:[#allocation33_spill]]  ;;  %s4041_s27 = sshll.u32 %s5075_s20, 3 }
  0x6a   : > { %782 = vmatpush.bf16.msra.mxu0 %v3606_v7  ;;  %v4200_v32 = vunpack.c.l.bf16 %v4447_v28  ;;  %v4196_v33 = vunpack.c.l.bf16 %v4446_v29  ;;  %v5231_v37 = vld [vmem:[%s6167_s7] ss:$0 sm:$0xff]  ;;  %v4201_v38 = vunpack.c.h.bf16 %v4447_v28  ;;  %v4197_v41 = vunpack.c.h.bf16 %v4446_v29  ;;  %v4449_v54 = vld [vmem:[#allocation7 + $0x20] sm:$0xff]   ;;  %v5248_v4 = vld [vmem:[#allocation7 + $0x28] sm:$0xff]   ;;  %s3271_s21 = scalar_lea.hbm %s6170_s10, %s4041_s27  ;;  %s3273_s1 = sshll.u32 %s5215_s25, 4  ;;  %s3274_s1 = int_to_ptr.vmem [resolvable:$true] %s3273_s1 }
  0x6b   : > { %v4205_v56 = vunpack.c.h.bf16 %v4448_v53  ;;  %v4204_v59 = vunpack.c.l.bf16 %v4448_v53  ;;  %v4209_v60 = vunpack.c.h.bf16 %v4449_v54  ;;  %v5250_v5 = vld [vmem:[#allocation7 + $0x80] sm:$0xff]   ;;  %v4208_v7 = vunpack.c.l.bf16 %v4449_v54  ;;  %v4454_v21 = vld [vmem:[#allocation7 + $0x48] sm:$0xff]   ;;  %s3275_s23 = sshll.u32 %s3271_s21, 4  ;;  %s3247_s29 = scalar_lea.sflag [#allocation18], %s5191_s3  ;;  %s3276_s23 = int_to_ptr.hbm [resolvable:$true] %s3275_s23 }
  0x6c   : > { %v4212_v8 = vunpack.c.l.bf16 %v5248_v4  ;;  %v4256_v12 = vunpack.c.l.bf16 %v5250_v5  ;;  %v4453_v20 = vld [vmem:[#allocation7 + $0x40] sm:$0xff]   ;;  %v4229_v28 = vunpack.c.h.bf16 %v4454_v21  ;;  %v4228_v29 = vunpack.c.l.bf16 %v4454_v21  ;;  %v4462_v54 = vld [vmem:[#allocation7 + $0x88] sm:$0xff]   ;;  %s4878_s11 = sshra.s32 %s3276_s23, 4  ;;  %s4884_s17 = scalar_lea.hbm %s6170_s10, 64  ;;  %s4879_s11 = int_to_ptr.hbm [resolvable:$true] %s4878_s11 }
  0x6d   : > { %v4224_v24 = vunpack.c.l.bf16 %v4453_v20  ;;  %v4470_v21 = vld [vmem:[#allocation7 + $0xc8] sm:$0xff]   ;;  %vm1949_vm2 = vcmask 261312   ;;  %vm1953_vm3 = vcmask 326912   ;;  %vm1957_vm4 = vcmask 392512   ;;  %s4880_s30 = scalar_lea.hbm %s4879_s11, 8  ;;  %p4885_p7 = scmp.lt.s32.totalorder %s4879_s11, %s6170_s10 }
  0x6e   : > { %783 = vmatpush.bf16.msra.mxu0 %v3582_v10  ;;  %vm1961_vm5 = vcmask 458112   ;;  %vm1965_vm6 = vcmask 523712   ;;  %vm1969_vm7 = vcmask 589312   ;;  %vm1973_vm8 = vcmask 654912   ;;  %p4881_p1 = scmp.ne.s32.totalorder %s4879_s11, %s4880_s30  ;;  %p4886_p8 = scmp.lt.s32.totalorder %s4884_s17, %s4880_s30 }
  0x6f   : > { %vm1977_vm9 = vcmask 720512   ;;  %vm1981_vm10 = vcmask 786112   ;;  %vm1985_vm11 = vcmask 851712   ;;  %vm1989_vm12 = vcmask 917312  }
  0x70   : > { %vm1993_vm13 = vcmask 982912   ;;  %vm1997_vm14 = vcmask 1048512   ;;  %vm2216_vm15 = vcmask 1041409   ;;  %p4882_p4 = pnand %p4881_p1, %p5147_p5  ;;  %p4887_p9 = por %p4886_p8, %p4885_p7 }
  0x72   : > { %784 = vmatpush.bf16.msra.mxu0 %v3558_v13  ;;  %p4883_p11 = pneg %p4882_p4 }
  0x74   : > { %p4888_p10 = pnand %p4887_p9, %p4883_p11 }
  0x76   : > { %785 = vmatpush.bf16.msra.mxu0 %v3534_v16 }
  0x7a   : > { %786 = vmatpush.bf16.msra.mxu0 %v3510_v19 }
  0x7e   : > { %787 = vmatpush.bf16.msra.mxu0 %v3486_v22 }
  0x82   : > { %788 = vmatpush.bf16.msra.mxu0 %v3462_v25 }
  0x85   : > { %789 = vmatmul.bf16.vlgmr.msra.gmra.mxu0 %v5219_v27 }
 0x102   : > { %v5222_v31 = vpop.f32.mrf.mxu0 }
 0x103   : > { %v5225_v35 = vperm.slane %v5222_v31, 0  ;;  %v1141_v61 = vrot.slane %v5222_v31, 2  ;;  %v1140_v13 = vrot.slane %v5222_v31, 1  ;;  %v1142_v30 = vrot.slane %v5222_v31, 3 }
 0x105   : > { %v1167_v36 = vadd.f32 %v4200_v32, %v5225_v35  ;;  %v1165_v39 = vadd.f32 %v4196_v33, %v5225_v35  ;;  %v1163_v40 = vadd.f32 %v4192_v34, %v5225_v35  ;;  %v1168_v48 = vadd.f32 %v4201_v38, %v5225_v35 }
 0x106   : > { %v1166_v51 = vadd.f32 %v4197_v41, %v5225_v35  ;;  %v1164_v52 = vadd.f32 %v4193_v42, %v5225_v35  ;;  %v1170_v63 = vadd.f32 %v4205_v56, %v5225_v35  ;;  %v1169_v2 = vadd.f32 %v4204_v59, %v5225_v35 }
 0x107   : > { %v1295_v43 = vmax.f32 %v1167_v36, 0.0  ;;  %v1293_v44 = vmax.f32 %v1165_v39, 0.0  ;;  %v1291_v45 = vmax.f32 %v1163_v40, 0.0  ;;  %v1296_v55 = vmax.f32 %v1168_v48, 0.0  ;;  %v4469_v40 = vld [vmem:[#allocation7 + $0xc0] sm:$0xff]  }
 0x108   : > { %v1294_v57 = vmax.f32 %v1166_v51, 0.0  ;;  %v1292_v58 = vmax.f32 %v1164_v52, 0.0  ;;  %v1172_v3 = vadd.f32 %v4209_v60, %v5225_v35  ;;  %v1298_v6 = vmax.f32 %v1170_v63, 0.0 }
 0x109   : > { %v1427_v47 = vmul.f32 %v5231_v37, %v1295_v43  ;;  %v1425_v49 = vmul.f32 %v5231_v37, %v1293_v44  ;;  %v1423_v50 = vmul.f32 %v5231_v37, %v1291_v45  ;;  %v1428_v62 = vmul.f32 %v5231_v37, %v1296_v55  ;;  %v4455_v55 = vld [vmem:[#allocation7 + $0x50] sm:$0xff]  }
 0x10a   : > { %v792_v46 = vpop.f32.mrf.mxu0  ;;  %v1426_v0 = vmul.f32 %v5231_v37, %v1294_v57  ;;  %v1424_v1 = vmul.f32 %v5231_v37, %v1292_v58  ;;  %v5253_v9 = vperm.slane %v1141_v61, 0  ;;  %v1297_v10 = vmax.f32 %v1169_v2, 0.0 }
 0x10b   : > { %1559 = vadd.xlane.f32.xlu1 %v1427_v47  ;;  %1555 = vadd.xlane.f32.xlu2 %v1425_v49  ;;  %v1300_v11 = vmax.f32 %v1172_v3, 0.0  ;;  %v1430_v14 = vmul.f32 %v5231_v37, %v1298_v6  ;;  %v1171_v15 = vadd.f32 %v4208_v7, %v5225_v35  ;;  %v1173_v18 = vadd.f32 %v4212_v8, %v5225_v35  ;;  %v4477_v7 = vld [vmem:[#allocation7 + $0x100] sm:$0xff]  }
 0x10c   : > { %1551 = vadd.xlane.f32.xlu0 %v1423_v50  ;;  %v1429_v16 = vmul.f32 %v5231_v37, %v1297_v10  ;;  %v1195_v19 = vadd.f32 %v4256_v12, %v5253_v9  ;;  %v5263_v22 = vperm.slane %v1140_v13, 0  ;;  %v4289_v42 = vunpack.c.h.bf16 %v4469_v40 }
 0x10d   : > { %v1432_v17 = vmul.f32 %v5231_v37, %v1300_v11  ;;  %v1299_v23 = vmax.f32 %v1171_v15, 0.0  ;;  %v1301_v25 = vmax.f32 %v1173_v18, 0.0  ;;  %v4225_v43 = vunpack.c.h.bf16 %v4453_v20 }
 0x10e   : > { %v1323_v26 = vmax.f32 %v1195_v19, 0.0  ;;  %v1179_v33 = vadd.f32 %v4224_v24, %v5263_v22  ;;  %v1182_v38 = vadd.f32 %v4229_v28, %v5263_v22  ;;  %v1181_v39 = vadd.f32 %v4228_v29, %v5263_v22 }
 0x10f   : > { %v1431_v32 = vmul.f32 %v5231_v37, %v1299_v23  ;;  %v1433_v34 = vmul.f32 %v5231_v37, %v1301_v25  ;;  %v5272_v44 = vperm.slane %v1142_v30, 0  ;;  %v4288_v47 = vunpack.c.l.bf16 %v4469_v40  ;;  %v5296_v23 = vld [vmem:[#allocation7 + $0x90] sm:$0xff]  }
 0x110   : > { %v1455_v36 = vmul.f32 %v5231_v37, %v1323_v26  ;;  %v1307_v41 = vmax.f32 %v1179_v33, 0.0  ;;  %v1310_v45 = vmax.f32 %v1182_v38, 0.0  ;;  %v1309_v46 = vmax.f32 %v1181_v39, 0.0 }
 0x111   : > { %v1180_v49 = vadd.f32 %v4225_v43, %v5263_v22  ;;  %v1212_v52 = vadd.f32 %v4289_v42, %v5272_v44  ;;  %v1211_v53 = vadd.f32 %v4288_v47, %v5272_v44  ;;  %v4257_v57 = vunpack.c.h.bf16 %v5250_v5  ;;  %v4478_v42 = vld [vmem:[#allocation7 + $0x108] sm:$0xff]  }
 0x112   : > { %v1439_v48 = vmul.f32 %v5231_v37, %v1307_v41  ;;  %v1442_v50 = vmul.f32 %v5231_v37, %v1310_v45  ;;  %v1441_v51 = vmul.f32 %v5231_v37, %v1309_v46  ;;  %v4261_v60 = vunpack.c.h.bf16 %v4462_v54  ;;  %v4485_v41 = vld [vmem:[#allocation7 + $0x140] sm:$0xff]  }
 0x113   : > { %1561 = vadd.xlane.f32.xlu1 %v1428_v62  ;;  %1557 = vadd.xlane.f32.xlu2 %v1426_v0  ;;  %v1308_v56 = vmax.f32 %v1180_v49, 0.0  ;;  %v1340_v58 = vmax.f32 %v1212_v52, 0.0  ;;  %v1339_v59 = vmax.f32 %v1211_v53, 0.0  ;;  %v4232_v61 = vunpack.c.l.bf16 %v4455_v55 }
 0x114   : > { %1553 = vadd.xlane.f32.xlu0 %v1424_v1  ;;  %v1143_v62 = vrot.slane %v5222_v31, 4  ;;  %v1196_v0 = vadd.f32 %v4257_v57, %v5253_v9  ;;  %v1198_v3 = vadd.f32 %v4261_v60, %v5253_v9  ;;  %v4321_v8 = vunpack.c.h.bf16 %v4477_v7  ;;  %v4456_v57 = vld [vmem:[#allocation7 + $0x58] sm:$0xff]  }
 0x115   : > { %v1440_v63 = vmul.f32 %v5231_v37, %v1308_v56  ;;  %v1472_v1 = vmul.f32 %v5231_v37, %v1340_v58  ;;  %v1471_v2 = vmul.f32 %v5231_v37, %v1339_v59  ;;  %v1183_v6 = vadd.f32 %v4232_v61, %v5263_v22  ;;  %v5314_v58 = vld [vmem:[#allocation7 + $0xd0] sm:$0xff]  }
 0x116   : > { %v1324_v5 = vmax.f32 %v1196_v0, 0.0  ;;  %v4260_v10 = vunpack.c.l.bf16 %v4462_v54  ;;  %v5288_v11 = vperm.slane %v1143_v62, 0  ;;  %v1326_v12 = vmax.f32 %v1198_v3, 0.0 }
 0x117   : > { %v1311_v13 = vmax.f32 %v1183_v6, 0.0  ;;  %v4292_v25 = vunpack.c.l.bf16 %v4470_v21  ;;  %v4264_v29 = vunpack.c.l.bf16 %v5296_v23  ;;  %v4233_v30 = vunpack.c.h.bf16 %v4455_v55 }
 0x118   : > { %v1456_v15 = vmul.f32 %v5231_v37, %v1324_v5  ;;  %v1228_v19 = vadd.f32 %v4321_v8, %v5288_v11  ;;  %v4352_v45 = vunpack.c.l.bf16 %v4485_v41  ;;  %v4293_v46 = vunpack.c.h.bf16 %v4470_v21 }
 0x119   : > { %v1443_v18 = vmul.f32 %v5231_v37, %v1311_v13  ;;  %v1199_v39 = vadd.f32 %v4264_v29, %v5253_v9  ;;  %v1184_v40 = vadd.f32 %v4233_v30, %v5263_v22  ;;  %v4353_v60 = vunpack.c.h.bf16 %v4485_v41 }
 0x11a   : > { %v1356_v26 = vmax.f32 %v1228_v19, 0.0  ;;  %v1214_v52 = vadd.f32 %v4293_v46, %v5272_v44  ;;  %v4296_v0 = vunpack.c.l.bf16 %v5314_v58  ;;  %v4325_v13 = vunpack.c.h.bf16 %v4478_v42 }
 0x11b   : > { %1565 = vadd.xlane.f32.xlu1 %v1430_v14  ;;  %1563 = vadd.xlane.f32.xlu2 %v1429_v16  ;;  %v4320_v14 = vunpack.c.l.bf16 %v4477_v7  ;;  %v1197_v16 = vadd.f32 %v4260_v10, %v5253_v9  ;;  %v1312_v49 = vmax.f32 %v1184_v40, 0.0  ;;  %v4493_v10 = vld [vmem:[#allocation7 + $0x180] sm:$0xff]  }
 0x11c   : > { %1569 = vadd.xlane.f32.xlu0 %v1432_v17  ;;  %v1458_v17 = vmul.f32 %v5231_v37, %v1326_v12  ;;  %v1342_v59 = vmax.f32 %v1214_v52, 0.0  ;;  %v1215_v8 = vadd.f32 %v4296_v0, %v5272_v44 }
 0x11d   : > { %v1227_v20 = vadd.f32 %v4320_v14, %v5288_v11  ;;  %v1325_v24 = vmax.f32 %v1197_v16, 0.0  ;;  %v1444_v54 = vmul.f32 %v5231_v37, %v1312_v49  ;;  %v4265_v14 = vunpack.c.h.bf16 %v5296_v23 }
 0x11f   : > { %v1355_v28 = vmax.f32 %v1227_v20, 0.0  ;;  %v1457_v33 = vmul.f32 %v5231_v37, %v1325_v24  ;;  %v1200_v20 = vadd.f32 %v4265_v14, %v5253_v9  ;;  %v5363_v14 = vld [vmem:[#allocation7 + $0x60] sm:$0xff]  }
 0x121   : > { %v1487_v38 = vmul.f32 %v5231_v37, %v1355_v28  ;;  %v4486_v28 = vld [vmem:[#allocation7 + $0x148] sm:$0xff]   ;;  %v1328_v23 = vmax.f32 %v1200_v20, 0.0 }
 0x122   : > { %v4356_v29 = vunpack.c.l.bf16 %v4486_v28 }
 0x123   : > { %1567 = vadd.xlane.f32.xlu1 %v1431_v32  ;;  %1571 = vadd.xlane.f32.xlu2 %v1433_v34  ;;  %v1144_v32 = vrot.slane %v5222_v31, 5  ;;  %v1213_v34 = vadd.f32 %v4292_v25, %v5272_v44  ;;  %v1230_v25 = vadd.f32 %v4325_v13, %v5288_v11  ;;  %v5361_v13 = vld [vmem:[#allocation7 + $0xd8] sm:$0xff]  }
 0x124   : > { %1615 = vadd.xlane.f32.xlu0 %v1455_v36  ;;  %v1488_v36 = vmul.f32 %v5231_v37, %v1356_v26 }
 0x125   : > { %v1341_v43 = vmax.f32 %v1213_v34, 0.0  ;;  %v5306_v47 = vperm.slane %v1144_v32, 0  ;;  %v1358_v30 = vmax.f32 %v1230_v25, 0.0  ;;  %v4237_v34 = vunpack.c.h.bf16 %v4456_v57 }
 0x127   : > { %v1243_v55 = vadd.f32 %v4352_v45, %v5306_v47  ;;  %v1244_v3 = vadd.f32 %v4353_v60, %v5306_v47  ;;  %v5341_v45 = vld [vmem:[#allocation7 + $0x110] sm:$0xff]   ;;  %v4494_v60 = vld [vmem:[#allocation7 + $0x188] sm:$0xff]  }
 0x128   : > { %v4328_v52 = vunpack.c.l.bf16 %v5341_v45 }
 0x129   : > { %v1371_v61 = vmax.f32 %v1243_v55, 0.0  ;;  %v1372_v12 = vmax.f32 %v1244_v3, 0.0 }
 0x12b   : > { %1583 = vadd.xlane.f32.xlu1 %v1439_v48  ;;  %1587 = vadd.xlane.f32.xlu2 %v1441_v51  ;;  %v1327_v48 = vmax.f32 %v1199_v39, 0.0  ;;  %v1473_v51 = vmul.f32 %v5231_v37, %v1341_v43  ;;  %v1503_v6 = vmul.f32 %v5231_v37, %v1371_v61  ;;  %v1504_v19 = vmul.f32 %v5231_v37, %v1372_v12  ;;  %v5339_v43 = vld [vmem:[#allocation7 + $0x98] sm:$0xff]   ;;  %v4501_v61 = vld [vmem:[#allocation7 + $0x1c0] sm:$0xff]  }
 0x12c   : > { %1589 = vadd.xlane.f32.xlu0 %v1442_v50  ;;  %v4324_v50 = vunpack.c.l.bf16 %v4478_v42  ;;  %v1490_v39 = vmul.f32 %v5231_v37, %v1358_v30  ;;  %v1186_v42 = vadd.f32 %v4237_v34, %v5263_v22  ;;  %v4416_v3 = vunpack.c.l.bf16 %v4501_v61 }
 0x12d   : > { %v1459_v53 = vmul.f32 %v5231_v37, %v1327_v48  ;;  %v4297_v48 = vunpack.c.h.bf16 %v5314_v58  ;;  %v1231_v58 = vadd.f32 %v4328_v52, %v5288_v11  ;;  %v4417_v20 = vunpack.c.h.bf16 %v4501_v61 }
 0x12e   : > { %v1229_v56 = vadd.f32 %v4324_v50, %v5288_v11  ;;  %v1314_v50 = vmax.f32 %v1186_v42, 0.0  ;;  %v4269_v30 = vunpack.c.h.bf16 %v5339_v43  ;;  %v4389_v34 = vunpack.c.h.bf16 %v4494_v60 }
 0x12f   : > { %v1216_v55 = vadd.f32 %v4297_v48, %v5272_v44  ;;  %v5376_v48 = vld [vmem:[#allocation7 + $0x150] sm:$0xff]  }
 0x130   : > { %v1357_v62 = vmax.f32 %v1229_v56, 0.0 }
 0x132   : > { %v1489_v7 = vmul.f32 %v5231_v37, %v1357_v62 }
 0x133   : > { %1585 = vadd.xlane.f32.xlu1 %v1440_v63  ;;  %1647 = vadd.xlane.f32.xlu2 %v1471_v2  ;;  %v4236_v63 = vunpack.c.l.bf16 %v4456_v57  ;;  %v1474_v2 = vmul.f32 %v5231_v37, %v1342_v59  ;;  %v1446_v57 = vmul.f32 %v5231_v37, %v1314_v50 }
 0x134   : > { %1649 = vadd.xlane.f32.xlu0 %v1472_v1  ;;  %v1145_v1 = vrot.slane %v5222_v31, 6 }
 0x135   : > { %v1185_v5 = vadd.f32 %v4236_v63, %v5263_v22  ;;  %v4388_v63 = vunpack.c.l.bf16 %v4494_v60  ;;  %v4241_v60 = vunpack.c.h.bf16 %v5363_v14 }
 0x137   : > { %v1313_v16 = vmax.f32 %v1185_v5, 0.0 }
 0x139   : > { %v1445_v21 = vmul.f32 %v5231_v37, %v1313_v16 }
 0x13b   : > { %1617 = vadd.xlane.f32.xlu1 %v1456_v15  ;;  %1591 = vadd.xlane.f32.xlu2 %v1443_v18  ;;  %v5325_v15 = vperm.slane %v1145_v1, 0  ;;  %v4384_v18 = vunpack.c.l.bf16 %v4493_v10  ;;  %v1359_v1 = vmax.f32 %v1231_v58, 0.0 }
 0x13c   : > { %1621 = vadd.xlane.f32.xlu0 %v1458_v17  ;;  %v1343_v17 = vmax.f32 %v1215_v8, 0.0 }
 0x13d   : > { %v1259_v26 = vadd.f32 %v4384_v18, %v5325_v15  ;;  %v1491_v8 = vmul.f32 %v5231_v37, %v1359_v1 }
 0x13e   : > { %v1475_v24 = vmul.f32 %v5231_v37, %v1343_v17  ;;  %v4300_v17 = vunpack.c.l.bf16 %v5361_v13 }
 0x13f   : > { %v1387_v32 = vmax.f32 %v1259_v26, 0.0 }
 0x140   : > { %v1217_v25 = vadd.f32 %v4300_v17, %v5272_v44 }
 0x141   : > { %v1519_v40 = vmul.f32 %v5231_v37, %v1387_v32  ;;  %v1807_v32 = vlaneseq }
 0x143   : > { %1619 = vadd.xlane.f32.xlu1 %v1457_v33  ;;  %1679 = vadd.xlane.f32.xlu2 %v1487_v38  ;;  %v4385_v33 = vunpack.c.h.bf16 %v4493_v10  ;;  %v1245_v38 = vadd.f32 %v4356_v29, %v5306_v47  ;;  %v5380_v50 = vand.u32 127, %v1807_v32 }
 0x144   : > { %1681 = vadd.xlane.f32.xlu0 %v1488_v36  ;;  %v1460_v36 = vmul.f32 %v5231_v37, %v1328_v23 }
 0x145   : > { %v1260_v41 = vadd.f32 %v4385_v33, %v5325_v15  ;;  %v1373_v46 = vmax.f32 %v1245_v38, 0.0  ;;  %v1345_v33 = vmax.f32 %v1217_v25, 0.0  ;;  %v5401_v1 = vadd.s32 4294967264, %v5380_v50 }
 0x146   : > { %v5421_v25 = vadd.s32 4294967240, %v5380_v50 }
 0x147   : > { %v1388_v49 = vmax.f32 %v1260_v41, 0.0 }
 0x149   : > { %v1520_v56 = vmul.f32 %v5231_v37, %v1388_v49  ;;  %v5378_v49 = vld [vmem:[#allocation7 + $0x1c8] sm:$0xff]  }
 0x14b   : > { %1651 = vadd.xlane.f32.xlu1 %v1473_v51  ;;  %1593 = vadd.xlane.f32.xlu2 %v1444_v54  ;;  %v4268_v51 = vunpack.c.l.bf16 %v5339_v43  ;;  %v1505_v54 = vmul.f32 %v5231_v37, %v1373_v46  ;;  %v1202_v46 = vadd.f32 %v4269_v30, %v5253_v9  ;;  %v1477_v43 = vmul.f32 %v5231_v37, %v1345_v33 }
 0x14c   : > { %1623 = vadd.xlane.f32.xlu0 %v1459_v53  ;;  %v1146_v53 = vrot.slane %v5222_v31, 7  ;;  %v1344_v31 = vmax.f32 %v1216_v55, 0.0  ;;  %v4301_v30 = vunpack.c.h.bf16 %v5361_v13 }
 0x14d   : > { %v1201_v59 = vadd.f32 %v4268_v51, %v5253_v9  ;;  %v1262_v51 = vadd.f32 %v4389_v34, %v5325_v15  ;;  %v1330_v55 = vmax.f32 %v1202_v46, 0.0 }
 0x14e   : > { %v5353_v62 = vperm.slane %v1146_v53, 0  ;;  %v1218_v13 = vadd.f32 %v4301_v30, %v5272_v44 }
 0x14f   : > { %v1329_v0 = vmax.f32 %v1201_v59, 0.0  ;;  %v5393_v59 = vadd.s32 4294967280, %v5380_v50  ;;  %v1390_v58 = vmax.f32 %v1262_v51, 0.0 }
 0x150   : > { %v1275_v12 = vadd.f32 %v4416_v3, %v5353_v62  ;;  %v1276_v23 = vadd.f32 %v4417_v20, %v5353_v62  ;;  %v5416_v20 = vld [vmem:[#allocation7 + $0x118] sm:$0xff]  }
 0x151   : > { %v1461_v5 = vmul.f32 %v5231_v37, %v1329_v0  ;;  %v4332_v34 = vunpack.c.l.bf16 %v5416_v20 }
 0x152   : > { %v1404_v38 = vmax.f32 %v1276_v23, 0.0 }
 0x153   : > { %1653 = vadd.xlane.f32.xlu1 %v1474_v2  ;;  %1683 = vadd.xlane.f32.xlu2 %v1489_v7  ;;  %v4357_v2 = vunpack.c.h.bf16 %v4486_v28  ;;  %v1261_v7 = vadd.f32 %v4388_v63, %v5325_v15 }
 0x154   : > { %1711 = vadd.xlane.f32.xlu0 %v1503_v6  ;;  %v1476_v6 = vmul.f32 %v5231_v37, %v1344_v31  ;;  %v1536_v52 = vmul.f32 %v5231_v37, %v1404_v38  ;;  %v5397_v31 = vadd.s32 4294967272, %v5380_v50 }
 0x155   : > { %v1246_v10 = vadd.f32 %v4357_v2, %v5306_v47  ;;  %v1389_v16 = vmax.f32 %v1261_v7, 0.0 }
 0x157   : > { %v1374_v18 = vmax.f32 %v1246_v10, 0.0 }
 0x159   : > { %v1506_v26 = vmul.f32 %v5231_v37, %v1374_v18 }
 0x15b   : > { %1713 = vadd.xlane.f32.xlu1 %v1504_v19  ;;  %1655 = vadd.xlane.f32.xlu2 %v1475_v24  ;;  %v1403_v19 = vmax.f32 %v1275_v12, 0.0  ;;  %v1521_v24 = vmul.f32 %v5231_v37, %v1389_v16  ;;  %v1188_v16 = vadd.f32 %v4241_v60, %v5263_v22 }
 0x15c   : > { %1595 = vadd.xlane.f32.xlu0 %v1445_v21  ;;  %v4240_v21 = vunpack.c.l.bf16 %v5363_v14  ;;  %v1522_v14 = vmul.f32 %v5231_v37, %v1390_v58  ;;  %v5445_v58 = vadd.s32 4294967232, %v5380_v50 }
 0x15d   : > { %v1535_v28 = vmul.f32 %v5231_v37, %v1403_v19  ;;  %v1316_v33 = vmax.f32 %v1188_v16, 0.0 }
 0x15e   : > { %v1187_v29 = vadd.f32 %v4240_v21, %v5263_v22 }
 0x163   : > { %1625 = vadd.xlane.f32.xlu1 %v1460_v36  ;;  %1743 = vadd.xlane.f32.xlu2 %v1519_v40  ;;  %v4329_v40 = vunpack.c.h.bf16 %v5341_v45 }
 0x164   : > { %1685 = vadd.xlane.f32.xlu0 %v1490_v39  ;;  %v1315_v39 = vmax.f32 %v1187_v29, 0.0  ;;  %v5428_v29 = vadd.s32 4294967248, %v5380_v50 }
 0x165   : > { %v1232_v45 = vadd.f32 %v4329_v40, %v5288_v11 }
 0x166   : > { %v1447_v53 = vmul.f32 %v5231_v37, %v1315_v39 }
 0x167   : > { %v1360_v63 = vmax.f32 %v1232_v45, 0.0 }
 0x169   : > { %v1492_v19 = vmul.f32 %v5231_v37, %v1360_v63  ;;  %v5451_v63 = vadd.s32 4294967224, %v5380_v50 }
 0x16b   : > { %1715 = vadd.xlane.f32.xlu1 %v1505_v54  ;;  %1597 = vadd.xlane.f32.xlu2 %v1446_v57  ;;  %v4360_v54 = vunpack.c.l.bf16 %v5376_v48  ;;  %v5390_v57 = vadd.s32 4294967288, %v5380_v50 }
 0x16c   : > { %1745 = vadd.xlane.f32.xlu0 %v1520_v56  ;;  %v4420_v56 = vunpack.c.l.bf16 %v5378_v49 }
 0x16d   : > { %v1247_v0 = vadd.f32 %v4360_v54, %v5306_v47 }
 0x16e   : > { %v1277_v7 = vadd.f32 %v4420_v56, %v5353_v62 }
 0x16f   : > { %v1375_v39 = vmax.f32 %v1247_v0, 0.0  ;;  %v1346_v0 = vmax.f32 %v1218_v13, 0.0 }
 0x170   : > { %v1405_v40 = vmax.f32 %v1277_v7, 0.0 }
 0x171   : > { %v1507_v54 = vmul.f32 %v5231_v37, %v1375_v39 }
 0x173   : > { %1657 = vadd.xlane.f32.xlu1 %v1476_v6  ;;  %1687 = vadd.xlane.f32.xlu2 %v1491_v8  ;;  %v1462_v6 = vmul.f32 %v5231_v37, %v1330_v55  ;;  %v5407_v8 = vadd.s32 4294967256, %v5380_v50  ;;  %v1537_v55 = vmul.f32 %v5231_v37, %v1405_v40 }
 0x174   : > { %1627 = vadd.xlane.f32.xlu0 %v1461_v5 }
 0x17b   : > { %1747 = vadd.xlane.f32.xlu1 %v1521_v24  ;;  %1775 = vadd.xlane.f32.xlu2 %v1535_v28 }
 0x17c   : > { %1717 = vadd.xlane.f32.xlu0 %v1506_v26  ;;  %v5423_v26 = vld [vmem:[#allocation7 + $0xa0] sm:$0xff]  }
 0x17d   : > { %v4273_v40 = vunpack.c.h.bf16 %v5423_v26 }
 0x17e   : > { %v1560_v36 = vpop.xlane.xlu1 %1559  ;;  %v1556_v41 = vpop.xlane.xlu2 %1555 }
 0x17f   : > { %v1552_v42 = vpop.xlane.xlu0 %1551  ;;  %v1944_v12 = vperm.slane %v1556_v41, %v5393_v59  ;;  %v1952_v21 = vperm.slane %v1560_v36, %v5401_v1  ;;  %v4272_v41 = vunpack.c.l.bf16 %v5423_v26  ;;  %v5488_v26 = vld [vmem:[#allocation7 + $0x158] sm:$0xff]  }
 0x180   : > { %v1938_v5 = vperm.slane %v1552_v42, %v5380_v50 }
 0x181   : > { %v1203_v56 = vadd.f32 %v4272_v41, %v5253_v9 }
 0x183   : > { %1659 = vadd.xlane.f32.xlu1 %v1477_v43  ;;  %1599 = vadd.xlane.f32.xlu2 %v1447_v53  ;;  %v1233_v53 = vadd.f32 %v4332_v34, %v5288_v11 }
 0x184   : > { %1777 = vadd.xlane.f32.xlu0 %v1536_v52  ;;  %v1448_v52 = vmul.f32 %v5231_v37, %v1316_v33 }
 0x186   : > { %v1562_v61 = vpop.xlane.xlu1 %1561  ;;  %v1558_v2 = vpop.xlane.xlu2 %1557 }
 0x187   : > { %v1554_v3 = vpop.xlane.xlu0 %1553  ;;  %v1948_v17 = vperm.slane %v1558_v2, %v5397_v31  ;;  %v1956_v28 = vperm.slane %v1562_v61, %v5407_v8  ;;  %v5448_v61 = vld [vmem:[#allocation7 + $0x190] sm:$0xff]   ;;  %v5454_v2 = vadd.s32 4294967216, %v5380_v50 }
 0x188   : > { %v1940_v10 = vperm.slane %v1554_v3, %v5390_v57  ;;  %v1361_v3 = vmax.f32 %v1233_v53, 0.0 }
 0x18a   : > { %v1942_v18 = vsel %vm1941_vm0, %v1940_v10, %v1938_v5  ;;  %v1331_v5 = vmax.f32 %v1203_v56, 0.0  ;;  %v4392_v10 = vunpack.c.l.bf16 %v5448_v61 }
 0x18b   : > { %v1946_v24 = vsel %vm1945_vm1, %v1944_v12, %v1942_v18  ;;  %1749 = vadd.xlane.f32.xlu1 %v1522_v14  ;;  %1689 = vadd.xlane.f32.xlu2 %v1492_v19  ;;  %v4361_v12 = vunpack.c.h.bf16 %v5376_v48  ;;  %v1478_v19 = vmul.f32 %v5231_v37, %v1346_v0  ;;  %v5468_v48 = vld [vmem:[#allocation7 + $0x68] sm:$0xff]  }
 0x18c   : > { %v1950_v23 = vsel %vm1949_vm2, %v1948_v17, %v1946_v24  ;;  %1629 = vadd.xlane.f32.xlu0 %v1462_v6  ;;  %v4421_v6 = vunpack.c.h.bf16 %v5378_v49  ;;  %v1493_v24 = vmul.f32 %v5231_v37, %v1361_v3  ;;  %v1463_v30 = vmul.f32 %v5231_v37, %v1331_v5 }
 0x18d   : > { %v1954_v32 = vsel %vm1953_vm3, %v1952_v21, %v1950_v23  ;;  %v1248_v33 = vadd.f32 %v4361_v12, %v5306_v47 }
 0x18e   : > { %v1566_v36 = vpop.xlane.xlu1 %1565  ;;  %v1958_v38 = vsel %vm1957_vm4, %v1956_v28, %v1954_v32  ;;  %v1564_v46 = vpop.xlane.xlu2 %1563  ;;  %v1278_v28 = vadd.f32 %v4421_v6, %v5353_v62  ;;  %v1263_v32 = vadd.f32 %v4392_v10, %v5325_v15  ;;  %v4364_v6 = vunpack.c.l.bf16 %v5488_v26 }
 0x18f   : > { %v1964_v42 = vperm.slane %v1566_v36, %v5421_v25  ;;  %v1570_v43 = vpop.xlane.xlu0 %1569  ;;  %v1960_v51 = vperm.slane %v1564_v46, %v5428_v29  ;;  %v5477_v36 = vld [vmem:[#allocation7 + $0xe0] sm:$0xff]   ;;  %v1376_v46 = vmax.f32 %v1248_v33, 0.0  ;;  %v4393_v10 = vunpack.c.h.bf16 %v5448_v61 }
 0x190   : > { %v1972_v18 = vperm.slane %v1570_v43, %v5451_v63  ;;  %v1406_v39 = vmax.f32 %v1278_v28, 0.0  ;;  %v4304_v43 = vunpack.c.l.bf16 %v5477_v36 }
 0x191   : > { %v1962_v45 = vsel %vm1961_vm5, %v1960_v51, %v1958_v38  ;;  %v4244_v38 = vunpack.c.l.bf16 %v5468_v48 }
 0x192   : > { %v1966_v60 = vsel %vm1965_vm6, %v1964_v42, %v1962_v45  ;;  %v1391_v42 = vmax.f32 %v1263_v32, 0.0  ;;  %v1538_v53 = vmul.f32 %v5231_v37, %v1406_v39  ;;  %v1204_v45 = vadd.f32 %v4273_v40, %v5253_v9 }
 0x193   : > { %1601 = vadd.xlane.f32.xlu1 %v1448_v52  ;;  %1779 = vadd.xlane.f32.xlu2 %v1537_v55  ;;  %v1189_v52 = vadd.f32 %v4244_v38, %v5263_v22  ;;  %v1508_v55 = vmul.f32 %v5231_v37, %v1376_v46  ;;  %v1219_v56 = vadd.f32 %v4304_v43, %v5272_v44  ;;  %v4213_v43 = vunpack.c.h.bf16 %v5248_v4 }
 0x194   : > { %1719 = vadd.xlane.f32.xlu0 %v1507_v54  ;;  %v1523_v54 = vmul.f32 %v5231_v37, %v1391_v42  ;;  %v1332_v3 = vmax.f32 %v1204_v45, 0.0  ;;  %v1264_v39 = vadd.f32 %v4393_v10, %v5325_v15 }
 0x195   : > { %v1317_v0 = vmax.f32 %v1189_v52, 0.0  ;;  %v1347_v5 = vmax.f32 %v1219_v56, 0.0 }
 0x196   : > { %v1568_v7 = vpop.xlane.xlu1 %1567  ;;  %v1572_v16 = vpop.xlane.xlu2 %1571 }
 0x197   : > { %v1968_v14 = vperm.slane %v1568_v7, %v5445_v58  ;;  %v5460_v17 = vpop.xlane.xlu0 %1615  ;;  %v1976_v21 = vperm.slane %v1572_v16, %v5454_v2  ;;  %v1479_v38 = vmul.f32 %v5231_v37, %v1347_v5 }
 0x198   : > { %v2030_v45 = vperm.slane %v5460_v17, %v5380_v50 }
 0x199   : > { %v1970_v49 = vsel %vm1969_vm7, %v1968_v14, %v1966_v60  ;;  %v4333_v60 = vunpack.c.h.bf16 %v5416_v20 }
 0x19a   : > { %v1974_v23 = vsel %vm1973_vm8, %v1972_v18, %v1970_v49 }
 0x19b   : > { %v5475_v34 = vsel %vm1977_vm9, %v1976_v21, %v1974_v23  ;;  %1691 = vadd.xlane.f32.xlu1 %v1493_v24  ;;  %1631 = vadd.xlane.f32.xlu2 %v1463_v30  ;;  %v1449_v24 = vmul.f32 %v5231_v37, %v1317_v0  ;;  %v1464_v23 = vmul.f32 %v5231_v37, %v1332_v3 }
 0x19c   : > { %1661 = vadd.xlane.f32.xlu0 %v1478_v19  ;;  %v1234_v19 = vadd.f32 %v4333_v60, %v5288_v11  ;;  %v1249_v30 = vadd.f32 %v4364_v6, %v5306_v47  ;;  %v1174_v6 = vadd.f32 %v4213_v43, %v5225_v35 }
 0x19e   : > { %v1584_v41 = vpop.xlane.xlu1 %1583  ;;  %v1588_v13 = vpop.xlane.xlu2 %1587  ;;  %v1362_v42 = vmax.f32 %v1234_v19, 0.0  ;;  %v1377_v46 = vmax.f32 %v1249_v30, 0.0  ;;  %v4305_v19 = vunpack.c.h.bf16 %v5477_v36 }
 0x19f   : > { %v1590_v51 = vpop.xlane.xlu0 %1589  ;;  %v1999_v12 = vperm.slane %v1584_v41, %v5380_v50  ;;  %v2002_v20 = vperm.slane %v1588_v13, %v5393_v59  ;;  %v5511_v41 = vld [vmem:[#allocation7 + $0x1d0] sm:$0xff]   ;;  %v1392_v13 = vmax.f32 %v1264_v39, 0.0 }
 0x1a0   : > { %v2004_v28 = vperm.slane %v1590_v51, %v5397_v31  ;;  %v4424_v52 = vunpack.c.l.bf16 %v5511_v41  ;;  %v1494_v3 = vmul.f32 %v5231_v37, %v1362_v42  ;;  %v1509_v4 = vmul.f32 %v5231_v37, %v1377_v46 }
 0x1a1   : > { %v1524_v17 = vmul.f32 %v5231_v37, %v1392_v13  ;;  %v1220_v42 = vadd.f32 %v4305_v19, %v5272_v44 }
 0x1a2   : > { %v1279_v5 = vadd.f32 %v4424_v52, %v5353_v62  ;;  %v5548_v52 = vld [vmem:[#allocation7 + $0x198] sm:$0xff]  }
 0x1a3   : > { %1781 = vadd.xlane.f32.xlu1 %v1538_v53  ;;  %1721 = vadd.xlane.f32.xlu2 %v1508_v55  ;;  %v4245_v53 = vunpack.c.h.bf16 %v5468_v48 }
 0x1a4   : > { %1751 = vadd.xlane.f32.xlu0 %v1523_v54 }
 0x1a5   : > { %v1190_v10 = vadd.f32 %v4245_v53, %v5263_v22 }
 0x1a6   : > { %v1586_v7 = vpop.xlane.xlu1 %1585  ;;  %v1648_v16 = vpop.xlane.xlu2 %1647 }
 0x1a7   : > { %v1650_v14 = vpop.xlane.xlu0 %1649  ;;  %v2000_v18 = vperm.slane %v1586_v7, %v5390_v57  ;;  %v2061_v21 = vperm.slane %v1648_v16, %v5380_v50  ;;  %v5524_v7 = vld [vmem:[#allocation7 + $0xa8] sm:$0xff]   ;;  %v1302_v16 = vmax.f32 %v1174_v6, 0.0 }
 0x1a8   : > { %v2062_v49 = vperm.slane %v1650_v14, %v5390_v57  ;;  %v4276_v14 = vunpack.c.l.bf16 %v5524_v7 }
 0x1a9   : > { %v2001_v61 = vsel %vm1941_vm0, %v2000_v18, %v1999_v12  ;;  %v5530_v12 = vld [vmem:[#allocation7 + $0x120] sm:$0xff]  }
 0x1aa   : > { %v5505_v32 = vsel %vm1941_vm0, %v2062_v49, %v2061_v21  ;;  %v2003_v33 = vsel %vm1945_vm1, %v2002_v20, %v2001_v61  ;;  %v4336_v18 = vunpack.c.l.bf16 %v5530_v12  ;;  %v1407_v49 = vmax.f32 %v1279_v5, 0.0 }
 0x1ab   : > { %1633 = vadd.xlane.f32.xlu1 %v1464_v23  ;;  %v2005_v40 = vsel %vm1949_vm2, %v2004_v28, %v2003_v33  ;;  %1663 = vadd.xlane.f32.xlu2 %v1479_v38  ;;  %v1318_v21 = vmax.f32 %v1190_v10, 0.0  ;;  %v1205_v38 = vadd.f32 %v4276_v14, %v5253_v9 }
 0x1ac   : > { %1603 = vadd.xlane.f32.xlu0 %v1449_v24  ;;  %v1235_v36 = vadd.f32 %v4336_v18, %v5288_v11  ;;  %v1539_v43 = vmul.f32 %v5231_v37, %v1407_v49 }
 0x1ad   : > { %v1333_v53 = vmax.f32 %v1205_v38, 0.0 }
 0x1ae   : > { %v1618_v51 = vpop.xlane.xlu1 %1617  ;;  %v1592_v55 = vpop.xlane.xlu2 %1591 }
 0x1af   : > { %v1622_v54 = vpop.xlane.xlu0 %1621  ;;  %v2031_v56 = vperm.slane %v1618_v51, %v5390_v57  ;;  %v2006_v60 = vperm.slane %v1592_v55, %v5401_v1  ;;  %v1450_v51 = vmul.f32 %v5231_v37, %v1318_v21  ;;  %v4396_v55 = vunpack.c.l.bf16 %v5548_v52  ;;  %v5568_v21 = vld [vmem:[#allocation7 + $0x30] sm:$0xff]  }
 0x1b0   : > { %v2035_v23 = vperm.slane %v1622_v54, %v5397_v31  ;;  %v1348_v54 = vmax.f32 %v1220_v42, 0.0  ;;  %v1465_v10 = vmul.f32 %v5231_v37, %v1333_v53  ;;  %v5581_v42 = vld [vmem:[%s6167_s7] ss:$0 sm:$0xff] }
 0x1b1   : > { %v2032_v0 = vsel %vm1941_vm0, %v2031_v56, %v2030_v45  ;;  %v2007_v48 = vsel %vm1953_vm3, %v2006_v60, %v2005_v40  ;;  %v1434_v40 = vmul.f32 %v5231_v37, %v1302_v16  ;;  %v1363_v45 = vmax.f32 %v1235_v36, 0.0 }
 0x1b2   : > { %v4365_v60 = vunpack.c.h.bf16 %v5488_v26  ;;  %v1480_v18 = vmul.f32 %v5231_v37, %v1348_v54  ;;  %v1265_v26 = vadd.f32 %v4396_v55, %v5325_v15 }
 0x1b3   : > { %1723 = vadd.xlane.f32.xlu1 %v1509_v4  ;;  %1753 = vadd.xlane.f32.xlu2 %v1524_v17  ;;  %v1495_v16 = vmul.f32 %v5231_v37, %v1363_v45  ;;  %v4216_v37 = vunpack.c.l.bf16 %v5568_v21 }
 0x1b4   : > { %1693 = vadd.xlane.f32.xlu0 %v1494_v3 }
 0x1b6   : > { %v1620_v20 = vpop.xlane.xlu1 %1619  ;;  %v1680_v28 = vpop.xlane.xlu2 %1679 }
 0x1b7   : > { %v1682_v24 = vpop.xlane.xlu0 %1681  ;;  %v2033_v61 = vperm.slane %v1620_v20, %v5393_v59  ;;  %v2092_v33 = vperm.slane %v1680_v28, %v5380_v50  ;;  %v1250_v20 = vadd.f32 %v4365_v60, %v5306_v47 }
 0x1b8   : > { %v2093_v30 = vperm.slane %v1682_v24, %v5390_v57  ;;  %v5570_v24 = vld [vmem:[#allocation7 + $0x70] sm:$0xff]  }
 0x1b9   : > { %v2034_v39 = vsel %vm1945_vm1, %v2033_v61, %v2032_v0  ;;  %v4425_v0 = vunpack.c.h.bf16 %v5511_v41  ;;  %v4248_v28 = vunpack.c.l.bf16 %v5570_v24 }
 0x1ba   : > { %v2094_v46 = vsel %vm1941_vm0, %v2093_v30, %v2092_v33  ;;  %v2036_v13 = vsel %vm1949_vm2, %v2035_v23, %v2034_v39  ;;  %v1378_v23 = vmax.f32 %v1250_v20, 0.0 }
 0x1bb   : > { %1573 = vadd.xlane.f32.xlu1 %v1434_v40  ;;  %1605 = vadd.xlane.f32.xlu2 %v1450_v51  ;;  %v1280_v49 = vadd.f32 %v4425_v0, %v5353_v62  ;;  %v1175_v51 = vadd.f32 %v4216_v37, %v5225_v35 }
 0x1bc   : > { %1783 = vadd.xlane.f32.xlu0 %v1539_v43  ;;  %v1510_v45 = vmul.f32 %v5581_v42, %v1378_v23 }
 0x1bd   : > { %v1408_v30 = vmax.f32 %v1280_v49, 0.0 }
 0x1be   : > { %v1652_v56 = vpop.xlane.xlu1 %1651  ;;  %v1594_v4 = vpop.xlane.xlu2 %1593 }
 0x1bf   : > { %v1624_v3 = vpop.xlane.xlu0 %1623  ;;  %v2064_v6 = vperm.slane %v1652_v56, %v5393_v59  ;;  %v2008_v5 = vperm.slane %v1594_v4, %v5407_v8  ;;  %v1540_v54 = vmul.f32 %v5581_v42, %v1408_v30  ;;  %v5592_v56 = vld [vmem:[#allocation7 + $0x160] sm:$0xff]   ;;  %v4337_v4 = vunpack.c.h.bf16 %v5530_v12 }
 0x1c0   : > { %v2037_v17 = vperm.slane %v1624_v3, %v5401_v1  ;;  %v4368_v3 = vunpack.c.l.bf16 %v5592_v56 }
 0x1c1   : > { %v2065_v14 = vsel %vm1945_vm1, %v2064_v6, %v5505_v32  ;;  %v2009_v19 = vsel %vm1957_vm4, %v2008_v5, %v2007_v48  ;;  %v1393_v32 = vmax.f32 %v1265_v26, 0.0  ;;  %v4277_v48 = vunpack.c.h.bf16 %v5524_v7  ;;  %v5586_v7 = vld [vmem:[#allocation7 + $0xe8] sm:$0xff]  }
 0x1c2   : > { %v5563_v41 = vsel %vm1953_vm3, %v2037_v17, %v2036_v13  ;;  %v1191_v13 = vadd.f32 %v4248_v28, %v5263_v22  ;;  %v4308_v60 = vunpack.c.l.bf16 %v5586_v7  ;;  %v1251_v12 = vadd.f32 %v4368_v3, %v5306_v47 }
 0x1c3   : > { %1665 = vadd.xlane.f32.xlu1 %v1480_v18  ;;  %1695 = vadd.xlane.f32.xlu2 %v1495_v16  ;;  %v1525_v43 = vmul.f32 %v5581_v42, %v1393_v32  ;;  %v1206_v55 = vadd.f32 %v4277_v48, %v5253_v9  ;;  %v1236_v37 = vadd.f32 %v4337_v4, %v5288_v11  ;;  %v5612_v48 = vld [vmem:[#allocation7 + $0x1d8] sm:$0xff]  }
 0x1c4   : > { %1635 = vadd.xlane.f32.xlu0 %v1465_v10  ;;  %v1319_v0 = vmax.f32 %v1191_v13, 0.0  ;;  %v1221_v20 = vadd.f32 %v4308_v60, %v5272_v44 }
 0x1c5   : > { %v1334_v17 = vmax.f32 %v1206_v55, 0.0 }
 0x1c6   : > { %v1654_v61 = vpop.xlane.xlu1 %1653  ;;  %v1684_v38 = vpop.xlane.xlu2 %1683  ;;  %v1451_v32 = vmul.f32 %v5581_v42, %v1319_v0 }
 0x1c7   : > { %v1712_v33 = vpop.xlane.xlu0 %1711  ;;  %v2066_v39 = vperm.slane %v1654_v61, %v5397_v31  ;;  %v2095_v40 = vperm.slane %v1684_v38, %v5393_v59  ;;  %v1466_v30 = vmul.f32 %v5581_v42, %v1334_v17  ;;  %v1364_v38 = vmax.f32 %v1236_v37, 0.0 }
 0x1c8   : > { %v2123_v5 = vperm.slane %v1712_v33, %v5380_v50  ;;  %v1349_v33 = vmax.f32 %v1221_v20, 0.0 }
 0x1c9   : > { %v2067_v36 = vsel %vm1949_vm2, %v2066_v39, %v2065_v14  ;;  %v2096_v53 = vsel %vm1945_vm1, %v2095_v40, %v2094_v46  ;;  %v1303_v46 = vmax.f32 %v1175_v51, 0.0  ;;  %v4428_v39 = vunpack.c.l.bf16 %v5612_v48 }
 0x1ca   : > { %v1481_v60 = vmul.f32 %v5581_v42, %v1349_v33  ;;  %v1496_v0 = vmul.f32 %v5581_v42, %v1364_v38  ;;  %v5642_v38 = vld [vmem:[#allocation7 + $0x128] sm:$0xff]  }
 0x1cb   : > { %1755 = vadd.xlane.f32.xlu1 %v1525_v43  ;;  %1785 = vadd.xlane.f32.xlu2 %v1540_v54  ;;  %v1435_v23 = vmul.f32 %v5581_v42, %v1303_v46  ;;  %v1379_v43 = vmax.f32 %v1251_v12, 0.0  ;;  %v1281_v3 = vadd.f32 %v4428_v39, %v5353_v62  ;;  %v5628_v46 = vld [vmem:[#allocation7 + $0xb0] sm:$0xff]  }
 0x1cc   : > { %1725 = vadd.xlane.f32.xlu0 %v1510_v45 }
 0x1cd   : > { %v1409_v17 = vmax.f32 %v1281_v3, 0.0 }
 0x1ce   : > { %v1714_v6 = vpop.xlane.xlu1 %1713  ;;  %v1656_v14 = vpop.xlane.xlu2 %1655 }
 0x1cf   : > { %v1596_v10 = vpop.xlane.xlu0 %1595  ;;  %v2124_v16 = vperm.slane %v1714_v6, %v5390_v57  ;;  %v2068_v26 = vperm.slane %v1656_v14, %v5401_v1 }
 0x1d0   : > { %v2010_v18 = vperm.slane %v1596_v10, %v5428_v29  ;;  %v4280_v10 = vunpack.c.l.bf16 %v5628_v46 }
 0x1d1   : > { %v2125_v49 = vsel %vm1941_vm0, %v2124_v16, %v2123_v5  ;;  %v5608_v61 = vsel %vm1953_vm3, %v2068_v26, %v2067_v36  ;;  %v4217_v36 = vunpack.c.h.bf16 %v5568_v21  ;;  %v4309_v5 = vunpack.c.h.bf16 %v5586_v7 }
 0x1d2   : > { %v2011_v28 = vsel %vm1961_vm5, %v2010_v18, %v2009_v19  ;;  %v4397_v19 = vunpack.c.h.bf16 %v5548_v52  ;;  %v1511_v52 = vmul.f32 %v5581_v42, %v1379_v43  ;;  %v1541_v7 = vmul.f32 %v5581_v42, %v1409_v17 }
 0x1d3   : > { %1607 = vadd.xlane.f32.xlu1 %v1451_v32  ;;  %1637 = vadd.xlane.f32.xlu2 %v1466_v30  ;;  %v1176_v6 = vadd.f32 %v4217_v36, %v5225_v35  ;;  %v1222_v30 = vadd.f32 %v4309_v5, %v5272_v44  ;;  %v1207_v33 = vadd.f32 %v4280_v10, %v5253_v9  ;;  %v5650_v36 = vld [vmem:[#allocation7 + $0x1a0] sm:$0xff]  }
 0x1d4   : > { %1575 = vadd.xlane.f32.xlu0 %v1435_v23  ;;  %v1266_v21 = vadd.f32 %v4397_v19, %v5325_v15 }
 0x1d5   : > { %v1304_v16 = vmax.f32 %v1176_v6, 0.0 }
 0x1d6   : > { %v1626_v40 = vpop.xlane.xlu1 %1625  ;;  %v1744_v13 = vpop.xlane.xlu2 %1743 }
 0x1d7   : > { %v1686_v51 = vpop.xlane.xlu0 %1685  ;;  %v2039_v45 = vperm.slane %v1626_v40, %v5407_v8  ;;  %v2154_v32 = vperm.slane %v1744_v13, %v5380_v50  ;;  %v1436_v19 = vmul.f32 %v5581_v42, %v1304_v16  ;;  %v1335_v13 = vmax.f32 %v1207_v33, 0.0 }
 0x1d8   : > { %v2097_v54 = vperm.slane %v1686_v51, %v5397_v31 }
 0x1d9   : > { %v2040_v55 = vsel %vm1957_vm4, %v2039_v45, %v5563_v41  ;;  %v4249_v41 = vunpack.c.h.bf16 %v5570_v24  ;;  %v4369_v45 = vunpack.c.h.bf16 %v5592_v56  ;;  %v1467_v56 = vmul.f32 %v5581_v42, %v1335_v13 }
 0x1da   : > { %v2098_v4 = vsel %vm1949_vm2, %v2097_v54, %v2096_v53  ;;  %v1394_v53 = vmax.f32 %v1266_v21, 0.0 }
 0x1db   : > { %1697 = vadd.xlane.f32.xlu1 %v1496_v0  ;;  %1727 = vadd.xlane.f32.xlu2 %v1511_v52  ;;  %v1192_v24 = vadd.f32 %v4249_v41, %v5263_v22  ;;  %v1252_v10 = vadd.f32 %v4369_v45, %v5306_v47 }
 0x1dc   : > { %1667 = vadd.xlane.f32.xlu0 %v1481_v60  ;;  %v1526_v43 = vmul.f32 %v5581_v42, %v1394_v53  ;;  %v1350_v60 = vmax.f32 %v1222_v30, 0.0 }
 0x1dd   : > { %v1320_v51 = vmax.f32 %v1192_v24, 0.0 }
 0x1de   : > { %v1716_v14 = vpop.xlane.xlu1 %1715  ;;  %v1598_v26 = vpop.xlane.xlu2 %1597  ;;  %v1482_v16 = vmul.f32 %v5581_v42, %v1350_v60 }
 0x1df   : > { %v1746_v18 = vpop.xlane.xlu0 %1745  ;;  %v2126_v20 = vperm.slane %v1716_v14, %v5393_v59  ;;  %v2012_v37 = vperm.slane %v1598_v26, %v5421_v25  ;;  %v1452_v5 = vmul.f32 %v5581_v42, %v1320_v51  ;;  %v5672_v26 = vld [vmem:[#allocation7 + $0x38] sm:$0xff]  }
 0x1e0   : > { %v2155_v12 = vperm.slane %v1746_v18, %v5390_v57 }
 0x1e1   : > { %v2127_v23 = vsel %vm1945_vm1, %v2126_v20, %v2125_v49  ;;  %v5646_v40 = vsel %vm1965_vm6, %v2012_v37, %v2011_v28  ;;  %v4340_v49 = vunpack.c.l.bf16 %v5642_v38  ;;  %v4400_v28 = vunpack.c.l.bf16 %v5650_v36 }
 0x1e2   : > { %v2156_v39 = vsel %vm1941_vm0, %v2155_v12, %v2154_v32  ;;  %v1380_v32 = vmax.f32 %v1252_v10, 0.0  ;;  %v4220_v12 = vunpack.c.l.bf16 %v5672_v26 }
 0x1e3   : > { %1787 = vadd.xlane.f32.xlu1 %v1541_v7  ;;  %1577 = vadd.xlane.f32.xlu2 %v1436_v19  ;;  %v1237_v41 = vadd.f32 %v4340_v49, %v5288_v11  ;;  %v1267_v18 = vadd.f32 %v4400_v28, %v5325_v15  ;;  %v5691_v28 = vld [vmem:[#allocation7 + $0xf0] sm:$0xff]  }
 0x1e4   : > { %1757 = vadd.xlane.f32.xlu0 %v1526_v43  ;;  %v1512_v51 = vmul.f32 %v5581_v42, %v1380_v32  ;;  %v1177_v13 = vadd.f32 %v4220_v12, %v5225_v35 }
 0x1e5   : > { %v1365_v20 = vmax.f32 %v1237_v41, 0.0  ;;  %v1395_v37 = vmax.f32 %v1267_v18, 0.0 }
 0x1e6   : > { %v1658_v54 = vpop.xlane.xlu1 %1657  ;;  %v1688_v3 = vpop.xlane.xlu2 %1687 }
 0x1e7   : > { %v1628_v0 = vpop.xlane.xlu0 %1627  ;;  %v2070_v52 = vperm.slane %v1658_v54, %v5407_v8  ;;  %v2099_v6 = vperm.slane %v1688_v3, %v5401_v1  ;;  %v1497_v49 = vmul.f32 %v5581_v42, %v1365_v20  ;;  %v4341_v3 = vunpack.c.h.bf16 %v5642_v38 }
 0x1e8   : > { %v2041_v21 = vperm.slane %v1628_v0, %v5428_v29  ;;  %v1305_v0 = vmax.f32 %v1177_v13, 0.0 }
 0x1e9   : > { %v2071_v17 = vsel %vm1957_vm4, %v2070_v52, %v5608_v61  ;;  %v5668_v53 = vsel %vm1953_vm3, %v2099_v6, %v2098_v4  ;;  %v5674_v61 = vld [vmem:[#allocation7 + $0x78] sm:$0xff]   ;;  %v4429_v4 = vunpack.c.h.bf16 %v5612_v48  ;;  %v1527_v48 = vmul.f32 %v5581_v42, %v1395_v37 }
 0x1ea   : > { %v5665_v14 = vsel %vm1961_vm5, %v2041_v21, %v2040_v55  ;;  %v4252_v24 = vunpack.c.l.bf16 %v5674_v61  ;;  %v4312_v52 = vunpack.c.l.bf16 %v5691_v28  ;;  %v1437_v38 = vmul.f32 %v5581_v42, %v1305_v0 }
 0x1eb   : > { %1639 = vadd.xlane.f32.xlu1 %v1467_v56  ;;  %1669 = vadd.xlane.f32.xlu2 %v1482_v16  ;;  %v1282_v54 = vadd.f32 %v4429_v4, %v5353_v62  ;;  %v1238_v32 = vadd.f32 %v4341_v3, %v5288_v11 }
 0x1ec   : > { %1609 = vadd.xlane.f32.xlu0 %v1452_v5  ;;  %v1193_v60 = vadd.f32 %v4252_v24, %v5263_v22  ;;  %v1223_v12 = vadd.f32 %v4312_v52, %v5272_v44 }
 0x1ed   : > { %v1410_v21 = vmax.f32 %v1282_v54, 0.0 }
 0x1ee   : > { %v1748_v55 = vpop.xlane.xlu1 %1747  ;;  %v1776_v30 = vpop.xlane.xlu2 %1775  ;;  %v1321_v6 = vmax.f32 %v1193_v60, 0.0 }
 0x1ef   : > { %v1718_v7 = vpop.xlane.xlu0 %1717  ;;  %v2157_v33 = vperm.slane %v1748_v55, %v5393_v59  ;;  %v2185_v10 = vperm.slane %v1776_v30, %v5380_v50  ;;  %v5707_v55 = vld [vmem:[#allocation7 + $0x168] sm:$0xff]   ;;  %v1542_v4 = vmul.f32 %v5581_v42, %v1410_v21 }
 0x1f0   : > { %v2128_v43 = vperm.slane %v1718_v7, %v5397_v31  ;;  %v1453_v24 = vmul.f32 %v5581_v42, %v1321_v6  ;;  %v4372_v7 = vunpack.c.l.bf16 %v5707_v55 }
 0x1f1   : > { %v2158_v19 = vsel %vm1945_vm1, %v2157_v33, %v2156_v39  ;;  %v4281_v39 = vunpack.c.h.bf16 %v5628_v46  ;;  %v1351_v33 = vmax.f32 %v1223_v12, 0.0 }
 0x1f2   : > { %v5686_v45 = vsel %vm1949_vm2, %v2128_v43, %v2127_v23  ;;  %v4401_v43 = vunpack.c.h.bf16 %v5650_v36  ;;  %v1253_v0 = vadd.f32 %v4372_v7, %v5306_v47 }
 0x1f3   : > { %1729 = vadd.xlane.f32.xlu1 %v1512_v51  ;;  %1759 = vadd.xlane.f32.xlu2 %v1527_v48  ;;  %v1208_v46 = vadd.f32 %v4281_v39, %v5253_v9  ;;  %v1366_v51 = vmax.f32 %v1238_v32, 0.0  ;;  %v1483_v36 = vmul.f32 %v5581_v42, %v1351_v33 }
 0x1f4   : > { %1699 = vadd.xlane.f32.xlu0 %v1497_v49 }
 0x1f5   : > { %v1336_v30 = vmax.f32 %v1208_v46, 0.0 }
 0x1f6   : > { %v1660_v23 = vpop.xlane.xlu1 %1659  ;;  %v1600_v5 = vpop.xlane.xlu2 %1599 }
 0x1f7   : > { %v1778_v41 = vpop.xlane.xlu0 %1777  ;;  %v2072_v56 = vperm.slane %v1660_v23, %v5428_v29  ;;  %v2014_v18 = vperm.slane %v1600_v5, %v5445_v58  ;;  %v1468_v52 = vmul.f32 %v5581_v42, %v1336_v30  ;;  %v1268_v23 = vadd.f32 %v4401_v43, %v5325_v15 }
 0x1f8   : > { %v2186_v16 = vperm.slane %v1778_v41, %v5390_v57  ;;  %v1498_v41 = vmul.f32 %v5581_v42, %v1366_v51 }
 0x1f9   : > { %v5702_v20 = vsel %vm1961_vm5, %v2072_v56, %v2071_v17  ;;  %v2015_v57 = vsel %vm1969_vm7, %v2014_v18, %v5646_v40  ;;  %v5714_v17 = vld [vmem:[#allocation7 + $0x1e0] sm:$0xff]   ;;  %v5735_v56 = vld [vmem:[#allocation7 + $0xb8] sm:$0xff]   ;;  %v4253_v18 = vunpack.c.h.bf16 %v5674_v61 }
 0x1fa   : > { %v2187_v37 = vsel %vm1941_vm0, %v2186_v16, %v2185_v10  ;;  %v4432_v13 = vunpack.c.l.bf16 %v5714_v17  ;;  %v1396_v10 = vmax.f32 %v1268_v23, 0.0  ;;  %v4221_v16 = vunpack.c.h.bf16 %v5672_v26 }
 0x1fb   : > { %1579 = vadd.xlane.f32.xlu1 %v1437_v38  ;;  %1611 = vadd.xlane.f32.xlu2 %v1453_v24  ;;  %v4284_v38 = vunpack.c.l.bf16 %v5735_v56  ;;  %v1194_v33 = vadd.f32 %v4253_v18, %v5263_v22  ;;  %vm2218_vm0 = vcmask 1042434  }
 0x1fc   : > { %1789 = vadd.xlane.f32.xlu0 %v1542_v4  ;;  %v1283_v5 = vadd.f32 %v4432_v13, %v5353_v62  ;;  %v1528_v26 = vmul.f32 %v5581_v42, %v1396_v10  ;;  %v1178_v61 = vadd.f32 %v4221_v16, %v5225_v35  ;;  %v5755_v13 = vld [vmem:[#allocation7 + $0x130] sm:$0xff]  }
 0x1fd   : > { %v1322_v35 = vmax.f32 %v1194_v33, 0.0  ;;  %v4344_v22 = vunpack.c.l.bf16 %v5755_v13 }
 0x1fe   : > { %v1750_v49 = vpop.xlane.xlu1 %1749  ;;  %v1690_v48 = vpop.xlane.xlu2 %1689 }
 0x1ff   : > { %v1630_v40 = vpop.xlane.xlu0 %1629  ;;  %v2159_v54 = vperm.slane %v1750_v49, %v5397_v31  ;;  %v2101_v39 = vperm.slane %v1690_v48, %v5407_v8 }
 0x200   : > { %v2043_v60 = vperm.slane %v1630_v40, %v5421_v25  ;;  %v1306_v40 = vmax.f32 %v1178_v61, 0.0 }
 0x201   : > { %v5724_v3 = vsel %vm1949_vm2, %v2159_v54, %v2158_v19  ;;  %v2102_v6 = vsel %vm1957_vm4, %v2101_v39, %v5668_v53  ;;  %v1381_v19 = vmax.f32 %v1253_v0, 0.0 }
 0x202   : > { %v2044_v21 = vsel %vm1965_vm6, %v2043_v60, %v5665_v14  ;;  %v1411_v14 = vmax.f32 %v1283_v5, 0.0  ;;  %v1438_v23 = vmul.f32 %v5581_v42, %v1306_v40  ;;  %v1239_v5 = vadd.f32 %v4344_v22, %v5288_v11 }
 0x203   : > { %1671 = vadd.xlane.f32.xlu1 %v1483_v36  ;;  %1701 = vadd.xlane.f32.xlu2 %v1498_v41  ;;  %v1513_v7 = vmul.f32 %v5581_v42, %v1381_v19  ;;  %v1454_v41 = vmul.f32 %v5581_v42, %v1322_v35  ;;  %v5795_v35 = vld [vmem:[#allocation7 + $0x170] sm:$0xff]  }
 0x204   : > { %1641 = vadd.xlane.f32.xlu0 %v1468_v52  ;;  %v1543_v51 = vmul.f32 %v5581_v42, %v1411_v14  ;;  %v1367_v14 = vmax.f32 %v1239_v5, 0.0 }
 0x206   : > { %v1602_v46 = vpop.xlane.xlu1 %1601  ;;  %v1780_v32 = vpop.xlane.xlu2 %1779 }
 0x207   : > { %v1720_v53 = vpop.xlane.xlu0 %1719  ;;  %v2016_v12 = vperm.slane %v1602_v46, %v5451_v63  ;;  %v2188_v24 = vperm.slane %v1780_v32, %v5393_v59  ;;  %v1209_v59 = vadd.f32 %v4284_v38, %v5253_v9  ;;  %v4433_v38 = vunpack.c.h.bf16 %v5714_v17 }
 0x208   : > { %v2130_v4 = vperm.slane %v1720_v53, %v5401_v1  ;;  %v1499_v17 = vmul.f32 %v5581_v42, %v1367_v14 }
 0x209   : > { %v5745_v30 = vsel %vm1973_vm8, %v2016_v12, %v2015_v57  ;;  %v2189_v49 = vsel %vm1945_vm1, %v2188_v24, %v2187_v37  ;;  %v4313_v57 = vunpack.c.h.bf16 %v5691_v28  ;;  %v1337_v54 = vmax.f32 %v1209_v59, 0.0 }
 0x20a   : > { %v2131_v43 = vsel %vm1953_vm3, %v2130_v4, %v5686_v45  ;;  %v4373_v45 = vunpack.c.h.bf16 %v5707_v55  ;;  %v5770_v55 = vld [vmem:[#allocation7 + $0x1a8] sm:$0xff]   ;;  %v4285_v12 = vunpack.c.h.bf16 %v5735_v56  ;;  %v4476_v56 = vld [vmem:[#allocation7 + $0xf8] sm:$0xff]   ;;  %vm2220_vm1 = vcmask 1043459  }
 0x20b   : > { %1761 = vadd.xlane.f32.xlu1 %v1528_v26  ;;  %1791 = vadd.xlane.f32.xlu2 %v1543_v51  ;;  %v1224_v36 = vadd.f32 %v4313_v57, %v5272_v44  ;;  %v1469_v16 = vmul.f32 %v5581_v42, %v1337_v54  ;;  %v1284_v51 = vadd.f32 %v4433_v38, %v5353_v62  ;;  %v4345_v54 = vunpack.c.h.bf16 %v5755_v13 }
 0x20c   : > { %1731 = vadd.xlane.f32.xlu0 %v1513_v7  ;;  %v1254_v18 = vadd.f32 %v4373_v45, %v5306_v47  ;;  %v1210_v40 = vadd.f32 %v4285_v12, %v5253_v9  ;;  %v4405_v38 = vunpack.c.h.bf16 %v5770_v55  ;;  %v4317_v12 = vunpack.c.h.bf16 %v4476_v56 }
 0x20d   : > { %v1352_v46 = vmax.f32 %v1224_v36, 0.0 }
 0x20e   : > { %v1692_v48 = vpop.xlane.xlu1 %1691  ;;  %v1632_v60 = vpop.xlane.xlu2 %1631  ;;  %v1382_v32 = vmax.f32 %v1254_v18, 0.0 }
 0x20f   : > { %v1662_v37 = vpop.xlane.xlu0 %1661  ;;  %v2103_v39 = vperm.slane %v1692_v48, %v5428_v29  ;;  %v2045_v52 = vperm.slane %v1632_v60, %v5445_v58  ;;  %v1484_v33 = vmul.f32 %v5581_v42, %v1352_v46  ;;  %v1412_v48 = vmax.f32 %v1284_v51, 0.0  ;;  %v5816_v46 = vld [vmem:[#allocation7 + $0x1e8] sm:$0xff]   ;;  %v4484_v51 = vld [vmem:[#allocation7 + $0x138] sm:$0xff]  }
 0x210   : > { %v2074_v0 = vperm.slane %v1662_v37, %v5421_v25  ;;  %v1514_v57 = vmul.f32 %v5581_v42, %v1382_v32  ;;  %v1338_v37 = vmax.f32 %v1210_v40, 0.0 }
 0x211   : > { %v5765_v28 = vsel %vm1961_vm5, %v2103_v39, %v2102_v6  ;;  %v2046_v10 = vsel %vm1969_vm7, %v2045_v52, %v2044_v21  ;;  %v4404_v6 = vunpack.c.l.bf16 %v5770_v55  ;;  %v1544_v13 = vmul.f32 %v5581_v42, %v1412_v48 }
 0x212   : > { %v2075_v19 = vsel %vm1965_vm6, %v2074_v0, %v5702_v20  ;;  %v1470_v18 = vmul.f32 %v5581_v42, %v1338_v37  ;;  %v4348_v48 = vunpack.c.l.bf16 %v4484_v51 }
 0x213   : > { %1613 = vadd.xlane.f32.xlu1 %v1454_v41  ;;  %1643 = vadd.xlane.f32.xlu2 %v1469_v16  ;;  %v1269_v26 = vadd.f32 %v4404_v6, %v5325_v15  ;;  %v1240_v41 = vadd.f32 %v4345_v54, %v5288_v11 }
 0x214   : > { %1581 = vadd.xlane.f32.xlu0 %v1438_v23 }
 0x215   : > { %v1397_v22 = vmax.f32 %v1269_v26, 0.0  ;;  %v1368_v14 = vmax.f32 %v1240_v41, 0.0 }
 0x216   : > { %v1782_v53 = vpop.xlane.xlu1 %1781  ;;  %v1722_v4 = vpop.xlane.xlu2 %1721 }
 0x217   : > { %v1752_v20 = vpop.xlane.xlu0 %1751  ;;  %v2190_v21 = vperm.slane %v1782_v53, %v5397_v31  ;;  %v2132_v7 = vperm.slane %v1722_v4, %v5407_v8  ;;  %v1529_v23 = vmul.f32 %v5581_v42, %v1397_v22  ;;  %v4436_v53 = vunpack.c.l.bf16 %v5816_v46  ;;  %v5837_v22 = vld [vmem:[#allocation7 + $0x1b0] sm:$0xff]  }
 0x218   : > { %v2161_v24 = vperm.slane %v1752_v20, %v5401_v1  ;;  %v1500_v55 = vmul.f32 %v5581_v42, %v1368_v14 }
 0x219   : > { %v5785_v61 = vsel %vm1949_vm2, %v2190_v21, %v2189_v49  ;;  %v2133_v31 = vsel %vm1957_vm4, %v2132_v7, %v2131_v43  ;;  %v4316_v49 = vunpack.c.l.bf16 %v4476_v56  ;;  %vm2222_vm2 = vcmask 1044484  }
 0x21a   : > { %v2162_v59 = vsel %vm1953_vm3, %v2161_v24, %v5724_v3  ;;  %v4376_v3 = vunpack.c.l.bf16 %v5795_v35 }
 0x21b   : > { %1703 = vadd.xlane.f32.xlu1 %v1499_v17  ;;  %1733 = vadd.xlane.f32.xlu2 %v1514_v57  ;;  %v1225_v52 = vadd.f32 %v4316_v49, %v5272_v44  ;;  %v1285_v17 = vadd.f32 %v4436_v53, %v5353_v62  ;;  %v1226_v49 = vadd.f32 %v4317_v12, %v5272_v44  ;;  %v4349_v53 = vunpack.c.h.bf16 %v4484_v51 }
 0x21c   : > { %1673 = vadd.xlane.f32.xlu0 %v1484_v33  ;;  %v1255_v6 = vadd.f32 %v4376_v3, %v5306_v47  ;;  %v1270_v33 = vadd.f32 %v4405_v38, %v5325_v15 }
 0x21d   : > { %v1413_v54 = vmax.f32 %v1285_v17, 0.0  ;;  %v1354_v3 = vmax.f32 %v1226_v49, 0.0  ;;  %v4507_v49 = vld [vmem:[#allocation7 + $0x1f0] sm:$0xff]  }
 0x21e   : > { %v1634_v45 = vpop.xlane.xlu1 %1633  ;;  %v1664_v43 = vpop.xlane.xlu2 %1663  ;;  %v1398_v37 = vmax.f32 %v1270_v33, 0.0 }
 0x21f   : > { %v1604_v60 = vpop.xlane.xlu0 %1603  ;;  %v2047_v39 = vperm.slane %v1634_v45, %v5451_v63  ;;  %v2076_v0 = vperm.slane %v1664_v43, %v5445_v58  ;;  %v4408_v45 = vunpack.c.l.bf16 %v5837_v22 }
 0x220   : > { %v2018_v9 = vperm.slane %v1604_v60, %v5454_v2 }
 0x221   : > { %v5804_v36 = vsel %vm1973_vm8, %v2047_v39, %v2046_v10  ;;  %v5812_v16 = vsel %vm1969_vm7, %v2076_v0, %v2075_v19  ;;  %v1353_v10 = vmax.f32 %v1225_v52, 0.0  ;;  %v1241_v0 = vadd.f32 %v4348_v48, %v5288_v11 }
 0x222   : > { %v2019_v5 = vsel %vm1977_vm9, %v2018_v9, %v5745_v30  ;;  %v1383_v30 = vmax.f32 %v1255_v6, 0.0  ;;  %v1486_v6 = vmul.f32 %v5581_v42, %v1354_v3 }
 0x223   : > { %1793 = vadd.xlane.f32.xlu1 %v1544_v13  ;;  %1645 = vadd.xlane.f32.xlu2 %v1470_v18  ;;  %v1485_v7 = vmul.f32 %v5581_v42, %v1353_v10  ;;  %v4492_v10 = vld [vmem:[#allocation7 + $0x178] sm:$0xff]   ;;  %v1369_v14 = vmax.f32 %v1241_v0, 0.0 }
 0x224   : > { %1763 = vadd.xlane.f32.xlu0 %v1529_v23  ;;  %v1515_v40 = vmul.f32 %v5581_v42, %v1383_v30  ;;  %v1271_v23 = vadd.f32 %v4408_v45, %v5325_v15  ;;  %v4380_v12 = vunpack.c.l.bf16 %v4492_v10  ;;  %v4440_v45 = vunpack.c.l.bf16 %v4507_v49  ;;  %v4500_v0 = vld [vmem:[#allocation7 + $0x1b8] sm:$0xff]  }
 0x226   : > { %v1724_v32 = vpop.xlane.xlu1 %1723  ;;  %v1754_v20 = vpop.xlane.xlu2 %1753  ;;  %v1399_v30 = vmax.f32 %v1271_v23, 0.0 }
 0x227   : > { %v1694_v19 = vpop.xlane.xlu0 %1693  ;;  %v2134_v4 = vperm.slane %v1724_v32, %v5428_v29  ;;  %v2163_v24 = vperm.slane %v1754_v20, %v5407_v8 }
 0x228   : > { %v2105_v21 = vperm.slane %v1694_v19, %v5421_v25  ;;  %v1531_v51 = vmul.f32 %v5581_v42, %v1399_v30 }
 0x229   : > { %v5825_v26 = vsel %vm1961_vm5, %v2134_v4, %v2133_v31  ;;  %v5833_v57 = vsel %vm1957_vm4, %v2163_v24, %v2162_v59  ;;  %v5840_v31 = vadd.s32 4294967208, %v5380_v50 }
 0x22a   : > { %v2106_v56 = vsel %vm1965_vm6, %v2105_v21, %v5765_v28  ;;  %v4377_v28 = vunpack.c.h.bf16 %v5795_v35  ;;  %v1545_v35 = vmul.f32 %v5581_v42, %v1413_v54  ;;  %v4409_v54 = vunpack.c.h.bf16 %v5837_v22 }
 0x22b   : > { %1705 = vadd.xlane.f32.xlu1 %v1500_v55  ;;  %1735 = vadd.xlane.f32.xlu2 %v1515_v40  ;;  %v1242_v55 = vadd.f32 %v4349_v53, %v5288_v11  ;;  %v1257_v40 = vadd.f32 %v4380_v12, %v5306_v47 }
 0x22c   : > { %1675 = vadd.xlane.f32.xlu0 %v1485_v7  ;;  %v1256_v13 = vadd.f32 %v4377_v28, %v5306_v47 }
 0x22d   : > { %v1370_v48 = vmax.f32 %v1242_v55, 0.0  ;;  %v1385_v28 = vmax.f32 %v1257_v40, 0.0  ;;  %v4508_v55 = vld [vmem:[#allocation7 + $0x1f8] sm:$0xff]  }
 0x22e   : > { %v1574_v59 = vpop.xlane.xlu1 %1573  ;;  %v1606_v44 = vpop.xlane.xlu2 %1605  ;;  %v1384_v38 = vmax.f32 %v1256_v13, 0.0  ;;  %v4445_v40 = vunpack.c.h.bf16 %v4508_v55 }
 0x22f   : > { %v1784_v60 = vpop.xlane.xlu0 %1783  ;;  %v1980_v43 = vperm.slane %v1574_v59, %v5840_v31  ;;  %v2020_v9 = vperm.slane %v1606_v44, %v5840_v31  ;;  %v4381_v59 = vunpack.c.h.bf16 %v4492_v10  ;;  %v1502_v22 = vmul.f32 %v5581_v42, %v1370_v48 }
 0x230   : > { %v2192_v39 = vperm.slane %v1784_v60, %v5401_v1  ;;  %v1530_v1 = vmul.f32 %v5581_v42, %v1398_v37  ;;  %v1516_v7 = vmul.f32 %v5581_v42, %v1384_v38  ;;  %v4413_v10 = vunpack.c.h.bf16 %v4500_v0 }
 0x231   : > { %v5850_v52 = vsel %vm1981_vm10, %v1980_v43, %v5475_v34  ;;  %v5858_v18 = vsel %vm1981_vm10, %v2020_v9, %v2019_v5  ;;  %v4437_v34 = vunpack.c.h.bf16 %v5816_v46  ;;  %v1501_v46 = vmul.f32 %v5581_v42, %v1369_v14 }
 0x232   : > { %v2193_v41 = vsel %vm1953_vm3, %v2192_v39, %v5785_v61  ;;  %v1272_v39 = vadd.f32 %v4409_v54, %v5325_v15  ;;  %v1287_v9 = vadd.f32 %v4440_v45, %v5353_v62  ;;  %v1258_v13 = vadd.f32 %v4381_v59, %v5306_v47 }
 0x233   : > { %1795 = vadd.xlane.f32.xlu1 %v1545_v35  ;;  %1677 = vadd.xlane.f32.xlu2 %v1486_v6  ;;  %v1286_v21 = vadd.f32 %v4437_v34, %v5353_v62  ;;  %v4441_v34 = vunpack.c.h.bf16 %v4507_v49  ;;  %vm2224_vm3 = vcmask 1045509  }
 0x234   : > { %1765 = vadd.xlane.f32.xlu0 %v1530_v1  ;;  %v4412_v1 = vunpack.c.l.bf16 %v4500_v0  ;;  %v1415_v6 = vmax.f32 %v1287_v9, 0.0  ;;  %v1386_v38 = vmax.f32 %v1258_v13, 0.0 }
 0x236   : > { %v1666_v32 = vpop.xlane.xlu1 %1665  ;;  %v1696_v19 = vpop.xlane.xlu2 %1695  ;;  %v1273_v12 = vadd.f32 %v4412_v1, %v5325_v15 }
 0x237   : > { %v1636_v61 = vpop.xlane.xlu0 %1635  ;;  %v2078_v5 = vperm.slane %v1666_v32, %v5451_v63  ;;  %v2107_v4 = vperm.slane %v1696_v19, %v5445_v58  ;;  %v1547_v19 = vmul.f32 %v5581_v42, %v1415_v6 }
 0x238   : > { %v2049_v20 = vperm.slane %v1636_v61, %v5454_v2 }
 0x239   : > { %v5869_v24 = vsel %vm1973_vm8, %v2078_v5, %v5812_v16  ;;  %v5877_v17 = vsel %vm1969_vm7, %v2107_v4, %v2106_v56  ;;  %v1414_v16 = vmax.f32 %v1286_v21, 0.0  ;;  %v1274_v5 = vadd.f32 %v4413_v10, %v5325_v15 }
 0x23a   : > { %v2050_v33 = vsel %vm1977_vm9, %v2049_v20, %v5804_v36  ;;  %v1288_v20 = vadd.f32 %v4441_v34, %v5353_v62  ;;  %v1401_v15 = vmax.f32 %v1273_v12, 0.0 }
 0x23b   : > { %1737 = vadd.xlane.f32.xlu1 %v1516_v7  ;;  %1767 = vadd.xlane.f32.xlu2 %v1531_v51  ;;  %v1546_v44 = vmul.f32 %v5581_v42, %v1414_v16  ;;  %v1518_v7 = vmul.f32 %v5581_v42, %v1386_v38  ;;  %v4444_v51 = vunpack.c.l.bf16 %v4508_v55  ;;  %v1402_v16 = vmax.f32 %v1274_v5, 0.0 }
 0x23c   : > { %1707 = vadd.xlane.f32.xlu0 %v1501_v46 }
 0x23d   : > { %v1289_v59 = vadd.f32 %v4444_v51, %v5353_v62 }
 0x23e   : > { %v1756_v11 = vpop.xlane.xlu1 %1755  ;;  %v1786_v37 = vpop.xlane.xlu2 %1785 }
 0x23f   : > { %v1726_v36 = vpop.xlane.xlu0 %1725  ;;  %v2165_v56 = vperm.slane %v1756_v11, %v5428_v29  ;;  %v2194_v60 = vperm.slane %v1786_v37, %v5407_v8  ;;  %v1517_v8 = vmul.f32 %v5581_v42, %v1385_v28 }
 0x240   : > { %v2136_v3 = vperm.slane %v1726_v36, %v5421_v25  ;;  %v1290_v36 = vadd.f32 %v4445_v40, %v5353_v62 }
 0x241   : > { %v5888_v43 = vsel %vm1961_vm5, %v2165_v56, %v5833_v57  ;;  %v5896_v23 = vsel %vm1957_vm4, %v2194_v60, %v2193_v41  ;;  %v5901_v57 = vadd.s32 4294967200, %v5380_v50  ;;  %v1534_v60 = vmul.f32 %v5581_v42, %v1402_v16 }
 0x242   : > { %v2137_v35 = vsel %vm1965_vm6, %v2136_v3, %v5825_v26  ;;  %v1400_v26 = vmax.f32 %v1272_v39, 0.0  ;;  %v1533_v3 = vmul.f32 %v5581_v42, %v1401_v15  ;;  %v1417_v39 = vmax.f32 %v1289_v59, 0.0 }
 0x243   : > { %1709 = vadd.xlane.f32.xlu1 %v1502_v22  ;;  %1739 = vadd.xlane.f32.xlu2 %v1517_v8  ;;  %vm2226_vm4 = vcmask 1046534  }
 0x244   : > { %1797 = vadd.xlane.f32.xlu0 %v1546_v44  ;;  %v1532_v46 = vmul.f32 %v5581_v42, %v1400_v26  ;;  %v1418_v44 = vmax.f32 %v1290_v36, 0.0  ;;  %v1549_v10 = vmul.f32 %v5581_v42, %v1417_v39 }
 0x246   : > { %v1608_v14 = vpop.xlane.xlu1 %1607  ;;  %v1638_v53 = vpop.xlane.xlu2 %1637  ;;  %v1550_v13 = vmul.f32 %v5581_v42, %v1418_v44 }
 0x247   : > { %v1576_v41 = vpop.xlane.xlu0 %1575  ;;  %v2022_v32 = vperm.slane %v1608_v14, %v5901_v57  ;;  %v2051_v30 = vperm.slane %v1638_v53, %v5840_v31 }
 0x248   : > { %v1984_v47 = vperm.slane %v1576_v41, %v5901_v57 }
 0x249   : > { %v2023_v61 = vsel %vm1985_vm11, %v2022_v32, %v5858_v18  ;;  %v2052_v21 = vsel %vm1981_vm10, %v2051_v30, %v2050_v33  ;;  %v1416_v18 = vmax.f32 %v1288_v20, 0.0 }
 0x24a   : > { %v1986_v4 = vsel %vm1985_vm11, %v1984_v47, %v5850_v52 }
 0x24b   : > { %1799 = vadd.xlane.f32.xlu1 %v1547_v19  ;;  %1741 = vadd.xlane.f32.xlu2 %v1518_v7  ;;  %v1548_v28 = vmul.f32 %v5581_v42, %v1416_v18 }
 0x24c   : > { %1769 = vadd.xlane.f32.xlu0 %v1532_v46 }
 0x24e   : > { %v1698_v49 = vpop.xlane.xlu1 %1697  ;;  %v1728_v54 = vpop.xlane.xlu2 %1727 }
 0x24f   : > { %v1668_v48 = vpop.xlane.xlu0 %1667  ;;  %v2109_v52 = vperm.slane %v1698_v49, %v5451_v63  ;;  %v2138_v45 = vperm.slane %v1728_v54, %v5445_v58 }
 0x250   : > { %v2080_v33 = vperm.slane %v1668_v48, %v5454_v2 }
 0x251   : > { %v2110_v11 = vsel %vm1973_vm8, %v2109_v52, %v5877_v17  ;;  %v2139_v56 = vsel %vm1969_vm7, %v2138_v45, %v2137_v35  ;;  %v5931_v17 = vadd.s32 4294967192, %v5380_v50 }
 0x252   : > { %v2081_v37 = vsel %vm1977_vm9, %v2080_v33, %v5869_v24 }
 0x253   : > { %1801 = vadd.xlane.f32.xlu1 %v1548_v28  ;;  %1773 = vadd.xlane.f32.xlu2 %v1534_v60 }
 0x254   : > { %1771 = vadd.xlane.f32.xlu0 %v1533_v3 }
 0x256   : > { %v1788_v22 = vpop.xlane.xlu1 %1787  ;;  %v1578_v62 = vpop.xlane.xlu2 %1577 }
 0x257   : > { %v1758_v9 = vpop.xlane.xlu0 %1757  ;;  %v2196_v24 = vperm.slane %v1788_v22, %v5428_v29  ;;  %v1988_v35 = vperm.slane %v1578_v62, %v5931_v17 }
 0x258   : > { %v2167_v0 = vperm.slane %v1758_v9, %v5421_v25  ;;  %v5981_v9 = vadd.s32 4294967176, %v5380_v50 }
 0x259   : > { %v2197_v8 = vsel %vm1961_vm5, %v2196_v24, %v5896_v23  ;;  %v1990_v6 = vsel %vm1989_vm12, %v1988_v35, %v1986_v4  ;;  %vm2228_vm5 = vcmask 1047559  }
 0x25a   : > { %v2168_v1 = vsel %vm1965_vm6, %v2167_v0, %v5888_v43 }
 0x25b   : > { %1805 = vadd.xlane.f32.xlu1 %v1550_v13 }
 0x25c   : > { %1803 = vadd.xlane.f32.xlu0 %v1549_v10 }
 0x25e   : > { %v1640_v34 = vpop.xlane.xlu1 %1639  ;;  %v1670_v14 = vpop.xlane.xlu2 %1669 }
 0x25f   : > { %v1610_v29 = vpop.xlane.xlu0 %1609  ;;  %v2053_v26 = vperm.slane %v1640_v34, %v5901_v57  ;;  %v2082_v23 = vperm.slane %v1670_v14, %v5840_v31 }
 0x260   : > { %v2024_v38 = vperm.slane %v1610_v29, %v5931_v17 }
 0x261   : > { %v2054_v41 = vsel %vm1985_vm11, %v2053_v26, %v2052_v21  ;;  %v2083_v43 = vsel %vm1981_vm10, %v2082_v23, %v2081_v37  ;;  %v5956_v21 = vadd.s32 4294967184, %v5380_v50 }
 0x262   : > { %v2025_v53 = vsel %vm1989_vm12, %v2024_v38, %v2023_v61 }
 0x266   : > { %v1730_v32 = vpop.xlane.xlu1 %1729  ;;  %v1760_v42 = vpop.xlane.xlu2 %1759 }
 0x267   : > { %v1700_v47 = vpop.xlane.xlu0 %1699  ;;  %v2140_v30 = vperm.slane %v1730_v32, %v5451_v63  ;;  %v2169_v19 = vperm.slane %v1760_v42, %v5445_v58 }
 0x268   : > { %v2111_v12 = vperm.slane %v1700_v47, %v5454_v2 }
 0x269   : > { %v2141_v5 = vsel %vm1973_vm8, %v2140_v30, %v2139_v56  ;;  %v2170_v4 = vsel %vm1969_vm7, %v2169_v19, %v2168_v1 }
 0x26a   : > { %v2112_v20 = vsel %vm1977_vm9, %v2111_v12, %v2110_v11 }
 0x26e   : > { %v1580_v61 = vpop.xlane.xlu1 %1579  ;;  %v1612_v7 = vpop.xlane.xlu2 %1611 }
 0x26f   : > { %v1790_v46 = vpop.xlane.xlu0 %1789  ;;  %v1992_v55 = vperm.slane %v1580_v61, %v5956_v21  ;;  %v2026_v51 = vperm.slane %v1612_v7, %v5956_v21 }
 0x270   : > { %v2198_v18 = vperm.slane %v1790_v46, %v5421_v25 }
 0x271   : > { %v1994_v40 = vsel %vm1993_vm13, %v1992_v55, %v1990_v6  ;;  %v2027_v15 = vsel %vm1993_vm13, %v2026_v51, %v2025_v53 }
 0x272   : > { %v2199_v49 = vsel %vm1965_vm6, %v2198_v18, %v2197_v8  ;;  %vm1809_vm6 = vcmp.lt.s32.totalorder %v5380_v50, 16 }
 0x276   : > { %v1672_v16 = vpop.xlane.xlu1 %1671  ;;  %v1702_v54 = vpop.xlane.xlu2 %1701 }
 0x277   : > { %v1642_v48 = vpop.xlane.xlu0 %1641  ;;  %v2084_v52 = vperm.slane %v1672_v16, %v5901_v57  ;;  %v2113_v45 = vperm.slane %v1702_v54, %v5840_v31 }
 0x278   : > { %v2055_v33 = vperm.slane %v1642_v48, %v5931_v17 }
 0x279   : > { %v2085_v11 = vsel %vm1985_vm11, %v2084_v52, %v2083_v43  ;;  %v2114_v28 = vsel %vm1981_vm10, %v2113_v45, %v2112_v20 }
 0x27a   : > { %v2056_v25 = vsel %vm1989_vm12, %v2055_v33, %v2054_v41 }
 0x27e   : > { %v1762_v59 = vpop.xlane.xlu1 %1761  ;;  %v1792_v37 = vpop.xlane.xlu2 %1791 }
 0x27f   : > { %v1732_v36 = vpop.xlane.xlu0 %1731  ;;  %v2171_v56 = vperm.slane %v1762_v59, %v5451_v63  ;;  %v2200_v60 = vperm.slane %v1792_v37, %v5445_v58 }
 0x280   : > { %v2142_v3 = vperm.slane %v1732_v36, %v5454_v2 }
 0x281   : > { %v5974_v44 = vsel %vm1973_vm8, %v2171_v56, %v2170_v4  ;;  %v5978_v39 = vsel %vm1969_vm7, %v2200_v60, %v2199_v49 }
 0x282   : > { %v2143_v22 = vsel %vm1977_vm9, %v2142_v3, %v2141_v5 }
 0x286   : > { %v1614_v62 = vpop.xlane.xlu1 %1613  ;;  %v1644_v0 = vpop.xlane.xlu2 %1643 }
 0x287   : > { %v1582_v24 = vpop.xlane.xlu0 %1581  ;;  %v2028_v35 = vperm.slane %v1614_v62, %v5981_v9  ;;  %v2057_v29 = vperm.slane %v1644_v0, %v5956_v21 }
 0x288   : > { %v1996_v8 = vperm.slane %v1582_v24, %v5981_v9 }
 0x289   : > { %v2029_v58 = vsel %vm1997_vm14, %v2028_v35, %v2027_v15  ;;  %v2058_v41 = vsel %vm1993_vm13, %v2057_v29, %v2056_v25 }
 0x28a   : > { %v1998_v13 = vsel %vm1997_vm14, %v1996_v8, %v1994_v40 }
 0x28b   : > { %v2217_v1 = vsel %vm2216_vm15, %v2029_v58, %v1998_v13 }
 0x28e   : > { %v1704_v6 = vpop.xlane.xlu1 %1703  ;;  %v1734_v34 = vpop.xlane.xlu2 %1733 }
 0x28f   : > { %v1674_v10 = vpop.xlane.xlu0 %1673  ;;  %v2115_v49 = vperm.slane %v1704_v6, %v5901_v57  ;;  %v2144_v36 = vperm.slane %v1734_v34, %v5840_v31 }
 0x290   : > { %v2086_v30 = vperm.slane %v1674_v10, %v5931_v17 }
 0x291   : > { %v2116_v48 = vsel %vm1985_vm11, %v2115_v49, %v2114_v28  ;;  %v2145_v60 = vsel %vm1981_vm10, %v2144_v36, %v2143_v22  ;;  %v3631_v49 = vld [vmem:[#allocation13 + $0x168] sm:$0xf0] }
 0x292   : > { %v2087_v4 = vsel %vm1989_vm12, %v2086_v30, %v2085_v11 }
 0x296   : > { %v5989_v14 = vpop.xlane.xlu1 %1793  ;;  %v1646_v38 = vpop.xlane.xlu2 %1645 }
 0x297   : > { %v1764_v26 = vpop.xlane.xlu0 %1763  ;;  %v2059_v23 = vperm.slane %v1646_v38, %v5981_v9 }
 0x299   : > { %v2060_v53 = vsel %vm1997_vm14, %v2059_v23, %v2058_v41 }
 0x29a   : > { %v2219_v43 = vsel %vm2218_vm0, %v2060_v53, %v2217_v1  ;;  %v2173_v1 = vperm.slane %v1764_v26, %v5454_v2 }
 0x29c   : > { %v2174_v38 = vsel %vm1977_vm9, %v2173_v1, %v5974_v44  ;;  %v4064_v1 = vld [vmem:[#allocation13 + $0x94] sm:$0xf] }
 0x29e   : > { %v1706_v32 = vpop.xlane.xlu1 %1705  ;;  %v1736_v42 = vpop.xlane.xlu2 %1735 }
 0x29f   : > { %v1676_v47 = vpop.xlane.xlu0 %1675  ;;  %v2117_v15 = vperm.slane %v1706_v32, %v5931_v17  ;;  %v2146_v56 = vperm.slane %v1736_v42, %v5901_v57  ;;  %v2202_v42 = vperm.slane %v5989_v14, %v5451_v63 }
 0x2a0   : > { %v2088_v12 = vperm.slane %v1676_v47, %v5956_v21 }
 0x2a1   : > { %v2118_v52 = vsel %vm1989_vm12, %v2117_v15, %v2116_v48  ;;  %v2147_v24 = vsel %vm1985_vm11, %v2146_v56, %v2145_v60  ;;  %v4082_v15 = vld [vmem:[#allocation13 + $0x124] sm:$0xf]  ;;  %v3559_v56 = vld [vmem:[#allocation13 + $0xd8] sm:$0xf0] }
 0x2a2   : > { %v2089_v46 = vsel %vm1993_vm13, %v2088_v12, %v2087_v4 }
 0x2a6   : > { %v5997_v19 = vpop.xlane.xlu1 %1795  ;;  %v1678_v20 = vpop.xlane.xlu2 %1677 }
 0x2a7   : > { %v1766_v5 = vpop.xlane.xlu0 %1765  ;;  %v2090_v61 = vperm.slane %v1678_v20, %v5981_v9  ;;  %v2204_v44 = vperm.slane %v5997_v19, %v5454_v2 }
 0x2a8   : > { %v2175_v10 = vperm.slane %v1766_v5, %v5840_v31 }
 0x2a9   : > { %v2091_v7 = vsel %vm1997_vm14, %v2090_v61, %v2089_v46  ;;  %v2203_v46 = vsel %vm1973_vm8, %v2202_v42, %v5978_v39  ;;  %v4074_v42 = vld [vmem:[#allocation13 + $0xdc] sm:$0xf0] }
 0x2aa   : > { %v2221_v55 = vsel %vm2220_vm1, %v2091_v7, %v2219_v43  ;;  %v2176_v41 = vsel %vm1981_vm10, %v2175_v10, %v2174_v38  ;;  %v2205_v14 = vsel %vm1977_vm9, %v2204_v44, %v2203_v46  ;;  %v4077_v38 = vld [vmem:[#allocation13 + $0xfc] sm:$0xf]  ;;  %v4071_v44 = vld [vmem:[#allocation13 + $0xcc] sm:$0xf] }
 0x2ab   : > { %v3511_v46 = vld [vmem:[#allocation13 + $0x78] sm:$0xf0] }
 0x2ae   : > { %v1738_v18 = vpop.xlane.xlu1 %1737  ;;  %v1768_v40 = vpop.xlane.xlu2 %1767 }
 0x2af   : > { %v1708_v51 = vpop.xlane.xlu0 %1707  ;;  %v2148_v28 = vperm.slane %v1738_v18, %v5931_v17  ;;  %v2177_v34 = vperm.slane %v1768_v40, %v5901_v57 }
 0x2b0   : > { %v2119_v16 = vperm.slane %v1708_v51, %v5956_v21 }
 0x2b1   : > { %v2149_v8 = vsel %vm1989_vm12, %v2148_v28, %v2147_v24  ;;  %v2178_v26 = vsel %vm1985_vm11, %v2177_v34, %v2176_v41  ;;  %v4086_v24 = vld [vmem:[#allocation13 + $0x13c] sm:$0xf0]  ;;  %v3535_v41 = vld [vmem:[#allocation13 + $0xa8] sm:$0xf0] }
 0x2b2   : > { %v2120_v25 = vsel %vm1993_vm13, %v2119_v16, %v2118_v52  ;;  %v3583_v52 = vld [vmem:[#allocation13 + $0x108] sm:$0xf0] }
 0x2b6   : > { %v1710_v54 = vpop.xlane.xlu1 %1709  ;;  %v1740_v45 = vpop.xlane.xlu2 %1739 }
 0x2b7   : > { %v1798_v33 = vpop.xlane.xlu0 %1797  ;;  %v2121_v11 = vperm.slane %v1710_v54, %v5981_v9  ;;  %v2150_v3 = vperm.slane %v1740_v45, %v5956_v21  ;;  %v4076_v54 = vld [vmem:[#allocation13 + $0xf4] sm:$0xf]  ;;  %v4092_v45 = vld [vmem:[#allocation13 + $0x16c] sm:$0xf0] }
 0x2b8   : > { %v2206_v5 = vperm.slane %v1798_v33, %v5840_v31  ;;  %v3637_v33 = vld [vmem:[#allocation13 + $0x158] sm:$0xf]  ;;  %v3586_v36 = vor.u32 %v4076_v54, %v3583_v52  ;;  %v4059_v52 = vld [vmem:[#allocation13 + $0x6c] sm:$0xf] }
 0x2b9   : > { %v2122_v59 = vsel %vm1997_vm14, %v2121_v11, %v2120_v25  ;;  %v2151_v13 = vsel %vm1993_vm13, %v2150_v3, %v2149_v8  ;;  %v3638_v50 = vor.u32 %v4092_v45, %v3637_v33  ;;  %v4089_v11 = vld [vmem:[#allocation13 + $0x15c] sm:$0xf]  ;;  %v3639_v25 = vld [vmem:[#allocation13 + $0x170] sm:$0xf0]  ;;  %v4093_v3 = vld [vmem:[#allocation13 + $0x174] sm:$0xf0] }
 0x2ba   : > { %v2223_v37 = vsel %vm2222_vm2, %v2122_v59, %v2221_v55  ;;  %v2207_v2 = vsel %vm1981_vm10, %v2206_v5, %v2205_v14  ;;  %v3645_v59 = vld [vmem:[#allocation13 + $0x160] sm:$0xf]  ;;  %v3642_v28 = vor.u32 %v4089_v11, %v3639_v25  ;;  %v3615_v8 = vld [vmem:[#allocation13 + $0x140] sm:$0xf0]  ;;  %v3538_v5 = vor.u32 %v4064_v1, %v3535_v41  ;;  %v3525_v11 = vld [vmem:[#allocation13 + $0x70] sm:$0xf] }
 0x2bb   : > { %807 = vmatpush.bf16.msra.mxu2 %v3638_v50  ;;  %v3646_v60 = vor.u32 %v4093_v3, %v3645_v59  ;;  %v3519_v33 = vld [vmem:[#allocation13 + $0x80] sm:$0xf0]  ;;  %v4063_v25 = vld [vmem:[#allocation13 + $0x84] sm:$0xf0]  ;;  %v3493_v3 = vld [vmem:[#allocation13 + $0x38] sm:$0xf] }
 0x2bc   : > { %820 = vmatpush.bf16.msra.mxu3 %v3642_v28  ;;  %v4046_v59 = vld [vmem:[#allocation13 + $0x4] sm:$0xf]  ;;  %v3522_v28 = vor.u32 %v4059_v52, %v3519_v33  ;;  %v4084_v1 = vld [vmem:[#allocation13 + $0x134] sm:$0xf]  ;;  %v4097_v52 = vld [vmem:[#allocation4 + $0x18] sm:$0xff] }
 0x2bd   : > { %833 = vmatpush.bf16.msrb.mxu0 %v3646_v60  ;;  %v3526_v60 = vor.u32 %v4063_v25, %v3525_v11  ;;  %v3471_v41 = vld [vmem:[#allocation13 + $0x20] sm:$0xf0]  ;;  %v4105_v33 = vld [vmem:[#allocation4 + $0x58] sm:$0xff]  ;;  %v4048_v11 = vld [vmem:[#allocation13 + $0x14] sm:$0xf] }
 0x2be   : > { %v1800_v62 = vpop.xlane.xlu1 %1799  ;;  %v1742_v35 = vpop.xlane.xlu2 %1741  ;;  %v3479_v25 = vld [vmem:[#allocation13 + $0x28] sm:$0xf0] }
 0x2bf   : > { %v1770_v0 = vpop.xlane.xlu0 %1769  ;;  %v2152_v58 = vperm.slane %v1742_v35, %v5981_v9  ;;  %v2208_v4 = vperm.slane %v1800_v62, %v5901_v57  ;;  %v3613_v62 = vld [vmem:[#allocation13 + $0x128] sm:$0xf] }
 0x2c0   : > { %v2179_v29 = vperm.slane %v1770_v0, %v5931_v17  ;;  %v4083_v0 = vld [vmem:[#allocation13 + $0x12c] sm:$0xf]  ;;  %v3614_v35 = vor.u32 %v4086_v24, %v3613_v62  ;;  %v4056_v62 = vld [vmem:[#allocation13 + $0x4c] sm:$0xf0]  ;;  %v4053_v24 = vld [vmem:[#allocation13 + $0x3c] sm:$0xf] }
 0x2c1   : > { %v2153_v6 = vsel %vm1997_vm14, %v2152_v58, %v2151_v13  ;;  %v2209_v31 = vsel %vm1985_vm11, %v2208_v4, %v2207_v2  ;;  %v3621_v58 = vld [vmem:[#allocation13 + $0x130] sm:$0xf]  ;;  %v4087_v13 = vld [vmem:[#allocation13 + $0x144] sm:$0xf0] }
 0x2c2   : > { %v2225_v22 = vsel %vm2224_vm3, %v2153_v6, %v2223_v37  ;;  %v2180_v30 = vsel %vm1989_vm12, %v2179_v29, %v2178_v26  ;;  %v4070_v37 = vld [vmem:[#allocation13 + $0xc4] sm:$0xf]  ;;  %v3618_v6 = vor.u32 %v4083_v0, %v3615_v8  ;;  %v3622_v10 = vor.u32 %v4087_v13, %v3621_v58  ;;  %v4080_v29 = vld [vmem:[#allocation13 + $0x10c] sm:$0xf0]  ;;  %808 = vmatpush.bf16.msra.mxu2 %v3614_v35  ;;  %v4081_v26 = vld [vmem:[#allocation13 + $0x114] sm:$0xf0] }
 0x2c3   : > { %v3562_v34 = vor.u32 %v4070_v37, %v3559_v56  ;;  %v4075_v4 = vld [vmem:[#allocation13 + $0xe4] sm:$0xf0]  ;;  %v4068_v2 = vld [vmem:[#allocation13 + $0xac] sm:$0xf0]  ;;  %v4090_v56 = vld [vmem:[#allocation13 + $0x164] sm:$0xf] }
 0x2c4   : > { %821 = vmatpush.bf16.msra.mxu3 %v3618_v6  ;;  %834 = vmatpush.bf16.msrb.mxu0 %v3622_v10  ;;  %v3495_v0 = vld [vmem:[#allocation13 + $0x50] sm:$0xf0]  ;;  %v3501_v8 = vld [vmem:[#allocation13 + $0x40] sm:$0xf]  ;;  %v4057_v58 = vld [vmem:[#allocation13 + $0x54] sm:$0xf0]  ;;  %v3494_v10 = vor.u32 %v4056_v62, %v3493_v3 }
 0x2c5   : > { %v3623_v6 = vld [vmem:[#allocation13 + $0x148] sm:$0xf0]  ;;  %v4123_v3 = vld [vmem:[#allocation4 + $0xe8] sm:$0xff] }
 0x2c6   : > { %v1802_v23 = vpop.xlane.xlu1 %1801  ;;  %v1774_v43 = vpop.xlane.xlu2 %1773  ;;  %v4121_v62 = vld [vmem:[#allocation4 + $0xd8] sm:$0xff] }
 0x2c7   : > { %v1772_v53 = vpop.xlane.xlu0 %1771  ;;  %v2183_v47 = vperm.slane %v1774_v43, %v5981_v9  ;;  %v2210_v63 = vperm.slane %v1802_v23, %v5931_v17  ;;  %v3591_v23 = vld [vmem:[#allocation13 + $0x110] sm:$0xf0]  ;;  %v3597_v43 = vld [vmem:[#allocation13 + $0x100] sm:$0xf] }
 0x2c8   : > { %v2181_v32 = vperm.slane %v1772_v53, %v5956_v21 }
 0x2c9   : > { %v2211_v57 = vsel %vm1989_vm12, %v2210_v63, %v2209_v31  ;;  %v3543_v31 = vld [vmem:[#allocation13 + $0xb0] sm:$0xf0] }
 0x2ca   : > { %v2182_v12 = vsel %vm1993_vm13, %v2181_v32, %v2180_v30  ;;  %v3594_v32 = vor.u32 %v4077_v38, %v3591_v23  ;;  %v3598_v30 = vor.u32 %v4081_v26, %v3597_v43  ;;  %v4050_v38 = vld [vmem:[#allocation13 + $0x1c] sm:$0xf0]  ;;  %v4047_v23 = vld [vmem:[#allocation13 + $0xc] sm:$0xf]  ;;  %v3477_v43 = vld [vmem:[#allocation13 + $0x10] sm:$0xf] }
 0x2cb   : > { %v2184_v20 = vsel %vm1997_vm14, %v2183_v47, %v2182_v12  ;;  %v3565_v47 = vld [vmem:[#allocation13 + $0xc8] sm:$0xf]  ;;  %v3567_v12 = vld [vmem:[#allocation13 + $0xe0] sm:$0xf0] }
 0x2cc   : > { %v2227_v61 = vsel %vm2226_vm4, %v2184_v20, %v2225_v22  ;;  %v3589_v22 = vld [vmem:[#allocation13 + $0xf8] sm:$0xf]  ;;  %v3573_v20 = vld [vmem:[#allocation13 + $0xd0] sm:$0xf]  ;;  %v3566_v63 = vor.u32 %v4074_v42, %v3565_v47  ;;  %822 = vmatpush.bf16.msra.mxu3 %v3594_v32  ;;  %v3570_v14 = vor.u32 %v4071_v44, %v3567_v12  ;;  %835 = vmatpush.bf16.msrb.mxu0 %v3598_v30  ;;  %v4051_v26 = vld [vmem:[#allocation13 + $0x24] sm:$0xf0] }
 0x2cd   : > { %v3590_v53 = vor.u32 %v4080_v29, %v3589_v22  ;;  %v3498_v22 = vor.u32 %v4053_v24, %v3495_v0  ;;  %v3502_v29 = vor.u32 %v4057_v58, %v3501_v8  ;;  %v3626_v32 = vor.u32 %v4084_v1, %v3623_v6  ;;  %v4078_v47 = vld [vmem:[#allocation13 + $0x104] sm:$0xf]  ;;  %v3599_v42 = vld [vmem:[#allocation13 + $0x118] sm:$0xf0]  ;;  %v4101_v12 = vld [vmem:[#allocation4 + $0x38] sm:$0xff] }
 0x2ce   : > { %v1806_v7 = vpop.xlane.xlu1 %1805  ;;  %v3474_v44 = vor.u32 %v4047_v23, %v3471_v41  ;;  %v4120_v24 = vld [vmem:[#allocation4 + $0xd0] sm:$0xff]  ;;  %v4095_v0 = vld [vmem:[#allocation4 + $0x8] sm:$0xff]  ;;  %v4102_v1 = vld [vmem:[#allocation4 + $0x40] sm:$0xff] }
 0x2cf   : > { %v1804_v19 = vpop.xlane.xlu0 %1803  ;;  %v2214_v55 = vperm.slane %v1806_v7, %v5981_v9  ;;  %v4088_v9 = vld [vmem:[#allocation13 + $0x154] sm:$0xf]  ;;  %809 = vmatpush.bf16.msra.mxu2 %v3590_v53  ;;  %v3541_v7 = vld [vmem:[#allocation13 + $0x98] sm:$0xf]  ;;  %v4140_v23 = vld [vmem:[#allocation4 + $0x170] sm:$0xff] }
 0x2d0   : > { %v2212_v18 = vperm.slane %v1804_v19, %v5956_v21  ;;  %v3634_v16 = vor.u32 %v4088_v9, %v3631_v49  ;;  %v3607_v21 = vld [vmem:[#allocation13 + $0x138] sm:$0xf0]  ;;  %v3574_v19 = vor.u32 %v4075_v4, %v3573_v20  ;;  %v3487_v9 = vld [vmem:[#allocation13 + $0x48] sm:$0xf0]  ;;  %v3542_v49 = vor.u32 %v4068_v2, %v3541_v7  ;;  %823 = vmatpush.bf16.msra.mxu3 %v3570_v14  ;;  %v4100_v14 = vld [vmem:[#allocation4 + $0x30] sm:$0xff] }
 0x2d1   : > { %v3610_v48 = vor.u32 %v4082_v15, %v3607_v21  ;;  %v3517_v21 = vld [vmem:[#allocation13 + $0x68] sm:$0xf]  ;;  %v4108_v7 = vld [vmem:[#allocation4 + $0x70] sm:$0xff]  ;;  %v4111_v8 = vld [vmem:[#allocation4 + $0x88] sm:$0xff] }
 0x2d2   : > { %v2213_v51 = vsel %vm1993_vm13, %v2212_v18, %v2211_v57  ;;  %794 = vmatpush.bf16.msra.mxu1 %v3634_v16  ;;  %v3549_v57 = vld [vmem:[#allocation13 + $0xa0] sm:$0xf]  ;;  %836 = vmatpush.bf16.msrb.mxu0 %v3574_v19  ;;  %v4109_v20 = vld [vmem:[#allocation4 + $0x78] sm:$0xff]  ;;  %v4119_v58 = vld [vmem:[#allocation4 + $0xc8] sm:$0xff] }
 0x2d3   : > { %v2215_v17 = vsel %vm1997_vm14, %v2214_v55, %v2213_v51  ;;  %v4065_v55 = vld [vmem:[#allocation13 + $0x9c] sm:$0xf]  ;;  %v4069_v51 = vld [vmem:[#allocation13 + $0xb4] sm:$0xf0]  ;;  %810 = vmatpush.bf16.msra.mxu2 %v3566_v63  ;;  %v4117_v4 = vld [vmem:[#allocation4 + $0xb8] sm:$0xff] }
 0x2d4   : > { %v2229_v39 = vsel %vm2228_vm5, %v2215_v17, %v2227_v61  ;;  %v4058_v61 = vld [vmem:[#allocation13 + $0x64] sm:$0xf]  ;;  %v3546_v16 = vor.u32 %v4065_v55, %v3543_v31  ;;  %v3550_v54 = vor.u32 %v4069_v51, %v3549_v57  ;;  %v3575_v63 = vld [vmem:[#allocation13 + $0xe8] sm:$0xf0]  ;;  %v3551_v31 = vld [vmem:[#allocation13 + $0xb8] sm:$0xf0] }
 0x2d5   : > { %v6057_v40 = vsel %vm1809_vm6, %v2229_v39, -1e+30  ;;  %v3514_v18 = vor.u32 %v4058_v61, %v3511_v46  ;;  %v4052_v39 = vld [vmem:[#allocation13 + $0x34] sm:$0xf]  ;;  %v3602_v61 = vor.u32 %v4078_v47, %v3599_v42  ;;  %v4116_v2 = vld [vmem:[#allocation4 + $0xb0] sm:$0xff]  ;;  %v4107_v57 = vld [vmem:[#allocation4 + $0x68] sm:$0xff] }
 0x2d6   : > { %2232 = vmax.xlane.f32.xlu2 %v6057_v40  ;;  %795 = vmatpush.bf16.msra.mxu1 %v3610_v48  ;;  %v4062_v48 = vld [vmem:[#allocation13 + $0x7c] sm:$0xf0]  ;;  %v3490_v50 = vor.u32 %v4052_v39, %v3487_v9  ;;  %v4072_v46 = vld [vmem:[#allocation13 + $0xd4] sm:$0xf]  ;;  %v4066_v55 = vld [vmem:[#allocation13 + $0xa4] sm:$0xf] }
 0x2d7   : > { %811 = vmatpush.bf16.msra.mxu2 %v3542_v49  ;;  %v3518_v37 = vor.u32 %v4062_v48, %v3517_v21  ;;  %824 = vmatpush.bf16.msra.mxu3 %v3546_v16  ;;  %v3578_v19 = vor.u32 %v4072_v46, %v3575_v63  ;;  %v4115_v51 = vld [vmem:[#allocation4 + $0xa8] sm:$0xff]  ;;  %v4060_v39 = vld [vmem:[#allocation13 + $0x74] sm:$0xf]  ;;  %v3527_v9 = vld [vmem:[#allocation13 + $0x88] sm:$0xf0] }
 0x2d8   : > { %837 = vmatpush.bf16.msrb.mxu0 %v3550_v54  ;;  %v4098_v49 = vld [vmem:[#allocation4 + $0x20] sm:$0xff]  ;;  %v3530_v21 = vor.u32 %v4060_v39, %v3527_v9  ;;  %v4054_v48 = vld [vmem:[#allocation13 + $0x44] sm:$0xf]  ;;  %v3503_v54 = vld [vmem:[#allocation13 + $0x58] sm:$0xf0] }
 0x2d9   : > { %v4114_v16 = vld [vmem:[#allocation4 + $0xa0] sm:$0xff]  ;;  %v4148_v41 = vld [vmem:[#allocation4 + $0x1b0] sm:$0xff]  ;;  %v4139_v47 = vld [vmem:[#allocation4 + $0x168] sm:$0xff] }
 0x2da   : > { %796 = vmatpush.bf16.msra.mxu1 %v3586_v36  ;;  %v3463_v36 = vld [vmem:[#allocation13 + $0x18] sm:$0xf0]  ;;  %v4110_v6 = vld [vmem:[#allocation4 + $0x80] sm:$0xff]  ;;  %v4137_v63 = vld [vmem:[#allocation4 + $0x158] sm:$0xff] }
 0x2db   : > { %v3466_v35 = vor.u32 %v4046_v59, %v3463_v36  ;;  %812 = vmatpush.bf16.msra.mxu2 %v3518_v37  ;;  %825 = vmatpush.bf16.msra.mxu3 %v3522_v28  ;;  %v4096_v59 = vld [vmem:[#allocation4 + $0x10] sm:$0xff]  ;;  %v4147_v42 = vld [vmem:[#allocation4 + $0x1a8] sm:$0xff] }
 0x2dc   : > { %838 = vmatpush.bf16.msrb.mxu0 %v3526_v60  ;;  %v4104_v36 = vld [vmem:[#allocation4 + $0x50] sm:$0xff]  ;;  %v4122_v60 = vld [vmem:[#allocation4 + $0xe0] sm:$0xff] }
 0x2dd   : > { %v4112_v37 = vld [vmem:[#allocation4 + $0x90] sm:$0xff] }
 0x2de   : > { %797 = vmatpush.bf16.msra.mxu1 %v3562_v34  ;;  %v3469_v34 = vld [vmem:[#allocation13 + $0x8] sm:$0xf]  ;;  %v4124_v28 = vld [vmem:[#allocation4 + $0xf0] sm:$0xff] }
 0x2df   : > { %813 = vmatpush.bf16.msra.mxu2 %v3494_v10  ;;  %826 = vmatpush.bf16.msra.mxu3 %v3498_v22  ;;  %v3470_v30 = vor.u32 %v4050_v38, %v3469_v34  ;;  %v4118_v10 = vld [vmem:[#allocation4 + $0xc0] sm:$0xff]  ;;  %v4141_v22 = vld [vmem:[#allocation4 + $0x178] sm:$0xff]  ;;  %v4132_v38 = vld [vmem:[#allocation4 + $0x130] sm:$0xff] }
 0x2e0   : > { %839 = vmatpush.bf16.msrb.mxu0 %v3502_v29  ;;  %v4149_v34 = vld [vmem:[#allocation4 + $0x1b8] sm:$0xff]  ;;  %v4152_v39 = vld [vmem:[#allocation4 + $0x1d0] sm:$0xff] }
 0x2e1   : > { %v4157_v29 = vld [vmem:[#allocation4 + $0x1f8] sm:$0xff] }
 0x2e2   : > { %798 = vmatpush.bf16.msra.mxu1 %v3538_v5  ;;  %v3478_v5 = vor.u32 %v4051_v26, %v3477_v43  ;;  %v4156_v43 = vld [vmem:[#allocation4 + $0x1f0] sm:$0xff]  ;;  %v4131_v26 = vld [vmem:[#allocation4 + $0x128] sm:$0xff] }
 0x2e3   : > { %814 = vmatpush.bf16.msra.mxu2 %v3470_v30  ;;  %827 = vmatpush.bf16.msra.mxu3 %v3474_v44  ;;  %v4155_v30 = vld [vmem:[#allocation4 + $0x1e8] sm:$0xff]  ;;  %v4130_v44 = vld [vmem:[#allocation4 + $0x120] sm:$0xff] }
 0x2e4   : > { %840 = vmatpush.bf16.msrb.mxu0 %v3478_v5  ;;  %v4146_v5 = vld [vmem:[#allocation4 + $0x1a0] sm:$0xff] }
 0x2e6   : > { %799 = vmatpush.bf16.msra.mxu1 %v3514_v18  ;;  %815 = vmatmul.bf16.vlgmr.msra.gmra.mxu2 %v5219_v27  ;;  %v4099_v18 = vld [vmem:[#allocation4 + $0x28] sm:$0xff] }
 0x2e7   : > { %2453 = vmatpush.bf16.msrb.mxu2 %v4101_v12  ;;  %2514 = vmatpush.bf16.msrb.mxu3 %v4109_v20  ;;  %v4138_v12 = vld [vmem:[#allocation4 + $0x160] sm:$0xff] }
 0x2e8   : > { %2575 = vmatpush.bf16.msra.mxu0 %v4117_v4  ;;  %828 = vmatmul.bf16.vlgmr.msra.gmra.mxu3 %v5219_v27  ;;  %v4154_v20 = vld [vmem:[#allocation4 + $0x1e0] sm:$0xff] }
 0x2e9   : > { %841 = vmatmul.bf16.vlgmr.msrb.gmra.mxu0 %v5219_v27 }
 0x2ea   : > { %800 = vmatpush.bf16.msra.mxu1 %v3490_v50  ;;  %v3506_v50 = vor.u32 %v4054_v48, %v3503_v54  ;;  %v4143_v54 = vld [vmem:[#allocation4 + $0x188] sm:$0xff] }
 0x2eb   : > { %2454 = vmatpush.bf16.msrb.mxu2 %v4100_v14  ;;  %2515 = vmatpush.bf16.msrb.mxu3 %v4108_v7  ;;  %v4145_v14 = vld [vmem:[#allocation4 + $0x198] sm:$0xff] }
 0x2ec   : > { %2576 = vmatpush.bf16.msra.mxu0 %v4116_v2  ;;  %v4153_v7 = vld [vmem:[#allocation4 + $0x1d8] sm:$0xff] }
 0x2ee   : > { %801 = vmatpush.bf16.msra.mxu1 %v3466_v35  ;;  %v4103_v35 = vld [vmem:[#allocation4 + $0x48] sm:$0xff] }
 0x2ef   : > { %2455 = vmatpush.bf16.msrb.mxu2 %v4099_v18  ;;  %2516 = vmatpush.bf16.msrb.mxu3 %v4107_v57  ;;  %v4136_v57 = vld [vmem:[#allocation4 + $0x150] sm:$0xff] }
 0x2f0   : > { %2577 = vmatpush.bf16.msra.mxu0 %v4115_v51 }
 0x2f1   : > { %802 = vmatmul.bf16.vlgmr.msra.gmra.mxu1 %v5219_v27 }
 0x2f3   : > { %2456 = vmatpush.bf16.msrb.mxu2 %v4098_v49 }
 0x2f4   : > { %2578 = vmatpush.bf16.msra.mxu0 %v4114_v16 }
 0x2f7   : > { %2457 = vmatpush.bf16.msrb.mxu2 %v4097_v52  ;;  %v4151_v52 = vld [vmem:[#allocation4 + $0x1c8] sm:$0xff] }
 0x2fb   : > { %2458 = vmatpush.bf16.msrb.mxu2 %v4096_v59 }
 0x2ff   : > { %2459 = vmatpush.bf16.msrb.mxu2 %v4095_v0 }
 0x349   : > { %v2233_v17 = vpop.xlane.xlu2 %2232 }
 0x34a   : > { %v2234_v15 = vsub.f32 %v6057_v40, %v2233_v17  ;;  %v3647_v40 = vld [vmem:[#allocation13 + $0x178] sm:$0xf0]  ;;  %v3554_v17 = vor.u32 %v4066_v55, %v3551_v31  ;;  %v4128_v55 = vld [vmem:[#allocation4 + $0x110] sm:$0xff] }
 0x34b   : > { %v3650_v13 = vor.u32 %v4090_v56, %v3647_v40  ;;  %v3482_v56 = vor.u32 %v4048_v11, %v3479_v25  ;;  %v4125_v40 = vld [vmem:[#allocation4 + $0xf8] sm:$0xff] }
 0x34c   : > { %v2235_v45 = vmul.f32 1.442695, %v2234_v15  ;;  %v4106_v15 = vld [vmem:[#allocation4 + $0x60] sm:$0xff] }
 0x34d   : > { %846 = vmatpush.bf16.msrb.mxu1 %v3650_v13  ;;  %2517 = vmatpush.bf16.msrb.mxu3 %v4106_v15  ;;  %v4094_v13 = vld [vmem:[#allocation4] sm:$0xff]  ;;  %v4127_v15 = vld [vmem:[#allocation4 + $0x108] sm:$0xff] }
 0x34e   : > { %4629 = vpow2.f32 %v2235_v45  ;;  %v4113_v45 = vld [vmem:[#allocation4 + $0x98] sm:$0xff]  ;;  %2460 = vmatpush.bf16.msrb.mxu2 %v4094_v13 }
 0x34f   : > { %2579 = vmatpush.bf16.msra.mxu0 %v4113_v45  ;;  %v4126_v45 = vld [vmem:[#allocation4 + $0x100] sm:$0xff] }
 0x351   : > { %847 = vmatpush.bf16.msrb.mxu1 %v3626_v32  ;;  %2518 = vmatpush.bf16.msrb.mxu3 %v4105_v33 }
 0x353   : > { %2580 = vmatpush.bf16.msra.mxu0 %v4112_v37 }
 0x354   : > { %v6061_v53 = vpop.eup %4629 }
 0x355   : > { %2237 = vadd.xlane.f32.xlu0 %v6061_v53  ;;  %848 = vmatpush.bf16.msrb.mxu1 %v3602_v61  ;;  %v4129_v61 = vld [vmem:[#allocation4 + $0x118] sm:$0xff] }
 0x356   : > { %2519 = vmatpush.bf16.msrb.mxu3 %v4104_v36 }
 0x357   : > { %2581 = vmatpush.bf16.msra.mxu0 %v4111_v8 }
 0x359   : > { %849 = vmatpush.bf16.msrb.mxu1 %v3578_v19 }
 0x35a   : > { %2520 = vmatpush.bf16.msrb.mxu3 %v4103_v35 }
 0x35b   : > { %2582 = vmatpush.bf16.msra.mxu0 %v4110_v6 }
 0x35d   : > { %850 = vmatpush.bf16.msrb.mxu1 %v3554_v17  ;;  %v4144_v17 = vld [vmem:[#allocation4 + $0x190] sm:$0xff] }
 0x35e   : > { %2521 = vmatpush.bf16.msrb.mxu3 %v4102_v1 }
 0x35f   : > { %2819 = vmatpush.bf16.msrb.mxu0 %v4149_v34 }
 0x361   : > { %851 = vmatpush.bf16.msrb.mxu1 %v3530_v21  ;;  %v4135_v21 = vld [vmem:[#allocation4 + $0x148] sm:$0xff] }
 0x362   : > { %2758 = vmatpush.bf16.msra.mxu3 %v4141_v22 }
 0x363   : > { %2820 = vmatpush.bf16.msrb.mxu0 %v4148_v41  ;;  %v4022_v41 = vld [vmem:[#allocation14 + $0xe0] sm:$0xf] }
 0x365   : > { %852 = vmatpush.bf16.msrb.mxu1 %v3506_v50 }
 0x366   : > { %2759 = vmatpush.bf16.msra.mxu3 %v4140_v23  ;;  %v6072_v50 = vpop.f32.mrf.mxu0  ;;  %v4628_v23 = vld [vmem:[%s6192_s6] ss:$0 sm:$0xff] }
 0x367   : > { %2821 = vmatpush.bf16.msrb.mxu0 %v4147_v42  ;;  %v4030_v42 = vld [vmem:[#allocation14 + $0xe8] sm:$0xf] }
 0x369   : > { %853 = vmatpush.bf16.msrb.mxu1 %v3482_v56  ;;  %v4134_v56 = vld [vmem:[#allocation4 + $0x140] sm:$0xff] }
 0x36a   : > { %2760 = vmatpush.bf16.msra.mxu3 %v4139_v47  ;;  %v4024_v47 = vld [vmem:[#allocation14 + $0xf0] sm:$0xf0] }
 0x36b   : > { %2822 = vmatpush.bf16.msrb.mxu0 %v4146_v5  ;;  %v4187_v5 = vld [vmem:[#allocation14 + $0xec] sm:$0xf] }
 0x36c   : > { %854 = vmatmul.bf16.vlgmr.msrb.gmra.mxu1 %v5219_v27  ;;  %v4133_v27 = vld [vmem:[#allocation4 + $0x138] sm:$0xff] }
 0x36d   : > { %2636 = vmatpush.bf16.msra.mxu1 %v4125_v40  ;;  %2697 = vmatpush.bf16.msra.mxu2 %v4133_v27 }
 0x36e   : > { %2761 = vmatpush.bf16.msra.mxu3 %v4138_v12  ;;  %v6069_v51 = vpop.f32.mrf.mxu1  ;;  %v844_v0 = vpop.f32.mrf.mxu0 }
 0x36f   : > { %2823 = vmatpush.bf16.msrb.mxu0 %v4145_v14  ;;  %v4182_v14 = vld [vmem:[#allocation14 + $0xc4] sm:$0xf] }
 0x371   : > { %2637 = vmatpush.bf16.msra.mxu1 %v4124_v28  ;;  %2698 = vmatpush.bf16.msra.mxu2 %v4132_v38 }
 0x372   : > { %2762 = vmatpush.bf16.msra.mxu3 %v4137_v63  ;;  %v4184_v63 = vld [vmem:[#allocation14 + $0xcc] sm:$0xf0] }
 0x373   : > { %2824 = vmatpush.bf16.msrb.mxu0 %v4144_v17  ;;  %v4016_v17 = vld [vmem:[#allocation14 + $0xd8] sm:$0xf0] }
 0x375   : > { %2638 = vmatpush.bf16.msra.mxu1 %v4123_v3  ;;  %2699 = vmatpush.bf16.msra.mxu2 %v4131_v26  ;;  %v4186_v26 = vld [vmem:[#allocation14 + $0xe4] sm:$0xf] }
 0x376   : > { %2763 = vmatpush.bf16.msra.mxu3 %v4136_v57  ;;  %v805_v37 = vpop.f32.mrf.mxu1 }
 0x377   : > { %2825 = vmatpush.bf16.msrb.mxu0 %v4143_v54  ;;  %v4181_v54 = vld [vmem:[#allocation14 + $0xb4] sm:$0xf0]  ;;  %v4174_v37 = vld [vmem:[#allocation14 + $0x84] sm:$0xf] }
 0x379   : > { %2639 = vmatpush.bf16.msra.mxu1 %v4122_v60  ;;  %2700 = vmatpush.bf16.msra.mxu2 %v4130_v44  ;;  %v4142_v60 = vld [vmem:[#allocation4 + $0x180] sm:$0xff]  ;;  %v4027_v44 = vor.u32 %v4186_v26, %v4024_v47 }
 0x37a   : > { %2764 = vmatpush.bf16.msra.mxu3 %v4135_v21  ;;  %v3992_v21 = vld [vmem:[#allocation14 + $0xb0] sm:$0xf0]  ;;  %v4168_v47 = vld [vmem:[#allocation14 + $0x4c] sm:$0xf0] }
 0x37b   : > { %2826 = vmatpush.bf16.msrb.mxu0 %v4142_v60  ;;  %v4177_v60 = vld [vmem:[#allocation14 + $0x94] sm:$0xf0] }
 0x37d   : > { %2640 = vmatpush.bf16.msra.mxu1 %v4121_v62  ;;  %2701 = vmatpush.bf16.msra.mxu2 %v4129_v61  ;;  %v6075_v62 = vpop.f32.mrf.mxu2  ;;  %v863_v61 = vadd.f32 %v4628_v23, %v6069_v51  ;;  %v3990_v51 = vld [vmem:[#allocation14 + $0xa0] sm:$0xf]  ;;  %v4171_v23 = vld [vmem:[#allocation14 + $0x6c] sm:$0xf] }
 0x37e   : > { %2765 = vmatpush.bf16.msra.mxu3 %v4134_v56  ;;  %v3976_v56 = vld [vmem:[#allocation14 + $0x90] sm:$0xf0] }
 0x381   : > { %2641 = vmatpush.bf16.msra.mxu1 %v4120_v24  ;;  %2702 = vmatpush.bf16.msra.mxu2 %v4128_v55  ;;  %v6077_v24 = vpop.f32.mrf.mxu3  ;;  %v4014_v55 = vld [vmem:[#allocation14 + $0xc8] sm:$0xf] }
 0x385   : > { %2642 = vmatpush.bf16.msra.mxu1 %v4119_v58  ;;  %2703 = vmatpush.bf16.msra.mxu2 %v4127_v15  ;;  %v818_v8 = vpop.f32.mrf.mxu2  ;;  %v4178_v15 = vld [vmem:[#allocation14 + $0xa4] sm:$0xf] }
 0x389   : > { %2643 = vmatpush.bf16.msra.mxu1 %v4118_v10  ;;  %2704 = vmatpush.bf16.msra.mxu2 %v4126_v45  ;;  %v831_v58 = vpop.f32.mrf.mxu3  ;;  %v4179_v45 = vld [vmem:[#allocation14 + $0xac] sm:$0xf] }
 0x38a   : > { %v3958_v58 = vld [vmem:[#allocation14 + $0x60] sm:$0xf] }
 0x38d   : > { %2880 = vmatpush.bf16.msrb.mxu1 %v4157_v29 }
 0x391   : > { %2881 = vmatpush.bf16.msrb.mxu1 %v4156_v43  ;;  %v4188_v43 = vld [vmem:[#allocation14 + $0xec] sm:$0xf0] }
 0x395   : > { %2882 = vmatpush.bf16.msrb.mxu1 %v4155_v30  ;;  %v4189_v30 = vld [vmem:[#allocation14 + $0xf4] sm:$0xf0] }
 0x396   : > { %v4031_v12 = vor.u32 %v4189_v30, %v4030_v42  ;;  %v4166_v42 = vld [vmem:[#allocation14 + $0x44] sm:$0xf] }
 0x399   : > { %2883 = vmatpush.bf16.msrb.mxu1 %v4154_v20  ;;  %v4032_v20 = vld [vmem:[#allocation14 + $0xf8] sm:$0xf0] }
 0x39d   : > { %2884 = vmatpush.bf16.msrb.mxu1 %v4153_v7  ;;  %v4008_v7 = vld [vmem:[#allocation14 + $0xd0] sm:$0xf0] }
 0x3a1   : > { %2885 = vmatpush.bf16.msrb.mxu1 %v4152_v39 }
 0x3a5   : > { %2886 = vmatpush.bf16.msrb.mxu1 %v4151_v52  ;;  %v3995_v52 = vor.u32 %v4178_v15, %v3992_v21  ;;  %v4158_v21 = vld [vmem:[#allocation14 + $0x4] sm:$0xf] }
 0x3c8   : > { %v2238_v32 = vpop.xlane.xlu0 %2237 }
 0x3c9   : > { %4631 = vrcp.f32 %v2238_v32  ;;  %v2250_v19 = vand.u32 2147483648, %v2238_v32  ;;  %v2248_v18 = vand.u32 2147483647, %v2238_v32  ;;  %vm2244_vm8 = vweird.f32 %v2238_v32 }
 0x3cb   : > { %v2251_v49 = vor.u32 1.1754944e-38, %v2250_v19  ;;  %vm2249_vm10 = vcmp.eq.f32.partialorder %v2248_v18, 8.507059e+37  ;;  %v4011_v19 = vor.u32 %v4182_v14, %v4008_v7  ;;  %v4183_v18 = vld [vmem:[#allocation14 + $0xcc] sm:$0xf]  ;;  %v3926_v7 = vld [vmem:[#allocation14 + $0x20] sm:$0xf] }
 0x3cc   : > { %v4019_v39 = vor.u32 %v4183_v18, %v4016_v17  ;;  %v3934_v18 = vld [vmem:[#allocation14 + $0x28] sm:$0xf] }
 0x3cf   : > { %v4632_v4 = vpop.eup %4631 }
 0x3d0   : > { %v2240_v46 = vmul.f32 %v4632_v4, %v2238_v32  ;;  %vm2245_vm7 = vweird.f32 %v4632_v4  ;;  %v4023_v32 = vor.u32 %v4188_v43, %v4022_v41  ;;  %v3968_v41 = vld [vmem:[#allocation14 + $0x78] sm:$0xf0] }
 0x3d1   : > { %vm2246_vm9 = vmor %vm2244_vm8, %vm2245_vm7  ;;  %v3971_v43 = vor.u32 %v4171_v23, %v3968_v41 }
 0x3d2   : > { %v2241_v2 = vsub.f32 1.0, %v2240_v46  ;;  %v4035_v46 = vor.u32 %v4187_v5, %v4032_v20  ;;  %v4169_v5 = vld [vmem:[#allocation14 + $0x54] sm:$0xf0] }
 0x3d4   : > { %v2242_v31 = vmul.f32 %v4632_v4, %v2241_v2 }
 0x3d6   : > { %v2243_v9 = vadd.f32 %v4632_v4, %v2242_v31  ;;  %v4185_v31 = vld [vmem:[#allocation14 + $0xd4] sm:$0xf0] }
 0x3d7   : > { %v4015_v57 = vor.u32 %v4185_v31, %v4014_v55  ;;  %v3928_v31 = vld [vmem:[#allocation14 + $0x30] sm:$0xf0] }
 0x3d8   : > { %v2247_v16 = vsel %vm2246_vm9, %v4632_v4, %v2243_v9  ;;  %v4006_v4 = vld [vmem:[#allocation14 + $0xc0] sm:$0xf]  ;;  %v3651_v9 = vmul.f32 -1.442695, %v863_v61 }
 0x3d9   : > { %v2252_v48 = vsel %vm2249_vm10, %v2251_v49, %v2247_v16  ;;  %v4007_v2 = vor.u32 %v4184_v63, %v4006_v4  ;;  %v4180_v49 = vld [vmem:[#allocation14 + $0xac] sm:$0xf0]  ;;  %v3952_v63 = vld [vmem:[#allocation14 + $0x58] sm:$0xf0] }
 0x3da   : > { %v2253_v33 = vmul.f32 %v6061_v53, %v2252_v48  ;;  %v4150_v53 = vld [vmem:[#allocation4 + $0x1c0] sm:$0xff]  ;;  %v3991_v16 = vor.u32 %v4180_v49, %v3990_v51  ;;  %v3998_v48 = vld [vmem:[#allocation14 + $0xa8] sm:$0xf]  ;;  %4633 = vpow2.f32 %v3651_v9  ;;  %v4163_v9 = vld [vmem:[#allocation14 + $0x2c] sm:$0xf] }
 0x3db   : > { %2887 = vmatpush.bf16.msrb.mxu1 %v4150_v53  ;;  %v4175_v53 = vld [vmem:[#allocation14 + $0x8c] sm:$0xf]  ;;  %v3936_v51 = vld [vmem:[#allocation14 + $0x38] sm:$0xf0]  ;;  %v3910_v49 = vld [vmem:[#allocation14] sm:$0xf] }
 0x3dc   : > { %3240 = vst [vmem:[%s5215_s25] sm:$0xff] %v2253_v33  ;;  %v2269_v11 = vpack.c.bf16 %v2253_v33, %v2253_v33  ;;  %v2255_v25 = vrot.slane %v2253_v33, 1  ;;  %v2256_v59 = vrot.slane %v2253_v33, 2  ;;  %v2257_v36 = vrot.slane %v2253_v33, 3 }
 0x3dd   : > { %v2258_v35 = vrot.slane %v2253_v33, 4  ;;  %v2259_v13 = vrot.slane %v2253_v33, 5  ;;  %v2260_v1 = vrot.slane %v2253_v33, 6  ;;  %v2261_v27 = vrot.slane %v2253_v33, 7 }
 0x3de   : > { %2461 = vmatmul.bf16.vlgmr.msrb.gmra.mxu2 %v2269_v11  ;;  %v2270_v40 = vpack.c.bf16 %v2255_v25, %v2255_v25  ;;  %v2271_v28 = vpack.c.bf16 %v2256_v59, %v2256_v59  ;;  %v2272_v3 = vpack.c.bf16 %v2257_v36, %v2257_v36  ;;  %v3999_v33 = vor.u32 %v4181_v54, %v3998_v48  ;;  %v4000_v11 = vld [vmem:[#allocation14 + $0xb8] sm:$0xf0]  ;;  %v3974_v25 = vld [vmem:[#allocation14 + $0x80] sm:$0xf]  ;;  %v4176_v36 = vld [vmem:[#allocation14 + $0x8c] sm:$0xf0] }
 0x3df   : > { %v2273_v6 = vpack.c.bf16 %v2258_v35, %v2258_v35  ;;  %v2274_v10 = vpack.c.bf16 %v2259_v13, %v2259_v13  ;;  %v2275_v22 = vpack.c.bf16 %v2260_v1, %v2260_v1  ;;  %v2276_v34 = vpack.c.bf16 %v2261_v27, %v2261_v27  ;;  %3114 = vmatpush.bf16.msrb.mxu2 %v4023_v32  ;;  %v3984_v35 = vld [vmem:[#allocation14 + $0x98] sm:$0xf0]  ;;  %v4172_v13 = vld [vmem:[#allocation14 + $0x6c] sm:$0xf0]  ;;  %v4170_v1 = vld [vmem:[#allocation14 + $0x64] sm:$0xf] }
 0x3e0   : > { %2522 = vmatmul.bf16.vlgmr.msrb.gmra.mxu3 %v2270_v40  ;;  %2583 = vmatmul.bf16.vlgmr.msra.gmra.mxu0 %v2271_v28  ;;  %v4003_v59 = vor.u32 %v4179_v45, %v4000_v11  ;;  %v3975_v40 = vor.u32 %v4176_v36, %v3974_v25  ;;  %v3979_v28 = vor.u32 %v4174_v37, %v3976_v56  ;;  %v4634_v26 = vpop.eup %4633  ;;  %v3942_v32 = vld [vmem:[#allocation14 + $0x40] sm:$0xf]  ;;  %v3912_v48 = vld [vmem:[#allocation14 + $0x10] sm:$0xf0]  ;;  %v4159_v45 = vld [vmem:[#allocation14 + $0xc] sm:$0xf] }
 0x3e1   : > { %2644 = vmatmul.bf16.vlgmr.msra.gmra.mxu1 %v2272_v3  ;;  %3127 = vmatpush.bf16.msrb.mxu3 %v4027_v44  ;;  %v3982_v3 = vld [vmem:[#allocation14 + $0x88] sm:$0xf]  ;;  %v3987_v8 = vor.u32 %v4175_v53, %v3984_v35  ;;  %v3959_v27 = vor.u32 %v4172_v13, %v3958_v58  ;;  %v3943_v30 = vor.u32 %v4168_v47, %v3942_v32  ;;  %v3944_v44 = vld [vmem:[#allocation14 + $0x50] sm:$0xf0]  ;;  %v6085_v20 = vadd.f32 1.0, %v4634_v26 }
 0x3e2   : > { %3140 = vmatpush.bf16.msra.mxu0 %v4031_v12  ;;  %3153 = vmatpush.bf16.msra.mxu1 %v4035_v46  ;;  %v3983_v0 = vor.u32 %v4177_v60, %v3982_v3  ;;  %v3950_v12 = vld [vmem:[#allocation14 + $0x48] sm:$0xf]  ;;  %v3947_v4 = vor.u32 %v4166_v42, %v3944_v44  ;;  %v4167_v46 = vld [vmem:[#allocation14 + $0x4c] sm:$0xf]  ;;  %v3939_v15 = vor.u32 %v4163_v9, %v3936_v51 }
 0x3e3   : > { %3115 = vmatpush.bf16.msrb.mxu2 %v4007_v2  ;;  %v3951_v61 = vor.u32 %v4169_v5, %v3950_v12  ;;  %v3955_v14 = vor.u32 %v4167_v46, %v3952_v63  ;;  %v4164_v2 = vld [vmem:[#allocation14 + $0x2c] sm:$0xf0]  ;;  %4635 = vrcp.f32 %v6085_v20  ;;  %v3915_v11 = vor.u32 %v4158_v21, %v3912_v48 }
 0x3e4   : > { %v3927_v55 = vor.u32 %v4164_v2, %v3926_v7  ;;  %vm873_vm11 = vweird.f32 %v6085_v20  ;;  %v877_v26 = vand.u32 2147483647, %v6085_v20 }
 0x3e5   : > { %3128 = vmatpush.bf16.msrb.mxu3 %v4011_v19  ;;  %v4162_v19 = vld [vmem:[#allocation14 + $0x24] sm:$0xf] }
 0x3e6   : > { %3141 = vmatpush.bf16.msra.mxu0 %v4015_v57  ;;  %3154 = vmatpush.bf16.msra.mxu1 %v4019_v39  ;;  %v4165_v57 = vld [vmem:[#allocation14 + $0x34] sm:$0xf0]  ;;  %v3931_v17 = vor.u32 %v4162_v19, %v3928_v31  ;;  %vm878_vm14 = vcmp.eq.f32.partialorder %v877_v26, 8.507059e+37 }
 0x3e7   : > { %3116 = vmatpush.bf16.msrb.mxu2 %v3991_v16  ;;  %v3935_v39 = vor.u32 %v4165_v57, %v3934_v18  ;;  %v4160_v16 = vld [vmem:[#allocation14 + $0xc] sm:$0xf0] }
 0x3e8   : > { %v3911_v54 = vor.u32 %v4160_v16, %v3910_v49 }
 0x3e9   : > { %v6079_v29 = vpop.f32.mrf.mxu1  ;;  %3129 = vmatpush.bf16.msrb.mxu3 %v3995_v52  ;;  %v3918_v52 = vld [vmem:[#allocation14 + $0x8] sm:$0xf] }
 0x3ea   : > { %3142 = vmatpush.bf16.msra.mxu0 %v3999_v33  ;;  %3155 = vmatpush.bf16.msra.mxu1 %v4003_v59  ;;  %v4161_v33 = vld [vmem:[#allocation14 + $0x14] sm:$0xf0]  ;;  %v3920_v59 = vld [vmem:[#allocation14 + $0x18] sm:$0xf0] }
 0x3eb   : > { %3117 = vmatpush.bf16.msrb.mxu2 %v3975_v40  ;;  %v3919_v25 = vor.u32 %v4161_v33, %v3918_v52  ;;  %v3923_v37 = vor.u32 %v4159_v45, %v3920_v59 }
 0x3ed   : > { %3130 = vmatpush.bf16.msrb.mxu3 %v3979_v28  ;;  %v4636_v28 = vpop.eup %4635 }
 0x3ee   : > { %2705 = vmatmul.bf16.vlgmr.msra.gmra.mxu2 %v2273_v6  ;;  %3143 = vmatpush.bf16.msra.mxu0 %v3983_v0  ;;  %v3960_v6 = vld [vmem:[#allocation14 + $0x70] sm:$0xf0]  ;;  %v869_v60 = vmul.f32 %v4636_v28, %v6085_v20  ;;  %vm874_vm12 = vweird.f32 %v4636_v28 }
 0x3ef   : > { %3156 = vmatpush.bf16.msra.mxu1 %v3987_v8  ;;  %3118 = vmatpush.bf16.msrb.mxu2 %v3959_v27  ;;  %vm875_vm13 = vmor %vm873_vm11, %vm874_vm12 }
 0x3f0   : > { %2766 = vmatmul.bf16.vlgmr.msra.gmra.mxu3 %v2274_v10  ;;  %2827 = vmatmul.bf16.vlgmr.msrb.gmra.mxu0 %v2275_v22  ;;  %v3966_v10 = vld [vmem:[#allocation14 + $0x68] sm:$0xf]  ;;  %v4173_v22 = vld [vmem:[#allocation14 + $0x74] sm:$0xf0]  ;;  %v870_v35 = vsub.f32 1.0, %v869_v60 }
 0x3f1   : > { %2888 = vmatmul.bf16.vlgmr.msrb.gmra.mxu1 %v2276_v34  ;;  %v857_v38 = vpop.f32.mrf.mxu1  ;;  %v3963_v34 = vor.u32 %v4170_v1, %v3960_v6 }
 0x3f2   : > { %v3967_v38 = vor.u32 %v4173_v22, %v3966_v10  ;;  %v871_v6 = vmul.f32 %v4636_v28, %v870_v35 }
 0x3f3   : > { %3131 = vmatpush.bf16.msrb.mxu3 %v3963_v34  ;;  %3157 = vmatpush.bf16.msra.mxu1 %v3971_v43 }
 0x3f4   : > { %3144 = vmatpush.bf16.msra.mxu0 %v3967_v38  ;;  %3119 = vmatpush.bf16.msrb.mxu2 %v3943_v30  ;;  %v879_v38 = vand.u32 2147483648, %v6085_v20  ;;  %v872_v43 = vadd.f32 %v4636_v28, %v871_v6 }
 0x3f6   : > { %v880_v12 = vor.u32 1.1754944e-38, %v879_v38 }
 0x3f7   : > { %3132 = vmatpush.bf16.msrb.mxu3 %v3947_v4  ;;  %3158 = vmatpush.bf16.msra.mxu1 %v3955_v14 }
 0x3f8   : > { %3145 = vmatpush.bf16.msra.mxu0 %v3951_v61  ;;  %3120 = vmatpush.bf16.msrb.mxu2 %v3927_v55  ;;  %v876_v61 = vsel %vm875_vm13, %v4636_v28, %v872_v43 }
 0x3f9   : > { %v881_v7 = vsel %vm878_vm14, %v880_v12, %v876_v61 }
 0x3fb   : > { %3133 = vmatpush.bf16.msrb.mxu3 %v3931_v17  ;;  %3159 = vmatpush.bf16.msra.mxu1 %v3939_v15 }
 0x3fc   : > { %3146 = vmatpush.bf16.msra.mxu0 %v3935_v39  ;;  %3121 = vmatpush.bf16.msrb.mxu2 %v3911_v54 }
 0x3ff   : > { %3134 = vmatpush.bf16.msrb.mxu3 %v3915_v11  ;;  %3160 = vmatpush.bf16.msra.mxu1 %v3923_v37 }
 0x400   : > { %3147 = vmatpush.bf16.msra.mxu0 %v3919_v25 }
 0x45d   : > { %v2584_v36 = vpop.f32.mrf.mxu0 }
 0x45e   : > { %v2645_v56 = vpop.f32.mrf.mxu1  ;;  %v2903_v10 = vrot.slane %v2584_v36, 6 }
 0x45f   : > { %v2905_v23 = vrot.slane %v2645_v56, 5 }
 0x461   : > { %v2462_v40 = vpop.f32.mrf.mxu2 }
 0x463   : > { %v2523_v3 = vpop.f32.mrf.mxu3 }
 0x464   : > { %v2901_v8 = vrot.slane %v2523_v3, 7 }
 0x465   : > { %v2586_v53 = vpop.f32.mrf.mxu0 }
 0x466   : > { %v2647_v0 = vpop.f32.mrf.mxu1  ;;  %v2902_v1 = vsel %vm2216_vm15, %v2901_v8, %v2462_v40 }
 0x467   : > { %v2904_v34 = vsel %vm2218_vm0, %v2903_v10, %v2902_v1 }
 0x468   : > { %v2906_v47 = vsel %vm2220_vm1, %v2905_v23, %v2904_v34 }
 0x469   : > { %v2464_v58 = vpop.f32.mrf.mxu2 }
 0x46b   : > { %v2525_v13 = vpop.f32.mrf.mxu3 }
 0x46d   : > { %v2828_v27 = vpop.f32.mrf.mxu0 }
 0x46e   : > { %v2889_v22 = vpop.f32.mrf.mxu1  ;;  %v2911_v5 = vrot.slane %v2828_v27, 2 }
 0x46f   : > { %v2913_v46 = vrot.slane %v2889_v22, 1 }
 0x471   : > { %v2706_v41 = vpop.f32.mrf.mxu2 }
 0x472   : > { %v2907_v32 = vrot.slane %v2706_v41, 4 }
 0x473   : > { %v2767_v42 = vpop.f32.mrf.mxu3 }
 0x474   : > { %v2908_v30 = vsel %vm2222_vm2, %v2907_v32, %v2906_v47  ;;  %v2909_v44 = vrot.slane %v2767_v42, 3 }
 0x475   : > { %v2830_v4 = vpop.f32.mrf.mxu0 }
 0x476   : > { %v2910_v63 = vsel %vm2224_vm3, %v2909_v44, %v2908_v30  ;;  %v2891_v20 = vpop.f32.mrf.mxu1 }
 0x477   : > { %v2912_v14 = vsel %vm2226_vm4, %v2911_v5, %v2910_v63 }
 0x478   : > { %v2914_v2 = vsel %vm2228_vm5, %v2913_v46, %v2912_v14 }
 0x479   : > { %v2708_v19 = vpop.f32.mrf.mxu2  ;;  %v2916_v55 = vmul.f32 %v2914_v2, %v881_v7 }
 0x47b   : > { %v2769_v31 = vpop.f32.mrf.mxu3  ;;  %v2921_v18 = vpack.c.bf16 %v2916_v55, %v2916_v55 }
 0x47d   : > { %3122 = vmatmul.bf16.vlgmr.msrb.gmra.mxu2 %v2921_v18  ;;  %3135 = vmatmul.bf16.vlgmr.msrb.gmra.mxu3 %v2921_v18 }
 0x47e   : > { %3148 = vmatmul.bf16.vlgmr.msra.gmra.mxu0 %v2921_v18  ;;  %3161 = vmatmul.bf16.vlgmr.msra.gmra.mxu1 %v2921_v18 }
 0x47f   : > { %4891 = shalt.err (!%p4888_p10)
}
 0x480   : > { %4536 = dma.vmem_to_hbm [thread:$0]  (%p5147_p5), %s3274_s1, 128, %s3276_s23, %s3247_s29   ;;  %v2920_v57 = vld [vmem:[%s5194_s22 + $0x18] sm:$0xff]  ;;  %v2917_v49 = vld [vmem:[%s5194_s22] sm:$0xff]  ;;  %v2918_v15 = vld [vmem:[%s5194_s22 + $0x8] sm:$0xff] }
 0x481   : > { %v2919_v53 = vld [vmem:[%s5194_s22 + $0x10] sm:$0xff]  ;;  %v491_v30 = vld [vmem:[#allocation3] sm:$0xff]  ;;  %s3257_s22 = scalar_lea.hbm %s6169_s9, %s4041_s27  ;;  %s3259_s25 = sshll.u32 %s5213_s24, 4  ;;  %s3260_s25 = int_to_ptr.vmem [resolvable:$true] %s3259_s25 }
 0x482   : > { %s3261_s18 = sshll.u32 %s3257_s22, 4  ;;  %s3242_s5 = scalar_lea.sflag [#allocation6], %s5191_s3  ;;  %s3262_s18 = int_to_ptr.hbm [resolvable:$true] %s3261_s18 }
 0x483   : > { %s4906_s21 = sshra.s32 %s3262_s18, 4  ;;  %s4912_s23 = scalar_lea.hbm %s6169_s9, 64  ;;  %s4907_s21 = int_to_ptr.hbm [resolvable:$true] %s4906_s21 }
 0x484   : > { %s4908_s20 = scalar_lea.hbm %s4907_s21, 8  ;;  %p4913_p2 = scmp.lt.s32.totalorder %s4907_s21, %s6169_s9 }
 0x485   : > { %p4909_p12 = scmp.ne.s32.totalorder %s4907_s21, %s4908_s20  ;;  %p4914_p3 = scmp.lt.s32.totalorder %s4912_s23, %s4908_s20 }
 0x487   : > { %p4910_p13 = pnand %p4909_p12, %p5147_p5  ;;  %p4915_p1 = por %p4914_p3, %p4913_p2 }
 0x489   : > { %p4911_p0 = pneg %p4910_p13 }
 0x48b   : > { %p4916_p4 = pnand %p4915_p1, %p4911_p0 }
 0x4fb   : > { %v3149_v17 = vpop.f32.mrf.mxu0  ;;  %v3162_v39 = vpop.f32.mrf.mxu1 }
 0x4fc   : > { %v3169_v9 = vadd.f32 %v3162_v39, %v2920_v57 }
 0x4fe   : > { %v3173_v51 = vadd.f32 %v3169_v9, %v6079_v29 }
 0x500   : > { %v4038_v16 = vmul.f32 -1.442695, %v3173_v51  ;;  %v3123_v21 = vpop.f32.mrf.mxu2  ;;  %v3136_v48 = vpop.f32.mrf.mxu3 }
 0x501   : > { %v3166_v54 = vadd.f32 %v3123_v21, %v2917_v49  ;;  %v3167_v52 = vadd.f32 %v3136_v48, %v2918_v15 }
 0x502   : > { %4637 = vpow2.f32 %v4038_v16 }
 0x503   : > { %v3170_v33 = vadd.f32 %v3166_v54, %v6075_v62  ;;  %v3171_v45 = vadd.f32 %v3167_v52, %v6077_v24  ;;  %v3151_v11 = vpop.f32.mrf.mxu0  ;;  %v3164_v25 = vpop.f32.mrf.mxu1  ;;  %v3168_v62 = vadd.f32 %v3149_v17, %v2919_v53 }
 0x505   : > { %v4036_v59 = vmul.f32 -1.442695, %v3170_v33  ;;  %v4037_v36 = vmul.f32 -1.442695, %v3171_v45  ;;  %v3172_v8 = vadd.f32 %v3168_v62, %v6072_v50 }
 0x507   : > { %4639 = vpow2.f32 %v4036_v59 }
 0x508   : > { %v4638_v37 = vpop.eup %4637  ;;  %4641 = vpow2.f32 %v4037_v36  ;;  %v3125_v29 = vpop.f32.mrf.mxu2 }
 0x509   : > { %v3138_v56 = vpop.f32.mrf.mxu3  ;;  %v3216_v40 = vadd.f32 1.0, %v4638_v37 }
 0x50b   : > { %4643 = vrcp.f32 %v3216_v40  ;;  %v3228_v2 = vand.u32 2147483648, %v3216_v40  ;;  %vm3222_vm8 = vweird.f32 %v3216_v40  ;;  %v3226_v19 = vand.u32 2147483647, %v3216_v40 }
 0x50d   : > { %v4640_v28 = vpop.eup %4639  ;;  %v3229_v31 = vor.u32 1.1754944e-38, %v3228_v2  ;;  %vm3227_vm10 = vcmp.eq.f32.partialorder %v3226_v19, 8.507059e+37 }
 0x50e   : > { %v4642_v3 = vpop.eup %4641  ;;  %v3177_v60 = vadd.f32 1.0, %v4640_v28 }
 0x50f   : > { %v3196_v0 = vadd.f32 1.0, %v4642_v3 }
 0x510   : > { %4645 = vrcp.f32 %v3177_v60  ;;  %v3189_v10 = vand.u32 2147483648, %v3177_v60  ;;  %v3187_v38 = vand.u32 2147483647, %v3177_v60  ;;  %vm3183_vm1 = vweird.f32 %v3177_v60 }
 0x511   : > { %4647 = vrcp.f32 %v3196_v0  ;;  %v4644_v24 = vpop.eup %4643  ;;  %v3208_v23 = vand.u32 2147483648, %v3196_v0  ;;  %v3206_v43 = vand.u32 2147483647, %v3196_v0  ;;  %vm3202_vm3 = vweird.f32 %v3196_v0 }
 0x512   : > { %v3218_v6 = vmul.f32 %v4644_v24, %v3216_v40  ;;  %4649 = vtanh.f32 %v3172_v8  ;;  %v3190_v50 = vor.u32 1.1754944e-38, %v3189_v10  ;;  %vm3188_vm4 = vcmp.eq.f32.partialorder %v3187_v38, 8.507059e+37 }
 0x513   : > { %v3209_v42 = vor.u32 1.1754944e-38, %v3208_v23  ;;  %vm3207_vm6 = vcmp.eq.f32.partialorder %v3206_v43, 8.507059e+37  ;;  %vm3223_vm7 = vweird.f32 %v4644_v24 }
 0x514   : > { %v3219_v32 = vsub.f32 1.0, %v3218_v6  ;;  %vm3224_vm9 = vmor %vm3222_vm8, %vm3223_vm7 }
 0x516   : > { %v4646_v35 = vpop.eup %4645  ;;  %v3220_v46 = vmul.f32 %v4644_v24, %v3219_v32 }
 0x517   : > { %v4648_v58 = vpop.eup %4647  ;;  %v3179_v13 = vmul.f32 %v4646_v35, %v3177_v60  ;;  %vm3184_vm15 = vweird.f32 %v4646_v35 }
 0x518   : > { %v3198_v1 = vmul.f32 %v4648_v58, %v3196_v0  ;;  %vm3203_vm0 = vweird.f32 %v4648_v58  ;;  %vm3185_vm2 = vmor %vm3183_vm1, %vm3184_vm15  ;;  %v4650_v12 = vpop.eup %4649  ;;  %v3221_v7 = vadd.f32 %v4644_v24, %v3220_v46 }
 0x519   : > { %v3180_v27 = vsub.f32 1.0, %v3179_v13  ;;  %vm3204_vm5 = vmor %vm3202_vm3, %vm3203_vm0 }
 0x51a   : > { %v3199_v22 = vsub.f32 1.0, %v3198_v1  ;;  %v3225_v55 = vsel %vm3224_vm9, %v4644_v24, %v3221_v7 }
 0x51b   : > { %v3181_v34 = vmul.f32 %v4646_v35, %v3180_v27  ;;  %v3230_v57 = vsel %vm3227_vm10, %v3229_v31, %v3225_v55 }
 0x51c   : > { %v3200_v41 = vmul.f32 %v4648_v58, %v3199_v22 }
 0x51d   : > { %v3182_v26 = vadd.f32 %v4646_v35, %v3181_v34 }
 0x51e   : > { %v3201_v47 = vadd.f32 %v4648_v58, %v3200_v41 }
 0x51f   : > { %v3186_v44 = vsel %vm3185_vm2, %v4646_v35, %v3182_v26 }
 0x520   : > { %v3191_v5 = vsel %vm3188_vm4, %v3190_v50, %v3186_v44  ;;  %v3205_v4 = vsel %vm3204_vm5, %v4648_v58, %v3201_v47 }
 0x521   : > { %v3210_v61 = vsel %vm3207_vm6, %v3209_v42, %v3205_v4  ;;  %v3233_v63 = vmul.f32 %v4650_v12, %v3191_v5 }
 0x522   : > { %v3232_v20 = vmul.f32 %v3210_v61, %v491_v30 }
 0x524   : > { %v3234_v14 = vadd.f32 %v3233_v63, %v3232_v20 }
 0x526   : > { %4651 = vtanh.f32 %v3234_v14  ;;  %3238 = vst [vmem:[#allocation3] sm:$0xff] %v3234_v14 }
 0x52c   : > { %v4652_v18 = vpop.eup %4651 }
 0x52d   : > { %v3236_v17 = vmul.f32 %v4652_v18, %v3230_v57 }
 0x52f   : > { %3237 = vst [vmem:[#allocation2] sm:$0xff] %v3236_v17 }
 0x530   : > { %3239 = vst [vmem:[%s5213_s24] sm:$0xff] %v3236_v17 }
 0x531   : > { %4919 = shalt.err (!%p4916_p4)
}
 0x532   : > { %4535 = dma.vmem_to_hbm [thread:$0]  (%p5147_p5), %s3260_s25, 128, %s3262_s18, %s3242_s5  }
 0x533 PF: > { %p4582_p11 = scmp.ge.s32.totalorder %s4982_s16, 2  ;;  %s3287_s3 = sand.u32 1, %s4970_s13  }
 0x534   : > { %s3288_s24 = scalar_lea.sflag [#allocation6], %s3287_s3 }
 0x535   : > { %p4563_p7 = pnand %p4582_p11, %p5151_p6 }
 0x537   : > { %p4564_p8 = pneg %p4563_p7 }
 0x539   : > { %4961 = dma.done.wait (%p4564_p8), %s3288_s24, 128  }
 0x53a   : > { %4963 = vsyncadd (%p4564_p8), %s3288_s24, 4294967168  ;;  %s3298_s30 = scalar_lea.sflag [#allocation18], %s3287_s3 }
 0x53b   : > { %4965 = dma.done.wait (%p4564_p8), %s3298_s30, 128  }
 0x53c   : > { %4967 = vsyncadd (%p4564_p8), %s3298_s30, 4294967168  ;;  %p28_p5 = scmp.ge.s32.totalorder %s5122_s28, 10   ;;  %s6193_s13 = smov %s4974_s14 }
 0x53d   : > { %s6194_s14 = smov %s4978_s15  ;;  %s6195_s15 = smov %s5133_s19 }
 0x53e   : > { %s6196_s16 = smov %s5122_s28  ;;  %30 = sbr.rel (!%p28_p5) target bundleno = 17 (0x11), region = 145 }
 0x543   :  { %3304 = vsyncpa [#allocation5], 1 }
 0x544   :  { %3306 = vsyncpa [#allocation5 + $0x1], 1 }
 0x545   :  { %3307 = vsyncpa [#allocation8], 1 }
 0x546   :  { %3308 = vsyncpa [#allocation12], 1 }
 0x547   :  { %3309 = vsyncpa [#allocation15], 1 }
 0x548   :  { %3310 = vsyncpa [#allocation6], 1 }
 0x549   :  { %3312 = vsyncpa [#allocation6 + $0x1], 1 }
 0x54a   :  { %3313 = vsyncpa [#allocation18], 1 }
 0x54b   :  { %3315 = vsyncpa [#allocation18 + $0x1], 1 }

</bundles_post_ra>
